<compile_context>
chip_gen: v7x
topology: tpu7x:2x2x1
jax: 0.10.0
libtpu: 0.0.40
codegen_flags: <defaults>
</compile_context>

<pallas_src>
import math
import functools

import jax
import jax.numpy as jnp
from jax.experimental import pallas as pl
from jax.experimental.pallas import tpu as pltpu

_NEG = -1e30   # finite "-inf": exp(_NEG - m) underflows to exactly 0.0 in f32


def _mha_kernel(*refs, bb, n, h, dk, has_att_mask, packed):
    """One grid step: bb batch elements, all h heads, full d_model width.

    Ref order:
      q, k, v              : (bb, n, d)  f32 activations
      q_mas, k_mas          : (bb, n, 1)  f32 0/1 masks
      [block_mas]           : (bb*n, bb*n) f32 block-diag mask      (packed only)
      [sel]                 : (n, bb*n)  f32 column selector         (packed & att)
      [att_mas]             : (bb, n, n) int8 0/1 attention mask     (att only)
      wq, wk, wv, wo        : (d, d)     bf16, pre-transposed (x @ W^T == nn.Linear)
      o                     : (bb, n, d) f32 output
      q_sc, k_sc, v_sc, y_sc: (bb*n, d)  bf16 VMEM scratch
    """
    d = h * dk
    rows = bb * n

    i = 0
    q_ref, k_ref, v_ref, qm_ref, km_ref = refs[i:i + 5]; i += 5
    bm_ref = sel_ref = am_ref = None
    if packed:
        bm_ref = refs[i]; i += 1
        if has_att_mask:
            sel_ref = refs[i]; i += 1
    if has_att_mask:
        am_ref = refs[i]; i += 1
    wq_ref, wk_ref, wv_ref, wo_ref = refs[i:i + 4]; i += 4
    o_ref = refs[i]; i += 1
    q_sc, k_sc, v_sc, y_sc = refs[i:i + 4]

    qm = qm_ref[...].reshape(rows, 1)
    km = km_ref[...].reshape(rows, 1)
    scale = 1.0 / math.sqrt(dk)

    # --- Projections: bf16 operands, f32 MXU accumulation, results stored to
    #     bf16 VMEM scratch (bounded live ranges, lane-aligned per-head slices).
    #     q_mas/k_mas row masking and the 1/sqrt(dk) scale are folded in here.
    q_sc[...] = (jnp.dot(q_ref[...].reshape(rows, d).astype(jnp.bfloat16),
                         wq_ref[...], preferred_element_type=jnp.float32)
                 * (qm * scale)).astype(jnp.bfloat16)
    k_sc[...] = (jnp.dot(k_ref[...].reshape(rows, d).astype(jnp.bfloat16),
                         wk_ref[...], preferred_element_type=jnp.float32)
                 * km).astype(jnp.bfloat16)
    v_sc[...] = (jnp.dot(v_ref[...].reshape(rows, d).astype(jnp.bfloat16),
                         wv_ref[...], preferred_element_type=jnp.float32)
                 * km).astype(jnp.bfloat16)

    # --- Combined 0/1 keep-mask over the packed (rows, rows) score frame,
    #     hoisted out of the head loop.
    keep = None
    if has_att_mask:
        am = am_ref[...].astype(jnp.float32).reshape(rows, n)         # (rows, n)
        if packed:
            # Column-tile the per-row att mask across the packed key axis with one
            # tiny matmul (sel = [I_n | I_n | ...]) and zero off-block entries.
            keep = jnp.dot(am, sel_ref[...],
                           preferred_element_type=jnp.float32) * bm_ref[...]
        else:
            keep = am                                                 # rows == n
    elif packed:
        keep = bm_ref[...]

    # --- Attention: bb batch elements packed into the matmul M/N dims so the MXU
    #     sees bb*n rows per push; only the small static h-loop is unrolled.
    contract_last = (((1,), (1,)), ((), ()))    # 'qd,kd->qk'
    for hd in range(h):
        c0 = hd * dk
        s = jax.lax.dot_general(q_sc[:, c0:c0 + dk], k_sc[:, c0:c0 + dk],
                                contract_last,
                                preferred_element_type=jnp.float32)   # (rows, rows)
        if keep is not None:
            s = jnp.where(keep != 1.0, _NEG, s)   # masked_fill((1 - mas).bool(), -inf)
        m = jnp.max(s, axis=-1, keepdims=True)
        e = jnp.exp(s - m)
        p = e * pl.reciprocal(jnp.sum(e, axis=-1, keepdims=True), approx=True)
        if keep is not None:
            p = p * keep                          # softmax(...) * mas
        yh = jnp.dot(p.astype(jnp.bfloat16), v_sc[:, c0:c0 + dk],
                     preferred_element_type=jnp.float32)              # (rows, dk)
        y_sc[:, c0:c0 + dk] = (yh * km).astype(jnp.bfloat16)          # ... * k_mas

    # --- Output projection: y = WO(concat(heads)) * k_mas
    out = jnp.dot(y_sc[...], wo_ref[...], preferred_element_type=jnp.float32) * km
    o_ref[...] = out.reshape(bb, n, d).astype(o_ref.dtype)


def multi_head_attention(Q, K, V, q_mas, k_mas=None, att_mas=None, *,
                         Wq, Wk, Wv, Wo, h, batch_block=None, target_rows=256):
    """Pallas implementation of MultiHeadAttention.forward.

    Q, K, V : (bs, n, d_model) float32
    q_mas   : (bs, n, 1)       float32 (0/1)
    k_mas   : (bs, n, 1) or None
    att_mas : (bs, n, n) or None   (hard 0/1 mask)
    Wq/Wk/Wv/Wo : (d_model, d_model) nn.Linear weights (out_features, in_features)
    batch_block : batch elements packed per grid step (None -> auto).
    """
    bs, n, d = Q.shape
    dk = d // h
    assert h * dk == d, "d_model must be divisible by h"
    if k_mas is None:
        k_mas = q_mas

    # Batch-block selection: pack bb batch elements per step so matmuls see
    # ~target_rows (256 fills the v6e/v7x MXU, fine on v5e) while keeping
    # grid >= 2 steps when bs >= 2 so ("parallel",) can use both v7x TCs.
    if batch_block is not None:
        bb = int(batch_block)
        assert bs % bb == 0
    else:
        bb = 1
        for cand in range(1, bs + 1):
            if bs % cand:
                continue
            if cand * n > max(target_rows, n):
                continue
            if bs >= 2 and bs // cand < 2:
                continue
            bb = cand
    rows = bb * n
    packed = bb > 1
    has_att = att_mas is not None
    grid = (bs // bb,)

    # nn.Linear weights are (out, in): pre-transpose so the kernel computes x @ W^T,
    # and cast to bf16 (MXU-native; f32 matmuls are emulated as ~3 bf16 passes).
    wq = Wq.T.astype(jnp.bfloat16)
    wk = Wk.T.astype(jnp.bfloat16)
    wv = Wv.T.astype(jnp.bfloat16)
    wo = Wo.T.astype(jnp.bfloat16)

    args = [Q, K, V, q_mas, k_mas]
    in_specs = [
        pl.BlockSpec((bb, n, d), lambda i: (i, 0, 0)),
        pl.BlockSpec((bb, n, d), lambda i: (i, 0, 0)),
        pl.BlockSpec((bb, n, d), lambda i: (i, 0, 0)),
        pl.BlockSpec((bb, n, 1), lambda i: (i, 0, 0)),
        pl.BlockSpec((bb, n, 1), lambda i: (i, 0, 0)),
    ]
    if packed:
        # Constant block-diagonal mask: 1 where query & key rows belong to the same
        # batch element of the packed block, 0 elsewhere.
        bm = jnp.kron(jnp.eye(bb, dtype=jnp.float32),
                      jnp.ones((n, n), dtype=jnp.float32))             # (rows, rows)
        args.append(bm)
        in_specs.append(pl.BlockSpec((rows, rows), lambda i: (0, 0)))
        if has_att:
            # Column selector [I_n | I_n | ...] used by the in-kernel mask tiling.
            sel = jnp.tile(jnp.eye(n, dtype=jnp.float32), (1, bb))      # (n, rows)
            args.append(sel)
            in_specs.append(pl.BlockSpec((n, rows), lambda i: (0, 0)))
    if has_att:
        # Hard 0/1 mask assumed (PyTorch uses (1 - mas).bool()); ship as int8 to cut
        # the (bs, n, n) mask DMA 4x vs f32.
        args.append((att_mas == 1).astype(jnp.int8))
        in_specs.append(pl.BlockSpec((bb, n, n), lambda i: (i, 0, 0)))
    args += [wq, wk, wv, wo]

    out_spec = pl.BlockSpec((bb, n, d), lambda i: (i, 0, 0))
    scratch = [pltpu.VMEM((rows, d), jnp.bfloat16) for _ in range(4)]

    # Per-step VMEM footprint (double-buffered ins/outs + weights + scratch).
    step_bytes = 2 * (3 * bb * n * d * 4 + bb * n * d * 4 + 2 * bb * n * 4)
    if packed:
        step_bytes += 2 * rows * rows * 4 + (2 * n * rows * 4 if has_att else 0)
    if has_att:
        step_bytes += 2 * bb * n * n
    step_bytes += 2 * 4 * d * d * 2 + 4 * rows * d * 2
    vmem_limit = int(min(max(2 * step_bytes + (8 << 20), 32 << 20), 48 << 20))

    kernel = functools.partial(_mha_kernel, bb=bb, n=n, h=h, dk=dk,
                               has_att_mask=has_att, packed=packed)
    out_shape = jax.ShapeDtypeStruct((bs, n, d), jnp.float32)
    cparams = pltpu.CompilerParams(dimension_semantics=("parallel",),
                                   vmem_limit_bytes=vmem_limit)

    def build(buffered_weights):
        if buffered_weights:
            # Grid-invariant weight blocks: single-buffer them (halves weight VMEM).
            w_spec = pl.BlockSpec((d, d), lambda i: (0, 0),
                                  pipeline_mode=pl.Buffered(1))
        else:
            w_spec = pl.BlockSpec((d, d), lambda i: (0, 0))
        return pl.pallas_call(
            kernel,
            out_shape=out_shape,
            grid_spec=pltpu.PrefetchScalarGridSpec(
                num_scalar_prefetch=0,
                grid=grid,
                in_specs=in_specs + [w_spec] * 4,
                out_specs=out_spec,
                scratch_shapes=scratch,
            ),
            compiler_params=cparams,
        )

    try:
        return build(True)(*args)
    except Exception:
        # Fallback for jax versions that reject Buffered(1) pipeline_mode.
        return build(False)(*args)


def multi_head_attention_ref(Q, K, V, q_mas, k_mas=None, att_mas=None, *,
                             Wq, Wk, Wv, Wo, h):
    """Pure-JAX f32 reference mirroring the PyTorch module."""
    bs, n, d = Q.shape
    dk = d // h
    qm = q_mas.reshape(bs, n, 1, 1).transpose(0, 2, 1, 3)             # (bs,1,n,1)
    km = qm if k_mas is None else k_mas.reshape(bs, n, 1, 1).transpose(0, 2, 1, 3)

    def proj(X, W):
        return (X @ W.T).reshape(bs, n, h, dk).transpose(0, 2, 1, 3)  # (bs,h,n,dk)

    Qh = qm * proj(Q, Wq)
    Kh = km * proj(K, Wk)
    Vh = km * proj(V, Wv)

    s = jnp.einsum("bhqd,bhkd->bhqk", Qh, Kh) / (dk ** 0.5)
    if att_mas is not None:
        mas = att_mas.reshape(bs, 1, n, n)
        s = jnp.where((1.0 - mas) != 0.0, -jnp.inf, s)
    p = jax.nn.softmax(s, axis=-1)
    if att_mas is not None:
        p = p * mas
    y = jnp.einsum("bhqk,bhkd->bhqd", p, Vh) * km                     # (bs,h,n,dk)
    y = y.transpose(0, 2, 1, 3).reshape(bs, n, d)
    y = (y @ Wo.T) * km.reshape(bs, n, 1)
    return y


def _xavier_normal(key, shape, dtype=jnp.float32, gain=1.0):
    fan_out, fan_in = shape
    std = gain * math.sqrt(2.0 / (fan_in + fan_out))
    return std * jax.random.normal(key, shape, dtype=dtype)


if __name__ == "__main__":
    # Module defaults: h=4, d_model=512 -> dk=128 (lane-aligned per-head slices).
    bs, n, d_model, h = 2, 8, 512, 4

    root = jax.random.PRNGKey(0)
    kq, kk, kv, kwq, kwk, kwv, kwo = jax.random.split(root, 7)

    Q = jax.random.normal(kq, (bs, n, d_model), dtype=jnp.float32)
    K = jax.random.normal(kk, (bs, n, d_model), dtype=jnp.float32)
    V = jax.random.normal(kv, (bs, n, d_model), dtype=jnp.float32)

    # Padding mask: batch 0 fully valid, batch 1 has last 2 positions padded.
    lengths = jnp.array([n, n - 2])
    q_mas = (jnp.arange(n)[None, :] < lengths[:, None]).astype(jnp.float32)[..., None]

    # Causal attention mask (no fully-masked rows -> f32 reference has no NaNs).
    att_mas = jnp.tile(jnp.tril(jnp.ones((n, n), dtype=jnp.float32))[None], (bs, 1, 1))

    # Deterministic xavier_normal_(gain=1.0) weights, shape (out_features, in_features).
    Wq = _xavier_normal(kwq, (d_model, d_model))
    Wk = _xavier_normal(kwk, (d_model, d_model))
    Wv = _xavier_normal(kwv, (d_model, d_model))
    Wo = _xavier_normal(kwo, (d_model, d_model))

    mha = functools.partial(multi_head_attention, Wq=Wq, Wk=Wk, Wv=Wv, Wo=Wo, h=h)
    ref = functools.partial(multi_head_attention_ref, Wq=Wq, Wk=Wk, Wv=Wv, Wo=Wo, h=h)

    # End-to-end bf16 matmuls (K=512) + approx reciprocal vs an f32 reference:
    # expected max abs error ~1e-2 on outputs of std ~0.35 -> 5e-2 tolerance.
    RTOL = ATOL = 5e-2

    expected = ref(Q, K, V, q_mas, None, att_mas)
    expected_nomask = ref(Q, K, V, q_mas)

    # 1) default auto batch-block (grid of 2 "parallel" steps), with attention mask.
    out = jax.block_until_ready(mha(Q, K, V, q_mas, None, att_mas))
    assert out.shape == (bs, n, d_model)
    assert jnp.allclose(out, expected, rtol=RTOL, atol=ATOL), (
        float(jnp.max(jnp.abs(out - expected))))

    # 2) att_mas=None path (no (bs, n, n) mask tensor ever built).
    out2 = jax.block_until_ready(mha(Q, K, V, q_mas))
    assert jnp.allclose(out2, expected_nomask, rtol=RTOL, atol=ATOL), (
        float(jnp.max(jnp.abs(out2 - expected_nomask))))

    # 3) packed path: both batch elements folded into one (bb*n)-row attention block,
    #    with the int8 att mask + block-diagonal masking.
    out3 = jax.block_until_ready(mha(Q, K, V, q_mas, None, att_mas, batch_block=2))
    assert jnp.allclose(out3, expected, rtol=RTOL, atol=ATOL), (
        float(jnp.max(jnp.abs(out3 - expected))))

    # 4) packed path without an attention mask (block-diagonal mask only).
    out4 = jax.block_until_ready(mha(Q, K, V, q_mas, batch_block=2))
    assert jnp.allclose(out4, expected_nomask, rtol=RTOL, atol=ATOL), (
        float(jnp.max(jnp.abs(out4 - expected_nomask))))

    print("KERNEL_OK")
</pallas_src>

<mosaic_0001>
module attributes {stable_mosaic.version = 11 : i64} {
  func.func @_mha_kernel(%arg0: i32, %arg1: memref<1x8x512xf32, #tpu.memory_space<vmem>>, %arg2: memref<1x8x512xf32, #tpu.memory_space<vmem>>, %arg3: memref<1x8x512xf32, #tpu.memory_space<vmem>>, %arg4: memref<1x8x1xf32, #tpu.memory_space<vmem>>, %arg5: memref<1x8x1xf32, #tpu.memory_space<vmem>>, %arg6: memref<1x8x8xi8, #tpu.memory_space<vmem>>, %arg7: memref<512x512xbf16, #tpu.memory_space<vmem>>, %arg8: memref<512x512xbf16, #tpu.memory_space<vmem>>, %arg9: memref<512x512xbf16, #tpu.memory_space<vmem>>, %arg10: memref<512x512xbf16, #tpu.memory_space<vmem>>, %arg11: memref<1x8x512xf32, #tpu.memory_space<vmem>>, %arg12: memref<8x512xbf16, #tpu.memory_space<vmem>>, %arg13: memref<8x512xbf16, #tpu.memory_space<vmem>>, %arg14: memref<8x512xbf16, #tpu.memory_space<vmem>>, %arg15: memref<8x512xbf16, #tpu.memory_space<vmem>>) attributes {dimension_semantics = [#tpu.dimension_semantics<parallel>], iteration_bounds = array<i64: 2>, scalar_prefetch = 0 : i64, scratch_operands = 4 : i64, tpu.core_type = #tpu.core_type<tc>, window_params = [{transform_indices = @transform_0, window_bounds = array<i64: 1, 8, 512>}, {transform_indices = @transform_1, window_bounds = array<i64: 1, 8, 512>}, {transform_indices = @transform_2, window_bounds = array<i64: 1, 8, 512>}, {transform_indices = @transform_3, window_bounds = array<i64: 1, 8, 1>}, {transform_indices = @transform_4, window_bounds = array<i64: 1, 8, 1>}, {transform_indices = @transform_5, window_bounds = array<i64: 1, 8, 8>}, {pipeline_mode = #tpu.pipeline_mode<synchronous>, transform_indices = @transform_6, window_bounds = array<i64: 512, 512>}, {pipeline_mode = #tpu.pipeline_mode<synchronous>, transform_indices = @transform_7, window_bounds = array<i64: 512, 512>}, {pipeline_mode = #tpu.pipeline_mode<synchronous>, transform_indices = @transform_8, window_bounds = array<i64: 512, 512>}, {pipeline_mode = #tpu.pipeline_mode<synchronous>, transform_indices = @transform_9, window_bounds = array<i64: 512, 512>}, {transform_indices = @transform_10, window_bounds = array<i64: 1, 8, 512>}]} {
    %c0 = arith.constant 0 : index
    %c0_0 = arith.constant 0 : index
    %c0_1 = arith.constant 0 : index
    %0 = vector.load %arg4[%c0, %c0_0, %c0_1] : memref<1x8x1xf32, #tpu.memory_space<vmem>>, vector<1x8x1xf32>
    %1 = vector.shape_cast %0 : vector<1x8x1xf32> to vector<8x1xf32>
    %c0_2 = arith.constant 0 : index
    %c0_3 = arith.constant 0 : index
    %c0_4 = arith.constant 0 : index
    %2 = vector.load %arg5[%c0_2, %c0_3, %c0_4] : memref<1x8x1xf32, #tpu.memory_space<vmem>>, vector<1x8x1xf32>
    %3 = vector.shape_cast %2 : vector<1x8x1xf32> to vector<8x1xf32>
    %c0_5 = arith.constant 0 : index
    %c0_6 = arith.constant 0 : index
    %c0_7 = arith.constant 0 : index
    %4 = vector.load %arg1[%c0_5, %c0_6, %c0_7] : memref<1x8x512xf32, #tpu.memory_space<vmem>>, vector<1x8x512xf32>
    %5 = vector.shape_cast %4 : vector<1x8x512xf32> to vector<8x512xf32>
    %6 = arith.truncf %5 : vector<8x512xf32> to vector<8x512xbf16>
    %c0_8 = arith.constant 0 : index
    %c0_9 = arith.constant 0 : index
    %7 = vector.load %arg7[%c0_8, %c0_9] : memref<512x512xbf16, #tpu.memory_space<vmem>>, vector<512x512xbf16>
    %cst = arith.constant dense<0.000000e+00> : vector<8x512xf32>
    %8 = tpu.matmul %6, %7, %cst {dimension_numbers = #tpu.dot_dimension_numbers<[1], [0], [0], [1], [0, 0, 1, 1], [], []>} : vector<8x512xbf16>, vector<512x512xbf16>, vector<8x512xf32> -> vector<8x512xf32>
    %cst_10 = arith.constant 0.0883883461 : f32
    %9 = vector.broadcast %cst_10 : f32 to vector<8x1xf32>
    %10 = arith.mulf %1, %9 : vector<8x1xf32>
    %11 = vector.broadcast %10 : vector<8x1xf32> to vector<8x512xf32>
    %12 = arith.mulf %8, %11 : vector<8x512xf32>
    %13 = arith.truncf %12 : vector<8x512xf32> to vector<8x512xbf16>
    %c0_11 = arith.constant 0 : index
    %c0_12 = arith.constant 0 : index
    %14 = vector.load %arg12[%c0_11, %c0_12] : memref<8x512xbf16, #tpu.memory_space<vmem>>, vector<8x512xbf16>
    tpu.vector_store %arg12[%c0_11, %c0_12], %13 {strides = array<i32>} : memref<8x512xbf16, #tpu.memory_space<vmem>>, vector<8x512xbf16>,
    %c0_13 = arith.constant 0 : index
    %c0_14 = arith.constant 0 : index
    %c0_15 = arith.constant 0 : index
    %15 = vector.load %arg2[%c0_13, %c0_14, %c0_15] : memref<1x8x512xf32, #tpu.memory_space<vmem>>, vector<1x8x512xf32>
    %16 = vector.shape_cast %15 : vector<1x8x512xf32> to vector<8x512xf32>
    %17 = arith.truncf %16 : vector<8x512xf32> to vector<8x512xbf16>
    %c0_16 = arith.constant 0 : index
    %c0_17 = arith.constant 0 : index
    %18 = vector.load %arg8[%c0_16, %c0_17] : memref<512x512xbf16, #tpu.memory_space<vmem>>, vector<512x512xbf16>
    %cst_18 = arith.constant dense<0.000000e+00> : vector<8x512xf32>
    %19 = tpu.matmul %17, %18, %cst_18 {dimension_numbers = #tpu.dot_dimension_numbers<[1], [0], [0], [1], [0, 0, 1, 1], [], []>} : vector<8x512xbf16>, vector<512x512xbf16>, vector<8x512xf32> -> vector<8x512xf32>
    %20 = vector.broadcast %3 : vector<8x1xf32> to vector<8x512xf32>
    %21 = arith.mulf %19, %20 : vector<8x512xf32>
    %22 = arith.truncf %21 : vector<8x512xf32> to vector<8x512xbf16>
    %c0_19 = arith.constant 0 : index
    %c0_20 = arith.constant 0 : index
    %23 = vector.load %arg13[%c0_19, %c0_20] : memref<8x512xbf16, #tpu.memory_space<vmem>>, vector<8x512xbf16>
    tpu.vector_store %arg13[%c0_19, %c0_20], %22 {strides = array<i32>} : memref<8x512xbf16, #tpu.memory_space<vmem>>, vector<8x512xbf16>,
    %c0_21 = arith.constant 0 : index
    %c0_22 = arith.constant 0 : index
    %c0_23 = arith.constant 0 : index
    %24 = vector.load %arg3[%c0_21, %c0_22, %c0_23] : memref<1x8x512xf32, #tpu.memory_space<vmem>>, vector<1x8x512xf32>
    %25 = vector.shape_cast %24 : vector<1x8x512xf32> to vector<8x512xf32>
    %26 = arith.truncf %25 : vector<8x512xf32> to vector<8x512xbf16>
    %c0_24 = arith.constant 0 : index
    %c0_25 = arith.constant 0 : index
    %27 = vector.load %arg9[%c0_24, %c0_25] : memref<512x512xbf16, #tpu.memory_space<vmem>>, vector<512x512xbf16>
    %cst_26 = arith.constant dense<0.000000e+00> : vector<8x512xf32>
    %28 = tpu.matmul %26, %27, %cst_26 {dimension_numbers = #tpu.dot_dimension_numbers<[1], [0], [0], [1], [0, 0, 1, 1], [], []>} : vector<8x512xbf16>, vector<512x512xbf16>, vector<8x512xf32> -> vector<8x512xf32>
    %29 = vector.broadcast %3 : vector<8x1xf32> to vector<8x512xf32>
    %30 = arith.mulf %28, %29 : vector<8x512xf32>
    %31 = arith.truncf %30 : vector<8x512xf32> to vector<8x512xbf16>
    %c0_27 = arith.constant 0 : index
    %c0_28 = arith.constant 0 : index
    %32 = vector.load %arg14[%c0_27, %c0_28] : memref<8x512xbf16, #tpu.memory_space<vmem>>, vector<8x512xbf16>
    tpu.vector_store %arg14[%c0_27, %c0_28], %31 {strides = array<i32>} : memref<8x512xbf16, #tpu.memory_space<vmem>>, vector<8x512xbf16>,
    %c0_29 = arith.constant 0 : index
    %c0_30 = arith.constant 0 : index
    %c0_31 = arith.constant 0 : index
    %33 = vector.load %arg6[%c0_29, %c0_30, %c0_31] : memref<1x8x8xi8, #tpu.memory_space<vmem>>, vector<1x8x8xi8>
    %34 = arith.sitofp %33 : vector<1x8x8xi8> to vector<1x8x8xf32>
    %35 = vector.shape_cast %34 : vector<1x8x8xf32> to vector<8x8xf32>
    %c0_32 = arith.constant 0 : index
    %c0_33 = arith.constant 0 : index
    %36 = vector.load %arg12[%c0_32, %c0_33] : memref<8x512xbf16, #tpu.memory_space<vmem>>, vector<8x128xbf16>
    %c0_34 = arith.constant 0 : index
    %c0_35 = arith.constant 0 : index
    %37 = vector.load %arg13[%c0_34, %c0_35] : memref<8x512xbf16, #tpu.memory_space<vmem>>, vector<8x128xbf16>
    %cst_36 = arith.constant dense<0.000000e+00> : vector<8x8xf32>
    %38 = tpu.matmul %36, %37, %cst_36 {dimension_numbers = #tpu.dot_dimension_numbers<[1], [1], [0], [0], [0, 0, 1, 0], [], []>} : vector<8x128xbf16>, vector<8x128xbf16>, vector<8x8xf32> -> vector<8x8xf32>
    %cst_37 = arith.constant 1.000000e+00 : f32
    %39 = vector.broadcast %cst_37 : f32 to vector<8x8xf32>
    %40 = arith.cmpf one, %35, %39 : vector<8x8xf32>
    %cst_38 = arith.constant -1.000000e+30 : f32
    %41 = vector.broadcast %cst_38 : f32 to vector<8x8xf32>
    %42 = arith.select %40, %41, %38 : vector<8x8xi1>, vector<8x8xf32>
    %cst_39 = arith.constant dense<0xFF800000> : vector<8xf32>
    %43 = vector.multi_reduction <maximumf>, %42, %cst_39 [1] : vector<8x8xf32> to vector<8xf32>
    %44 = vector.shape_cast %43 : vector<8xf32> to vector<8x1xf32>
    %45 = vector.broadcast %44 : vector<8x1xf32> to vector<8x8xf32>
    %46 = arith.subf %42, %45 : vector<8x8xf32>
    %47 = math.exp %46 : vector<8x8xf32>
    %cst_40 = arith.constant dense<0.000000e+00> : vector<8xf32>
    %48 = vector.multi_reduction <add>, %47, %cst_40 [1] : vector<8x8xf32> to vector<8xf32>
    %49 = vector.shape_cast %48 : vector<8xf32> to vector<8x1xf32>
    %50 = tpu.reciprocal %49 {approx = true} : vector<8x1xf32> -> vector<8x1xf32>
    %51 = vector.broadcast %50 : vector<8x1xf32> to vector<8x8xf32>
    %52 = arith.mulf %47, %51 : vector<8x8xf32>
    %53 = arith.mulf %52, %35 : vector<8x8xf32>
    %54 = arith.truncf %53 : vector<8x8xf32> to vector<8x8xbf16>
    %c0_41 = arith.constant 0 : index
    %c0_42 = arith.constant 0 : index
    %55 = vector.load %arg14[%c0_41, %c0_42] : memref<8x512xbf16, #tpu.memory_space<vmem>>, vector<8x128xbf16>
    %cst_43 = arith.constant dense<0.000000e+00> : vector<8x128xf32>
    %56 = tpu.matmul %54, %55, %cst_43 {dimension_numbers = #tpu.dot_dimension_numbers<[1], [0], [0], [1], [0, 0, 1, 1], [], []>} : vector<8x8xbf16>, vector<8x128xbf16>, vector<8x128xf32> -> vector<8x128xf32>
    %57 = vector.broadcast %3 : vector<8x1xf32> to vector<8x128xf32>
    %58 = arith.mulf %56, %57 : vector<8x128xf32>
    %59 = arith.truncf %58 : vector<8x128xf32> to vector<8x128xbf16>
    %c0_44 = arith.constant 0 : index
    %c0_45 = arith.constant 0 : index
    %60 = vector.load %arg15[%c0_44, %c0_45] : memref<8x512xbf16, #tpu.memory_space<vmem>>, vector<8x128xbf16>
    tpu.vector_store %arg15[%c0_44, %c0_45], %59 {strides = array<i32>} : memref<8x512xbf16, #tpu.memory_space<vmem>>, vector<8x128xbf16>,
    %c0_46 = arith.constant 0 : index
    %c128 = arith.constant 128 : index
    %61 = vector.load %arg12[%c0_46, %c128] : memref<8x512xbf16, #tpu.memory_space<vmem>>, vector<8x128xbf16>
    %c0_47 = arith.constant 0 : index
    %c128_48 = arith.constant 128 : index
    %62 = vector.load %arg13[%c0_47, %c128_48] : memref<8x512xbf16, #tpu.memory_space<vmem>>, vector<8x128xbf16>
    %cst_49 = arith.constant dense<0.000000e+00> : vector<8x8xf32>
    %63 = tpu.matmul %61, %62, %cst_49 {dimension_numbers = #tpu.dot_dimension_numbers<[1], [1], [0], [0], [0, 0, 1, 0], [], []>} : vector<8x128xbf16>, vector<8x128xbf16>, vector<8x8xf32> -> vector<8x8xf32>
    %cst_50 = arith.constant 1.000000e+00 : f32
    %64 = vector.broadcast %cst_50 : f32 to vector<8x8xf32>
    %65 = arith.cmpf one, %35, %64 : vector<8x8xf32>
    %cst_51 = arith.constant -1.000000e+30 : f32
    %66 = vector.broadcast %cst_51 : f32 to vector<8x8xf32>
    %67 = arith.select %65, %66, %63 : vector<8x8xi1>, vector<8x8xf32>
    %cst_52 = arith.constant dense<0xFF800000> : vector<8xf32>
    %68 = vector.multi_reduction <maximumf>, %67, %cst_52 [1] : vector<8x8xf32> to vector<8xf32>
    %69 = vector.shape_cast %68 : vector<8xf32> to vector<8x1xf32>
    %70 = vector.broadcast %69 : vector<8x1xf32> to vector<8x8xf32>
    %71 = arith.subf %67, %70 : vector<8x8xf32>
    %72 = math.exp %71 : vector<8x8xf32>
    %cst_53 = arith.constant dense<0.000000e+00> : vector<8xf32>
    %73 = vector.multi_reduction <add>, %72, %cst_53 [1] : vector<8x8xf32> to vector<8xf32>
    %74 = vector.shape_cast %73 : vector<8xf32> to vector<8x1xf32>
    %75 = tpu.reciprocal %74 {approx = true} : vector<8x1xf32> -> vector<8x1xf32>
    %76 = vector.broadcast %75 : vector<8x1xf32> to vector<8x8xf32>
    %77 = arith.mulf %72, %76 : vector<8x8xf32>
    %78 = arith.mulf %77, %35 : vector<8x8xf32>
    %79 = arith.truncf %78 : vector<8x8xf32> to vector<8x8xbf16>
    %c0_54 = arith.constant 0 : index
    %c128_55 = arith.constant 128 : index
    %80 = vector.load %arg14[%c0_54, %c128_55] : memref<8x512xbf16, #tpu.memory_space<vmem>>, vector<8x128xbf16>
    %cst_56 = arith.constant dense<0.000000e+00> : vector<8x128xf32>
    %81 = tpu.matmul %79, %80, %cst_56 {dimension_numbers = #tpu.dot_dimension_numbers<[1], [0], [0], [1], [0, 0, 1, 1], [], []>} : vector<8x8xbf16>, vector<8x128xbf16>, vector<8x128xf32> -> vector<8x128xf32>
    %82 = vector.broadcast %3 : vector<8x1xf32> to vector<8x128xf32>
    %83 = arith.mulf %81, %82 : vector<8x128xf32>
    %84 = arith.truncf %83 : vector<8x128xf32> to vector<8x128xbf16>
    %c0_57 = arith.constant 0 : index
    %c128_58 = arith.constant 128 : index
    %85 = vector.load %arg15[%c0_57, %c128_58] : memref<8x512xbf16, #tpu.memory_space<vmem>>, vector<8x128xbf16>
    tpu.vector_store %arg15[%c0_57, %c128_58], %84 {strides = array<i32>} : memref<8x512xbf16, #tpu.memory_space<vmem>>, vector<8x128xbf16>,
    %c0_59 = arith.constant 0 : index
    %c256 = arith.constant 256 : index
    %86 = vector.load %arg12[%c0_59, %c256] : memref<8x512xbf16, #tpu.memory_space<vmem>>, vector<8x128xbf16>
    %c0_60 = arith.constant 0 : index
    %c256_61 = arith.constant 256 : index
    %87 = vector.load %arg13[%c0_60, %c256_61] : memref<8x512xbf16, #tpu.memory_space<vmem>>, vector<8x128xbf16>
    %cst_62 = arith.constant dense<0.000000e+00> : vector<8x8xf32>
    %88 = tpu.matmul %86, %87, %cst_62 {dimension_numbers = #tpu.dot_dimension_numbers<[1], [1], [0], [0], [0, 0, 1, 0], [], []>} : vector<8x128xbf16>, vector<8x128xbf16>, vector<8x8xf32> -> vector<8x8xf32>
    %cst_63 = arith.constant 1.000000e+00 : f32
    %89 = vector.broadcast %cst_63 : f32 to vector<8x8xf32>
    %90 = arith.cmpf one, %35, %89 : vector<8x8xf32>
    %cst_64 = arith.constant -1.000000e+30 : f32
    %91 = vector.broadcast %cst_64 : f32 to vector<8x8xf32>
    %92 = arith.select %90, %91, %88 : vector<8x8xi1>, vector<8x8xf32>
    %cst_65 = arith.constant dense<0xFF800000> : vector<8xf32>
    %93 = vector.multi_reduction <maximumf>, %92, %cst_65 [1] : vector<8x8xf32> to vector<8xf32>
    %94 = vector.shape_cast %93 : vector<8xf32> to vector<8x1xf32>
    %95 = vector.broadcast %94 : vector<8x1xf32> to vector<8x8xf32>
    %96 = arith.subf %92, %95 : vector<8x8xf32>
    %97 = math.exp %96 : vector<8x8xf32>
    %cst_66 = arith.constant dense<0.000000e+00> : vector<8xf32>
    %98 = vector.multi_reduction <add>, %97, %cst_66 [1] : vector<8x8xf32> to vector<8xf32>
    %99 = vector.shape_cast %98 : vector<8xf32> to vector<8x1xf32>
    %100 = tpu.reciprocal %99 {approx = true} : vector<8x1xf32> -> vector<8x1xf32>
    %101 = vector.broadcast %100 : vector<8x1xf32> to vector<8x8xf32>
    %102 = arith.mulf %97, %101 : vector<8x8xf32>
    %103 = arith.mulf %102, %35 : vector<8x8xf32>
    %104 = arith.truncf %103 : vector<8x8xf32> to vector<8x8xbf16>
    %c0_67 = arith.constant 0 : index
    %c256_68 = arith.constant 256 : index
    %105 = vector.load %arg14[%c0_67, %c256_68] : memref<8x512xbf16, #tpu.memory_space<vmem>>, vector<8x128xbf16>
    %cst_69 = arith.constant dense<0.000000e+00> : vector<8x128xf32>
    %106 = tpu.matmul %104, %105, %cst_69 {dimension_numbers = #tpu.dot_dimension_numbers<[1], [0], [0], [1], [0, 0, 1, 1], [], []>} : vector<8x8xbf16>, vector<8x128xbf16>, vector<8x128xf32> -> vector<8x128xf32>
    %107 = vector.broadcast %3 : vector<8x1xf32> to vector<8x128xf32>
    %108 = arith.mulf %106, %107 : vector<8x128xf32>
    %109 = arith.truncf %108 : vector<8x128xf32> to vector<8x128xbf16>
    %c0_70 = arith.constant 0 : index
    %c256_71 = arith.constant 256 : index
    %110 = vector.load %arg15[%c0_70, %c256_71] : memref<8x512xbf16, #tpu.memory_space<vmem>>, vector<8x128xbf16>
    tpu.vector_store %arg15[%c0_70, %c256_71], %109 {strides = array<i32>} : memref<8x512xbf16, #tpu.memory_space<vmem>>, vector<8x128xbf16>,
    %c0_72 = arith.constant 0 : index
    %c384 = arith.constant 384 : index
    %111 = vector.load %arg12[%c0_72, %c384] : memref<8x512xbf16, #tpu.memory_space<vmem>>, vector<8x128xbf16>
    %c0_73 = arith.constant 0 : index
    %c384_74 = arith.constant 384 : index
    %112 = vector.load %arg13[%c0_73, %c384_74] : memref<8x512xbf16, #tpu.memory_space<vmem>>, vector<8x128xbf16>
    %cst_75 = arith.constant dense<0.000000e+00> : vector<8x8xf32>
    %113 = tpu.matmul %111, %112, %cst_75 {dimension_numbers = #tpu.dot_dimension_numbers<[1], [1], [0], [0], [0, 0, 1, 0], [], []>} : vector<8x128xbf16>, vector<8x128xbf16>, vector<8x8xf32> -> vector<8x8xf32>
    %cst_76 = arith.constant 1.000000e+00 : f32
    %114 = vector.broadcast %cst_76 : f32 to vector<8x8xf32>
    %115 = arith.cmpf one, %35, %114 : vector<8x8xf32>
    %cst_77 = arith.constant -1.000000e+30 : f32
    %116 = vector.broadcast %cst_77 : f32 to vector<8x8xf32>
    %117 = arith.select %115, %116, %113 : vector<8x8xi1>, vector<8x8xf32>
    %cst_78 = arith.constant dense<0xFF800000> : vector<8xf32>
    %118 = vector.multi_reduction <maximumf>, %117, %cst_78 [1] : vector<8x8xf32> to vector<8xf32>
    %119 = vector.shape_cast %118 : vector<8xf32> to vector<8x1xf32>
    %120 = vector.broadcast %119 : vector<8x1xf32> to vector<8x8xf32>
    %121 = arith.subf %117, %120 : vector<8x8xf32>
    %122 = math.exp %121 : vector<8x8xf32>
    %cst_79 = arith.constant dense<0.000000e+00> : vector<8xf32>
    %123 = vector.multi_reduction <add>, %122, %cst_79 [1] : vector<8x8xf32> to vector<8xf32>
    %124 = vector.shape_cast %123 : vector<8xf32> to vector<8x1xf32>
    %125 = tpu.reciprocal %124 {approx = true} : vector<8x1xf32> -> vector<8x1xf32>
    %126 = vector.broadcast %125 : vector<8x1xf32> to vector<8x8xf32>
    %127 = arith.mulf %122, %126 : vector<8x8xf32>
    %128 = arith.mulf %127, %35 : vector<8x8xf32>
    %129 = arith.truncf %128 : vector<8x8xf32> to vector<8x8xbf16>
    %c0_80 = arith.constant 0 : index
    %c384_81 = arith.constant 384 : index
    %130 = vector.load %arg14[%c0_80, %c384_81] : memref<8x512xbf16, #tpu.memory_space<vmem>>, vector<8x128xbf16>
    %cst_82 = arith.constant dense<0.000000e+00> : vector<8x128xf32>
    %131 = tpu.matmul %129, %130, %cst_82 {dimension_numbers = #tpu.dot_dimension_numbers<[1], [0], [0], [1], [0, 0, 1, 1], [], []>} : vector<8x8xbf16>, vector<8x128xbf16>, vector<8x128xf32> -> vector<8x128xf32>
    %132 = vector.broadcast %3 : vector<8x1xf32> to vector<8x128xf32>
    %133 = arith.mulf %131, %132 : vector<8x128xf32>
    %134 = arith.truncf %133 : vector<8x128xf32> to vector<8x128xbf16>
    %c0_83 = arith.constant 0 : index
    %c384_84 = arith.constant 384 : index
    %135 = vector.load %arg15[%c0_83, %c384_84] : memref<8x512xbf16, #tpu.memory_space<vmem>>, vector<8x128xbf16>
    tpu.vector_store %arg15[%c0_83, %c384_84], %134 {strides = array<i32>} : memref<8x512xbf16, #tpu.memory_space<vmem>>, vector<8x128xbf16>,
    %c0_85 = arith.constant 0 : index
    %c0_86 = arith.constant 0 : index
    %136 = vector.load %arg15[%c0_85, %c0_86] : memref<8x512xbf16, #tpu.memory_space<vmem>>, vector<8x512xbf16>
    %c0_87 = arith.constant 0 : index
    %c0_88 = arith.constant 0 : index
    %137 = vector.load %arg10[%c0_87, %c0_88] : memref<512x512xbf16, #tpu.memory_space<vmem>>, vector<512x512xbf16>
    %cst_89 = arith.constant dense<0.000000e+00> : vector<8x512xf32>
    %138 = tpu.matmul %136, %137, %cst_89 {dimension_numbers = #tpu.dot_dimension_numbers<[1], [0], [0], [1], [0, 0, 1, 1], [], []>} : vector<8x512xbf16>, vector<512x512xbf16>, vector<8x512xf32> -> vector<8x512xf32>
    %139 = vector.broadcast %3 : vector<8x1xf32> to vector<8x512xf32>
    %140 = arith.mulf %138, %139 : vector<8x512xf32>
    %141 = vector.shape_cast %140 : vector<8x512xf32> to vector<1x8x512xf32>
    %c0_90 = arith.constant 0 : index
    %c0_91 = arith.constant 0 : index
    %c0_92 = arith.constant 0 : index
    %142 = vector.load %arg11[%c0_90, %c0_91, %c0_92] : memref<1x8x512xf32, #tpu.memory_space<vmem>>, vector<1x8x512xf32>
    tpu.vector_store %arg11[%c0_90, %c0_91, %c0_92], %141 {strides = array<i32>} : memref<1x8x512xf32, #tpu.memory_space<vmem>>, vector<1x8x512xf32>,
    return
  }
  func.func @transform_0(%arg0: i32) -> (i32, i32, i32) {
    %c0_i32 = arith.constant 0 : i32
    %c0_i32_0 = arith.constant 0 : i32
    %c0_i32_1 = arith.constant 0 : i32
    return %arg0, %c0_i32, %c0_i32_0 : i32, i32, i32
  }
  func.func @transform_1(%arg0: i32) -> (i32, i32, i32) {
    %c0_i32 = arith.constant 0 : i32
    %c0_i32_0 = arith.constant 0 : i32
    %c0_i32_1 = arith.constant 0 : i32
    return %arg0, %c0_i32, %c0_i32_0 : i32, i32, i32
  }
  func.func @transform_2(%arg0: i32) -> (i32, i32, i32) {
    %c0_i32 = arith.constant 0 : i32
    %c0_i32_0 = arith.constant 0 : i32
    %c0_i32_1 = arith.constant 0 : i32
    return %arg0, %c0_i32, %c0_i32_0 : i32, i32, i32
  }
  func.func @transform_3(%arg0: i32) -> (i32, i32, i32) {
    %c0_i32 = arith.constant 0 : i32
    %c0_i32_0 = arith.constant 0 : i32
    %c0_i32_1 = arith.constant 0 : i32
    return %arg0, %c0_i32, %c0_i32_0 : i32, i32, i32
  }
  func.func @transform_4(%arg0: i32) -> (i32, i32, i32) {
    %c0_i32 = arith.constant 0 : i32
    %c0_i32_0 = arith.constant 0 : i32
    %c0_i32_1 = arith.constant 0 : i32
    return %arg0, %c0_i32, %c0_i32_0 : i32, i32, i32
  }
  func.func @transform_5(%arg0: i32) -> (i32, i32, i32) {
    %c0_i32 = arith.constant 0 : i32
    %c0_i32_0 = arith.constant 0 : i32
    %c0_i32_1 = arith.constant 0 : i32
    return %arg0, %c0_i32, %c0_i32_0 : i32, i32, i32
  }
  func.func @transform_6(%arg0: i32) -> (i32, i32) {
    %c0_i32 = arith.constant 0 : i32
    %c0_i32_0 = arith.constant 0 : i32
    %c0_i32_1 = arith.constant 0 : i32
    return %c0_i32, %c0_i32_0 : i32, i32
  }
  func.func @transform_7(%arg0: i32) -> (i32, i32) {
    %c0_i32 = arith.constant 0 : i32
    %c0_i32_0 = arith.constant 0 : i32
    %c0_i32_1 = arith.constant 0 : i32
    return %c0_i32, %c0_i32_0 : i32, i32
  }
  func.func @transform_8(%arg0: i32) -> (i32, i32) {
    %c0_i32 = arith.constant 0 : i32
    %c0_i32_0 = arith.constant 0 : i32
    %c0_i32_1 = arith.constant 0 : i32
    return %c0_i32, %c0_i32_0 : i32, i32
  }
  func.func @transform_9(%arg0: i32) -> (i32, i32) {
    %c0_i32 = arith.constant 0 : i32
    %c0_i32_0 = arith.constant 0 : i32
    %c0_i32_1 = arith.constant 0 : i32
    return %c0_i32, %c0_i32_0 : i32, i32
  }
  func.func @transform_10(%arg0: i32) -> (i32, i32, i32) {
    %c0_i32 = arith.constant 0 : i32
    %c0_i32_0 = arith.constant 0 : i32
    %c0_i32_1 = arith.constant 0 : i32
    return %arg0, %c0_i32, %c0_i32_0 : i32, i32, i32
  }
}

module attributes {stable_mosaic.version = 11 : i64} {
  func.func @_mha_kernel(%arg0: i32, %arg1: memref<1x8x512xf32, #tpu.memory_space<vmem>>, %arg2: memref<1x8x512xf32, #tpu.memory_space<vmem>>, %arg3: memref<1x8x512xf32, #tpu.memory_space<vmem>>, %arg4: memref<1x8x1xf32, #tpu.memory_space<vmem>>, %arg5: memref<1x8x1xf32, #tpu.memory_space<vmem>>, %arg6: memref<1x8x8xi8, #tpu.memory_space<vmem>>, %arg7: memref<512x512xbf16, #tpu.memory_space<vmem>>, %arg8: memref<512x512xbf16, #tpu.memory_space<vmem>>, %arg9: memref<512x512xbf16, #tpu.memory_space<vmem>>, %arg10: memref<512x512xbf16, #tpu.memory_space<vmem>>, %arg11: memref<1x8x512xf32, #tpu.memory_space<vmem>>, %arg12: memref<8x512xbf16, #tpu.memory_space<vmem>>, %arg13: memref<8x512xbf16, #tpu.memory_space<vmem>>, %arg14: memref<8x512xbf16, #tpu.memory_space<vmem>>, %arg15: memref<8x512xbf16, #tpu.memory_space<vmem>>) attributes {dimension_semantics = [#tpu.dimension_semantics<parallel>], iteration_bounds = array<i64: 2>, scalar_prefetch = 0 : i64, scratch_operands = 4 : i64, tpu.core_type = #tpu.core_type<tc>, window_params = [{transform_indices = @transform_0, window_bounds = array<i64: 1, 8, 512>}, {transform_indices = @transform_1, window_bounds = array<i64: 1, 8, 512>}, {transform_indices = @transform_2, window_bounds = array<i64: 1, 8, 512>}, {transform_indices = @transform_3, window_bounds = array<i64: 1, 8, 1>}, {transform_indices = @transform_4, window_bounds = array<i64: 1, 8, 1>}, {transform_indices = @transform_5, window_bounds = array<i64: 1, 8, 8>}, {pipeline_mode = #tpu.pipeline_mode<synchronous>, transform_indices = @transform_6, window_bounds = array<i64: 512, 512>}, {pipeline_mode = #tpu.pipeline_mode<synchronous>, transform_indices = @transform_7, window_bounds = array<i64: 512, 512>}, {pipeline_mode = #tpu.pipeline_mode<synchronous>, transform_indices = @transform_8, window_bounds = array<i64: 512, 512>}, {pipeline_mode = #tpu.pipeline_mode<synchronous>, transform_indices = @transform_9, window_bounds = array<i64: 512, 512>}, {transform_indices = @transform_10, window_bounds = array<i64: 1, 8, 512>}]} {
    %c0 = arith.constant 0 : index
    %c0_0 = arith.constant 0 : index
    %c0_1 = arith.constant 0 : index
    %0 = vector.load %arg4[%c0, %c0_0, %c0_1] : memref<1x8x1xf32, #tpu.memory_space<vmem>>, vector<1x8x1xf32>
    %1 = vector.shape_cast %0 : vector<1x8x1xf32> to vector<8x1xf32>
    %c0_2 = arith.constant 0 : index
    %c0_3 = arith.constant 0 : index
    %c0_4 = arith.constant 0 : index
    %2 = vector.load %arg5[%c0_2, %c0_3, %c0_4] : memref<1x8x1xf32, #tpu.memory_space<vmem>>, vector<1x8x1xf32>
    %3 = vector.shape_cast %2 : vector<1x8x1xf32> to vector<8x1xf32>
    %c0_5 = arith.constant 0 : index
    %c0_6 = arith.constant 0 : index
    %c0_7 = arith.constant 0 : index
    %4 = vector.load %arg1[%c0_5, %c0_6, %c0_7] : memref<1x8x512xf32, #tpu.memory_space<vmem>>, vector<1x8x512xf32>
    %5 = vector.shape_cast %4 : vector<1x8x512xf32> to vector<8x512xf32>
    %6 = arith.truncf %5 : vector<8x512xf32> to vector<8x512xbf16>
    %c0_8 = arith.constant 0 : index
    %c0_9 = arith.constant 0 : index
    %7 = vector.load %arg7[%c0_8, %c0_9] : memref<512x512xbf16, #tpu.memory_space<vmem>>, vector<512x512xbf16>
    %cst = arith.constant dense<0.000000e+00> : vector<8x512xf32>
    %8 = tpu.matmul %6, %7, %cst {dimension_numbers = #tpu.dot_dimension_numbers<[1], [0], [0], [1], [0, 0, 1, 1], [], []>} : vector<8x512xbf16>, vector<512x512xbf16>, vector<8x512xf32> -> vector<8x512xf32>
    %cst_10 = arith.constant 0.0883883461 : f32
    %9 = vector.broadcast %cst_10 : f32 to vector<8x1xf32>
    %10 = arith.mulf %1, %9 : vector<8x1xf32>
    %11 = vector.broadcast %10 : vector<8x1xf32> to vector<8x512xf32>
    %12 = arith.mulf %8, %11 : vector<8x512xf32>
    %13 = arith.truncf %12 : vector<8x512xf32> to vector<8x512xbf16>
    %c0_11 = arith.constant 0 : index
    %c0_12 = arith.constant 0 : index
    %14 = vector.load %arg12[%c0_11, %c0_12] : memref<8x512xbf16, #tpu.memory_space<vmem>>, vector<8x512xbf16>
    tpu.vector_store %arg12[%c0_11, %c0_12], %13 {strides = array<i32>} : memref<8x512xbf16, #tpu.memory_space<vmem>>, vector<8x512xbf16>,
    %c0_13 = arith.constant 0 : index
    %c0_14 = arith.constant 0 : index
    %c0_15 = arith.constant 0 : index
    %15 = vector.load %arg2[%c0_13, %c0_14, %c0_15] : memref<1x8x512xf32, #tpu.memory_space<vmem>>, vector<1x8x512xf32>
    %16 = vector.shape_cast %15 : vector<1x8x512xf32> to vector<8x512xf32>
    %17 = arith.truncf %16 : vector<8x512xf32> to vector<8x512xbf16>
    %c0_16 = arith.constant 0 : index
    %c0_17 = arith.constant 0 : index
    %18 = vector.load %arg8[%c0_16, %c0_17] : memref<512x512xbf16, #tpu.memory_space<vmem>>, vector<512x512xbf16>
    %cst_18 = arith.constant dense<0.000000e+00> : vector<8x512xf32>
    %19 = tpu.matmul %17, %18, %cst_18 {dimension_numbers = #tpu.dot_dimension_numbers<[1], [0], [0], [1], [0, 0, 1, 1], [], []>} : vector<8x512xbf16>, vector<512x512xbf16>, vector<8x512xf32> -> vector<8x512xf32>
    %20 = vector.broadcast %3 : vector<8x1xf32> to vector<8x512xf32>
    %21 = arith.mulf %19, %20 : vector<8x512xf32>
    %22 = arith.truncf %21 : vector<8x512xf32> to vector<8x512xbf16>
    %c0_19 = arith.constant 0 : index
    %c0_20 = arith.constant 0 : index
    %23 = vector.load %arg13[%c0_19, %c0_20] : memref<8x512xbf16, #tpu.memory_space<vmem>>, vector<8x512xbf16>
    tpu.vector_store %arg13[%c0_19, %c0_20], %22 {strides = array<i32>} : memref<8x512xbf16, #tpu.memory_space<vmem>>, vector<8x512xbf16>,
    %c0_21 = arith.constant 0 : index
    %c0_22 = arith.constant 0 : index
    %c0_23 = arith.constant 0 : index
    %24 = vector.load %arg3[%c0_21, %c0_22, %c0_23] : memref<1x8x512xf32, #tpu.memory_space<vmem>>, vector<1x8x512xf32>
    %25 = vector.shape_cast %24 : vector<1x8x512xf32> to vector<8x512xf32>
    %26 = arith.truncf %25 : vector<8x512xf32> to vector<8x512xbf16>
    %c0_24 = arith.constant 0 : index
    %c0_25 = arith.constant 0 : index
    %27 = vector.load %arg9[%c0_24, %c0_25] : memref<512x512xbf16, #tpu.memory_space<vmem>>, vector<512x512xbf16>
    %cst_26 = arith.constant dense<0.000000e+00> : vector<8x512xf32>
    %28 = tpu.matmul %26, %27, %cst_26 {dimension_numbers = #tpu.dot_dimension_numbers<[1], [0], [0], [1], [0, 0, 1, 1], [], []>} : vector<8x512xbf16>, vector<512x512xbf16>, vector<8x512xf32> -> vector<8x512xf32>
    %29 = vector.broadcast %3 : vector<8x1xf32> to vector<8x512xf32>
    %30 = arith.mulf %28, %29 : vector<8x512xf32>
    %31 = arith.truncf %30 : vector<8x512xf32> to vector<8x512xbf16>
    %c0_27 = arith.constant 0 : index
    %c0_28 = arith.constant 0 : index
    %32 = vector.load %arg14[%c0_27, %c0_28] : memref<8x512xbf16, #tpu.memory_space<vmem>>, vector<8x512xbf16>
    tpu.vector_store %arg14[%c0_27, %c0_28], %31 {strides = array<i32>} : memref<8x512xbf16, #tpu.memory_space<vmem>>, vector<8x512xbf16>,
    %c0_29 = arith.constant 0 : index
    %c0_30 = arith.constant 0 : index
    %c0_31 = arith.constant 0 : index
    %33 = vector.load %arg6[%c0_29, %c0_30, %c0_31] : memref<1x8x8xi8, #tpu.memory_space<vmem>>, vector<1x8x8xi8>
    %34 = arith.sitofp %33 : vector<1x8x8xi8> to vector<1x8x8xf32>
    %35 = vector.shape_cast %34 : vector<1x8x8xf32> to vector<8x8xf32>
    %c0_32 = arith.constant 0 : index
    %c0_33 = arith.constant 0 : index
    %36 = vector.load %arg12[%c0_32, %c0_33] : memref<8x512xbf16, #tpu.memory_space<vmem>>, vector<8x128xbf16>
    %c0_34 = arith.constant 0 : index
    %c0_35 = arith.constant 0 : index
    %37 = vector.load %arg13[%c0_34, %c0_35] : memref<8x512xbf16, #tpu.memory_space<vmem>>, vector<8x128xbf16>
    %cst_36 = arith.constant dense<0.000000e+00> : vector<8x8xf32>
    %38 = tpu.matmul %36, %37, %cst_36 {dimension_numbers = #tpu.dot_dimension_numbers<[1], [1], [0], [0], [0, 0, 1, 0], [], []>} : vector<8x128xbf16>, vector<8x128xbf16>, vector<8x8xf32> -> vector<8x8xf32>
    %cst_37 = arith.constant 1.000000e+00 : f32
    %39 = vector.broadcast %cst_37 : f32 to vector<8x8xf32>
    %40 = arith.cmpf one, %35, %39 : vector<8x8xf32>
    %cst_38 = arith.constant -1.000000e+30 : f32
    %41 = vector.broadcast %cst_38 : f32 to vector<8x8xf32>
    %42 = arith.select %40, %41, %38 : vector<8x8xi1>, vector<8x8xf32>
    %cst_39 = arith.constant dense<0xFF800000> : vector<8xf32>
    %43 = vector.multi_reduction <maximumf>, %42, %cst_39 [1] : vector<8x8xf32> to vector<8xf32>
    %44 = vector.shape_cast %43 : vector<8xf32> to vector<8x1xf32>
    %45 = vector.broadcast %44 : vector<8x1xf32> to vector<8x8xf32>
    %46 = arith.subf %42, %45 : vector<8x8xf32>
    %47 = math.exp %46 : vector<8x8xf32>
    %cst_40 = arith.constant dense<0.000000e+00> : vector<8xf32>
    %48 = vector.multi_reduction <add>, %47, %cst_40 [1] : vector<8x8xf32> to vector<8xf32>
    %49 = vector.shape_cast %48 : vector<8xf32> to vector<8x1xf32>
    %50 = tpu.reciprocal %49 {approx = true} : vector<8x1xf32> -> vector<8x1xf32>
    %51 = vector.broadcast %50 : vector<8x1xf32> to vector<8x8xf32>
    %52 = arith.mulf %47, %51 : vector<8x8xf32>
    %53 = arith.mulf %52, %35 : vector<8x8xf32>
    %54 = arith.truncf %53 : vector<8x8xf32> to vector<8x8xbf16>
    %c0_41 = arith.constant 0 : index
    %c0_42 = arith.constant 0 : index
    %55 = vector.load %arg14[%c0_41, %c0_42] : memref<8x512xbf16, #tpu.memory_space<vmem>>, vector<8x128xbf16>
    %cst_43 = arith.constant dense<0.000000e+00> : vector<8x128xf32>
    %56 = tpu.matmul %54, %55, %cst_43 {dimension_numbers = #tpu.dot_dimension_numbers<[1], [0], [0], [1], [0, 0, 1, 1], [], []>} : vector<8x8xbf16>, vector<8x128xbf16>, vector<8x128xf32> -> vector<8x128xf32>
    %57 = vector.broadcast %3 : vector<8x1xf32> to vector<8x128xf32>
    %58 = arith.mulf %56, %57 : vector<8x128xf32>
    %59 = arith.truncf %58 : vector<8x128xf32> to vector<8x128xbf16>
    %c0_44 = arith.constant 0 : index
    %c0_45 = arith.constant 0 : index
    %60 = vector.load %arg15[%c0_44, %c0_45] : memref<8x512xbf16, #tpu.memory_space<vmem>>, vector<8x128xbf16>
    tpu.vector_store %arg15[%c0_44, %c0_45], %59 {strides = array<i32>} : memref<8x512xbf16, #tpu.memory_space<vmem>>, vector<8x128xbf16>,
    %c0_46 = arith.constant 0 : index
    %c128 = arith.constant 128 : index
    %61 = vector.load %arg12[%c0_46, %c128] : memref<8x512xbf16, #tpu.memory_space<vmem>>, vector<8x128xbf16>
    %c0_47 = arith.constant 0 : index
    %c128_48 = arith.constant 128 : index
    %62 = vector.load %arg13[%c0_47, %c128_48] : memref<8x512xbf16, #tpu.memory_space<vmem>>, vector<8x128xbf16>
    %cst_49 = arith.constant dense<0.000000e+00> : vector<8x8xf32>
    %63 = tpu.matmul %61, %62, %cst_49 {dimension_numbers = #tpu.dot_dimension_numbers<[1], [1], [0], [0], [0, 0, 1, 0], [], []>} : vector<8x128xbf16>, vector<8x128xbf16>, vector<8x8xf32> -> vector<8x8xf32>
    %cst_50 = arith.constant 1.000000e+00 : f32
    %64 = vector.broadcast %cst_50 : f32 to vector<8x8xf32>
    %65 = arith.cmpf one, %35, %64 : vector<8x8xf32>
    %cst_51 = arith.constant -1.000000e+30 : f32
    %66 = vector.broadcast %cst_51 : f32 to vector<8x8xf32>
    %67 = arith.select %65, %66, %63 : vector<8x8xi1>, vector<8x8xf32>
    %cst_52 = arith.constant dense<0xFF800000> : vector<8xf32>
    %68 = vector.multi_reduction <maximumf>, %67, %cst_52 [1] : vector<8x8xf32> to vector<8xf32>
    %69 = vector.shape_cast %68 : vector<8xf32> to vector<8x1xf32>
    %70 = vector.broadcast %69 : vector<8x1xf32> to vector<8x8xf32>
    %71 = arith.subf %67, %70 : vector<8x8xf32>
    %72 = math.exp %71 : vector<8x8xf32>
    %cst_53 = arith.constant dense<0.000000e+00> : vector<8xf32>
    %73 = vector.multi_reduction <add>, %72, %cst_53 [1] : vector<8x8xf32> to vector<8xf32>
    %74 = vector.shape_cast %73 : vector<8xf32> to vector<8x1xf32>
    %75 = tpu.reciprocal %74 {approx = true} : vector<8x1xf32> -> vector<8x1xf32>
    %76 = vector.broadcast %75 : vector<8x1xf32> to vector<8x8xf32>
    %77 = arith.mulf %72, %76 : vector<8x8xf32>
    %78 = arith.mulf %77, %35 : vector<8x8xf32>
    %79 = arith.truncf %78 : vector<8x8xf32> to vector<8x8xbf16>
    %c0_54 = arith.constant 0 : index
    %c128_55 = arith.constant 128 : index
    %80 = vector.load %arg14[%c0_54, %c128_55] : memref<8x512xbf16, #tpu.memory_space<vmem>>, vector<8x128xbf16>
    %cst_56 = arith.constant dense<0.000000e+00> : vector<8x128xf32>
    %81 = tpu.matmul %79, %80, %cst_56 {dimension_numbers = #tpu.dot_dimension_numbers<[1], [0], [0], [1], [0, 0, 1, 1], [], []>} : vector<8x8xbf16>, vector<8x128xbf16>, vector<8x128xf32> -> vector<8x128xf32>
    %82 = vector.broadcast %3 : vector<8x1xf32> to vector<8x128xf32>
    %83 = arith.mulf %81, %82 : vector<8x128xf32>
    %84 = arith.truncf %83 : vector<8x128xf32> to vector<8x128xbf16>
    %c0_57 = arith.constant 0 : index
    %c128_58 = arith.constant 128 : index
    %85 = vector.load %arg15[%c0_57, %c128_58] : memref<8x512xbf16, #tpu.memory_space<vmem>>, vector<8x128xbf16>
    tpu.vector_store %arg15[%c0_57, %c128_58], %84 {strides = array<i32>} : memref<8x512xbf16, #tpu.memory_space<vmem>>, vector<8x128xbf16>,
    %c0_59 = arith.constant 0 : index
    %c256 = arith.constant 256 : index
    %86 = vector.load %arg12[%c0_59, %c256] : memref<8x512xbf16, #tpu.memory_space<vmem>>, vector<8x128xbf16>
    %c0_60 = arith.constant 0 : index
    %c256_61 = arith.constant 256 : index
    %87 = vector.load %arg13[%c0_60, %c256_61] : memref<8x512xbf16, #tpu.memory_space<vmem>>, vector<8x128xbf16>
    %cst_62 = arith.constant dense<0.000000e+00> : vector<8x8xf32>
    %88 = tpu.matmul %86, %87, %cst_62 {dimension_numbers = #tpu.dot_dimension_numbers<[1], [1], [0], [0], [0, 0, 1, 0], [], []>} : vector<8x128xbf16>, vector<8x128xbf16>, vector<8x8xf32> -> vector<8x8xf32>
    %cst_63 = arith.constant 1.000000e+00 : f32
    %89 = vector.broadcast %cst_63 : f32 to vector<8x8xf32>
    %90 = arith.cmpf one, %35, %89 : vector<8x8xf32>
    %cst_64 = arith.constant -1.000000e+30 : f32
    %91 = vector.broadcast %cst_64 : f32 to vector<8x8xf32>
    %92 = arith.select %90, %91, %88 : vector<8x8xi1>, vector<8x8xf32>
    %cst_65 = arith.constant dense<0xFF800000> : vector<8xf32>
    %93 = vector.multi_reduction <maximumf>, %92, %cst_65 [1] : vector<8x8xf32> to vector<8xf32>
    %94 = vector.shape_cast %93 : vector<8xf32> to vector<8x1xf32>
    %95 = vector.broadcast %94 : vector<8x1xf32> to vector<8x8xf32>
    %96 = arith.subf %92, %95 : vector<8x8xf32>
    %97 = math.exp %96 : vector<8x8xf32>
    %cst_66 = arith.constant dense<0.000000e+00> : vector<8xf32>
    %98 = vector.multi_reduction <add>, %97, %cst_66 [1] : vector<8x8xf32> to vector<8xf32>
    %99 = vector.shape_cast %98 : vector<8xf32> to vector<8x1xf32>
    %100 = tpu.reciprocal %99 {approx = true} : vector<8x1xf32> -> vector<8x1xf32>
    %101 = vector.broadcast %100 : vector<8x1xf32> to vector<8x8xf32>
    %102 = arith.mulf %97, %101 : vector<8x8xf32>
    %103 = arith.mulf %102, %35 : vector<8x8xf32>
    %104 = arith.truncf %103 : vector<8x8xf32> to vector<8x8xbf16>
    %c0_67 = arith.constant 0 : index
    %c256_68 = arith.constant 256 : index
    %105 = vector.load %arg14[%c0_67, %c256_68] : memref<8x512xbf16, #tpu.memory_space<vmem>>, vector<8x128xbf16>
    %cst_69 = arith.constant dense<0.000000e+00> : vector<8x128xf32>
    %106 = tpu.matmul %104, %105, %cst_69 {dimension_numbers = #tpu.dot_dimension_numbers<[1], [0], [0], [1], [0, 0, 1, 1], [], []>} : vector<8x8xbf16>, vector<8x128xbf16>, vector<8x128xf32> -> vector<8x128xf32>
    %107 = vector.broadcast %3 : vector<8x1xf32> to vector<8x128xf32>
    %108 = arith.mulf %106, %107 : vector<8x128xf32>
    %109 = arith.truncf %108 : vector<8x128xf32> to vector<8x128xbf16>
    %c0_70 = arith.constant 0 : index
    %c256_71 = arith.constant 256 : index
    %110 = vector.load %arg15[%c0_70, %c256_71] : memref<8x512xbf16, #tpu.memory_space<vmem>>, vector<8x128xbf16>
    tpu.vector_store %arg15[%c0_70, %c256_71], %109 {strides = array<i32>} : memref<8x512xbf16, #tpu.memory_space<vmem>>, vector<8x128xbf16>,
    %c0_72 = arith.constant 0 : index
    %c384 = arith.constant 384 : index
    %111 = vector.load %arg12[%c0_72, %c384] : memref<8x512xbf16, #tpu.memory_space<vmem>>, vector<8x128xbf16>
    %c0_73 = arith.constant 0 : index
    %c384_74 = arith.constant 384 : index
    %112 = vector.load %arg13[%c0_73, %c384_74] : memref<8x512xbf16, #tpu.memory_space<vmem>>, vector<8x128xbf16>
    %cst_75 = arith.constant dense<0.000000e+00> : vector<8x8xf32>
    %113 = tpu.matmul %111, %112, %cst_75 {dimension_numbers = #tpu.dot_dimension_numbers<[1], [1], [0], [0], [0, 0, 1, 0], [], []>} : vector<8x128xbf16>, vector<8x128xbf16>, vector<8x8xf32> -> vector<8x8xf32>
    %cst_76 = arith.constant 1.000000e+00 : f32
    %114 = vector.broadcast %cst_76 : f32 to vector<8x8xf32>
    %115 = arith.cmpf one, %35, %114 : vector<8x8xf32>
    %cst_77 = arith.constant -1.000000e+30 : f32
    %116 = vector.broadcast %cst_77 : f32 to vector<8x8xf32>
    %117 = arith.select %115, %116, %113 : vector<8x8xi1>, vector<8x8xf32>
    %cst_78 = arith.constant dense<0xFF800000> : vector<8xf32>
    %118 = vector.multi_reduction <maximumf>, %117, %cst_78 [1] : vector<8x8xf32> to vector<8xf32>
    %119 = vector.shape_cast %118 : vector<8xf32> to vector<8x1xf32>
    %120 = vector.broadcast %119 : vector<8x1xf32> to vector<8x8xf32>
    %121 = arith.subf %117, %120 : vector<8x8xf32>
    %122 = math.exp %121 : vector<8x8xf32>
    %cst_79 = arith.constant dense<0.000000e+00> : vector<8xf32>
    %123 = vector.multi_reduction <add>, %122, %cst_79 [1] : vector<8x8xf32> to vector<8xf32>
    %124 = vector.shape_cast %123 : vector<8xf32> to vector<8x1xf32>
    %125 = tpu.reciprocal %124 {approx = true} : vector<8x1xf32> -> vector<8x1xf32>
    %126 = vector.broadcast %125 : vector<8x1xf32> to vector<8x8xf32>
    %127 = arith.mulf %122, %126 : vector<8x8xf32>
    %128 = arith.mulf %127, %35 : vector<8x8xf32>
    %129 = arith.truncf %128 : vector<8x8xf32> to vector<8x8xbf16>
    %c0_80 = arith.constant 0 : index
    %c384_81 = arith.constant 384 : index
    %130 = vector.load %arg14[%c0_80, %c384_81] : memref<8x512xbf16, #tpu.memory_space<vmem>>, vector<8x128xbf16>
    %cst_82 = arith.constant dense<0.000000e+00> : vector<8x128xf32>
    %131 = tpu.matmul %129, %130, %cst_82 {dimension_numbers = #tpu.dot_dimension_numbers<[1], [0], [0], [1], [0, 0, 1, 1], [], []>} : vector<8x8xbf16>, vector<8x128xbf16>, vector<8x128xf32> -> vector<8x128xf32>
    %132 = vector.broadcast %3 : vector<8x1xf32> to vector<8x128xf32>
    %133 = arith.mulf %131, %132 : vector<8x128xf32>
    %134 = arith.truncf %133 : vector<8x128xf32> to vector<8x128xbf16>
    %c0_83 = arith.constant 0 : index
    %c384_84 = arith.constant 384 : index
    %135 = vector.load %arg15[%c0_83, %c384_84] : memref<8x512xbf16, #tpu.memory_space<vmem>>, vector<8x128xbf16>
    tpu.vector_store %arg15[%c0_83, %c384_84], %134 {strides = array<i32>} : memref<8x512xbf16, #tpu.memory_space<vmem>>, vector<8x128xbf16>,
    %c0_85 = arith.constant 0 : index
    %c0_86 = arith.constant 0 : index
    %136 = vector.load %arg15[%c0_85, %c0_86] : memref<8x512xbf16, #tpu.memory_space<vmem>>, vector<8x512xbf16>
    %c0_87 = arith.constant 0 : index
    %c0_88 = arith.constant 0 : index
    %137 = vector.load %arg10[%c0_87, %c0_88] : memref<512x512xbf16, #tpu.memory_space<vmem>>, vector<512x512xbf16>
    %cst_89 = arith.constant dense<0.000000e+00> : vector<8x512xf32>
    %138 = tpu.matmul %136, %137, %cst_89 {dimension_numbers = #tpu.dot_dimension_numbers<[1], [0], [0], [1], [0, 0, 1, 1], [], []>} : vector<8x512xbf16>, vector<512x512xbf16>, vector<8x512xf32> -> vector<8x512xf32>
    %139 = vector.broadcast %3 : vector<8x1xf32> to vector<8x512xf32>
    %140 = arith.mulf %138, %139 : vector<8x512xf32>
    %141 = vector.shape_cast %140 : vector<8x512xf32> to vector<1x8x512xf32>
    %c0_90 = arith.constant 0 : index
    %c0_91 = arith.constant 0 : index
    %c0_92 = arith.constant 0 : index
    %142 = vector.load %arg11[%c0_90, %c0_91, %c0_92] : memref<1x8x512xf32, #tpu.memory_space<vmem>>, vector<1x8x512xf32>
    tpu.vector_store %arg11[%c0_90, %c0_91, %c0_92], %141 {strides = array<i32>} : memref<1x8x512xf32, #tpu.memory_space<vmem>>, vector<1x8x512xf32>,
    return
  }
  func.func @transform_0(%arg0: i32) -> (i32, i32, i32) {
    %c0_i32 = arith.constant 0 : i32
    %c0_i32_0 = arith.constant 0 : i32
    %c0_i32_1 = arith.constant 0 : i32
    return %arg0, %c0_i32, %c0_i32_0 : i32, i32, i32
  }
  func.func @transform_1(%arg0: i32) -> (i32, i32, i32) {
    %c0_i32 = arith.constant 0 : i32
    %c0_i32_0 = arith.constant 0 : i32
    %c0_i32_1 = arith.constant 0 : i32
    return %arg0, %c0_i32, %c0_i32_0 : i32, i32, i32
  }
  func.func @transform_2(%arg0: i32) -> (i32, i32, i32) {
    %c0_i32 = arith.constant 0 : i32
    %c0_i32_0 = arith.constant 0 : i32
    %c0_i32_1 = arith.constant 0 : i32
    return %arg0, %c0_i32, %c0_i32_0 : i32, i32, i32
  }
  func.func @transform_3(%arg0: i32) -> (i32, i32, i32) {
    %c0_i32 = arith.constant 0 : i32
    %c0_i32_0 = arith.constant 0 : i32
    %c0_i32_1 = arith.constant 0 : i32
    return %arg0, %c0_i32, %c0_i32_0 : i32, i32, i32
  }
  func.func @transform_4(%arg0: i32) -> (i32, i32, i32) {
    %c0_i32 = arith.constant 0 : i32
    %c0_i32_0 = arith.constant 0 : i32
    %c0_i32_1 = arith.constant 0 : i32
    return %arg0, %c0_i32, %c0_i32_0 : i32, i32, i32
  }
  func.func @transform_5(%arg0: i32) -> (i32, i32, i32) {
    %c0_i32 = arith.constant 0 : i32
    %c0_i32_0 = arith.constant 0 : i32
    %c0_i32_1 = arith.constant 0 : i32
    return %arg0, %c0_i32, %c0_i32_0 : i32, i32, i32
  }
  func.func @transform_6(%arg0: i32) -> (i32, i32) {
    %c0_i32 = arith.constant 0 : i32
    %c0_i32_0 = arith.constant 0 : i32
    %c0_i32_1 = arith.constant 0 : i32
    return %c0_i32, %c0_i32_0 : i32, i32
  }
  func.func @transform_7(%arg0: i32) -> (i32, i32) {
    %c0_i32 = arith.constant 0 : i32
    %c0_i32_0 = arith.constant 0 : i32
    %c0_i32_1 = arith.constant 0 : i32
    return %c0_i32, %c0_i32_0 : i32, i32
  }
  func.func @transform_8(%arg0: i32) -> (i32, i32) {
    %c0_i32 = arith.constant 0 : i32
    %c0_i32_0 = arith.constant 0 : i32
    %c0_i32_1 = arith.constant 0 : i32
    return %c0_i32, %c0_i32_0 : i32, i32
  }
  func.func @transform_9(%arg0: i32) -> (i32, i32) {
    %c0_i32 = arith.constant 0 : i32
    %c0_i32_0 = arith.constant 0 : i32
    %c0_i32_1 = arith.constant 0 : i32
    return %c0_i32, %c0_i32_0 : i32, i32
  }
  func.func @transform_10(%arg0: i32) -> (i32, i32, i32) {
    %c0_i32 = arith.constant 0 : i32
    %c0_i32_0 = arith.constant 0 : i32
    %c0_i32_1 = arith.constant 0 : i32
    return %arg0, %c0_i32, %c0_i32_0 : i32, i32, i32
  }
}

</mosaic_0001>

<bundles_post_ra>
// kernel: tpu_custom_call.1
= control target key start
LH: loop header
LB: loop body
LE: loop exit
PB: predicated region body
PF: predicated region fallthrough
CT: control target
= control target key end

     0   :  { %s7438_s0 = inlined_call_operand.hbm [shape: f32[2,8,512], index: 0, kind: input, shape index: {}]   ;;  %s7439_s1 = inlined_call_operand.hbm [shape: f32[2,8,512], index: 1, kind: input, shape index: {}]   ;;  %s7440_s2 = inlined_call_operand.hbm [shape: f32[2,8,512], index: 2, kind: input, shape index: {}]   ;;  %s7441_s3 = inlined_call_operand.vmem [shape: f32[2,8,1], index: 3, kind: input, shape index: {}]   ;;  %s7442_s4 = inlined_call_operand.vmem [shape: f32[2,8,1], index: 4, kind: input, shape index: {}]   ;;  %s7443_s5 = inlined_call_operand.vmem [shape: s8[2,8,8], index: 5, kind: input, shape index: {}]   ;;  %s7444_s6 = inlined_call_operand.hbm [shape: bf16[512,512], index: 6, kind: input, shape index: {}]   ;;  %s7445_s7 = inlined_call_operand.hbm [shape: bf16[512,512], index: 7, kind: input, shape index: {}]   ;;  %s7446_s8 = inlined_call_operand.hbm [shape: bf16[512,512], index: 8, kind: input, shape index: {}]   ;;  %s7447_s9 = inlined_call_operand.hbm [shape: bf16[512,512], index: 9, kind: input, shape index: {}]   ;;  %s7448_s10 = inlined_call_operand.hbm [shape: f32[2,8,512], index: 10, kind: output, shape index: {}]  }
   0x1   :  { %7474 = sst [smem:[#allocation30_spill]] %s7439_s1 }
   0x2   :  { %7475 = sst [smem:[#allocation31_spill]] %s7441_s3 }
   0x3   :  { %7476 = sst [smem:[#allocation32_spill]] %s7443_s5 }
   0x4   :  { %7477 = sst [smem:[#allocation33_spill]] %s7444_s6 }
   0x5   :  { %7478 = sst [smem:[#allocation34_spill]] %s7446_s8 }
   0x6   :  { %7479 = sst [smem:[#allocation35_spill]] %s7448_s10 }
   0x7   :  { %15 = vsyncpa [#allocation7], 0 }
   0x8   :  { %17 = vsyncpa [#allocation7 + $0x1], 0 }
   0x9   :  { %18 = vsyncpa [#allocation10], 0 }
   0xa   :  { %20 = vsyncpa [#allocation10 + $0x1], 0 }
   0xb   :  { %21 = vsyncpa [#allocation13], 0 }
   0xc   :  { %22 = vsyncpa [#allocation16], 0 }
   0xd   :  { %23 = vsyncpa [#allocation8], 0 }
   0xe   :  { %25 = vsyncpa [#allocation8 + $0x1], 0  ;;  %s6952_s13 = smov 0   ;;  %s6954_s14 = smov 0  }
   0xf   :  { %s6956_s15 = smov 0   ;;  %s6958_s16 = smov 0  }
  0x10 LB: > { %7480 = sst [smem:[#allocation24_spill]] %s6870_s13  ;;  %s6884_s17 = smov [#allocation12]   ;;  %s6882_s16 = sphi %s6958_s16, %s7521_s16   ;;  %s6878_s15 = sphi %s6956_s15, %s7525_s15   ;;  %s6874_s14 = sphi %s6954_s14, %s7524_s14   ;;  %s6870_s13 = sphi %s6952_s13, %s7523_s13  }
  0x11   : > { %7481 = sst [smem:[#allocation25_spill]] %s6882_s16  ;;  %s314_s18 = sshll.u32 %s6884_s17, 4  ;;  %s6978_s18 = int_to_ptr.vmem [resolvable:$true] %s314_s18 }
  0x12   : > { %s6973_s19 = sadd.s32 4294967295, %s6882_s16   ;;  %p5047_p0 = scmp.ge.s32.totalorder %s6882_s16, 1 }
  0x13   : > { %p7461_p1 = scmp.eq.s32.totalorder %s6973_s19, 0  ;;  %p302_p2 = scmp.lt.s32.totalorder %s6882_s16, 3 }
  0x14   : > { %s6885_s21 = smov [#allocation15]   ;;  %s7484_s6 = sld [smem:[#allocation33_spill]] }
  0x15   : > { %p6980_p3 = pnand %p5047_p0, %p302_p2  ;;  %s340_s22 = sshll.u32 %s6885_s21, 4  ;;  %s6993_s22 = int_to_ptr.vmem [resolvable:$true] %s340_s22 }
  0x17   : > { %s7482_s20 = scalar_select %p6980_p3, 1, 0 }
  0x18   : > { %p5735_p5 = pneg %p6980_p3 }
  0x1a   : > { %p6989_p6 = pnand %p5735_p5, %p7461_p1  ;;  %s6602_s26 = scalar_lea.hbm %s7484_s6, 16384 }
  0x1b   : > { %p6603_p7 = scmp.ne.s32.totalorder %s7484_s6, %s6602_s26  ;;  %p6609_p11 = scmp.lt.u32.totalorder %s6602_s26, %s7484_s6 }
  0x1c   : > { %s7483_s23 = scalar_select %p6989_p6, 1, 0 }
  0x1d   : > { %p7003_p8 = pneg %p6989_p6 }
  0x1f   : > { %s7485_s29 = scalar_select %p7003_p8, 1, 0 }
  0x20   : > { %p6605_p9 = pnand %p7003_p8, %p6603_p7 }
  0x22   : > { %p6606_p10 = pneg %p6605_p9 }
  0x24   : > { %p6611_p12 = pnand %p6609_p11, %p6606_p10 }
  0x26   : > { %6614 = shalt.err (!%p6611_p12)
}
  0x27   : > { %s6615_s12 = scalar_lea.vmem %s6978_s18, 16384  ;;  %p6623_p5 = scmp.lt.s32.totalorder %s6978_s18, %s6978_s18 }
  0x28   : > { %p6616_p13 = scmp.ne.s32.totalorder %s6978_s18, %s6615_s12  ;;  %p6624_p4 = scmp.lt.s32.totalorder %s6615_s12, %s6615_s12 }
  0x2a   : > { %p6618_p0 = pnand %p6616_p13, %p7003_p8  ;;  %p6625_p7 = por %p6624_p4, %p6623_p5 }
  0x2c   : > { %p6619_p2 = pneg %p6618_p0 }
  0x2e   : > { %p6626_p9 = pnand %p6625_p7, %p6619_p2 }
  0x30   : > { %6629 = shalt.err (!%p6626_p9)
}
  0x31   : > { %s7451_s17 = smov 256   ;;  %s7453_s21 = smov 16  }
  0x32   : > { %5738 = dma.hbm_to_vmem [thread:$0]  (!%p6989_p6), %s7484_s6, 16384, %s6978_s18, [#allocation13], %s7451_s17, %s7451_s17, %s7453_s21  }
  0x33   : > { %s7486_s8 = sld [smem:[#allocation34_spill]] }
  0x39   : > { %s6630_s28 = scalar_lea.hbm %s7486_s8, 16384 }
  0x3a   : > { %p6631_p4 = scmp.ne.s32.totalorder %s7486_s8, %s6630_s28  ;;  %p6637_p12 = scmp.lt.u32.totalorder %s6630_s28, %s7486_s8 }
  0x3c   : > { %p6633_p10 = pnand %p6631_p4, %p7003_p8 }
  0x3e   : > { %p6634_p11 = pneg %p6633_p10 }
  0x40   : > { %p6639_p13 = pnand %p6637_p12, %p6634_p11 }
  0x42   : > { %6642 = shalt.err (!%p6639_p13)
}
  0x43   : > { %s6643_s18 = scalar_lea.vmem %s6993_s22, 16384  ;;  %p6651_p7 = scmp.lt.s32.totalorder %s6993_s22, %s6993_s22 }
  0x44   : > { %p6644_p0 = scmp.ne.s32.totalorder %s6993_s22, %s6643_s18  ;;  %p6652_p9 = scmp.lt.s32.totalorder %s6643_s18, %s6643_s18 }
  0x46   : > { %p6646_p2 = pnand %p6644_p0, %p7003_p8  ;;  %p6653_p4 = por %p6652_p9, %p6651_p7 }
  0x48   : > { %p6647_p5 = pneg %p6646_p2 }
  0x4a   : > { %p6654_p10 = pnand %p6653_p4, %p6647_p5 }
  0x4c   : > { %6657 = shalt.err (!%p6654_p10)
}
  0x4d   : > { %5744 = dma.hbm_to_vmem [thread:$0]  (!%p6989_p6), %s7486_s8, 16384, %s6993_s22, [#allocation16], %s7451_s17, %s7451_s17, %s7453_s21  }
  0x4e   : > { %s5046_s25 = sadd.s32 4294967294, %s6882_s16   ;;  %s7055_s26 = sadd.s32 1, %s6882_s16  }
  0x4f   : > { %7487 = sst [smem:[#allocation26_spill]] %s7055_s26  ;;  %s35_s27 = ssub.s32 %s6882_s16, %s7055_s26 }
  0x50   : > { %s38_s28 = sadd.s32 1, %s6878_s15  ;;  %p36_p11 = scmp.eq.s32.totalorder %s35_s27, 0 }
  0x51   : > { %p45_p12 = scmp.ne.s32.totalorder %s6878_s15, %s6874_s14  ;;  %p46_p13 = scmp.eq.s32.totalorder %s6882_s16, 0 }
  0x52   : > { %p51_p0 = scmp.ne.s32.totalorder %s6874_s14, %s6870_s13  ;;  %p289_p7 = scmp.eq.s32.totalorder %s6973_s19, 1 }
  0x53   : > { %s7066_s30 = scalar_select %p36_p11, %s6878_s15, %s38_s28  }
  0x54   : > { %p47_p2 = por %p46_p13, %p45_p12  ;;  %p7070_p5 = por %p7461_p1, %p51_p0 }
  0x55   : > { %7488 = sst [smem:[#allocation27_spill]] %s7066_s30  ;;  %p295_p9 = scmp.eq.s32.totalorder %s5046_s25, 1 }
  0x56   : > { %s7489_s11 = scalar_select %p7070_p5, 1, 0 }
  0x57   : > { %p5766_p4 = scmp.lt.s32.totalorder %s6882_s16, 2  ;;  %s7455_s22 = sand.u32 1, %s6878_s15  }
  0x58   : > { %p7077_p10 = por %p289_p7, %p45_p12  ;;  %p7081_p3 = por %p295_p9, %p51_p0 }
  0x59   : > { %s7087_s10 = sshll.u32 %s7455_s22, 5  ;;  %s7090_s24 = sshll.u32 %s6882_s16, 9 }
  0x5a   : > { %s7490_s12 = scalar_select %p7077_p10, 1, 0 }
  0x5b   : > { %s7492_s18 = scalar_select %p7081_p3, 1, 0 }
  0x5c   : > { %7491 = sst [smem:[#allocation28_spill]] %s7490_s12  ;;  %p7092_p11 = pnand %p5766_p4, %p47_p2 }
  0x5d   : > { %7493 = sst [smem:[#allocation29_spill]] %s7492_s18  ;;  %s386_s25 = sand.u32 1, %s6882_s16  }
  0x5e   : > { %s7494_s27 = scalar_select %p7092_p11, 1, 0 }
  0x5f   : > { %s7495_s1 = sld [smem:[#allocation30_spill]]  ;;  %s390_s22 = scalar_lea.vmem [#allocation9], %s7087_s10 }
  0x60   : > { %s398_s6 = sshll.u32 %s390_s22, 4  ;;  %s6888_s8 = smov [#allocation14]   ;;  %s7104_s6 = int_to_ptr.vmem [resolvable:$true] %s398_s6 }
  0x61   : > { %s7106_s30 = sshll.u32 %s6888_s8, 4  ;;  %s7108_s26 = scalar_lea.sflag [#allocation10], %s386_s25  ;;  %s328_s30 = int_to_ptr.vmem [resolvable:$true] %s7106_s30 }
  0x62   : > { %p7114_p13 = pneg %p7092_p11 }
  0x64   : > { %s7496_s17 = scalar_select %p7114_p13, 1, 0 }
  0x65   : > { %s7101_s21 = scalar_lea.hbm %s7495_s1, %s7090_s24  ;;  %s6663_s16 = scalar_lea.hbm %s7495_s1, 1024 }
  0x66   : > { %s6658_s18 = scalar_lea.hbm %s7101_s21, 512  ;;  %p6664_p7 = scmp.lt.u32.totalorder %s7101_s21, %s7495_s1 }
  0x67   : > { %p6659_p12 = scmp.ne.s32.totalorder %s7101_s21, %s6658_s18  ;;  %p6665_p9 = scmp.lt.u32.totalorder %s6663_s16, %s6658_s18 }
  0x68   : > { %p6667_p1 = scmp.lt.u32.totalorder %s6658_s18, %s7101_s21 }
  0x69   : > { %p6661_p0 = pnand %p7114_p13, %p6659_p12  ;;  %p6666_p4 = por %p6665_p9, %p6664_p7 }
  0x6b   : > { %p6662_p2 = pneg %p6661_p0  ;;  %p6668_p3 = por %p6667_p1, %p6666_p4 }
  0x6d   : > { %p6669_p10 = pnand %p6668_p3, %p6662_p2 }
  0x6f   : > { %6672 = shalt.err (!%p6669_p10)
}
  0x70   : > { %s6673_s25 = scalar_lea.vmem %s7104_s6, 512  ;;  %s6889_s28 = smov [#allocation9]  }
  0x71   : > { %p6674_p12 = scmp.ne.s32.totalorder %s7104_s6, %s6673_s25  ;;  %s6678_s22 = sshll.u32 %s6889_s28, 4  ;;  %s6679_s22 = int_to_ptr.vmem [resolvable:$false] %s6678_s22 }
  0x72   : > { %s6680_s13 = scalar_lea.vmem %s6679_s22, 1024  ;;  %p6681_p6 = scmp.lt.s32.totalorder %s7104_s6, %s6679_s22 }
  0x73   : > { %p6676_p0 = pnand %p6674_p12, %p7114_p13  ;;  %p6682_p8 = scmp.lt.s32.totalorder %s6680_s13, %s6673_s25 }
  0x75   : > { %p6677_p5 = pneg %p6676_p0  ;;  %p6683_p7 = por %p6682_p8, %p6681_p6 }
  0x77   : > { %p6684_p9 = pnand %p6683_p7, %p6677_p5 }
  0x79   : > { %6687 = shalt.err (!%p6684_p9)
}
  0x7a   : > { %5754 = dma.hbm_to_vmem [thread:$0]  (!%p7092_p11), %s7101_s21, 512, %s7104_s6, %s7108_s26  }
  0x7b   : > { %s6688_s8 = scalar_lea.hbm %s7445_s7, 16384  ;;  %p7497_p3 = scmp.ne.s32.totalorder %s7485_s29, 0 }
  0x7c   : > { %p6689_p1 = scmp.ne.s32.totalorder %s7445_s7, %s6688_s8  ;;  %p6695_p5 = scmp.lt.u32.totalorder %s6688_s8, %s7445_s7 }
  0x7e   : > { %p6691_p6 = pnand %p6689_p1, %p7497_p3 }
  0x80   : > { %p6692_p8 = pneg %p6691_p6 }
  0x82   : > { %p6697_p10 = pnand %p6695_p5, %p6692_p8 }
  0x84   : > { %6700 = shalt.err (!%p6697_p10)
}
  0x85   : > { %s6701_s13 = scalar_lea.vmem %s328_s30, 16384  ;;  %p6709_p0 = scmp.lt.s32.totalorder %s328_s30, %s328_s30 }
  0x86   : > { %p6702_p2 = scmp.ne.s32.totalorder %s328_s30, %s6701_s13  ;;  %p6710_p7 = scmp.lt.s32.totalorder %s6701_s13, %s6701_s13 }
  0x88   : > { %p6704_p4 = pnand %p6702_p2, %p7497_p3  ;;  %p6711_p9 = por %p6710_p7, %p6709_p0 }
  0x8a   : > { %p6705_p12 = pneg %p6704_p4 }
  0x8c   : > { %p6712_p11 = pnand %p6711_p9, %p6705_p12 }
  0x8e   : > { %6715 = shalt.err (!%p6712_p11)
}
  0x8f   : > { %p7498_p1 = scmp.ne.s32.totalorder %s7483_s23, 0  ;;  %s7499_s1 = smov 16  }
  0x90   : > { %s7500_s6 = smov 256   ;;  %s6890_s18 = smov [#allocation17]  }
  0x91   : > { %5741 = dma.hbm_to_vmem [thread:$0]  (!%p7498_p1), %s7445_s7, 16384, %s328_s30, [#allocation13], %s7500_s6, %s7500_s6, %s7499_s1  }
  0x92   : > { %s353_s8 = sshll.u32 %s6890_s18, 4  ;;  %s6716_s22 = scalar_lea.hbm %s7447_s9, 16384  ;;  %s354_s8 = int_to_ptr.vmem [resolvable:$true] %s353_s8 }
  0x93   : > { %p6717_p11 = scmp.ne.s32.totalorder %s7447_s9, %s6716_s22  ;;  %p6723_p5 = scmp.lt.u32.totalorder %s6716_s22, %s7447_s9 }
  0x95   : > { %p6719_p6 = pnand %p6717_p11, %p7497_p3 }
  0x97   : > { %p6720_p8 = pneg %p6719_p6 }
  0x99   : > { %p6725_p10 = pnand %p6723_p5, %p6720_p8 }
  0x9b   : > { %6728 = shalt.err (!%p6725_p10)
}
  0x9c   : > { %s6729_s30 = scalar_lea.vmem %s354_s8, 16384  ;;  %p6737_p0 = scmp.lt.s32.totalorder %s354_s8, %s354_s8 }
  0x9d   : > { %p6730_p2 = scmp.ne.s32.totalorder %s354_s8, %s6729_s30  ;;  %p6738_p7 = scmp.lt.s32.totalorder %s6729_s30, %s6729_s30 }
  0x9f   : > { %p6732_p4 = pnand %p6730_p2, %p7497_p3  ;;  %p6739_p9 = por %p6738_p7, %p6737_p0 }
  0xa1   : > { %p6733_p12 = pneg %p6732_p4 }
  0xa3   : > { %p6740_p13 = pnand %p6739_p9, %p6733_p12 }
  0xa5   : > { %6743 = shalt.err (!%p6740_p13)
}
  0xa6   : > { %5747 = dma.hbm_to_vmem [thread:$0]  (!%p7498_p1), %s7447_s9, 16384, %s354_s8, [#allocation16], %s7500_s6, %s7500_s6, %s7499_s1  }
  0xa7   : > { %s7185_s21 = scalar_lea.hbm %s7438_s0, %s7090_s24  ;;  %s371_s23 = scalar_lea.vmem [#allocation6], %s7087_s10 }
  0xa8   : > { %s379_s16 = sshll.u32 %s371_s23, 4  ;;  %s7501_s18 = sand.u32 1, %s6878_s15   ;;  %s380_s16 = int_to_ptr.vmem [resolvable:$true] %s379_s16 }
  0xa9   : > { %s368_s28 = scalar_lea.sflag [#allocation7], %s7501_s18  ;;  %s6744_s25 = scalar_lea.hbm %s7185_s21, 512 }
  0xaa   : > { %p6745_p13 = scmp.ne.s32.totalorder %s7185_s21, %s6744_s25  ;;  %p7502_p3 = scmp.ne.s32.totalorder %s7496_s17, 0 }
  0xab   : > { %s6749_s8 = scalar_lea.hbm %s7438_s0, 1024  ;;  %p6750_p1 = scmp.lt.u32.totalorder %s7185_s21, %s7438_s0 }
  0xac   : > { %p6747_p11 = pnand %p6745_p13, %p7502_p3  ;;  %p6751_p8 = scmp.lt.u32.totalorder %s6749_s8, %s6744_s25 }
  0xad   : > { %p6753_p10 = scmp.lt.u32.totalorder %s6744_s25, %s7185_s21 }
  0xae   : > { %p6748_p6 = pneg %p6747_p11  ;;  %p6752_p5 = por %p6751_p8, %p6750_p1 }
  0xb0   : > { %p6754_p2 = por %p6753_p10, %p6752_p5 }
  0xb2   : > { %p6755_p4 = pnand %p6754_p2, %p6748_p6 }
  0xb4   : > { %6758 = shalt.err (!%p6755_p4)
}
  0xb5   : > { %s6759_s30 = scalar_lea.vmem %s380_s16, 512  ;;  %s6891_s3 = smov [#allocation6]  }
  0xb6   : > { %p6760_p12 = scmp.ne.s32.totalorder %s380_s16, %s6759_s30  ;;  %s6764_s5 = sshll.u32 %s6891_s3, 4  ;;  %s6765_s5 = int_to_ptr.vmem [resolvable:$false] %s6764_s5 }
  0xb7   : > { %s6766_s29 = scalar_lea.vmem %s6765_s5, 1024  ;;  %p6767_p9 = scmp.lt.s32.totalorder %s380_s16, %s6765_s5 }
  0xb8   : > { %p6762_p0 = pnand %p6760_p12, %p7502_p3  ;;  %p6768_p13 = scmp.lt.s32.totalorder %s6766_s29, %s6759_s30 }
  0xba   : > { %p6763_p7 = pneg %p6762_p0  ;;  %p6769_p11 = por %p6768_p13, %p6767_p9 }
  0xbc   : > { %p6770_p1 = pnand %p6769_p11, %p6763_p7 }
  0xbe   : > { %6773 = shalt.err (!%p6770_p1)
}
  0xbf   : > { %p7503_p8 = scmp.ne.s32.totalorder %s7494_s27, 0  ;;  %s7211_s18 = scalar_lea.hbm %s7440_s2, %s7090_s24 }
  0xc0   : > { %s409_s25 = scalar_lea.vmem [#allocation11], %s7087_s10  ;;  %s6774_s6 = scalar_lea.hbm %s7211_s18, 512 }
  0xc1   : > { %5751 = dma.hbm_to_vmem [thread:$0]  (!%p7503_p8), %s7185_s21, 512, %s380_s16, %s368_s28  }
  0xc2   : > { %s417_s1 = sshll.u32 %s409_s25, 4  ;;  %p6775_p6 = scmp.ne.s32.totalorder %s7211_s18, %s6774_s6  ;;  %s418_s1 = int_to_ptr.vmem [resolvable:$true] %s417_s1 }
  0xc3   : > { %s6779_s21 = scalar_lea.hbm %s7440_s2, 1024  ;;  %p6780_p2 = scmp.lt.u32.totalorder %s7211_s18, %s7440_s2 }
  0xc4   : > { %p6777_p5 = pnand %p6775_p6, %p7502_p3  ;;  %p6781_p4 = scmp.lt.u32.totalorder %s6779_s21, %s6774_s6 }
  0xc5   : > { %p6783_p0 = scmp.lt.u32.totalorder %s6774_s6, %s7211_s18 }
  0xc6   : > { %p6778_p10 = pneg %p6777_p5  ;;  %p6782_p12 = por %p6781_p4, %p6780_p2 }
  0xc8   : > { %p6784_p7 = por %p6783_p0, %p6782_p12 }
  0xca   : > { %p6785_p9 = pnand %p6784_p7, %p6778_p10 }
  0xcc   : > { %6788 = shalt.err (!%p6785_p9)
}
  0xcd   : > { %s6789_s10 = scalar_lea.vmem %s418_s1, 512  ;;  %s6892_s24 = smov [#allocation11]  }
  0xce   : > { %p6790_p13 = scmp.ne.s32.totalorder %s418_s1, %s6789_s10  ;;  %s6794_s13 = sshll.u32 %s6892_s24, 4  ;;  %s6795_s13 = int_to_ptr.vmem [resolvable:$false] %s6794_s13 }
  0xcf   : > { %s6796_s30 = scalar_lea.vmem %s6795_s13, 1024  ;;  %p6797_p6 = scmp.lt.s32.totalorder %s418_s1, %s6795_s13 }
  0xd0   : > { %p6792_p11 = pnand %p6790_p13, %p7502_p3  ;;  %p6798_p5 = scmp.lt.s32.totalorder %s6796_s30, %s6789_s10 }
  0xd2   : > { %p6793_p1 = pneg %p6792_p11  ;;  %p6799_p8 = por %p6798_p5, %p6797_p6 }
  0xd4   : > { %p6800_p2 = pnand %p6799_p8, %p6793_p1 }
  0xd6   : > { %6803 = shalt.err (!%p6800_p2)
}
  0xd7   : > { %p7504_p4 = scmp.ne.s32.totalorder %s7494_s27, 0  ;;  %p7505_p10 = scmp.ne.s32.totalorder %s7482_s20, 0 }
  0xd8   : > { %s7235_s17 = sand.u32 (!%p7505_p10), 1, %s6874_s14   ;;  %p7506_p3 = scmp.ne.s32.totalorder (!%p7505_p10), %s7489_s11, 0 }
  0xd9   : > { %5757 = dma.hbm_to_vmem [thread:$0]  (!%p7504_p4), %s7211_s18, 512, %s418_s1, %s7108_s26  }
  0xda   : > { %447 = sbr.rel (%p7505_p10) target bundleno = 1783 (0x6f7), region = 60  ;;  %s7238_s3 = sshll.u32 (!%p7505_p10), %s7235_s17, 5 }
  0xdb   : > { %s450_s5 = scalar_lea.sflag (!%p7505_p10), [#allocation7], %s7235_s17  ;;  %s7242_s29 = scalar_lea.vmem (!%p7505_p10), [#allocation6], %s7238_s3 }
  0xe1   : > { %6849 = dma.done.wait (%p7506_p3), %s450_s5, 512  }
  0xe2   : > { %6851 = vsyncadd (%p7506_p3), %s450_s5, 4294966784  ;;  %s458_s20 = sand.u32 1, %s6973_s19   ;;  %s7250_s27 = scalar_lea.vmem [#allocation9], %s7238_s3 }
  0xe3   : > { %s459_s26 = scalar_lea.sflag [#allocation10], %s458_s20 }
  0xe4   : > { %6853 = dma.done.wait (%p7506_p3), %s459_s26, 1024  }
  0xe5   : > { %6855 = vsyncadd (%p7506_p3), %s459_s26, 4294966272  ;;  %s7257_s12 = scalar_lea.vmem [#allocation11], %s7238_s3  ;;  %p7507_p8 = scmp.eq.s32.totalorder %s6973_s19, 0 }
  0xe7   : > { %6857 = dma.done.wait (%p7507_p8), [#allocation13], 32768   ;;  %p7508_p12 = pmov %p7507_p8 }
  0xe8   : > { %p7509_p0 = pmov %p7507_p8 }
  0xe9   : > { %6859 = vsyncadd (%p7508_p12), [#allocation13], 4294934528 }
  0xea   : > { %6861 = dma.done.wait (%p7509_p0), [#allocation16], 32768   ;;  %p7510_p7 = pmov %p7509_p0 }
  0xeb   : > { %v5814_v0 = vld [vmem:[#allocation12 + $0x4] ss:$16 sps:$4 sm:$0xff]   ;;  %v5816_v1 = vld [vmem:[#allocation12 + $0xc] ss:$16 sps:$4 sm:$0xff]   ;;  %v5818_v2 = vld [vmem:[#allocation12] ss:$16 sps:$4 sm:$0xff]  }
  0xec   : > { %6863 = vsyncadd (%p7510_p7), [#allocation16], 4294934528  ;;  %1337 = vmatprep.subr.bf16.mxu0 %v5814_v0  ;;  %v5819_v3 = vld [vmem:[#allocation12 + $0x8] ss:$16 sps:$4 sm:$0xff]   ;;  %1419 = vmatprep.subr.bf16.mxu1 %v5816_v1  ;;  %v5820_v4 = vld [vmem:[#allocation12 + $0x24] ss:$16 sps:$4 sm:$0xff]  }
  0xed   : > { %1338 = vmatpush1.bf16.msra.mxu0 %v5818_v2  ;;  %1420 = vmatpush1.bf16.msra.mxu1 %v5819_v3  ;;  %v5822_v5 = vld [vmem:[#allocation12 + $0x2c] ss:$16 sps:$4 sm:$0xff]   ;;  %v5824_v6 = vld [vmem:[#allocation12 + $0x20] ss:$16 sps:$4 sm:$0xff]   ;;  %v5825_v7 = vld [vmem:[#allocation12 + $0x28] ss:$16 sps:$4 sm:$0xff]  }
  0xee   : > { %1339 = vmatprep.subr.bf16.mxu0 %v5820_v4  ;;  %1421 = vmatprep.subr.bf16.mxu1 %v5822_v5  ;;  %v5826_v8 = vld [vmem:[#allocation12 + $0x44] ss:$16 sps:$4 sm:$0xff]   ;;  %v5828_v9 = vld [vmem:[#allocation12 + $0x4c] ss:$16 sps:$4 sm:$0xff]   ;;  %v5830_v10 = vld [vmem:[#allocation12 + $0x40] ss:$16 sps:$4 sm:$0xff]  }
  0xef   : > { %v5831_v11 = vld [vmem:[#allocation12 + $0x48] ss:$16 sps:$4 sm:$0xff]   ;;  %v5832_v12 = vld [vmem:[#allocation12 + $0x64] ss:$16 sps:$4 sm:$0xff]   ;;  %v5834_v13 = vld [vmem:[#allocation12 + $0x6c] ss:$16 sps:$4 sm:$0xff]  }
  0xf0   : > { %v5836_v14 = vld [vmem:[#allocation12 + $0x60] ss:$16 sps:$4 sm:$0xff]   ;;  %v5837_v15 = vld [vmem:[#allocation12 + $0x68] ss:$16 sps:$4 sm:$0xff]   ;;  %v5838_v16 = vld [vmem:[#allocation12 + $0x84] ss:$16 sps:$4 sm:$0xff]  }
  0xf1   : > { %1340 = vmatpush1.bf16.msra.mxu0 %v5824_v6  ;;  %1422 = vmatpush1.bf16.msra.mxu1 %v5825_v7  ;;  %v5840_v17 = vld [vmem:[#allocation12 + $0x8c] ss:$16 sps:$4 sm:$0xff]   ;;  %v5842_v18 = vld [vmem:[#allocation12 + $0x80] ss:$16 sps:$4 sm:$0xff]   ;;  %v5843_v19 = vld [vmem:[#allocation12 + $0x88] ss:$16 sps:$4 sm:$0xff]  }
  0xf2   : > { %1341 = vmatprep.subr.bf16.mxu0 %v5826_v8  ;;  %1423 = vmatprep.subr.bf16.mxu1 %v5828_v9  ;;  %v5844_v20 = vld [vmem:[#allocation12 + $0xa4] ss:$16 sps:$4 sm:$0xff]   ;;  %v5846_v21 = vld [vmem:[#allocation12 + $0xac] ss:$16 sps:$4 sm:$0xff]   ;;  %v5848_v22 = vld [vmem:[#allocation12 + $0xa0] ss:$16 sps:$4 sm:$0xff]  }
  0xf3   : > { %v5849_v23 = vld [vmem:[#allocation12 + $0xa8] ss:$16 sps:$4 sm:$0xff]   ;;  %v5850_v24 = vld [vmem:[#allocation12 + $0xc4] ss:$16 sps:$4 sm:$0xff]   ;;  %v5852_v25 = vld [vmem:[#allocation12 + $0xcc] ss:$16 sps:$4 sm:$0xff]  }
  0xf4   : > { %v5854_v26 = vld [vmem:[#allocation12 + $0xc0] ss:$16 sps:$4 sm:$0xff]   ;;  %v5855_v27 = vld [vmem:[#allocation12 + $0xc8] ss:$16 sps:$4 sm:$0xff]   ;;  %v5856_v28 = vld [vmem:[#allocation12 + $0xe4] ss:$16 sps:$4 sm:$0xff]  }
  0xf5   : > { %1342 = vmatpush1.bf16.msra.mxu0 %v5830_v10  ;;  %1424 = vmatpush1.bf16.msra.mxu1 %v5831_v11  ;;  %v5858_v29 = vld [vmem:[#allocation12 + $0xec] ss:$16 sps:$4 sm:$0xff]   ;;  %v5860_v30 = vld [vmem:[#allocation12 + $0xe0] ss:$16 sps:$4 sm:$0xff]   ;;  %v5861_v31 = vld [vmem:[#allocation12 + $0xe8] ss:$16 sps:$4 sm:$0xff]  }
  0xf6   : > { %1343 = vmatprep.subr.bf16.mxu0 %v5832_v12  ;;  %1425 = vmatprep.subr.bf16.mxu1 %v5834_v13  ;;  %v5862_v32 = vld [vmem:[#allocation12 + $0x104] ss:$16 sps:$4 sm:$0xff]   ;;  %v5864_v33 = vld [vmem:[#allocation12 + $0x10c] ss:$16 sps:$4 sm:$0xff]   ;;  %v5866_v34 = vld [vmem:[#allocation12 + $0x100] ss:$16 sps:$4 sm:$0xff]  }
  0xf7   : > { %v5867_v35 = vld [vmem:[#allocation12 + $0x108] ss:$16 sps:$4 sm:$0xff]   ;;  %v5868_v36 = vld [vmem:[#allocation12 + $0x124] ss:$16 sps:$4 sm:$0xff]   ;;  %v5870_v37 = vld [vmem:[#allocation12 + $0x12c] ss:$16 sps:$4 sm:$0xff]  }
  0xf8   : > { %v5872_v38 = vld [vmem:[#allocation12 + $0x120] ss:$16 sps:$4 sm:$0xff]   ;;  %v5873_v39 = vld [vmem:[#allocation12 + $0x128] ss:$16 sps:$4 sm:$0xff]   ;;  %v5874_v40 = vld [vmem:[#allocation12 + $0x144] ss:$16 sps:$4 sm:$0xff]  }
  0xf9   : > { %1344 = vmatpush1.bf16.msra.mxu0 %v5836_v14  ;;  %1426 = vmatpush1.bf16.msra.mxu1 %v5837_v15  ;;  %v5876_v41 = vld [vmem:[#allocation12 + $0x14c] ss:$16 sps:$4 sm:$0xff]   ;;  %v5878_v42 = vld [vmem:[#allocation12 + $0x140] ss:$16 sps:$4 sm:$0xff]   ;;  %v5879_v43 = vld [vmem:[#allocation12 + $0x148] ss:$16 sps:$4 sm:$0xff]  }
  0xfa   : > { %1345 = vmatprep.subr.bf16.mxu0 %v5838_v16  ;;  %1427 = vmatprep.subr.bf16.mxu1 %v5840_v17  ;;  %v5880_v44 = vld [vmem:[#allocation12 + $0x164] ss:$16 sps:$4 sm:$0xff]   ;;  %v5882_v45 = vld [vmem:[#allocation12 + $0x16c] ss:$16 sps:$4 sm:$0xff]   ;;  %v5884_v47 = vld [vmem:[#allocation12 + $0x160] ss:$16 sps:$4 sm:$0xff]  }
  0xfb   : > { %v562_v46 = vld [vmem:[%s7242_s29 + $0x8] sm:$0xff]  ;;  %v5886_v50 = vld [vmem:[#allocation12 + $0x184] ss:$16 sps:$4 sm:$0xff]   ;;  %v5890_v52 = vld [vmem:[#allocation12 + $0x180] ss:$16 sps:$4 sm:$0xff]   ;;  %p546_p9 = scmp.lt.s32.totalorder %s6973_s19, 1 }
  0xfc   : > { %v566_v48 = vpack.c.bf16 %v562_v46, %v562_v46  ;;  %v5885_v49 = vld [vmem:[#allocation12 + $0x168] ss:$16 sps:$4 sm:$0xff]   ;;  %v5888_v51 = vld [vmem:[#allocation12 + $0x18c] ss:$16 sps:$4 sm:$0xff]   ;;  %v5892_v54 = vld [vmem:[#allocation12 + $0x1a4] ss:$16 sps:$4 sm:$0xff]  }
  0xfd   : > { %1346 = vmatpush1.bf16.msra.mxu0 %v5842_v18  ;;  %1428 = vmatpush1.bf16.msra.mxu1 %v5843_v19  ;;  %v5891_v53 = vld [vmem:[#allocation12 + $0x188] ss:$16 sps:$4 sm:$0xff]   ;;  %v5894_v55 = vld [vmem:[#allocation12 + $0x1ac] ss:$16 sps:$4 sm:$0xff]   ;;  %v5896_v56 = vld [vmem:[#allocation12 + $0x1a0] ss:$16 sps:$4 sm:$0xff]  }
  0xfe   : > { %1347 = vmatprep.subr.bf16.mxu0 %v5844_v20  ;;  %1429 = vmatprep.subr.bf16.mxu1 %v5846_v21  ;;  %v5897_v57 = vld [vmem:[#allocation12 + $0x1a8] ss:$16 sps:$4 sm:$0xff]   ;;  %v5898_v58 = vld [vmem:[#allocation12 + $0x1c4] ss:$16 sps:$4 sm:$0xff]   ;;  %v5900_v59 = vld [vmem:[#allocation12 + $0x1cc] ss:$16 sps:$4 sm:$0xff]  }
  0xff   : > { %1369 = vmatprep.mubr.bf16.mxu0 %v566_v48  ;;  %1451 = vmatprep.mubr.bf16.mxu1 %v566_v48  ;;  %v5902_v60 = vld [vmem:[#allocation12 + $0x1c0] ss:$16 sps:$4 sm:$0xff]   ;;  %v5903_v61 = vld [vmem:[#allocation12 + $0x1c8] ss:$16 sps:$4 sm:$0xff]   ;;  %v5904_v62 = vld [vmem:[#allocation12 + $0x1e4] ss:$16 sps:$4 sm:$0xff]  }
 0x100   : > { %v5906_v63 = vld [vmem:[#allocation12 + $0x1ec] ss:$16 sps:$4 sm:$0xff]   ;;  %v5908_v0 = vld [vmem:[#allocation12 + $0x1e0] ss:$16 sps:$4 sm:$0xff]   ;;  %v5909_v1 = vld [vmem:[#allocation12 + $0x1e8] ss:$16 sps:$4 sm:$0xff]  }
 0x101   : > { %1348 = vmatpush1.bf16.msra.mxu0 %v5848_v22  ;;  %1430 = vmatpush1.bf16.msra.mxu1 %v5849_v23  ;;  %v561_v2 = vld [vmem:[%s7242_s29] sm:$0xff]  ;;  %v5915_v4 = vld [vmem:[#allocation12 + $0x20c] ss:$16 sps:$4 sm:$0xff]   ;;  %v5913_v7 = vld [vmem:[#allocation12 + $0x208] ss:$16 sps:$4 sm:$0xff]   ;;  %s7274_s11 = scalar_select %p546_p9, %s6973_s19, 1 }
 0x102   : > { %1349 = vmatprep.subr.bf16.mxu0 %v5850_v24  ;;  %1431 = vmatprep.subr.bf16.mxu1 %v5852_v25  ;;  %v5912_v3 = vld [vmem:[#allocation12 + $0x204] ss:$16 sps:$4 sm:$0xff]   ;;  %v565_v5 = vpack.c.bf16 %v561_v2, %v561_v2  ;;  %v5910_v6 = vld [vmem:[#allocation12 + $0x200] ss:$16 sps:$4 sm:$0xff]   ;;  %v5921_v9 = vld [vmem:[#allocation12 + $0x22c] ss:$16 sps:$4 sm:$0xff]  }
 0x103   : > { %v5918_v8 = vld [vmem:[#allocation12 + $0x224] ss:$16 sps:$4 sm:$0xff]   ;;  %v5916_v10 = vld [vmem:[#allocation12 + $0x220] ss:$16 sps:$4 sm:$0xff]   ;;  %v5919_v11 = vld [vmem:[#allocation12 + $0x228] ss:$16 sps:$4 sm:$0xff]  }
 0x104   : > { %v5924_v12 = vld [vmem:[#allocation12 + $0x244] ss:$16 sps:$4 sm:$0xff]   ;;  %v5927_v13 = vld [vmem:[#allocation12 + $0x24c] ss:$16 sps:$4 sm:$0xff]   ;;  %v5922_v14 = vld [vmem:[#allocation12 + $0x240] ss:$16 sps:$4 sm:$0xff]  }
 0x105   : > { %1350 = vmatpush1.bf16.msra.mxu0 %v5854_v26  ;;  %1432 = vmatpush1.bf16.msra.mxu1 %v5855_v27  ;;  %v5925_v15 = vld [vmem:[#allocation12 + $0x248] ss:$16 sps:$4 sm:$0xff]   ;;  %v5930_v16 = vld [vmem:[#allocation12 + $0x264] ss:$16 sps:$4 sm:$0xff]   ;;  %v5933_v17 = vld [vmem:[#allocation12 + $0x26c] ss:$16 sps:$4 sm:$0xff]  }
 0x106   : > { %1351 = vmatprep.subr.bf16.mxu0 %v5856_v28  ;;  %1433 = vmatprep.subr.bf16.mxu1 %v5858_v29  ;;  %v5928_v18 = vld [vmem:[#allocation12 + $0x260] ss:$16 sps:$4 sm:$0xff]   ;;  %v5931_v19 = vld [vmem:[#allocation12 + $0x268] ss:$16 sps:$4 sm:$0xff]   ;;  %v5936_v20 = vld [vmem:[#allocation12 + $0x284] ss:$16 sps:$4 sm:$0xff]  }
 0x107   : > { %v5939_v21 = vld [vmem:[#allocation12 + $0x28c] ss:$16 sps:$4 sm:$0xff]   ;;  %v5934_v22 = vld [vmem:[#allocation12 + $0x280] ss:$16 sps:$4 sm:$0xff]   ;;  %v5937_v23 = vld [vmem:[#allocation12 + $0x288] ss:$16 sps:$4 sm:$0xff]  }
 0x108   : > { %v5942_v24 = vld [vmem:[#allocation12 + $0x2a4] ss:$16 sps:$4 sm:$0xff]   ;;  %v5945_v25 = vld [vmem:[#allocation12 + $0x2ac] ss:$16 sps:$4 sm:$0xff]   ;;  %v6893_v26 = vmov 0   ;;  %s5071_s23 = sshll.u32 %s7274_s11, 3 }
 0x109   : > { %1352 = vmatpush1.bf16.msra.mxu0 %v5860_v30  ;;  %1434 = vmatpush1.bf16.msra.mxu1 %v5861_v31  ;;  %v5940_v27 = vld [vmem:[#allocation12 + $0x2a0] ss:$16 sps:$4 sm:$0xff]   ;;  %v5943_v28 = vld [vmem:[#allocation12 + $0x2a8] ss:$16 sps:$4 sm:$0xff]   ;;  %v5948_v29 = vld [vmem:[#allocation12 + $0x2c4] ss:$16 sps:$4 sm:$0xff]   ;;  %s553_s1 = scalar_lea.vmem %s7442_s4, %s5071_s23 }
 0x10a   : > { %1353 = vmatprep.subr.bf16.mxu0 %v5862_v32  ;;  %1435 = vmatprep.subr.bf16.mxu1 %v5864_v33  ;;  %v5951_v30 = vld [vmem:[#allocation12 + $0x2cc] ss:$16 sps:$4 sm:$0xff]   ;;  %v5946_v32 = vld [vmem:[#allocation12 + $0x2c0] ss:$16 sps:$4 sm:$0xff]   ;;  %v5949_v33 = vld [vmem:[#allocation12 + $0x2c8] ss:$16 sps:$4 sm:$0xff]  }
 0x10b   : > { %5813 = vset.pattern.permute.xlu0 %v6893_v26  ;;  %v564_v31 = vld [vmem:[%s7242_s29 + $0x18] sm:$0xff]  ;;  %s7511_s22 = sld [smem:[#allocation31_spill]]  ;;  %vm6895_vm0 = vmmov 0   ;;  %vm3523_vm1 = vcmask 1043456   ;;  %s5073_s16 = sshll.u32 %s7274_s11, 1  ;;  %vm3505_vm3 = vcmask 64512  }
 0x10c   : > { %v5967_v46 = vld [vmem:[#allocation12 + $0x328] ss:$16 sps:$4 sm:$0xff]   ;;  %v5975_v48 = vld [vmem:[#allocation12 + $0x34c] ss:$16 sps:$4 sm:$0xff]   ;;  %s7512_s24 = sld [smem:[#allocation32_spill]]  ;;  %s5614_s30 = sshll.u32 %s6973_s19, 9 }
 0x10d   : > { %1354 = vmatpush1.bf16.msra.mxu0 %v5866_v34  ;;  %1436 = vmatpush1.bf16.msra.mxu1 %v5867_v35  ;;  %v568_v34 = vpack.c.bf16 %v564_v31, %v564_v31  ;;  %v5954_v35 = vld [vmem:[#allocation12 + $0x2e4] ss:$16 sps:$4 sm:$0xff]   ;;  %v5997_v2 = vld [vmem:[#allocation12 + $0x3c8] ss:$16 sps:$4 sm:$0xff]   ;;  %s545_s5 = scalar_lea.vmem [#allocation18], %s7238_s3  ;;  %s7513_s20 = sld [smem:[#allocation28_spill]] }
 0x10e   : > { %1355 = vmatprep.subr.bf16.mxu0 %v5868_v36  ;;  %1437 = vmatprep.subr.bf16.mxu1 %v5870_v37  ;;  %v5957_v36 = vld [vmem:[#allocation12 + $0x2ec] ss:$16 sps:$4 sm:$0xff]   ;;  %v5952_v37 = vld [vmem:[#allocation12 + $0x2e0] ss:$16 sps:$4 sm:$0xff]   ;;  %v6027_v26 = vld [vmem:[#allocation14 + $0x68] ss:$16 sps:$4 sm:$0xff]  }
 0x10f   : > { %v560_v31 = vld [vmem:[%s553_s1] sm:$0xff]  ;;  %s7514_s3 = sld [smem:[#allocation35_spill]] }
 0x110   : > { %2471 = vperm.xlu0 %5813, %v560_v31   ;;  %v6125_v31 = vld [vmem:[#allocation14 + $0x26c] ss:$16 sps:$4 sm:$0xff]  }
 0x111   : > { %1356 = vmatpush1.bf16.msra.mxu0 %v5872_v38  ;;  %1438 = vmatpush1.bf16.msra.mxu1 %v5873_v39  ;;  %v5955_v38 = vld [vmem:[#allocation12 + $0x2e8] ss:$16 sps:$4 sm:$0xff]   ;;  %v5960_v39 = vld [vmem:[#allocation12 + $0x304] ss:$16 sps:$4 sm:$0xff]   ;;  %s549_s21 = scalar_lea.vmem %s7511_s22, %s5071_s23  ;;  %s6896_s23 = smov [#allocation18]  }
 0x112   : > { %1357 = vmatprep.subr.bf16.mxu0 %v5874_v40  ;;  %1439 = vmatprep.subr.bf16.mxu1 %v5876_v41  ;;  %v5963_v40 = vld [vmem:[#allocation12 + $0x30c] ss:$16 sps:$4 sm:$0xff]   ;;  %v5958_v41 = vld [vmem:[#allocation12 + $0x300] ss:$16 sps:$4 sm:$0xff]   ;;  %s557_s13 = scalar_lea.vmem %s7512_s24, %s5073_s16  ;;  %s6808_s18 = sshll.u32 %s6896_s23, 4  ;;  %s6809_s18 = int_to_ptr.vmem [resolvable:$false] %s6808_s18 }
 0x113   : > { %p7515_p11 = scmp.ne.s32.totalorder %s7513_s20, 0  ;;  %s6810_s25 = scalar_lea.vmem %s6809_s18, 1024 }
 0x115   : > { %1358 = vmatpush1.bf16.msra.mxu0 %v5878_v42  ;;  %1440 = vmatpush1.bf16.msra.mxu1 %v5879_v43  ;;  %v5961_v42 = vld [vmem:[#allocation12 + $0x308] ss:$16 sps:$4 sm:$0xff]   ;;  %v5966_v43 = vld [vmem:[#allocation12 + $0x324] ss:$16 sps:$4 sm:$0xff]  }
 0x116   : > { %1359 = vmatprep.subr.bf16.mxu0 %v5880_v44  ;;  %1441 = vmatprep.subr.bf16.mxu1 %v5882_v45  ;;  %v5969_v44 = vld [vmem:[#allocation12 + $0x32c] ss:$16 sps:$4 sm:$0xff]   ;;  %v5964_v45 = vld [vmem:[#allocation12 + $0x320] ss:$16 sps:$4 sm:$0xff]  }
 0x119   : > { %1360 = vmatpush1.bf16.msra.mxu0 %v5884_v47  ;;  %1442 = vmatpush1.bf16.msra.mxu1 %v5885_v49  ;;  %v5972_v47 = vld [vmem:[#allocation12 + $0x344] ss:$16 sps:$4 sm:$0xff]   ;;  %v5970_v49 = vld [vmem:[#allocation12 + $0x340] ss:$16 sps:$4 sm:$0xff]  }
 0x11a   : > { %1361 = vmatprep.subr.bf16.mxu0 %v5886_v50  ;;  %1443 = vmatprep.subr.bf16.mxu1 %v5888_v51  ;;  %v5973_v50 = vld [vmem:[#allocation12 + $0x348] ss:$16 sps:$4 sm:$0xff]   ;;  %v5978_v51 = vld [vmem:[#allocation12 + $0x364] ss:$16 sps:$4 sm:$0xff]  }
 0x11d   : > { %1362 = vmatpush1.bf16.msra.mxu0 %v5890_v52  ;;  %1444 = vmatpush1.bf16.msra.mxu1 %v5891_v53  ;;  %v5981_v52 = vld [vmem:[#allocation12 + $0x36c] ss:$16 sps:$4 sm:$0xff]   ;;  %v5976_v53 = vld [vmem:[#allocation12 + $0x360] ss:$16 sps:$4 sm:$0xff]  }
 0x11e   : > { %1363 = vmatprep.subr.bf16.mxu0 %v5892_v54  ;;  %1445 = vmatprep.subr.bf16.mxu1 %v5894_v55  ;;  %v5979_v54 = vld [vmem:[#allocation12 + $0x368] ss:$16 sps:$4 sm:$0xff]   ;;  %v5984_v55 = vld [vmem:[#allocation12 + $0x384] ss:$16 sps:$4 sm:$0xff]  }
 0x121   : > { %1364 = vmatpush1.bf16.msra.mxu0 %v5896_v56  ;;  %1446 = vmatpush1.bf16.msra.mxu1 %v5897_v57  ;;  %v5987_v56 = vld [vmem:[#allocation12 + $0x38c] ss:$16 sps:$4 sm:$0xff]   ;;  %v5982_v57 = vld [vmem:[#allocation12 + $0x380] ss:$16 sps:$4 sm:$0xff]  }
 0x122   : > { %1365 = vmatprep.subr.bf16.mxu0 %v5898_v58  ;;  %1447 = vmatprep.subr.bf16.mxu1 %v5900_v59  ;;  %v5985_v58 = vld [vmem:[#allocation12 + $0x388] ss:$16 sps:$4 sm:$0xff]   ;;  %v5990_v59 = vld [vmem:[#allocation12 + $0x3a4] ss:$16 sps:$4 sm:$0xff]  }
 0x125   : > { %1366 = vmatpush1.bf16.msra.mxu0 %v5902_v60  ;;  %1448 = vmatpush1.bf16.msra.mxu1 %v5903_v61  ;;  %v5993_v60 = vld [vmem:[#allocation12 + $0x3ac] ss:$16 sps:$4 sm:$0xff]   ;;  %v5988_v61 = vld [vmem:[#allocation12 + $0x3a0] ss:$16 sps:$4 sm:$0xff]  }
 0x126   : > { %1367 = vmatprep.subr.bf16.mxu0 %v5904_v62  ;;  %1449 = vmatprep.subr.bf16.mxu1 %v5906_v63  ;;  %v5991_v62 = vld [vmem:[#allocation12 + $0x3a8] ss:$16 sps:$4 sm:$0xff]   ;;  %v5996_v63 = vld [vmem:[#allocation12 + $0x3c4] ss:$16 sps:$4 sm:$0xff]  }
 0x129   : > { %1368 = vmatpush1.bf16.msra.mxu0 %v5908_v0  ;;  %1450 = vmatpush1.bf16.msra.mxu1 %v5909_v1  ;;  %v5999_v0 = vld [vmem:[#allocation12 + $0x3cc] ss:$16 sps:$4 sm:$0xff]   ;;  %v5994_v1 = vld [vmem:[#allocation12 + $0x3c0] ss:$16 sps:$4 sm:$0xff]  }
 0x12a   : > { %1378 = vmatprep.subr.bf16.mxu0 %v5912_v3  ;;  %1460 = vmatprep.subr.bf16.mxu1 %v5915_v4  ;;  %v6002_v3 = vld [vmem:[#allocation12 + $0x3e4] ss:$16 sps:$4 sm:$0xff]   ;;  %v6005_v4 = vld [vmem:[#allocation12 + $0x3ec] ss:$16 sps:$4 sm:$0xff]  }
 0x12c   : > { %1370 = vmatmul.mubr.bf16.vlgmr.msra.gmra.mrb[0].mxu0 %v565_v5  ;;  %1452 = vmatmul.mubr.bf16.vlgmr.msra.gmra.mrb[0].mxu1 %v565_v5  ;;  %v6000_v5 = vld [vmem:[#allocation12 + $0x3e0] ss:$16 sps:$4 sm:$0xff]  }
 0x12d   : > { %1379 = vmatpush1.bf16.msra.mxu0 %v5910_v6  ;;  %1461 = vmatpush1.bf16.msra.mxu1 %v5913_v7  ;;  %v6003_v6 = vld [vmem:[#allocation12 + $0x3e8] ss:$16 sps:$4 sm:$0xff]   ;;  %v563_v7 = vld [vmem:[%s7242_s29 + $0x10] sm:$0xff]  ;;  %s4859_s29 = sshll.u32 %s545_s5, 4  ;;  %s7396_s29 = int_to_ptr.vmem [resolvable:$true] %s4859_s29 }
 0x12e   : > { %1380 = vmatprep.subr.bf16.mxu0 %v5918_v8  ;;  %1462 = vmatprep.subr.bf16.mxu1 %v5921_v9  ;;  %v6008_v8 = vld [vmem:[#allocation14 + $0x4] ss:$16 sps:$4 sm:$0xff]   ;;  %v6011_v9 = vld [vmem:[#allocation14 + $0xc] ss:$16 sps:$4 sm:$0xff]   ;;  %s6804_s11 = scalar_lea.vmem %s7396_s29, 512  ;;  %p6811_p5 = scmp.lt.s32.totalorder %s7396_s29, %s6809_s18 }
 0x12f   : > { %1410 = vmatprep.mubr.bf16.mxu0 %v568_v34  ;;  %1492 = vmatprep.mubr.bf16.mxu1 %v568_v34  ;;  %v559_v34 = vld [vmem:[%s549_s21] sm:$0xff]  ;;  %p6805_p13 = scmp.ne.s32.totalorder %s7396_s29, %s6804_s11  ;;  %p6812_p2 = scmp.lt.s32.totalorder %s6810_s25, %s6804_s11 }
 0x131   : > { %1381 = vmatpush1.bf16.msra.mxu0 %v5916_v10  ;;  %1463 = vmatpush1.bf16.msra.mxu1 %v5919_v11  ;;  %v567_v10 = vpack.c.bf16 %v563_v7, %v563_v7  ;;  %v6006_v11 = vld [vmem:[#allocation14] ss:$16 sps:$4 sm:$0xff]   ;;  %v6095_v7 = vld [vmem:[#allocation14 + $0x1cc] ss:$16 sps:$4 sm:$0xff]   ;;  %p6806_p1 = pnand %p6805_p13, %p7515_p11  ;;  %p6813_p4 = por %p6812_p2, %p6811_p5 }
 0x132   : > { %1382 = vmatprep.subr.bf16.mxu0 %v5924_v12  ;;  %1464 = vmatprep.subr.bf16.mxu1 %v5927_v13  ;;  %v6009_v12 = vld [vmem:[#allocation14 + $0x8] ss:$16 sps:$4 sm:$0xff]   ;;  %v6014_v13 = vld [vmem:[#allocation14 + $0x24] ss:$16 sps:$4 sm:$0xff]  }
 0x133   : > { %p6807_p6 = pneg %p6806_p1 }
 0x135   : > { %1383 = vmatpush1.bf16.msra.mxu0 %v5922_v14  ;;  %1465 = vmatpush1.bf16.msra.mxu1 %v5925_v15  ;;  %v6017_v14 = vld [vmem:[#allocation14 + $0x2c] ss:$16 sps:$4 sm:$0xff]   ;;  %p6814_p10 = pnand %p6813_p4, %p6807_p6 }
 0x136   : > { %1384 = vmatprep.subr.bf16.mxu0 %v5930_v16  ;;  %1466 = vmatprep.subr.bf16.mxu1 %v5933_v17  ;;  %v1530_v15 = vld [vmem:[%s7250_s27 + $0x8] sm:$0xff]  ;;  %v6012_v17 = vld [vmem:[#allocation14 + $0x20] ss:$16 sps:$4 sm:$0xff]  }
 0x137   : > { %v1534_v16 = vpack.c.bf16 %v1530_v15, %v1530_v15  ;;  %v1529_v15 = vld [vmem:[%s7250_s27] sm:$0xff] }
 0x139   : > { %1385 = vmatpush1.bf16.msra.mxu0 %v5928_v18  ;;  %1467 = vmatpush1.bf16.msra.mxu1 %v5931_v19  ;;  %v6015_v18 = vld [vmem:[#allocation14 + $0x28] ss:$16 sps:$4 sm:$0xff]   ;;  %v6020_v19 = vld [vmem:[#allocation14 + $0x44] ss:$16 sps:$4 sm:$0xff]  }
 0x13a   : > { %1386 = vmatprep.subr.bf16.mxu0 %v5936_v20  ;;  %1468 = vmatprep.subr.bf16.mxu1 %v5939_v21  ;;  %v6023_v20 = vld [vmem:[#allocation14 + $0x4c] ss:$16 sps:$4 sm:$0xff]   ;;  %v6018_v21 = vld [vmem:[#allocation14 + $0x40] ss:$16 sps:$4 sm:$0xff]  }
 0x13d   : > { %1387 = vmatpush1.bf16.msra.mxu0 %v5934_v22  ;;  %1469 = vmatpush1.bf16.msra.mxu1 %v5937_v23  ;;  %v6021_v22 = vld [vmem:[#allocation14 + $0x48] ss:$16 sps:$4 sm:$0xff]   ;;  %v6026_v23 = vld [vmem:[#allocation14 + $0x64] ss:$16 sps:$4 sm:$0xff]  }
 0x13e   : > { %1388 = vmatprep.subr.bf16.mxu0 %v5942_v24  ;;  %1470 = vmatprep.subr.bf16.mxu1 %v5945_v25  ;;  %v6029_v24 = vld [vmem:[#allocation14 + $0x6c] ss:$16 sps:$4 sm:$0xff]   ;;  %v6024_v25 = vld [vmem:[#allocation14 + $0x60] ss:$16 sps:$4 sm:$0xff]  }
 0x141   : > { %1389 = vmatpush1.bf16.msra.mxu0 %v5940_v27  ;;  %1471 = vmatpush1.bf16.msra.mxu1 %v5943_v28  ;;  %v6032_v27 = vld [vmem:[#allocation14 + $0x84] ss:$16 sps:$4 sm:$0xff]   ;;  %v6035_v28 = vld [vmem:[#allocation14 + $0x8c] ss:$16 sps:$4 sm:$0xff]  }
 0x142   : > { %1390 = vmatprep.subr.bf16.mxu0 %v5948_v29  ;;  %1472 = vmatprep.subr.bf16.mxu1 %v5951_v30  ;;  %v6030_v29 = vld [vmem:[#allocation14 + $0x80] ss:$16 sps:$4 sm:$0xff]   ;;  %v6033_v30 = vld [vmem:[#allocation14 + $0x88] ss:$16 sps:$4 sm:$0xff]  }
 0x145   : > { %1391 = vmatpush1.bf16.msra.mxu0 %v5946_v32  ;;  %1473 = vmatpush1.bf16.msra.mxu1 %v5949_v33  ;;  %v6038_v32 = vld [vmem:[#allocation14 + $0xa4] ss:$16 sps:$4 sm:$0xff]   ;;  %v6041_v33 = vld [vmem:[#allocation14 + $0xac] ss:$16 sps:$4 sm:$0xff]  }
 0x146   : > { %1392 = vmatprep.subr.bf16.mxu0 %v5954_v35  ;;  %1474 = vmatprep.subr.bf16.mxu1 %v5957_v36  ;;  %v6036_v35 = vld [vmem:[#allocation14 + $0xa0] ss:$16 sps:$4 sm:$0xff]   ;;  %v1501_v36 = vmul.f32 0.088388346, %v559_v34  ;;  %v6128_v34 = vld [vmem:[#allocation14 + $0x284] ss:$16 sps:$4 sm:$0xff]  }
 0x148   : > { %1504 = vperm.xlu0 %5813, %v1501_v36   ;;  %v6126_v36 = vld [vmem:[#allocation14 + $0x280] ss:$16 sps:$4 sm:$0xff]  }
 0x149   : > { %1393 = vmatpush1.bf16.msra.mxu0 %v5952_v37  ;;  %1475 = vmatpush1.bf16.msra.mxu1 %v5955_v38  ;;  %v6039_v37 = vld [vmem:[#allocation14 + $0xa8] ss:$16 sps:$4 sm:$0xff]   ;;  %v6044_v38 = vld [vmem:[#allocation14 + $0xc4] ss:$16 sps:$4 sm:$0xff]  }
 0x14a   : > { %1394 = vmatprep.subr.bf16.mxu0 %v5960_v39  ;;  %1476 = vmatprep.subr.bf16.mxu1 %v5963_v40  ;;  %v6047_v39 = vld [vmem:[#allocation14 + $0xcc] ss:$16 sps:$4 sm:$0xff]   ;;  %v6042_v40 = vld [vmem:[#allocation14 + $0xc0] ss:$16 sps:$4 sm:$0xff]  }
 0x14d   : > { %1395 = vmatpush1.bf16.msra.mxu0 %v5958_v41  ;;  %1477 = vmatpush1.bf16.msra.mxu1 %v5961_v42  ;;  %v6045_v41 = vld [vmem:[#allocation14 + $0xc8] ss:$16 sps:$4 sm:$0xff]   ;;  %v6050_v42 = vld [vmem:[#allocation14 + $0xe4] ss:$16 sps:$4 sm:$0xff]  }
 0x14e   : > { %1396 = vmatprep.subr.bf16.mxu0 %v5966_v43  ;;  %1478 = vmatprep.subr.bf16.mxu1 %v5969_v44  ;;  %v6053_v43 = vld [vmem:[#allocation14 + $0xec] ss:$16 sps:$4 sm:$0xff]   ;;  %v6048_v44 = vld [vmem:[#allocation14 + $0xe0] ss:$16 sps:$4 sm:$0xff]  }
 0x151   : > { %1397 = vmatpush1.bf16.msra.mxu0 %v5964_v45  ;;  %1479 = vmatpush1.bf16.msra.mxu1 %v5967_v46  ;;  %v6051_v45 = vld [vmem:[#allocation14 + $0xe8] ss:$16 sps:$4 sm:$0xff]   ;;  %v6056_v46 = vld [vmem:[#allocation14 + $0x104] ss:$16 sps:$4 sm:$0xff]  }
 0x152   : > { %1398 = vmatprep.subr.bf16.mxu0 %v5972_v47  ;;  %1480 = vmatprep.subr.bf16.mxu1 %v5975_v48  ;;  %v6059_v47 = vld [vmem:[#allocation14 + $0x10c] ss:$16 sps:$4 sm:$0xff]   ;;  %v6054_v48 = vld [vmem:[#allocation14 + $0x100] ss:$16 sps:$4 sm:$0xff]  }
 0x155   : > { %1399 = vmatpush1.bf16.msra.mxu0 %v5970_v49  ;;  %1481 = vmatpush1.bf16.msra.mxu1 %v5973_v50  ;;  %v6057_v49 = vld [vmem:[#allocation14 + $0x108] ss:$16 sps:$4 sm:$0xff]   ;;  %v6062_v50 = vld [vmem:[#allocation14 + $0x124] ss:$16 sps:$4 sm:$0xff]  }
 0x156   : > { %1400 = vmatprep.subr.bf16.mxu0 %v5978_v51  ;;  %1482 = vmatprep.subr.bf16.mxu1 %v5981_v52  ;;  %v6065_v51 = vld [vmem:[#allocation14 + $0x12c] ss:$16 sps:$4 sm:$0xff]   ;;  %v6060_v52 = vld [vmem:[#allocation14 + $0x120] ss:$16 sps:$4 sm:$0xff]  }
 0x159   : > { %1401 = vmatpush1.bf16.msra.mxu0 %v5976_v53  ;;  %1483 = vmatpush1.bf16.msra.mxu1 %v5979_v54  ;;  %v6063_v53 = vld [vmem:[#allocation14 + $0x128] ss:$16 sps:$4 sm:$0xff]   ;;  %v6068_v54 = vld [vmem:[#allocation14 + $0x144] ss:$16 sps:$4 sm:$0xff]  }
 0x15a   : > { %1402 = vmatprep.subr.bf16.mxu0 %v5984_v55  ;;  %1484 = vmatprep.subr.bf16.mxu1 %v5987_v56  ;;  %v6071_v55 = vld [vmem:[#allocation14 + $0x14c] ss:$16 sps:$4 sm:$0xff]   ;;  %v6066_v56 = vld [vmem:[#allocation14 + $0x140] ss:$16 sps:$4 sm:$0xff]  }
 0x15d   : > { %1403 = vmatpush1.bf16.msra.mxu0 %v5982_v57  ;;  %1485 = vmatpush1.bf16.msra.mxu1 %v5985_v58  ;;  %v6069_v57 = vld [vmem:[#allocation14 + $0x148] ss:$16 sps:$4 sm:$0xff]   ;;  %v6074_v58 = vld [vmem:[#allocation14 + $0x164] ss:$16 sps:$4 sm:$0xff]  }
 0x15e   : > { %1404 = vmatprep.subr.bf16.mxu0 %v5990_v59  ;;  %1486 = vmatprep.subr.bf16.mxu1 %v5993_v60  ;;  %v6077_v59 = vld [vmem:[#allocation14 + $0x16c] ss:$16 sps:$4 sm:$0xff]   ;;  %v6072_v60 = vld [vmem:[#allocation14 + $0x160] ss:$16 sps:$4 sm:$0xff]  }
 0x161   : > { %1405 = vmatpush1.bf16.msra.mxu0 %v5988_v61  ;;  %1487 = vmatpush1.bf16.msra.mxu1 %v5991_v62  ;;  %v6075_v61 = vld [vmem:[#allocation14 + $0x168] ss:$16 sps:$4 sm:$0xff]   ;;  %v6080_v62 = vld [vmem:[#allocation14 + $0x184] ss:$16 sps:$4 sm:$0xff]  }
 0x162   : > { %1406 = vmatprep.subr.bf16.mxu0 %v5996_v63  ;;  %1488 = vmatprep.subr.bf16.mxu1 %v5999_v0  ;;  %v6083_v63 = vld [vmem:[#allocation14 + $0x18c] ss:$16 sps:$4 sm:$0xff]   ;;  %v6078_v0 = vld [vmem:[#allocation14 + $0x180] ss:$16 sps:$4 sm:$0xff]  }
 0x165   : > { %1407 = vmatpush1.bf16.msra.mxu0 %v5994_v1  ;;  %1489 = vmatpush1.bf16.msra.mxu1 %v5997_v2  ;;  %v6081_v1 = vld [vmem:[#allocation14 + $0x188] ss:$16 sps:$4 sm:$0xff]   ;;  %v6086_v2 = vld [vmem:[#allocation14 + $0x1a4] ss:$16 sps:$4 sm:$0xff]  }
 0x166   : > { %1408 = vmatprep.subr.bf16.mxu0 %v6002_v3  ;;  %1490 = vmatprep.subr.bf16.mxu1 %v6005_v4  ;;  %v6089_v3 = vld [vmem:[#allocation14 + $0x1ac] ss:$16 sps:$4 sm:$0xff]   ;;  %v6084_v4 = vld [vmem:[#allocation14 + $0x1a0] ss:$16 sps:$4 sm:$0xff]  }
 0x169   : > { %1409 = vmatpush1.bf16.msra.mxu0 %v6000_v5  ;;  %1491 = vmatpush1.bf16.msra.mxu1 %v6003_v6  ;;  %v6087_v5 = vld [vmem:[#allocation14 + $0x1a8] ss:$16 sps:$4 sm:$0xff]   ;;  %v6092_v6 = vld [vmem:[#allocation14 + $0x1c4] ss:$16 sps:$4 sm:$0xff]  }
 0x16a   : > { %2305 = vmatprep.subr.bf16.mxu0 %v6008_v8  ;;  %2387 = vmatprep.subr.bf16.mxu1 %v6011_v9  ;;  %v6090_v8 = vld [vmem:[#allocation14 + $0x1c0] ss:$16 sps:$4 sm:$0xff]   ;;  %v6093_v9 = vld [vmem:[#allocation14 + $0x1c8] ss:$16 sps:$4 sm:$0xff]  }
 0x16c   : > { %1411 = vmatmul.mubr.bf16.vlgmr.msra.gmra.mrb[0].mxu0 %v567_v10  ;;  %1493 = vmatmul.mubr.bf16.vlgmr.msra.gmra.mrb[0].mxu1 %v567_v10  ;;  %v6098_v10 = vld [vmem:[#allocation14 + $0x1e4] ss:$16 sps:$4 sm:$0xff]  }
 0x16d   : > { %2306 = vmatpush1.bf16.msra.mxu0 %v6006_v11  ;;  %2388 = vmatpush1.bf16.msra.mxu1 %v6009_v12  ;;  %v6101_v11 = vld [vmem:[#allocation14 + $0x1ec] ss:$16 sps:$4 sm:$0xff]   ;;  %v6096_v12 = vld [vmem:[#allocation14 + $0x1e0] ss:$16 sps:$4 sm:$0xff]  }
 0x16e   : > { %2307 = vmatprep.subr.bf16.mxu0 %v6014_v13  ;;  %2389 = vmatprep.subr.bf16.mxu1 %v6017_v14  ;;  %v6099_v13 = vld [vmem:[#allocation14 + $0x1e8] ss:$16 sps:$4 sm:$0xff]   ;;  %v6104_v14 = vld [vmem:[#allocation14 + $0x204] ss:$16 sps:$4 sm:$0xff]  }
 0x16f   : > { %2337 = vmatprep.mubr.bf16.mxu0 %v1534_v16  ;;  %2419 = vmatprep.mubr.bf16.mxu1 %v1534_v16  ;;  %v6107_v16 = vld [vmem:[#allocation14 + $0x20c] ss:$16 sps:$4 sm:$0xff]  }
 0x171   : > { %2308 = vmatpush1.bf16.msra.mxu0 %v6012_v17  ;;  %2390 = vmatpush1.bf16.msra.mxu1 %v6015_v18  ;;  %v6102_v17 = vld [vmem:[#allocation14 + $0x200] ss:$16 sps:$4 sm:$0xff]   ;;  %v1533_v18 = vpack.c.bf16 %v1529_v15, %v1529_v15  ;;  %v6197_v15 = vld [vmem:[#allocation14 + $0x3ec] ss:$16 sps:$4 sm:$0xff]  }
 0x172   : > { %2309 = vmatprep.subr.bf16.mxu0 %v6020_v19  ;;  %2391 = vmatprep.subr.bf16.mxu1 %v6023_v20  ;;  %v1532_v19 = vld [vmem:[%s7250_s27 + $0x18] sm:$0xff] }
 0x173   : > { %v6105_v20 = vld [vmem:[#allocation14 + $0x208] ss:$16 sps:$4 sm:$0xff]  }
 0x175   : > { %2310 = vmatpush1.bf16.msra.mxu0 %v6018_v21  ;;  %2392 = vmatpush1.bf16.msra.mxu1 %v6021_v22  ;;  %v6110_v21 = vld [vmem:[#allocation14 + $0x224] ss:$16 sps:$4 sm:$0xff]   ;;  %v6113_v22 = vld [vmem:[#allocation14 + $0x22c] ss:$16 sps:$4 sm:$0xff]  }
 0x176   : > { %2311 = vmatprep.subr.bf16.mxu0 %v6026_v23  ;;  %2393 = vmatprep.subr.bf16.mxu1 %v6029_v24  ;;  %v1536_v23 = vpack.c.bf16 %v1532_v19, %v1532_v19  ;;  %v6108_v24 = vld [vmem:[#allocation14 + $0x220] ss:$16 sps:$4 sm:$0xff]   ;;  %v6200_v19 = vld [vmem:[#allocation15 + $0x4] ss:$16 sps:$4 sm:$0xff]  }
 0x179   : > { %2312 = vmatpush1.bf16.msra.mxu0 %v6024_v25  ;;  %2394 = vmatpush1.bf16.msra.mxu1 %v6027_v26  ;;  %v6111_v25 = vld [vmem:[#allocation14 + $0x228] ss:$16 sps:$4 sm:$0xff]   ;;  %v6116_v26 = vld [vmem:[#allocation14 + $0x244] ss:$16 sps:$4 sm:$0xff]  }
 0x17a   : > { %2313 = vmatprep.subr.bf16.mxu0 %v6032_v27  ;;  %2395 = vmatprep.subr.bf16.mxu1 %v6035_v28  ;;  %v6119_v27 = vld [vmem:[#allocation14 + $0x24c] ss:$16 sps:$4 sm:$0xff]   ;;  %v6114_v28 = vld [vmem:[#allocation14 + $0x240] ss:$16 sps:$4 sm:$0xff]  }
 0x17d   : > { %2314 = vmatpush1.bf16.msra.mxu0 %v6030_v29  ;;  %2396 = vmatpush1.bf16.msra.mxu1 %v6033_v30  ;;  %v6117_v29 = vld [vmem:[#allocation14 + $0x248] ss:$16 sps:$4 sm:$0xff]   ;;  %v6122_v30 = vld [vmem:[#allocation14 + $0x264] ss:$16 sps:$4 sm:$0xff]  }
 0x17e   : > { %2315 = vmatprep.subr.bf16.mxu0 %v6038_v32  ;;  %2397 = vmatprep.subr.bf16.mxu1 %v6041_v33  ;;  %v6120_v32 = vld [vmem:[#allocation14 + $0x260] ss:$16 sps:$4 sm:$0xff]   ;;  %v6123_v33 = vld [vmem:[#allocation14 + $0x268] ss:$16 sps:$4 sm:$0xff]  }
 0x181   : > { %2316 = vmatpush1.bf16.msra.mxu0 %v6036_v35  ;;  %2398 = vmatpush1.bf16.msra.mxu1 %v6039_v37  ;;  %v6131_v35 = vld [vmem:[#allocation14 + $0x28c] ss:$16 sps:$4 sm:$0xff]   ;;  %v6129_v37 = vld [vmem:[#allocation14 + $0x288] ss:$16 sps:$4 sm:$0xff]  }
 0x182   : > { %2317 = vmatprep.subr.bf16.mxu0 %v6044_v38  ;;  %2399 = vmatprep.subr.bf16.mxu1 %v6047_v39  ;;  %v6134_v38 = vld [vmem:[#allocation14 + $0x2a4] ss:$16 sps:$4 sm:$0xff]   ;;  %v6137_v39 = vld [vmem:[#allocation14 + $0x2ac] ss:$16 sps:$4 sm:$0xff]  }
 0x185   : > { %2318 = vmatpush1.bf16.msra.mxu0 %v6042_v40  ;;  %2400 = vmatpush1.bf16.msra.mxu1 %v6045_v41  ;;  %v6132_v40 = vld [vmem:[#allocation14 + $0x2a0] ss:$16 sps:$4 sm:$0xff]   ;;  %v6135_v41 = vld [vmem:[#allocation14 + $0x2a8] ss:$16 sps:$4 sm:$0xff]  }
 0x186   : > { %2319 = vmatprep.subr.bf16.mxu0 %v6050_v42  ;;  %2401 = vmatprep.subr.bf16.mxu1 %v6053_v43  ;;  %v6140_v42 = vld [vmem:[#allocation14 + $0x2c4] ss:$16 sps:$4 sm:$0xff]   ;;  %v6143_v43 = vld [vmem:[#allocation14 + $0x2cc] ss:$16 sps:$4 sm:$0xff]  }
 0x189   : > { %2320 = vmatpush1.bf16.msra.mxu0 %v6048_v44  ;;  %2402 = vmatpush1.bf16.msra.mxu1 %v6051_v45  ;;  %v6138_v44 = vld [vmem:[#allocation14 + $0x2c0] ss:$16 sps:$4 sm:$0xff]   ;;  %v6141_v45 = vld [vmem:[#allocation14 + $0x2c8] ss:$16 sps:$4 sm:$0xff]  }
 0x18a   : > { %2321 = vmatprep.subr.bf16.mxu0 %v6056_v46  ;;  %2403 = vmatprep.subr.bf16.mxu1 %v6059_v47  ;;  %v6146_v46 = vld [vmem:[#allocation14 + $0x2e4] ss:$16 sps:$4 sm:$0xff]   ;;  %v6149_v47 = vld [vmem:[#allocation14 + $0x2ec] ss:$16 sps:$4 sm:$0xff]  }
 0x18d   : > { %2322 = vmatpush1.bf16.msra.mxu0 %v6054_v48  ;;  %2404 = vmatpush1.bf16.msra.mxu1 %v6057_v49  ;;  %v6144_v48 = vld [vmem:[#allocation14 + $0x2e0] ss:$16 sps:$4 sm:$0xff]   ;;  %v6147_v49 = vld [vmem:[#allocation14 + $0x2e8] ss:$16 sps:$4 sm:$0xff]  }
 0x18e   : > { %2323 = vmatprep.subr.bf16.mxu0 %v6062_v50  ;;  %2405 = vmatprep.subr.bf16.mxu1 %v6065_v51  ;;  %v6152_v50 = vld [vmem:[#allocation14 + $0x304] ss:$16 sps:$4 sm:$0xff]   ;;  %v6155_v51 = vld [vmem:[#allocation14 + $0x30c] ss:$16 sps:$4 sm:$0xff]  }
 0x191   : > { %2324 = vmatpush1.bf16.msra.mxu0 %v6060_v52  ;;  %2406 = vmatpush1.bf16.msra.mxu1 %v6063_v53  ;;  %v6150_v52 = vld [vmem:[#allocation14 + $0x300] ss:$16 sps:$4 sm:$0xff]   ;;  %v6153_v53 = vld [vmem:[#allocation14 + $0x308] ss:$16 sps:$4 sm:$0xff]  }
 0x192   : > { %2325 = vmatprep.subr.bf16.mxu0 %v6068_v54  ;;  %2407 = vmatprep.subr.bf16.mxu1 %v6071_v55  ;;  %v6158_v54 = vld [vmem:[#allocation14 + $0x324] ss:$16 sps:$4 sm:$0xff]   ;;  %v6161_v55 = vld [vmem:[#allocation14 + $0x32c] ss:$16 sps:$4 sm:$0xff]  }
 0x195   : > { %2326 = vmatpush1.bf16.msra.mxu0 %v6066_v56  ;;  %2408 = vmatpush1.bf16.msra.mxu1 %v6069_v57  ;;  %v6156_v56 = vld [vmem:[#allocation14 + $0x320] ss:$16 sps:$4 sm:$0xff]   ;;  %v6159_v57 = vld [vmem:[#allocation14 + $0x328] ss:$16 sps:$4 sm:$0xff]  }
 0x196   : > { %2327 = vmatprep.subr.bf16.mxu0 %v6074_v58  ;;  %2409 = vmatprep.subr.bf16.mxu1 %v6077_v59  ;;  %v6164_v58 = vld [vmem:[#allocation14 + $0x344] ss:$16 sps:$4 sm:$0xff]   ;;  %v6167_v59 = vld [vmem:[#allocation14 + $0x34c] ss:$16 sps:$4 sm:$0xff]  }
 0x199   : > { %2328 = vmatpush1.bf16.msra.mxu0 %v6072_v60  ;;  %2410 = vmatpush1.bf16.msra.mxu1 %v6075_v61  ;;  %v6162_v60 = vld [vmem:[#allocation14 + $0x340] ss:$16 sps:$4 sm:$0xff]   ;;  %v6165_v61 = vld [vmem:[#allocation14 + $0x348] ss:$16 sps:$4 sm:$0xff]  }
 0x19a   : > { %2329 = vmatprep.subr.bf16.mxu0 %v6080_v62  ;;  %2411 = vmatprep.subr.bf16.mxu1 %v6083_v63  ;;  %v6170_v62 = vld [vmem:[#allocation14 + $0x364] ss:$16 sps:$4 sm:$0xff]   ;;  %v6173_v63 = vld [vmem:[#allocation14 + $0x36c] ss:$16 sps:$4 sm:$0xff]  }
 0x19d   : > { %2330 = vmatpush1.bf16.msra.mxu0 %v6078_v0  ;;  %2412 = vmatpush1.bf16.msra.mxu1 %v6081_v1  ;;  %v6168_v0 = vld [vmem:[#allocation14 + $0x360] ss:$16 sps:$4 sm:$0xff]   ;;  %v6171_v1 = vld [vmem:[#allocation14 + $0x368] ss:$16 sps:$4 sm:$0xff]  }
 0x19e   : > { %2331 = vmatprep.subr.bf16.mxu0 %v6086_v2  ;;  %2413 = vmatprep.subr.bf16.mxu1 %v6089_v3  ;;  %v6176_v2 = vld [vmem:[#allocation14 + $0x384] ss:$16 sps:$4 sm:$0xff]   ;;  %v6179_v3 = vld [vmem:[#allocation14 + $0x38c] ss:$16 sps:$4 sm:$0xff]  }
 0x1a1   : > { %2332 = vmatpush1.bf16.msra.mxu0 %v6084_v4  ;;  %2414 = vmatpush1.bf16.msra.mxu1 %v6087_v5  ;;  %v6174_v4 = vld [vmem:[#allocation14 + $0x380] ss:$16 sps:$4 sm:$0xff]   ;;  %v6177_v5 = vld [vmem:[#allocation14 + $0x388] ss:$16 sps:$4 sm:$0xff]  }
 0x1a2   : > { %2333 = vmatprep.subr.bf16.mxu0 %v6092_v6  ;;  %2415 = vmatprep.subr.bf16.mxu1 %v6095_v7  ;;  %v6182_v6 = vld [vmem:[#allocation14 + $0x3a4] ss:$16 sps:$4 sm:$0xff]   ;;  %v6185_v7 = vld [vmem:[#allocation14 + $0x3ac] ss:$16 sps:$4 sm:$0xff]  }
 0x1a5   : > { %2334 = vmatpush1.bf16.msra.mxu0 %v6090_v8  ;;  %2416 = vmatpush1.bf16.msra.mxu1 %v6093_v9  ;;  %v6180_v8 = vld [vmem:[#allocation14 + $0x3a0] ss:$16 sps:$4 sm:$0xff]   ;;  %v6183_v9 = vld [vmem:[#allocation14 + $0x3a8] ss:$16 sps:$4 sm:$0xff]  }
 0x1a6   : > { %2335 = vmatprep.subr.bf16.mxu0 %v6098_v10  ;;  %2417 = vmatprep.subr.bf16.mxu1 %v6101_v11  ;;  %v6188_v10 = vld [vmem:[#allocation14 + $0x3c4] ss:$16 sps:$4 sm:$0xff]   ;;  %v6191_v11 = vld [vmem:[#allocation14 + $0x3cc] ss:$16 sps:$4 sm:$0xff]  }
 0x1a9   : > { %2336 = vmatpush1.bf16.msra.mxu0 %v6096_v12  ;;  %2418 = vmatpush1.bf16.msra.mxu1 %v6099_v13  ;;  %v6186_v12 = vld [vmem:[#allocation14 + $0x3c0] ss:$16 sps:$4 sm:$0xff]   ;;  %v6189_v13 = vld [vmem:[#allocation14 + $0x3c8] ss:$16 sps:$4 sm:$0xff]  }
 0x1aa   : > { %2346 = vmatprep.subr.bf16.mxu0 %v6104_v14  ;;  %2428 = vmatprep.subr.bf16.mxu1 %v6107_v16  ;;  %v6194_v14 = vld [vmem:[#allocation14 + $0x3e4] ss:$16 sps:$4 sm:$0xff]   ;;  %v6192_v16 = vld [vmem:[#allocation14 + $0x3e0] ss:$16 sps:$4 sm:$0xff]  }
 0x1ac   : > { %2338 = vmatmul.mubr.bf16.vlgmr.msra.gmra.mrb[4].mxu0 %v1533_v18  ;;  %2420 = vmatmul.mubr.bf16.vlgmr.msra.gmra.mrb[4].mxu1 %v1533_v18  ;;  %v1531_v18 = vld [vmem:[%s7250_s27 + $0x10] sm:$0xff]  ;;  %s7394_s27 = scalar_lea.hbm %s7514_s3, %s5614_s30 }
 0x1ad   : > { %2347 = vmatpush1.bf16.msra.mxu0 %v6102_v17  ;;  %2429 = vmatpush1.bf16.msra.mxu1 %v6105_v20  ;;  %v6195_v17 = vld [vmem:[#allocation14 + $0x3e8] ss:$16 sps:$4 sm:$0xff]   ;;  %v6203_v20 = vld [vmem:[#allocation15 + $0xc] ss:$16 sps:$4 sm:$0xff]  }
 0x1ae   : > { %2348 = vmatprep.subr.bf16.mxu0 %v6110_v21  ;;  %2430 = vmatprep.subr.bf16.mxu1 %v6113_v22  ;;  %v6198_v21 = vld [vmem:[#allocation15] ss:$16 sps:$4 sm:$0xff]   ;;  %v1535_v22 = vpack.c.bf16 %v1531_v18, %v1531_v18  ;;  %v6290_v18 = vld [vmem:[#allocation15 + $0x1e4] ss:$16 sps:$4 sm:$0xff]  }
 0x1af   : > { %2378 = vmatprep.mubr.bf16.mxu0 %v1536_v23  ;;  %2460 = vmatprep.mubr.bf16.mxu1 %v1536_v23  ;;  %v2497_v23 = vld [vmem:[%s7257_s12 + $0x8] sm:$0xff] }
 0x1b1   : > { %2349 = vmatpush1.bf16.msra.mxu0 %v6108_v24  ;;  %2431 = vmatpush1.bf16.msra.mxu1 %v6111_v25  ;;  %v6201_v24 = vld [vmem:[#allocation15 + $0x8] ss:$16 sps:$4 sm:$0xff]   ;;  %v6206_v25 = vld [vmem:[#allocation15 + $0x24] ss:$16 sps:$4 sm:$0xff]  }
 0x1b2   : > { %2350 = vmatprep.subr.bf16.mxu0 %v6116_v26  ;;  %2432 = vmatprep.subr.bf16.mxu1 %v6119_v27  ;;  %v6209_v26 = vld [vmem:[#allocation15 + $0x2c] ss:$16 sps:$4 sm:$0xff]   ;;  %v2501_v27 = vpack.c.bf16 %v2497_v23, %v2497_v23  ;;  %v6296_v23 = vld [vmem:[#allocation15 + $0x204] ss:$16 sps:$4 sm:$0xff]  }
 0x1b5   : > { %2351 = vmatpush1.bf16.msra.mxu0 %v6114_v28  ;;  %2433 = vmatpush1.bf16.msra.mxu1 %v6117_v29  ;;  %v6204_v28 = vld [vmem:[#allocation15 + $0x20] ss:$16 sps:$4 sm:$0xff]   ;;  %v6207_v29 = vld [vmem:[#allocation15 + $0x28] ss:$16 sps:$4 sm:$0xff]  }
 0x1b6   : > { %2352 = vmatprep.subr.bf16.mxu0 %v6122_v30  ;;  %2434 = vmatprep.subr.bf16.mxu1 %v6125_v31  ;;  %v6212_v30 = vld [vmem:[#allocation15 + $0x44] ss:$16 sps:$4 sm:$0xff]   ;;  %v6215_v31 = vld [vmem:[#allocation15 + $0x4c] ss:$16 sps:$4 sm:$0xff]  }
 0x1b9   : > { %2353 = vmatpush1.bf16.msra.mxu0 %v6120_v32  ;;  %2435 = vmatpush1.bf16.msra.mxu1 %v6123_v33  ;;  %v6210_v32 = vld [vmem:[#allocation15 + $0x40] ss:$16 sps:$4 sm:$0xff]   ;;  %v6213_v33 = vld [vmem:[#allocation15 + $0x48] ss:$16 sps:$4 sm:$0xff]  }
 0x1ba   : > { %2354 = vmatprep.subr.bf16.mxu0 %v6128_v34  ;;  %2436 = vmatprep.subr.bf16.mxu1 %v6131_v35  ;;  %v6218_v34 = vld [vmem:[#allocation15 + $0x64] ss:$16 sps:$4 sm:$0xff]   ;;  %v6221_v35 = vld [vmem:[#allocation15 + $0x6c] ss:$16 sps:$4 sm:$0xff]  }
 0x1bd   : > { %2355 = vmatpush1.bf16.msra.mxu0 %v6126_v36  ;;  %2437 = vmatpush1.bf16.msra.mxu1 %v6129_v37  ;;  %v6216_v36 = vld [vmem:[#allocation15 + $0x60] ss:$16 sps:$4 sm:$0xff]   ;;  %v6219_v37 = vld [vmem:[#allocation15 + $0x68] ss:$16 sps:$4 sm:$0xff]  }
 0x1be   : > { %2356 = vmatprep.subr.bf16.mxu0 %v6134_v38  ;;  %2438 = vmatprep.subr.bf16.mxu1 %v6137_v39  ;;  %v6224_v38 = vld [vmem:[#allocation15 + $0x84] ss:$16 sps:$4 sm:$0xff]   ;;  %v6227_v39 = vld [vmem:[#allocation15 + $0x8c] ss:$16 sps:$4 sm:$0xff]  }
 0x1c1   : > { %2357 = vmatpush1.bf16.msra.mxu0 %v6132_v40  ;;  %2439 = vmatpush1.bf16.msra.mxu1 %v6135_v41  ;;  %v6222_v40 = vld [vmem:[#allocation15 + $0x80] ss:$16 sps:$4 sm:$0xff]   ;;  %v6225_v41 = vld [vmem:[#allocation15 + $0x88] ss:$16 sps:$4 sm:$0xff]  }
 0x1c2   : > { %2358 = vmatprep.subr.bf16.mxu0 %v6140_v42  ;;  %2440 = vmatprep.subr.bf16.mxu1 %v6143_v43  ;;  %v6230_v42 = vld [vmem:[#allocation15 + $0xa4] ss:$16 sps:$4 sm:$0xff]   ;;  %v6233_v43 = vld [vmem:[#allocation15 + $0xac] ss:$16 sps:$4 sm:$0xff]  }
 0x1c5   : > { %2359 = vmatpush1.bf16.msra.mxu0 %v6138_v44  ;;  %2441 = vmatpush1.bf16.msra.mxu1 %v6141_v45  ;;  %v6228_v44 = vld [vmem:[#allocation15 + $0xa0] ss:$16 sps:$4 sm:$0xff]   ;;  %v6231_v45 = vld [vmem:[#allocation15 + $0xa8] ss:$16 sps:$4 sm:$0xff]  }
 0x1c6   : > { %2360 = vmatprep.subr.bf16.mxu0 %v6146_v46  ;;  %2442 = vmatprep.subr.bf16.mxu1 %v6149_v47  ;;  %v6236_v46 = vld [vmem:[#allocation15 + $0xc4] ss:$16 sps:$4 sm:$0xff]   ;;  %v6239_v47 = vld [vmem:[#allocation15 + $0xcc] ss:$16 sps:$4 sm:$0xff]  }
 0x1c9   : > { %2361 = vmatpush1.bf16.msra.mxu0 %v6144_v48  ;;  %2443 = vmatpush1.bf16.msra.mxu1 %v6147_v49  ;;  %v6234_v48 = vld [vmem:[#allocation15 + $0xc0] ss:$16 sps:$4 sm:$0xff]   ;;  %v6237_v49 = vld [vmem:[#allocation15 + $0xc8] ss:$16 sps:$4 sm:$0xff]  }
 0x1ca   : > { %2362 = vmatprep.subr.bf16.mxu0 %v6152_v50  ;;  %2444 = vmatprep.subr.bf16.mxu1 %v6155_v51  ;;  %v6242_v50 = vld [vmem:[#allocation15 + $0xe4] ss:$16 sps:$4 sm:$0xff]   ;;  %v6245_v51 = vld [vmem:[#allocation15 + $0xec] ss:$16 sps:$4 sm:$0xff]  }
 0x1cd   : > { %2363 = vmatpush1.bf16.msra.mxu0 %v6150_v52  ;;  %2445 = vmatpush1.bf16.msra.mxu1 %v6153_v53  ;;  %v6240_v52 = vld [vmem:[#allocation15 + $0xe0] ss:$16 sps:$4 sm:$0xff]   ;;  %v6243_v53 = vld [vmem:[#allocation15 + $0xe8] ss:$16 sps:$4 sm:$0xff]  }
 0x1ce   : > { %2364 = vmatprep.subr.bf16.mxu0 %v6158_v54  ;;  %2446 = vmatprep.subr.bf16.mxu1 %v6161_v55  ;;  %v6248_v54 = vld [vmem:[#allocation15 + $0x104] ss:$16 sps:$4 sm:$0xff]   ;;  %v6251_v55 = vld [vmem:[#allocation15 + $0x10c] ss:$16 sps:$4 sm:$0xff]  }
 0x1d1   : > { %2365 = vmatpush1.bf16.msra.mxu0 %v6156_v56  ;;  %2447 = vmatpush1.bf16.msra.mxu1 %v6159_v57  ;;  %v6246_v56 = vld [vmem:[#allocation15 + $0x100] ss:$16 sps:$4 sm:$0xff]   ;;  %v6249_v57 = vld [vmem:[#allocation15 + $0x108] ss:$16 sps:$4 sm:$0xff]  }
 0x1d2   : > { %2366 = vmatprep.subr.bf16.mxu0 %v6164_v58  ;;  %2448 = vmatprep.subr.bf16.mxu1 %v6167_v59  ;;  %v6254_v58 = vld [vmem:[#allocation15 + $0x124] ss:$16 sps:$4 sm:$0xff]   ;;  %v6257_v59 = vld [vmem:[#allocation15 + $0x12c] ss:$16 sps:$4 sm:$0xff]  }
 0x1d5   : > { %2367 = vmatpush1.bf16.msra.mxu0 %v6162_v60  ;;  %2449 = vmatpush1.bf16.msra.mxu1 %v6165_v61  ;;  %v6252_v60 = vld [vmem:[#allocation15 + $0x120] ss:$16 sps:$4 sm:$0xff]   ;;  %v6255_v61 = vld [vmem:[#allocation15 + $0x128] ss:$16 sps:$4 sm:$0xff]  }
 0x1d6   : > { %2368 = vmatprep.subr.bf16.mxu0 %v6170_v62  ;;  %2450 = vmatprep.subr.bf16.mxu1 %v6173_v63  ;;  %v6260_v62 = vld [vmem:[#allocation15 + $0x144] ss:$16 sps:$4 sm:$0xff]   ;;  %v6263_v63 = vld [vmem:[#allocation15 + $0x14c] ss:$16 sps:$4 sm:$0xff]  }
 0x1d9   : > { %2369 = vmatpush1.bf16.msra.mxu0 %v6168_v0  ;;  %2451 = vmatpush1.bf16.msra.mxu1 %v6171_v1  ;;  %v6258_v0 = vld [vmem:[#allocation15 + $0x140] ss:$16 sps:$4 sm:$0xff]   ;;  %v6261_v1 = vld [vmem:[#allocation15 + $0x148] ss:$16 sps:$4 sm:$0xff]  }
 0x1da   : > { %2370 = vmatprep.subr.bf16.mxu0 %v6176_v2  ;;  %2452 = vmatprep.subr.bf16.mxu1 %v6179_v3  ;;  %v6266_v2 = vld [vmem:[#allocation15 + $0x164] ss:$16 sps:$4 sm:$0xff]   ;;  %v6269_v3 = vld [vmem:[#allocation15 + $0x16c] ss:$16 sps:$4 sm:$0xff]  }
 0x1dd   : > { %2371 = vmatpush1.bf16.msra.mxu0 %v6174_v4  ;;  %2453 = vmatpush1.bf16.msra.mxu1 %v6177_v5  ;;  %v6264_v4 = vld [vmem:[#allocation15 + $0x160] ss:$16 sps:$4 sm:$0xff]   ;;  %v6267_v5 = vld [vmem:[#allocation15 + $0x168] ss:$16 sps:$4 sm:$0xff]  }
 0x1de   : > { %2372 = vmatprep.subr.bf16.mxu0 %v6182_v6  ;;  %2454 = vmatprep.subr.bf16.mxu1 %v6185_v7  ;;  %v6272_v6 = vld [vmem:[#allocation15 + $0x184] ss:$16 sps:$4 sm:$0xff]   ;;  %v6275_v7 = vld [vmem:[#allocation15 + $0x18c] ss:$16 sps:$4 sm:$0xff]  }
 0x1e1   : > { %2373 = vmatpush1.bf16.msra.mxu0 %v6180_v8  ;;  %2455 = vmatpush1.bf16.msra.mxu1 %v6183_v9  ;;  %v6270_v8 = vld [vmem:[#allocation15 + $0x180] ss:$16 sps:$4 sm:$0xff]   ;;  %v6273_v9 = vld [vmem:[#allocation15 + $0x188] ss:$16 sps:$4 sm:$0xff]  }
 0x1e2   : > { %2374 = vmatprep.subr.bf16.mxu0 %v6188_v10  ;;  %2456 = vmatprep.subr.bf16.mxu1 %v6191_v11  ;;  %v6278_v10 = vld [vmem:[#allocation15 + $0x1a4] ss:$16 sps:$4 sm:$0xff]   ;;  %v6281_v11 = vld [vmem:[#allocation15 + $0x1ac] ss:$16 sps:$4 sm:$0xff]  }
 0x1e5   : > { %2375 = vmatpush1.bf16.msra.mxu0 %v6186_v12  ;;  %2457 = vmatpush1.bf16.msra.mxu1 %v6189_v13  ;;  %v6276_v12 = vld [vmem:[#allocation15 + $0x1a0] ss:$16 sps:$4 sm:$0xff]   ;;  %v6279_v13 = vld [vmem:[#allocation15 + $0x1a8] ss:$16 sps:$4 sm:$0xff]  }
 0x1e6   : > { %2376 = vmatprep.subr.bf16.mxu0 %v6194_v14  ;;  %2458 = vmatprep.subr.bf16.mxu1 %v6197_v15  ;;  %v6284_v14 = vld [vmem:[#allocation15 + $0x1c4] ss:$16 sps:$4 sm:$0xff]   ;;  %v6287_v15 = vld [vmem:[#allocation15 + $0x1cc] ss:$16 sps:$4 sm:$0xff]  }
 0x1e9   : > { %2377 = vmatpush1.bf16.msra.mxu0 %v6192_v16  ;;  %2459 = vmatpush1.bf16.msra.mxu1 %v6195_v17  ;;  %v6282_v16 = vld [vmem:[#allocation15 + $0x1c0] ss:$16 sps:$4 sm:$0xff]   ;;  %v6285_v17 = vld [vmem:[#allocation15 + $0x1c8] ss:$16 sps:$4 sm:$0xff]  }
 0x1ea   : > { %3272 = vmatprep.subr.bf16.mxu0 %v6200_v19  ;;  %3354 = vmatprep.subr.bf16.mxu1 %v6203_v20  ;;  %v6293_v19 = vld [vmem:[#allocation15 + $0x1ec] ss:$16 sps:$4 sm:$0xff]   ;;  %v6288_v20 = vld [vmem:[#allocation15 + $0x1e0] ss:$16 sps:$4 sm:$0xff]  }
 0x1ec   : > { %2379 = vmatmul.mubr.bf16.vlgmr.msra.gmra.mrb[4].mxu0 %v1535_v22  ;;  %2461 = vmatmul.mubr.bf16.vlgmr.msra.gmra.mrb[4].mxu1 %v1535_v22  ;;  %v2496_v22 = vld [vmem:[%s7257_s12] sm:$0xff] }
 0x1ed   : > { %3273 = vmatpush1.bf16.msra.mxu0 %v6198_v21  ;;  %3355 = vmatpush1.bf16.msra.mxu1 %v6201_v24  ;;  %v6291_v21 = vld [vmem:[#allocation15 + $0x1e8] ss:$16 sps:$4 sm:$0xff]   ;;  %v6299_v24 = vld [vmem:[#allocation15 + $0x20c] ss:$16 sps:$4 sm:$0xff]  }
 0x1ee   : > { %3274 = vmatprep.subr.bf16.mxu0 %v6206_v25  ;;  %3356 = vmatprep.subr.bf16.mxu1 %v6209_v26  ;;  %v2500_v25 = vpack.c.bf16 %v2496_v22, %v2496_v22  ;;  %v2499_v26 = vld [vmem:[%s7257_s12 + $0x18] sm:$0xff]  ;;  %v6362_v22 = vld [vmem:[#allocation15 + $0x364] ss:$16 sps:$4 sm:$0xff]  }
 0x1ef   : > { %3304 = vmatprep.mubr.bf16.mxu0 %v2501_v27  ;;  %3386 = vmatprep.mubr.bf16.mxu1 %v2501_v27  ;;  %v6294_v27 = vld [vmem:[#allocation15 + $0x200] ss:$16 sps:$4 sm:$0xff]  }
 0x1f1   : > { %3275 = vmatpush1.bf16.msra.mxu0 %v6204_v28  ;;  %3357 = vmatpush1.bf16.msra.mxu1 %v6207_v29  ;;  %v6297_v28 = vld [vmem:[#allocation15 + $0x208] ss:$16 sps:$4 sm:$0xff]   ;;  %v6302_v29 = vld [vmem:[#allocation15 + $0x224] ss:$16 sps:$4 sm:$0xff]  }
 0x1f2   : > { %3276 = vmatprep.subr.bf16.mxu0 %v6212_v30  ;;  %3358 = vmatprep.subr.bf16.mxu1 %v6215_v31  ;;  %v6305_v30 = vld [vmem:[#allocation15 + $0x22c] ss:$16 sps:$4 sm:$0xff]   ;;  %v2503_v31 = vpack.c.bf16 %v2499_v26, %v2499_v26  ;;  %v6368_v26 = vld [vmem:[#allocation15 + $0x384] ss:$16 sps:$4 sm:$0xff]  }
 0x1f5   : > { %3277 = vmatpush1.bf16.msra.mxu0 %v6210_v32  ;;  %3359 = vmatpush1.bf16.msra.mxu1 %v6213_v33  ;;  %v6300_v32 = vld [vmem:[#allocation15 + $0x220] ss:$16 sps:$4 sm:$0xff]   ;;  %v6303_v33 = vld [vmem:[#allocation15 + $0x228] ss:$16 sps:$4 sm:$0xff]  }
 0x1f6   : > { %3278 = vmatprep.subr.bf16.mxu0 %v6218_v34  ;;  %3360 = vmatprep.subr.bf16.mxu1 %v6221_v35  ;;  %v6308_v34 = vld [vmem:[#allocation15 + $0x244] ss:$16 sps:$4 sm:$0xff]   ;;  %v6311_v35 = vld [vmem:[#allocation15 + $0x24c] ss:$16 sps:$4 sm:$0xff]  }
 0x1f9   : > { %3279 = vmatpush1.bf16.msra.mxu0 %v6216_v36  ;;  %3361 = vmatpush1.bf16.msra.mxu1 %v6219_v37  ;;  %v6306_v36 = vld [vmem:[#allocation15 + $0x240] ss:$16 sps:$4 sm:$0xff]   ;;  %v6309_v37 = vld [vmem:[#allocation15 + $0x248] ss:$16 sps:$4 sm:$0xff]  }
 0x1fa   : > { %3280 = vmatprep.subr.bf16.mxu0 %v6224_v38  ;;  %3362 = vmatprep.subr.bf16.mxu1 %v6227_v39  ;;  %v6314_v38 = vld [vmem:[#allocation15 + $0x264] ss:$16 sps:$4 sm:$0xff]   ;;  %v6317_v39 = vld [vmem:[#allocation15 + $0x26c] ss:$16 sps:$4 sm:$0xff]  }
 0x1fd   : > { %3281 = vmatpush1.bf16.msra.mxu0 %v6222_v40  ;;  %3363 = vmatpush1.bf16.msra.mxu1 %v6225_v41  ;;  %v6312_v40 = vld [vmem:[#allocation15 + $0x260] ss:$16 sps:$4 sm:$0xff]   ;;  %v6315_v41 = vld [vmem:[#allocation15 + $0x268] ss:$16 sps:$4 sm:$0xff]  }
 0x1fe   : > { %3282 = vmatprep.subr.bf16.mxu0 %v6230_v42  ;;  %3364 = vmatprep.subr.bf16.mxu1 %v6233_v43  ;;  %v6320_v42 = vld [vmem:[#allocation15 + $0x284] ss:$16 sps:$4 sm:$0xff]   ;;  %v6323_v43 = vld [vmem:[#allocation15 + $0x28c] ss:$16 sps:$4 sm:$0xff]  }
 0x201   : > { %3283 = vmatpush1.bf16.msra.mxu0 %v6228_v44  ;;  %3365 = vmatpush1.bf16.msra.mxu1 %v6231_v45  ;;  %v7289_v44 = vpop.permute.xlu0 %2471  ;;  %v6318_v45 = vld [vmem:[#allocation15 + $0x280] ss:$16 sps:$4 sm:$0xff]  }
 0x202   : > { %3284 = vmatprep.subr.bf16.mxu0 %v6236_v46  ;;  %3366 = vmatprep.subr.bf16.mxu1 %v6239_v47  ;;  %v6321_v46 = vld [vmem:[#allocation15 + $0x288] ss:$16 sps:$4 sm:$0xff]   ;;  %v6326_v47 = vld [vmem:[#allocation15 + $0x2a4] ss:$16 sps:$4 sm:$0xff]  }
 0x205   : > { %3285 = vmatpush1.bf16.msra.mxu0 %v6234_v48  ;;  %3367 = vmatpush1.bf16.msra.mxu1 %v6237_v49  ;;  %v6329_v48 = vld [vmem:[#allocation15 + $0x2ac] ss:$16 sps:$4 sm:$0xff]   ;;  %v1505_v49 = vpop.permute.xlu0 %1504 }
 0x206   : > { %3286 = vmatprep.subr.bf16.mxu0 %v6242_v50  ;;  %3368 = vmatprep.subr.bf16.mxu1 %v6245_v51  ;;  %v6324_v50 = vld [vmem:[#allocation15 + $0x2a0] ss:$16 sps:$4 sm:$0xff]   ;;  %v6327_v51 = vld [vmem:[#allocation15 + $0x2a8] ss:$16 sps:$4 sm:$0xff]  }
 0x209   : > { %3287 = vmatpush1.bf16.msra.mxu0 %v6240_v52  ;;  %3369 = vmatpush1.bf16.msra.mxu1 %v6243_v53  ;;  %v6332_v52 = vld [vmem:[#allocation15 + $0x2c4] ss:$16 sps:$4 sm:$0xff]   ;;  %v6335_v53 = vld [vmem:[#allocation15 + $0x2cc] ss:$16 sps:$4 sm:$0xff]  }
 0x20a   : > { %3288 = vmatprep.subr.bf16.mxu0 %v6248_v54  ;;  %3370 = vmatprep.subr.bf16.mxu1 %v6251_v55 }
 0x20d   : > { %3289 = vmatpush1.bf16.msra.mxu0 %v6246_v56  ;;  %3371 = vmatpush1.bf16.msra.mxu1 %v6249_v57 }
 0x20e   : > { %3290 = vmatprep.subr.bf16.mxu0 %v6254_v58  ;;  %3372 = vmatprep.subr.bf16.mxu1 %v6257_v59 }
 0x211   : > { %3291 = vmatpush1.bf16.msra.mxu0 %v6252_v60  ;;  %3373 = vmatpush1.bf16.msra.mxu1 %v6255_v61 }
 0x212   : > { %3292 = vmatprep.subr.bf16.mxu0 %v6260_v62  ;;  %3374 = vmatprep.subr.bf16.mxu1 %v6263_v63 }
 0x215   : > { %3293 = vmatpush1.bf16.msra.mxu0 %v6258_v0  ;;  %3375 = vmatpush1.bf16.msra.mxu1 %v6261_v1  ;;  %v6330_v0 = vld [vmem:[#allocation15 + $0x2c0] ss:$16 sps:$4 sm:$0xff]   ;;  %v6333_v1 = vld [vmem:[#allocation15 + $0x2c8] ss:$16 sps:$4 sm:$0xff]  }
 0x216   : > { %3294 = vmatprep.subr.bf16.mxu0 %v6266_v2  ;;  %3376 = vmatprep.subr.bf16.mxu1 %v6269_v3 }
 0x219   : > { %3295 = vmatpush1.bf16.msra.mxu0 %v6264_v4  ;;  %3377 = vmatpush1.bf16.msra.mxu1 %v6267_v5  ;;  %v6338_v4 = vld [vmem:[#allocation15 + $0x2e4] ss:$16 sps:$4 sm:$0xff]   ;;  %v6341_v5 = vld [vmem:[#allocation15 + $0x2ec] ss:$16 sps:$4 sm:$0xff]  }
 0x21a   : > { %3296 = vmatprep.subr.bf16.mxu0 %v6272_v6  ;;  %3378 = vmatprep.subr.bf16.mxu1 %v6275_v7 }
 0x21d   : > { %3297 = vmatpush1.bf16.msra.mxu0 %v6270_v8  ;;  %3379 = vmatpush1.bf16.msra.mxu1 %v6273_v9  ;;  %v6336_v8 = vld [vmem:[#allocation15 + $0x2e0] ss:$16 sps:$4 sm:$0xff]   ;;  %v6339_v9 = vld [vmem:[#allocation15 + $0x2e8] ss:$16 sps:$4 sm:$0xff]  }
 0x21e   : > { %3298 = vmatprep.subr.bf16.mxu0 %v6278_v10  ;;  %3380 = vmatprep.subr.bf16.mxu1 %v6281_v11  ;;  %v6344_v10 = vld [vmem:[#allocation15 + $0x304] ss:$16 sps:$4 sm:$0xff]   ;;  %v6347_v11 = vld [vmem:[#allocation15 + $0x30c] ss:$16 sps:$4 sm:$0xff]  }
 0x221   : > { %3299 = vmatpush1.bf16.msra.mxu0 %v6276_v12  ;;  %3381 = vmatpush1.bf16.msra.mxu1 %v6279_v13  ;;  %v6342_v12 = vld [vmem:[#allocation15 + $0x300] ss:$16 sps:$4 sm:$0xff]   ;;  %v6345_v13 = vld [vmem:[#allocation15 + $0x308] ss:$16 sps:$4 sm:$0xff]  }
 0x222   : > { %3300 = vmatprep.subr.bf16.mxu0 %v6284_v14  ;;  %3382 = vmatprep.subr.bf16.mxu1 %v6287_v15  ;;  %v6350_v14 = vld [vmem:[#allocation15 + $0x324] ss:$16 sps:$4 sm:$0xff]   ;;  %v6353_v15 = vld [vmem:[#allocation15 + $0x32c] ss:$16 sps:$4 sm:$0xff]  }
 0x225   : > { %3301 = vmatpush1.bf16.msra.mxu0 %v6282_v16  ;;  %3383 = vmatpush1.bf16.msra.mxu1 %v6285_v17  ;;  %v6348_v16 = vld [vmem:[#allocation15 + $0x320] ss:$16 sps:$4 sm:$0xff]   ;;  %v6351_v17 = vld [vmem:[#allocation15 + $0x328] ss:$16 sps:$4 sm:$0xff]  }
 0x226   : > { %3302 = vmatprep.subr.bf16.mxu0 %v6290_v18  ;;  %3384 = vmatprep.subr.bf16.mxu1 %v6293_v19  ;;  %v6356_v18 = vld [vmem:[#allocation15 + $0x344] ss:$16 sps:$4 sm:$0xff]   ;;  %v6359_v19 = vld [vmem:[#allocation15 + $0x34c] ss:$16 sps:$4 sm:$0xff]  }
 0x229   : > { %3303 = vmatpush1.bf16.msra.mxu0 %v6288_v20  ;;  %3385 = vmatpush1.bf16.msra.mxu1 %v6291_v21  ;;  %v6354_v20 = vld [vmem:[#allocation15 + $0x340] ss:$16 sps:$4 sm:$0xff]   ;;  %v6357_v21 = vld [vmem:[#allocation15 + $0x348] ss:$16 sps:$4 sm:$0xff]  }
 0x22a   : > { %3313 = vmatprep.subr.bf16.mxu0 %v6296_v23  ;;  %3395 = vmatprep.subr.bf16.mxu1 %v6299_v24  ;;  %v6365_v23 = vld [vmem:[#allocation15 + $0x36c] ss:$16 sps:$4 sm:$0xff]   ;;  %v6360_v24 = vld [vmem:[#allocation15 + $0x360] ss:$16 sps:$4 sm:$0xff]  }
 0x22c   : > { %3305 = vmatmul.mubr.bf16.vlgmr.msra.gmra.mrb[8].mxu0 %v2500_v25  ;;  %3387 = vmatmul.mubr.bf16.vlgmr.msra.gmra.mrb[8].mxu1 %v2500_v25  ;;  %v6363_v25 = vld [vmem:[#allocation15 + $0x368] ss:$16 sps:$4 sm:$0xff]  }
 0x22d   : > { %3314 = vmatpush1.bf16.msra.mxu0 %v6294_v27  ;;  %3396 = vmatpush1.bf16.msra.mxu1 %v6297_v28  ;;  %v6371_v27 = vld [vmem:[#allocation15 + $0x38c] ss:$16 sps:$4 sm:$0xff]   ;;  %v6366_v28 = vld [vmem:[#allocation15 + $0x380] ss:$16 sps:$4 sm:$0xff]  }
 0x22e   : > { %3315 = vmatprep.subr.bf16.mxu0 %v6302_v29  ;;  %3397 = vmatprep.subr.bf16.mxu1 %v6305_v30  ;;  %v6369_v29 = vld [vmem:[#allocation15 + $0x388] ss:$16 sps:$4 sm:$0xff]   ;;  %v6374_v30 = vld [vmem:[#allocation15 + $0x3a4] ss:$16 sps:$4 sm:$0xff]  }
 0x22f   : > { %3345 = vmatprep.mubr.bf16.mxu0 %v2503_v31  ;;  %3427 = vmatprep.mubr.bf16.mxu1 %v2503_v31  ;;  %v6377_v31 = vld [vmem:[#allocation15 + $0x3ac] ss:$16 sps:$4 sm:$0xff]  }
 0x231   : > { %3316 = vmatpush1.bf16.msra.mxu0 %v6300_v32  ;;  %3398 = vmatpush1.bf16.msra.mxu1 %v6303_v33  ;;  %v6372_v32 = vld [vmem:[#allocation15 + $0x3a0] ss:$16 sps:$4 sm:$0xff]   ;;  %v6375_v33 = vld [vmem:[#allocation15 + $0x3a8] ss:$16 sps:$4 sm:$0xff]  }
 0x232   : > { %3317 = vmatprep.subr.bf16.mxu0 %v6308_v34  ;;  %3399 = vmatprep.subr.bf16.mxu1 %v6311_v35  ;;  %v6380_v34 = vld [vmem:[#allocation15 + $0x3c4] ss:$16 sps:$4 sm:$0xff]   ;;  %v6383_v35 = vld [vmem:[#allocation15 + $0x3cc] ss:$16 sps:$4 sm:$0xff]  }
 0x235   : > { %3318 = vmatpush1.bf16.msra.mxu0 %v6306_v36  ;;  %3400 = vmatpush1.bf16.msra.mxu1 %v6309_v37  ;;  %v6378_v36 = vld [vmem:[#allocation15 + $0x3c0] ss:$16 sps:$4 sm:$0xff]   ;;  %v6381_v37 = vld [vmem:[#allocation15 + $0x3c8] ss:$16 sps:$4 sm:$0xff]  }
 0x236   : > { %3319 = vmatprep.subr.bf16.mxu0 %v6314_v38  ;;  %3401 = vmatprep.subr.bf16.mxu1 %v6317_v39  ;;  %v6386_v38 = vld [vmem:[#allocation15 + $0x3e4] ss:$16 sps:$4 sm:$0xff]   ;;  %v6389_v39 = vld [vmem:[#allocation15 + $0x3ec] ss:$16 sps:$4 sm:$0xff]  }
 0x239   : > { %3320 = vmatpush1.bf16.msra.mxu0 %v6312_v40  ;;  %3402 = vmatpush1.bf16.msra.mxu1 %v6315_v41  ;;  %v6384_v40 = vld [vmem:[#allocation15 + $0x3e0] ss:$16 sps:$4 sm:$0xff]   ;;  %v6387_v41 = vld [vmem:[#allocation15 + $0x3e8] ss:$16 sps:$4 sm:$0xff]  }
 0x23a   : > { %3321 = vmatprep.subr.bf16.mxu0 %v6320_v42  ;;  %3403 = vmatprep.subr.bf16.mxu1 %v6323_v43  ;;  %v2498_v42 = vld [vmem:[%s7257_s12 + $0x10] sm:$0xff]  ;;  %s4845_s12 = scalar_lea.sflag [#allocation8], %s7235_s17 }
 0x23b   : > { %v2502_v43 = vpack.c.bf16 %v2498_v42, %v2498_v42 }
 0x23d   : > { %3322 = vmatpush1.bf16.msra.mxu0 %v6318_v45  ;;  %3404 = vmatpush1.bf16.msra.mxu1 %v6321_v46  ;;  %v6894_v45 = vmov 0.0  }
 0x23e   : > { %3323 = vmatprep.subr.bf16.mxu0 %v6326_v47  ;;  %3405 = vmatprep.subr.bf16.mxu1 %v6329_v48 }
 0x23f   : > { %v1412_v54 = vpop.f32.mrb[0].mxu0  ;;  %v1494_v55 = vpop.f32.mrb[0].mxu1 }
 0x240   : > { %v1414_v56 = vpop.f32.mrb[1].mxu0  ;;  %v1507_v57 = vmul.f32 %v1505_v49, %v1412_v54  ;;  %v1496_v58 = vpop.f32.mrb[1].mxu1  ;;  %v1509_v59 = vmul.f32 %v1505_v49, %v1494_v55 }
 0x241   : > { %v1508_v60 = vmul.f32 %v1505_v49, %v1414_v56  ;;  %v1510_v61 = vmul.f32 %v1505_v49, %v1496_v58  ;;  %v1416_v62 = vpop.f32.mrb[2].mxu0  ;;  %v1498_v63 = vpop.f32.mrb[2].mxu1  ;;  %3324 = vmatpush1.bf16.msra.mxu0 %v6324_v50  ;;  %3406 = vmatpush1.bf16.msra.mxu1 %v6327_v51 }
 0x242   : > { %v1417_v2 = vpop.f32.mrb[3].mxu0  ;;  %v1499_v3 = vpop.f32.mrb[3].mxu1  ;;  %3325 = vmatprep.subr.bf16.mxu0 %v6332_v52  ;;  %3407 = vmatprep.subr.bf16.mxu1 %v6335_v53 }
 0x243   : > { %v5608_v6 = vpack.c.bf16 %v1508_v60, %v1507_v57  ;;  %v5609_v7 = vpack.c.bf16 %v1510_v61, %v1509_v59 }
 0x245   : > { %1527 = vst [vmem:[#allocation2] sm:$0xff] %v5608_v6  ;;  %1528 = vst [vmem:[#allocation2 + $0x8] sm:$0xff] %v5609_v7  ;;  %3326 = vmatpush1.bf16.msra.mxu0 %v6330_v0  ;;  %3408 = vmatpush1.bf16.msra.mxu1 %v6333_v1 }
 0x246   : > { %3327 = vmatprep.subr.bf16.mxu0 %v6338_v4  ;;  %3409 = vmatprep.subr.bf16.mxu1 %v6341_v5 }
 0x249   : > { %3328 = vmatpush1.bf16.msra.mxu0 %v6336_v8  ;;  %3410 = vmatpush1.bf16.msra.mxu1 %v6339_v9 }
 0x24a   : > { %3329 = vmatprep.subr.bf16.mxu0 %v6344_v10  ;;  %3411 = vmatprep.subr.bf16.mxu1 %v6347_v11 }
 0x24c   : > { %v3461_v61 = vld [vmem:[#allocation2] sm:$0xf]  ;;  %v3570_v63 = vld [vmem:[#allocation2 + $0x4] sm:$0xf]  ;;  %v3676_v1 = vld [vmem:[#allocation2 + $0x8] sm:$0xf] }
 0x24d   : > { %3330 = vmatpush1.bf16.msra.mxu0 %v6342_v12  ;;  %3412 = vmatpush1.bf16.msra.mxu1 %v6345_v13  ;;  %v3782_v3 = vld [vmem:[#allocation2 + $0xc] sm:$0xf] }
 0x24e   : > { %3331 = vmatprep.subr.bf16.mxu0 %v6350_v14  ;;  %3413 = vmatprep.subr.bf16.mxu1 %v6353_v15 }
 0x251   : > { %3332 = vmatpush1.bf16.msra.mxu0 %v6348_v16  ;;  %3414 = vmatpush1.bf16.msra.mxu1 %v6351_v17 }
 0x252   : > { %3333 = vmatprep.subr.bf16.mxu0 %v6356_v18  ;;  %3415 = vmatprep.subr.bf16.mxu1 %v6359_v19 }
 0x255   : > { %3334 = vmatpush1.bf16.msra.mxu0 %v6354_v20  ;;  %3416 = vmatpush1.bf16.msra.mxu1 %v6357_v21  ;;  %v3458_v20 = vld [vmem:[%s557_s13] sm:$0x3] }
 0x256   : > { %3335 = vmatprep.subr.bf16.mxu0 %v6362_v22  ;;  %3417 = vmatprep.subr.bf16.mxu1 %v6365_v23  ;;  %v3459_v21 = vunpack.c.0.s8 %v3458_v20  ;;  %v6432_v20 = vld [vmem:[#allocation17 + $0xe0] ss:$16 sps:$4 sm:$0xff]  }
 0x258   : > { %v7321_v22 = vcvt.s32.f32 %v3459_v21  ;;  %v6440_v21 = vld [vmem:[#allocation17 + $0x104] ss:$16 sps:$4 sm:$0xff]  }
 0x259   : > { %3336 = vmatpush1.bf16.msra.mxu0 %v6360_v24  ;;  %3418 = vmatpush1.bf16.msra.mxu1 %v6363_v25 }
 0x25a   : > { %3337 = vmatprep.subr.bf16.mxu0 %v6368_v26  ;;  %3419 = vmatprep.subr.bf16.mxu1 %v6371_v27  ;;  %vm3503_vm2 = vcmp.ne.f32.partialorder %v7321_v22, 1.0 }
 0x25d   : > { %3338 = vmatpush1.bf16.msra.mxu0 %v6366_v28  ;;  %3420 = vmatpush1.bf16.msra.mxu1 %v6369_v29 }
 0x25e   : > { %3339 = vmatprep.subr.bf16.mxu0 %v6374_v30  ;;  %3421 = vmatprep.subr.bf16.mxu1 %v6377_v31 }
 0x261   : > { %3340 = vmatpush1.bf16.msra.mxu0 %v6372_v32  ;;  %3422 = vmatpush1.bf16.msra.mxu1 %v6375_v33 }
 0x262   : > { %3341 = vmatprep.subr.bf16.mxu0 %v6380_v34  ;;  %3423 = vmatprep.subr.bf16.mxu1 %v6383_v35 }
 0x265   : > { %3342 = vmatpush1.bf16.msra.mxu0 %v6378_v36  ;;  %3424 = vmatpush1.bf16.msra.mxu1 %v6381_v37 }
 0x266   : > { %3343 = vmatprep.subr.bf16.mxu0 %v6386_v38  ;;  %3425 = vmatprep.subr.bf16.mxu1 %v6389_v39 }
 0x269   : > { %3344 = vmatpush1.bf16.msra.mxu0 %v6384_v40  ;;  %3426 = vmatpush1.bf16.msra.mxu1 %v6387_v41 }
 0x26a   : > { %5631 = vmatprep.subr.bf16.mxu0 %v6894_v45  ;;  %5637 = vmatprep.subr.bf16.mxu1 %v6894_v45 }
 0x26c   : > { %3346 = vmatmul.mubr.bf16.vlgmr.msra.gmra.mrb[8].mxu0 %v2502_v43  ;;  %3428 = vmatmul.mubr.bf16.vlgmr.msra.gmra.mrb[8].mxu1 %v2502_v43 }
 0x26d   : > { %5633 = vmatprep.mubr.msk.bf16.mxu0 %vm6895_vm0, %v6894_v45  ;;  %5639 = vmatprep.mubr.msk.bf16.mxu1 %vm6895_vm0, %v6894_v45 }
 0x2bf   : > { %v2380_v46 = vpop.f32.mrb[4].mxu0  ;;  %v2462_v47 = vpop.f32.mrb[4].mxu1 }
 0x2c0   : > { %v2474_v48 = vmul.f32 %v7289_v44, %v2380_v46  ;;  %v2476_v49 = vmul.f32 %v7289_v44, %v2462_v47  ;;  %v2382_v50 = vpop.f32.mrb[5].mxu0  ;;  %v2464_v51 = vpop.f32.mrb[5].mxu1 }
 0x2c1   : > { %v2475_v52 = vmul.f32 %v7289_v44, %v2382_v50  ;;  %v2477_v53 = vmul.f32 %v7289_v44, %v2464_v51  ;;  %v2384_v54 = vpop.f32.mrb[6].mxu0  ;;  %v2466_v55 = vpop.f32.mrb[6].mxu1 }
 0x2c2   : > { %v2385_v56 = vpop.f32.mrb[7].mxu0  ;;  %v2467_v57 = vpop.f32.mrb[7].mxu1 }
 0x2c3   : > { %v5610_v58 = vpack.c.bf16 %v2475_v52, %v2474_v48  ;;  %v5611_v59 = vpack.c.bf16 %v2477_v53, %v2476_v49 }
 0x2c5   : > { %2494 = vst [vmem:[#allocation3] sm:$0xff] %v5610_v58  ;;  %2495 = vst [vmem:[#allocation3 + $0x8] sm:$0xff] %v5611_v59 }
 0x2cc   : > { %v3462_v60 = vld [vmem:[#allocation3] sm:$0xf]  ;;  %v3571_v62 = vld [vmem:[#allocation3 + $0x4] sm:$0xf]  ;;  %v3677_v0 = vld [vmem:[#allocation3 + $0x8] sm:$0xf] }
 0x2cd   : > { %5632 = vmatpush3.bf16.xpose.msra.mxu0 %v3462_v60  ;;  %v3783_v2 = vld [vmem:[#allocation3 + $0xc] sm:$0xf] }
 0x2ce   : > { %5643 = vmatprep.subr.bf16.mxu0 %v6894_v45 }
 0x2d4   : > { %5634 = vmatmul.mubr.bf16.vlgmr.msra.gmra.mrb[12].mxu0 %v3461_v61 }
 0x2d5   : > { %5644 = vmatpush3.bf16.xpose.msra.mxu0 %v3571_v62  ;;  %5645 = vmatprep.mubr.msk.bf16.mxu0 %vm6895_vm0, %v6894_v45 }
 0x2d6   : > { %5655 = vmatprep.subr.bf16.mxu0 %v6894_v45 }
 0x2dc   : > { %5646 = vmatmul.mubr.bf16.vlgmr.msra.gmra.mrb[16].mxu0 %v3570_v63 }
 0x2dd   : > { %5656 = vmatpush3.bf16.xpose.msra.mxu0 %v3677_v0  ;;  %5657 = vmatprep.mubr.msk.bf16.mxu0 %vm6895_vm0, %v6894_v45 }
 0x2de   : > { %5667 = vmatprep.subr.bf16.mxu0 %v6894_v45 }
 0x2e4   : > { %5658 = vmatmul.mubr.bf16.vlgmr.msra.gmra.mrb[20].mxu0 %v3676_v1 }
 0x2e5   : > { %5668 = vmatpush3.bf16.xpose.msra.mxu0 %v3783_v2  ;;  %5669 = vmatprep.mubr.msk.bf16.mxu0 %vm6895_vm0, %v6894_v45 }
 0x2ec   : > { %5670 = vmatmul.mubr.bf16.vlgmr.msra.gmra.mrb[24].mxu0 %v3782_v3 }
 0x33f   : > { %v3347_v4 = vpop.f32.mrb[8].mxu0  ;;  %v3429_v5 = vpop.f32.mrb[8].mxu1 }
 0x340   : > { %v3436_v6 = vmul.f32 %v3347_v4, %v7289_v44  ;;  %v3438_v7 = vmul.f32 %v3429_v5, %v7289_v44  ;;  %v3349_v8 = vpop.f32.mrb[9].mxu0  ;;  %v3431_v9 = vpop.f32.mrb[9].mxu1  ;;  %v6390_v5 = vld [vmem:[#allocation17] ss:$16 sps:$4 sm:$0xff]  }
 0x341   : > { %v3437_v10 = vmul.f32 %v3349_v8, %v7289_v44  ;;  %v3439_v11 = vmul.f32 %v3431_v9, %v7289_v44  ;;  %v3351_v12 = vpop.f32.mrb[10].mxu0  ;;  %v3433_v13 = vpop.f32.mrb[10].mxu1  ;;  %v6396_v8 = vld [vmem:[#allocation17 + $0x20] ss:$16 sps:$4 sm:$0xff]   ;;  %v6404_v9 = vld [vmem:[#allocation17 + $0x44] ss:$16 sps:$4 sm:$0xff]  }
 0x342   : > { %v3352_v14 = vpop.f32.mrb[11].mxu0  ;;  %v3434_v15 = vpop.f32.mrb[11].mxu1  ;;  %v6408_v12 = vld [vmem:[#allocation17 + $0x60] ss:$16 sps:$4 sm:$0xff]   ;;  %v6416_v13 = vld [vmem:[#allocation17 + $0x84] ss:$16 sps:$4 sm:$0xff]  }
 0x343   : > { %v5612_v16 = vpack.c.bf16 %v3437_v10, %v3436_v6  ;;  %v5613_v17 = vpack.c.bf16 %v3439_v11, %v3438_v7  ;;  %v6392_v6 = vld [vmem:[#allocation17 + $0x4] ss:$16 sps:$4 sm:$0xff]   ;;  %v6402_v10 = vld [vmem:[#allocation17 + $0x40] ss:$16 sps:$4 sm:$0xff]  }
 0x344   : > { %v6398_v7 = vld [vmem:[#allocation17 + $0x24] ss:$16 sps:$4 sm:$0xff]   ;;  %4672 = vmatprep.subr.bf16.mxu0 %v6392_v6  ;;  %v6414_v14 = vld [vmem:[#allocation17 + $0x80] ss:$16 sps:$4 sm:$0xff]   ;;  %v6443_v6 = vld [vmem:[#allocation17 + $0x10c] ss:$16 sps:$4 sm:$0xff]  }
 0x345   : > { %3456 = vst [vmem:[#allocation4] sm:$0xff] %v5612_v16  ;;  %3457 = vst [vmem:[#allocation4 + $0x8] sm:$0xff] %v5613_v17  ;;  %4673 = vmatpush1.bf16.msra.mxu0 %v6390_v5  ;;  %v6410_v11 = vld [vmem:[#allocation17 + $0x64] ss:$16 sps:$4 sm:$0xff]   ;;  %v6420_v16 = vld [vmem:[#allocation17 + $0xa0] ss:$16 sps:$4 sm:$0xff]  }
 0x346   : > { %4674 = vmatprep.subr.bf16.mxu0 %v6398_v7  ;;  %v6422_v15 = vld [vmem:[#allocation17 + $0xa4] ss:$16 sps:$4 sm:$0xff]   ;;  %v6435_v5 = vld [vmem:[#allocation17 + $0xe8] ss:$16 sps:$4 sm:$0xff]  }
 0x347   : > { %v6428_v17 = vld [vmem:[#allocation17 + $0xc4] ss:$16 sps:$4 sm:$0xff]   ;;  %v6441_v7 = vld [vmem:[#allocation17 + $0x108] ss:$16 sps:$4 sm:$0xff]  }
 0x349   : > { %4675 = vmatpush1.bf16.msra.mxu0 %v6396_v8  ;;  %v6449_v8 = vld [vmem:[#allocation17 + $0x12c] ss:$16 sps:$4 sm:$0xff]  }
 0x34a   : > { %4676 = vmatprep.subr.bf16.mxu0 %v6404_v9  ;;  %v6447_v9 = vld [vmem:[#allocation17 + $0x128] ss:$16 sps:$4 sm:$0xff]  }
 0x34c   : > { %v3519_v18 = vld [vmem:[#allocation4] sm:$0xf] }
 0x34d   : > { %v3525_v19 = vsel %vm3523_vm1, %v3519_v18, 0  ;;  %4677 = vmatpush1.bf16.msra.mxu0 %v6402_v10  ;;  %v6426_v18 = vld [vmem:[#allocation17 + $0xc0] ss:$16 sps:$4 sm:$0xff]   ;;  %v6455_v10 = vld [vmem:[#allocation17 + $0x14c] ss:$16 sps:$4 sm:$0xff]  }
 0x34e   : > { %5638 = vmatpush3.bf16.msra.mxu1 %v3525_v19  ;;  %4678 = vmatprep.subr.bf16.mxu0 %v6410_v11  ;;  %v6434_v19 = vld [vmem:[#allocation17 + $0xe4] ss:$16 sps:$4 sm:$0xff]   ;;  %v6453_v11 = vld [vmem:[#allocation17 + $0x148] ss:$16 sps:$4 sm:$0xff]  }
 0x34f   : > { %5649 = vmatprep.subr.bf16.mxu1 %v6894_v45 }
 0x351   : > { %4679 = vmatpush1.bf16.msra.mxu0 %v6408_v12  ;;  %v6458_v12 = vld [vmem:[#allocation17 + $0x164] ss:$16 sps:$4 sm:$0xff]  }
 0x352   : > { %4680 = vmatprep.subr.bf16.mxu0 %v6416_v13  ;;  %v6461_v13 = vld [vmem:[#allocation17 + $0x16c] ss:$16 sps:$4 sm:$0xff]  }
 0x355   : > { %4681 = vmatpush1.bf16.msra.mxu0 %v6414_v14  ;;  %v6456_v14 = vld [vmem:[#allocation17 + $0x160] ss:$16 sps:$4 sm:$0xff]  }
 0x356   : > { %4682 = vmatprep.subr.bf16.mxu0 %v6422_v15  ;;  %v6459_v15 = vld [vmem:[#allocation17 + $0x168] ss:$16 sps:$4 sm:$0xff]  }
 0x359   : > { %4683 = vmatpush1.bf16.msra.mxu0 %v6420_v16  ;;  %v6462_v16 = vld [vmem:[#allocation17 + $0x180] ss:$16 sps:$4 sm:$0xff]  }
 0x35a   : > { %4684 = vmatprep.subr.bf16.mxu0 %v6428_v17  ;;  %v6464_v17 = vld [vmem:[#allocation17 + $0x184] ss:$16 sps:$4 sm:$0xff]  }
 0x35d   : > { %4685 = vmatpush1.bf16.msra.mxu0 %v6426_v18  ;;  %v6465_v18 = vld [vmem:[#allocation17 + $0x188] ss:$16 sps:$4 sm:$0xff]  }
 0x35e   : > { %4686 = vmatprep.subr.bf16.mxu0 %v6434_v19  ;;  %v6467_v19 = vld [vmem:[#allocation17 + $0x18c] ss:$16 sps:$4 sm:$0xff]  }
 0x361   : > { %4687 = vmatpush1.bf16.msra.mxu0 %v6432_v20  ;;  %v6470_v20 = vld [vmem:[#allocation17 + $0x1a4] ss:$16 sps:$4 sm:$0xff]  }
 0x362   : > { %4688 = vmatprep.subr.bf16.mxu0 %v6440_v21  ;;  %v6473_v21 = vld [vmem:[#allocation17 + $0x1ac] ss:$16 sps:$4 sm:$0xff]  }
 0x3a7   : > { %v3497_v23 = vpop.f32.mrb[12].mxu0 }
 0x3a8   : > { %v3504_v24 = vsel %vm3503_vm2, -1e+30, %v3497_v23  ;;  %v5635_v25 = vpop.f32.mrb[13].mxu0  ;;  %v6438_v23 = vld [vmem:[#allocation17 + $0x100] ss:$16 sps:$4 sm:$0xff]  }
 0x3a9   : > { %v3500_v26 = vpop.f32.mrb[14].mxu0  ;;  %v3506_v27 = vsel %vm3505_vm3, %v3504_v24, -inf  ;;  %4689 = vmatpush1.bf16.msra.mxu0 %v6438_v23  ;;  %v6444_v25 = vld [vmem:[#allocation17 + $0x120] ss:$16 sps:$4 sm:$0xff]  }
 0x3aa   : > { %3507 = vmax.xlane.f32.xlu1 %v3506_v27  ;;  %v5636_v28 = vpop.f32.mrb[15].mxu0  ;;  %v6452_v26 = vld [vmem:[#allocation17 + $0x144] ss:$16 sps:$4 sm:$0xff]   ;;  %v6450_v27 = vld [vmem:[#allocation17 + $0x140] ss:$16 sps:$4 sm:$0xff]  }
 0x3ab   : > { %v6468_v23 = vld [vmem:[#allocation17 + $0x1a0] ss:$16 sps:$4 sm:$0xff]  }
 0x3af   : > { %v3606_v29 = vpop.f32.mrb[16].mxu0 }
 0x3b0   : > { %v3612_v30 = vsel %vm3503_vm2, -1e+30, %v3606_v29  ;;  %v5647_v31 = vpop.f32.mrb[17].mxu0 }
 0x3b1   : > { %v3609_v32 = vpop.f32.mrb[18].mxu0  ;;  %v3613_v33 = vsel %vm3505_vm3, %v3612_v30, -inf }
 0x3b2   : > { %3614 = vmax.xlane.f32.xlu1 %v3613_v33  ;;  %v5648_v34 = vpop.f32.mrb[19].mxu0  ;;  %v3626_v33 = vld [vmem:[#allocation4 + $0x4] sm:$0xf] }
 0x3b7   : > { %v3712_v35 = vpop.f32.mrb[20].mxu0 }
 0x3b8   : > { %v3718_v36 = vsel %vm3503_vm2, -1e+30, %v3712_v35  ;;  %v5659_v37 = vpop.f32.mrb[21].mxu0 }
 0x3b9   : > { %v3715_v38 = vpop.f32.mrb[22].mxu0  ;;  %v3719_v39 = vsel %vm3505_vm3, %v3718_v36, -inf }
 0x3ba   : > { %3720 = vmax.xlane.f32.xlu0 %v3719_v39  ;;  %v5660_v40 = vpop.f32.mrb[23].mxu0 }
 0x3bb   : > { %v3732_v40 = vld [vmem:[#allocation4 + $0x8] sm:$0xf] }
 0x3bf   : > { %v3818_v41 = vpop.f32.mrb[24].mxu0 }
 0x3c0   : > { %v3824_v42 = vsel %vm3503_vm2, -1e+30, %v3818_v41  ;;  %v5671_v43 = vpop.f32.mrb[25].mxu0 }
 0x3c1   : > { %v3821_v46 = vpop.f32.mrb[26].mxu0  ;;  %v3825_v47 = vsel %vm3505_vm3, %v3824_v42, -inf  ;;  %v3737_v43 = vsel %vm3523_vm1, %v3732_v40, 0 }
 0x3c2   : > { %3826 = vmax.xlane.f32.xlu1 %v3825_v47  ;;  %v5672_v48 = vpop.f32.mrb[27].mxu0 }
 0x437   : > { %v3508_v49 = vpop.xlane.xlu1 %3507 }
 0x438   : > { %v3509_v50 = vsub.f32 %v3504_v24, %v3508_v49  ;;  %v6446_v24 = vld [vmem:[#allocation17 + $0x124] ss:$16 sps:$4 sm:$0xff]   ;;  %v3838_v49 = vld [vmem:[#allocation4 + $0xc] sm:$0xf] }
 0x439   : > { %4690 = vmatprep.subr.bf16.mxu0 %v6446_v24  ;;  %v6471_v24 = vld [vmem:[#allocation17 + $0x1a8] ss:$16 sps:$4 sm:$0xff]  }
 0x43a   : > { %v3510_v51 = vmul.f32 1.442695, %v3509_v50  ;;  %4691 = vmatpush1.bf16.msra.mxu0 %v6444_v25  ;;  %v6474_v25 = vld [vmem:[#allocation17 + $0x1c0] ss:$16 sps:$4 sm:$0xff]  }
 0x43b   : > { %4692 = vmatprep.subr.bf16.mxu0 %v6452_v26  ;;  %v6476_v26 = vld [vmem:[#allocation17 + $0x1c4] ss:$16 sps:$4 sm:$0xff]  }
 0x43c   : > { %6586 = vpow2.f32 %v3510_v51  ;;  %v6395_v51 = vld [vmem:[#allocation17 + $0xc] ss:$16 sps:$4 sm:$0xff]  }
 0x43e   : > { %4693 = vmatpush1.bf16.msra.mxu0 %v6450_v27  ;;  %v6477_v27 = vld [vmem:[#allocation17 + $0x1c8] ss:$16 sps:$4 sm:$0xff]  }
 0x43f   : > { %v3615_v52 = vpop.xlane.xlu1 %3614  ;;  %4694 = vmatprep.subr.bf16.mxu0 %v6458_v12  ;;  %v6514_v12 = vld [vmem:[#allocation17 + $0x284] ss:$16 sps:$4 sm:$0xff]  }
 0x440   : > { %v3616_v53 = vsub.f32 %v3612_v30, %v3615_v52  ;;  %v3843_v52 = vsel %vm3523_vm1, %v3838_v49, 0 }
 0x442   : > { %v3617_v54 = vmul.f32 1.442695, %v3616_v53  ;;  %4695 = vmatpush1.bf16.msra.mxu0 %v6456_v14 }
 0x443   : > { %4696 = vmatprep.subr.bf16.mxu0 %v6464_v17  ;;  %v6517_v17 = vld [vmem:[#allocation17 + $0x288] ss:$16 sps:$4 sm:$0xff]  }
 0x444   : > { %6588 = vpow2.f32 %v3617_v54 }
 0x446   : > { %v7336_v55 = vpop.eup %6586  ;;  %4697 = vmatpush1.bf16.msra.mxu0 %v6462_v16 }
 0x447   : > { %v3721_v56 = vpop.xlane.xlu0 %3720  ;;  %v3512_v57 = vsel %vm3505_vm3, %v7336_v55, 0.0  ;;  %4698 = vmatprep.subr.bf16.mxu0 %v6470_v20  ;;  %v6520_v20 = vld [vmem:[#allocation17 + $0x2a0] ss:$16 sps:$4 sm:$0xff]  }
 0x448   : > { %v3722_v58 = vsub.f32 %v3718_v36, %v3721_v56  ;;  %3513 = vadd.xlane.f32.xlu1 %v3512_v57  ;;  %v3631_v36 = vsel %vm3523_vm1, %v3626_v33, 0  ;;  %v6393_v56 = vld [vmem:[#allocation17 + $0x8] ss:$16 sps:$4 sm:$0xff]   ;;  %v6490_v33 = vld [vmem:[#allocation17 + $0x204] ss:$16 sps:$4 sm:$0xff]  }
 0x44a   : > { %v3723_v59 = vmul.f32 1.442695, %v3722_v58  ;;  %v6401_v58 = vld [vmem:[#allocation17 + $0x2c] ss:$16 sps:$4 sm:$0xff]   ;;  %4699 = vmatpush1.bf16.msra.mxu0 %v6468_v23  ;;  %v6528_v23 = vld [vmem:[#allocation17 + $0x2c4] ss:$16 sps:$4 sm:$0xff]  }
 0x44b   : > { %4700 = vmatprep.subr.bf16.mxu0 %v6476_v26  ;;  %v6529_v26 = vld [vmem:[#allocation17 + $0x2c8] ss:$16 sps:$4 sm:$0xff]  }
 0x44c   : > { %6590 = vpow2.f32 %v3723_v59  ;;  %v6399_v59 = vld [vmem:[#allocation17 + $0x28] ss:$16 sps:$4 sm:$0xff]  }
 0x44e   : > { %v7340_v60 = vpop.eup %6588  ;;  %4701 = vmatpush1.bf16.msra.mxu0 %v6474_v25  ;;  %v6526_v25 = vld [vmem:[#allocation17 + $0x2c0] ss:$16 sps:$4 sm:$0xff]  }
 0x44f   : > { %v3827_v61 = vpop.xlane.xlu1 %3826  ;;  %v3619_v62 = vsel %vm3505_vm3, %v7340_v60, 0.0 }
 0x450   : > { %v3828_v63 = vsub.f32 %v3824_v42, %v3827_v61  ;;  %3620 = vadd.xlane.f32.xlu1 %v3619_v62  ;;  %v6405_v61 = vld [vmem:[#allocation17 + $0x48] ss:$16 sps:$4 sm:$0xff]   ;;  %v6413_v62 = vld [vmem:[#allocation17 + $0x6c] ss:$16 sps:$4 sm:$0xff]  }
 0x452   : > { %v3829_v0 = vmul.f32 1.442695, %v3828_v63  ;;  %v6419_v63 = vld [vmem:[#allocation17 + $0x8c] ss:$16 sps:$4 sm:$0xff]  }
 0x454   : > { %6592 = vpow2.f32 %v3829_v0  ;;  %v6417_v0 = vld [vmem:[#allocation17 + $0x88] ss:$16 sps:$4 sm:$0xff]  }
 0x456   : > { %v7344_v1 = vpop.eup %6590 }
 0x457   : > { %v3725_v2 = vsel %vm3505_vm3, %v7344_v1, 0.0 }
 0x458   : > { %3726 = vadd.xlane.f32.xlu1 %v3725_v2  ;;  %v6431_v2 = vld [vmem:[#allocation17 + $0xcc] ss:$16 sps:$4 sm:$0xff]  }
 0x45e   : > { %v7348_v3 = vpop.eup %6592 }
 0x45f   : > { %v3831_v4 = vsel %vm3505_vm3, %v7348_v3, 0.0 }
 0x460   : > { %3832 = vadd.xlane.f32.xlu1 %v3831_v4  ;;  %v6437_v4 = vld [vmem:[#allocation17 + $0xec] ss:$16 sps:$4 sm:$0xff]  }
 0x4d5   : > { %v3514_v28 = vpop.xlane.xlu1 %3513 }
 0x4d6   : > { %6594 = vrcp.f32 %v3514_v28  ;;  %v6479_v28 = vld [vmem:[#allocation17 + $0x1cc] ss:$16 sps:$4 sm:$0xff]  }
 0x4dd   : > { %v3621_v29 = vpop.xlane.xlu1 %3620 }
 0x4de   : > { %6596 = vrcp.f32 %v3621_v29  ;;  %v6482_v29 = vld [vmem:[#allocation17 + $0x1e4] ss:$16 sps:$4 sm:$0xff]  }
 0x4df   : > { %4702 = vmatprep.subr.bf16.mxu0 %v6482_v29  ;;  %v6532_v29 = vld [vmem:[#allocation17 + $0x2e0] ss:$16 sps:$4 sm:$0xff]  }
 0x4e0   : > { %v6595_v30 = vpop.eup %6594 }
 0x4e1   : > { %v3516_v31 = vmul.f32 %v6595_v30, %v7336_v55  ;;  %v6485_v30 = vld [vmem:[#allocation17 + $0x1ec] ss:$16 sps:$4 sm:$0xff]  }
 0x4e3   : > { %v3517_v32 = vmul.f32 %v3516_v31, %v7321_v22  ;;  %v6480_v31 = vld [vmem:[#allocation17 + $0x1e0] ss:$16 sps:$4 sm:$0xff]  }
 0x4e4   : > { %4703 = vmatpush1.bf16.msra.mxu0 %v6480_v31  ;;  %v6540_v31 = vld [vmem:[#allocation17 + $0x304] ss:$16 sps:$4 sm:$0xff]  }
 0x4e5   : > { %v3727_v34 = vpop.xlane.xlu1 %3726  ;;  %v3518_v35 = vpack.c.bf16 %v3517_v32, %v3517_v32  ;;  %v6483_v32 = vld [vmem:[#allocation17 + $0x1e8] ss:$16 sps:$4 sm:$0xff]   ;;  %4713 = vmatprep.subr.bf16.mxu0 %v6490_v33  ;;  %v6538_v33 = vld [vmem:[#allocation17 + $0x300] ss:$16 sps:$4 sm:$0xff]  }
 0x4e6   : > { %6598 = vrcp.f32 %v3727_v34  ;;  %v6493_v34 = vld [vmem:[#allocation17 + $0x20c] ss:$16 sps:$4 sm:$0xff]  }
 0x4e7   : > { %5640 = vmatmul.mubr.msk.bf16.vlgmr.msra.gmra.mrb[12].mxu1 %vm3505_vm3, %v3518_v35 }
 0x4e8   : > { %v6597_v37 = vpop.eup %6596  ;;  %5650 = vmatpush3.bf16.msra.mxu1 %v3631_v36  ;;  %5651 = vmatprep.mubr.msk.bf16.mxu1 %vm6895_vm0, %v6894_v45 }
 0x4e9   : > { %v3623_v38 = vmul.f32 %v6597_v37, %v7340_v60  ;;  %5661 = vmatprep.subr.bf16.mxu1 %v6894_v45  ;;  %v6407_v60 = vld [vmem:[#allocation17 + $0x4c] ss:$16 sps:$4 sm:$0xff]  }
 0x4eb   : > { %v3624_v39 = vmul.f32 %v3623_v38, %v7321_v22 }
 0x4ed   : > { %v3833_v41 = vpop.xlane.xlu1 %3832  ;;  %v3625_v42 = vpack.c.bf16 %v3624_v39, %v3624_v39 }
 0x4ee   : > { %6600 = vrcp.f32 %v3833_v41 }
 0x4ef   : > { %5652 = vmatmul.mubr.msk.bf16.vlgmr.msra.gmra.mrb[16].mxu1 %vm3505_vm3, %v3625_v42 }
 0x4f0   : > { %v6599_v46 = vpop.eup %6598  ;;  %5662 = vmatpush3.bf16.msra.mxu1 %v3737_v43  ;;  %5663 = vmatprep.mubr.msk.bf16.mxu1 %vm6895_vm0, %v6894_v45 }
 0x4f1   : > { %v3729_v47 = vmul.f32 %v6599_v46, %v7344_v1  ;;  %5673 = vmatprep.subr.bf16.mxu1 %v6894_v45  ;;  %v6423_v1 = vld [vmem:[#allocation17 + $0xa8] ss:$16 sps:$4 sm:$0xff]  }
 0x4f3   : > { %v3730_v48 = vmul.f32 %v3729_v47, %v7321_v22 }
 0x4f5   : > { %v3731_v50 = vpack.c.bf16 %v3730_v48, %v3730_v48 }
 0x4f7   : > { %5664 = vmatmul.mubr.msk.bf16.vlgmr.msra.gmra.mrb[20].mxu1 %vm3505_vm3, %v3731_v50 }
 0x4f8   : > { %v6601_v53 = vpop.eup %6600  ;;  %5674 = vmatpush3.bf16.msra.mxu1 %v3843_v52  ;;  %5675 = vmatprep.mubr.msk.bf16.mxu1 %vm6895_vm0, %v6894_v45  ;;  %v6411_v45 = vld [vmem:[#allocation17 + $0x68] ss:$16 sps:$4 sm:$0xff]  }
 0x4f9   : > { %v3835_v54 = vmul.f32 %v6601_v53, %v7348_v3  ;;  %4754 = vmatprep.subr.bf16.mxu1 %v6395_v51  ;;  %v6429_v3 = vld [vmem:[#allocation17 + $0xc8] ss:$16 sps:$4 sm:$0xff]  }
 0x4fb   : > { %v3836_v55 = vmul.f32 %v3835_v54, %v7321_v22  ;;  %v6425_v22 = vld [vmem:[#allocation17 + $0xac] ss:$16 sps:$4 sm:$0xff]  }
 0x4fd   : > { %v3837_v57 = vpack.c.bf16 %v3836_v55, %v3836_v55 }
 0x4ff   : > { %5676 = vmatmul.mubr.msk.bf16.vlgmr.msra.gmra.mrb[24].mxu1 %vm3505_vm3, %v3837_v57 }
 0x500   : > { %4755 = vmatpush1.bf16.msra.mxu1 %v6393_v56 }
 0x501   : > { %4756 = vmatprep.subr.bf16.mxu1 %v6401_v58  ;;  %v6488_v58 = vld [vmem:[#allocation17 + $0x200] ss:$16 sps:$4 sm:$0xff]  }
 0x504   : > { %4757 = vmatpush1.bf16.msra.mxu1 %v6399_v59  ;;  %v6491_v59 = vld [vmem:[#allocation17 + $0x208] ss:$16 sps:$4 sm:$0xff]  }
 0x505   : > { %4758 = vmatprep.subr.bf16.mxu1 %v6407_v60  ;;  %v6496_v60 = vld [vmem:[#allocation17 + $0x224] ss:$16 sps:$4 sm:$0xff]  }
 0x508   : > { %4759 = vmatpush1.bf16.msra.mxu1 %v6405_v61  ;;  %v6499_v61 = vld [vmem:[#allocation17 + $0x22c] ss:$16 sps:$4 sm:$0xff]  }
 0x509   : > { %4760 = vmatprep.subr.bf16.mxu1 %v6413_v62 }
 0x50c   : > { %4761 = vmatpush1.bf16.msra.mxu1 %v6411_v45 }
 0x50d   : > { %4762 = vmatprep.subr.bf16.mxu1 %v6419_v63 }
 0x510   : > { %4763 = vmatpush1.bf16.msra.mxu1 %v6417_v0  ;;  %v6494_v0 = vld [vmem:[#allocation17 + $0x220] ss:$16 sps:$4 sm:$0xff]  }
 0x511   : > { %4764 = vmatprep.subr.bf16.mxu1 %v6425_v22  ;;  %v6497_v22 = vld [vmem:[#allocation17 + $0x228] ss:$16 sps:$4 sm:$0xff]  }
 0x514   : > { %4765 = vmatpush1.bf16.msra.mxu1 %v6423_v1 }
 0x515   : > { %4766 = vmatprep.subr.bf16.mxu1 %v6431_v2  ;;  %v6502_v2 = vld [vmem:[#allocation17 + $0x244] ss:$16 sps:$4 sm:$0xff]  }
 0x518   : > { %4767 = vmatpush1.bf16.msra.mxu1 %v6429_v3  ;;  %v6505_v3 = vld [vmem:[#allocation17 + $0x24c] ss:$16 sps:$4 sm:$0xff]  }
 0x519   : > { %4768 = vmatprep.subr.bf16.mxu1 %v6437_v4 }
 0x51c   : > { %4769 = vmatpush1.bf16.msra.mxu1 %v6435_v5 }
 0x51d   : > { %4770 = vmatprep.subr.bf16.mxu1 %v6443_v6  ;;  %v6500_v6 = vld [vmem:[#allocation17 + $0x240] ss:$16 sps:$4 sm:$0xff]  }
 0x520   : > { %4771 = vmatpush1.bf16.msra.mxu1 %v6441_v7  ;;  %v6503_v7 = vld [vmem:[#allocation17 + $0x248] ss:$16 sps:$4 sm:$0xff]  }
 0x521   : > { %4772 = vmatprep.subr.bf16.mxu1 %v6449_v8  ;;  %v6508_v8 = vld [vmem:[#allocation17 + $0x264] ss:$16 sps:$4 sm:$0xff]  }
 0x524   : > { %4773 = vmatpush1.bf16.msra.mxu1 %v6447_v9  ;;  %v6511_v9 = vld [vmem:[#allocation17 + $0x26c] ss:$16 sps:$4 sm:$0xff]  }
 0x525   : > { %4774 = vmatprep.subr.bf16.mxu1 %v6455_v10  ;;  %v6506_v10 = vld [vmem:[#allocation17 + $0x260] ss:$16 sps:$4 sm:$0xff]  }
 0x528   : > { %4775 = vmatpush1.bf16.msra.mxu1 %v6453_v11  ;;  %v6509_v11 = vld [vmem:[#allocation17 + $0x268] ss:$16 sps:$4 sm:$0xff]  }
 0x529   : > { %4776 = vmatprep.subr.bf16.mxu1 %v6461_v13  ;;  %v6519_v13 = vld [vmem:[#allocation17 + $0x28c] ss:$16 sps:$4 sm:$0xff]  }
 0x52c   : > { %4777 = vmatpush1.bf16.msra.mxu1 %v6459_v15  ;;  %v6512_v15 = vld [vmem:[#allocation17 + $0x280] ss:$16 sps:$4 sm:$0xff]  }
 0x52d   : > { %4778 = vmatprep.subr.bf16.mxu1 %v6467_v19  ;;  %v6525_v19 = vld [vmem:[#allocation17 + $0x2ac] ss:$16 sps:$4 sm:$0xff]  }
 0x530   : > { %4779 = vmatpush1.bf16.msra.mxu1 %v6465_v18  ;;  %v6522_v18 = vld [vmem:[#allocation17 + $0x2a4] ss:$16 sps:$4 sm:$0xff]  }
 0x531   : > { %4780 = vmatprep.subr.bf16.mxu1 %v6473_v21  ;;  %v6523_v21 = vld [vmem:[#allocation17 + $0x2a8] ss:$16 sps:$4 sm:$0xff]  }
 0x534   : > { %4781 = vmatpush1.bf16.msra.mxu1 %v6471_v24  ;;  %v6531_v24 = vld [vmem:[#allocation17 + $0x2cc] ss:$16 sps:$4 sm:$0xff]  }
 0x535   : > { %4782 = vmatprep.subr.bf16.mxu1 %v6479_v28  ;;  %v6537_v28 = vld [vmem:[#allocation17 + $0x2ec] ss:$16 sps:$4 sm:$0xff]  }
 0x538   : > { %4783 = vmatpush1.bf16.msra.mxu1 %v6477_v27  ;;  %v6534_v27 = vld [vmem:[#allocation17 + $0x2e4] ss:$16 sps:$4 sm:$0xff]  }
 0x539   : > { %4784 = vmatprep.subr.bf16.mxu1 %v6485_v30  ;;  %v6535_v30 = vld [vmem:[#allocation17 + $0x2e8] ss:$16 sps:$4 sm:$0xff]  }
 0x53c   : > { %4785 = vmatpush1.bf16.msra.mxu1 %v6483_v32  ;;  %v6543_v32 = vld [vmem:[#allocation17 + $0x30c] ss:$16 sps:$4 sm:$0xff]  }
 0x53d   : > { %4795 = vmatprep.subr.bf16.mxu1 %v6493_v34  ;;  %v6541_v34 = vld [vmem:[#allocation17 + $0x308] ss:$16 sps:$4 sm:$0xff]  }
 0x5ba   : > { %v3561_v35 = vpop.f32.mrb[12].mxu1 }
 0x5bb   : > { %v3567_v36 = vmul.f32 %v3561_v35, %v7289_v44  ;;  %v5641_v37 = vpop.f32.mrb[13].mxu1  ;;  %v6546_v35 = vld [vmem:[#allocation17 + $0x324] ss:$16 sps:$4 sm:$0xff]  }
 0x5bc   : > { %v3564_v38 = vpop.f32.mrb[14].mxu1  ;;  %v6544_v37 = vld [vmem:[#allocation17 + $0x320] ss:$16 sps:$4 sm:$0xff]  }
 0x5bd   : > { %v3568_v39 = vpack.c.bf16 %v3567_v36, %v3567_v36  ;;  %v5642_v40 = vpop.f32.mrb[15].mxu1  ;;  %v6549_v36 = vld [vmem:[#allocation17 + $0x32c] ss:$16 sps:$4 sm:$0xff]   ;;  %v6547_v38 = vld [vmem:[#allocation17 + $0x328] ss:$16 sps:$4 sm:$0xff]  }
 0x5be   : > { %v6555_v40 = vld [vmem:[#allocation17 + $0x34c] ss:$16 sps:$4 sm:$0xff]  }
 0x5bf   : > { %3569 = vst [vmem:[#allocation5] sm:$0xf] %v3568_v39  ;;  %v6552_v39 = vld [vmem:[#allocation17 + $0x344] ss:$16 sps:$4 sm:$0xff]  }
 0x5c2   : > { %v3667_v41 = vpop.f32.mrb[16].mxu1 }
 0x5c3   : > { %v3673_v42 = vmul.f32 %v3667_v41, %v7289_v44  ;;  %v5653_v43 = vpop.f32.mrb[17].mxu1  ;;  %v6550_v41 = vld [vmem:[#allocation17 + $0x340] ss:$16 sps:$4 sm:$0xff]  }
 0x5c4   : > { %v3670_v46 = vpop.f32.mrb[18].mxu1  ;;  %v6558_v43 = vld [vmem:[#allocation17 + $0x364] ss:$16 sps:$4 sm:$0xff]  }
 0x5c5   : > { %v3674_v47 = vpack.c.bf16 %v3673_v42, %v3673_v42  ;;  %v5654_v48 = vpop.f32.mrb[19].mxu1  ;;  %v6553_v42 = vld [vmem:[#allocation17 + $0x348] ss:$16 sps:$4 sm:$0xff]   ;;  %v6561_v46 = vld [vmem:[#allocation17 + $0x36c] ss:$16 sps:$4 sm:$0xff]  }
 0x5c6   : > { %v6559_v48 = vld [vmem:[#allocation17 + $0x368] ss:$16 sps:$4 sm:$0xff]  }
 0x5c7   : > { %3675 = vst [vmem:[#allocation5 + $0x4] sm:$0xf] %v3674_v47  ;;  %v6556_v47 = vld [vmem:[#allocation17 + $0x360] ss:$16 sps:$4 sm:$0xff]  }
 0x5ca   : > { %v3773_v49 = vpop.f32.mrb[20].mxu1 }
 0x5cb   : > { %v3779_v50 = vmul.f32 %v3773_v49, %v7289_v44  ;;  %v5665_v51 = vpop.f32.mrb[21].mxu1  ;;  %v6564_v49 = vld [vmem:[#allocation17 + $0x384] ss:$16 sps:$4 sm:$0xff]  }
 0x5cc   : > { %v3776_v52 = vpop.f32.mrb[22].mxu1  ;;  %v6562_v51 = vld [vmem:[#allocation17 + $0x380] ss:$16 sps:$4 sm:$0xff]  }
 0x5cd   : > { %v3780_v53 = vpack.c.bf16 %v3779_v50, %v3779_v50  ;;  %v5666_v54 = vpop.f32.mrb[23].mxu1  ;;  %v6567_v50 = vld [vmem:[#allocation17 + $0x38c] ss:$16 sps:$4 sm:$0xff]   ;;  %v6565_v52 = vld [vmem:[#allocation17 + $0x388] ss:$16 sps:$4 sm:$0xff]  }
 0x5ce   : > { %v3888_v55 = vld [vmem:[#allocation5] sm:$0xff]  ;;  %v6573_v54 = vld [vmem:[#allocation17 + $0x3ac] ss:$16 sps:$4 sm:$0xff]  }
 0x5cf   : > { %3781 = vst [vmem:[#allocation5 + $0x8] sm:$0xf] %v3780_v53  ;;  %v5468_v56 = vcombine.low %v3888_v55, %v3888_v55  ;;  %v5469_v57 = vcombine.high %v3888_v55, %v3888_v55  ;;  %v6570_v53 = vld [vmem:[#allocation17 + $0x3a4] ss:$16 sps:$4 sm:$0xff]   ;;  %v6568_v55 = vld [vmem:[#allocation17 + $0x3a0] ss:$16 sps:$4 sm:$0xff]  }
 0x5d1   : > { %4704 = vmatprep.mubr.bf16.mxu0 %v5469_v57  ;;  %4786 = vmatprep.mubr.bf16.mxu1 %v5469_v57  ;;  %v6576_v57 = vld [vmem:[#allocation17 + $0x3c4] ss:$16 sps:$4 sm:$0xff]  }
 0x5d2   : > { %v3879_v62 = vpop.f32.mrb[24].mxu1  ;;  %4705 = vmatmul.mubr.bf16.vlgmr.msra.gmra.mrb[28].mxu0 %v5468_v56  ;;  %4787 = vmatmul.mubr.bf16.vlgmr.msra.gmra.mrb[28].mxu1 %v5468_v56  ;;  %v6571_v56 = vld [vmem:[#allocation17 + $0x3a8] ss:$16 sps:$4 sm:$0xff]  }
 0x5d3   : > { %v3885_v45 = vmul.f32 %v3879_v62, %v7289_v44  ;;  %4714 = vmatpush1.bf16.msra.mxu0 %v6488_v58  ;;  %4796 = vmatpush1.bf16.msra.mxu1 %v6491_v59  ;;  %v5677_v63 = vpop.f32.mrb[25].mxu1  ;;  %v6579_v58 = vld [vmem:[#allocation17 + $0x3cc] ss:$16 sps:$4 sm:$0xff]   ;;  %v6574_v59 = vld [vmem:[#allocation17 + $0x3c0] ss:$16 sps:$4 sm:$0xff]  }
 0x5d4   : > { %v3882_v1 = vpop.f32.mrb[26].mxu1  ;;  %4715 = vmatprep.subr.bf16.mxu0 %v6496_v60  ;;  %4797 = vmatprep.subr.bf16.mxu1 %v6499_v61  ;;  %v6577_v60 = vld [vmem:[#allocation17 + $0x3c8] ss:$16 sps:$4 sm:$0xff]   ;;  %v6582_v61 = vld [vmem:[#allocation17 + $0x3e4] ss:$16 sps:$4 sm:$0xff]  }
 0x5d5   : > { %v3886_v4 = vpack.c.bf16 %v3885_v45, %v3885_v45  ;;  %v5678_v5 = vpop.f32.mrb[27].mxu1  ;;  %v6585_v62 = vld [vmem:[#allocation17 + $0x3ec] ss:$16 sps:$4 sm:$0xff]   ;;  %v6580_v45 = vld [vmem:[#allocation17 + $0x3e0] ss:$16 sps:$4 sm:$0xff]  }
 0x5d6   : > { %v6583_v63 = vld [vmem:[#allocation17 + $0x3e8] ss:$16 sps:$4 sm:$0xff]  }
 0x5d7   : > { %3887 = vst [vmem:[#allocation5 + $0xc] sm:$0xf] %v3886_v4  ;;  %4716 = vmatpush1.bf16.msra.mxu0 %v6494_v0  ;;  %4798 = vmatpush1.bf16.msra.mxu1 %v6497_v22 }
 0x5d8   : > { %4717 = vmatprep.subr.bf16.mxu0 %v6502_v2  ;;  %4799 = vmatprep.subr.bf16.mxu1 %v6505_v3 }
 0x5db   : > { %4718 = vmatpush1.bf16.msra.mxu0 %v6500_v6  ;;  %4800 = vmatpush1.bf16.msra.mxu1 %v6503_v7 }
 0x5dc   : > { %4719 = vmatprep.subr.bf16.mxu0 %v6508_v8  ;;  %4801 = vmatprep.subr.bf16.mxu1 %v6511_v9 }
 0x5de   : > { %v7379_v14 = vld [vmem:[#allocation5 + $0x8] sm:$0xff] }
 0x5df   : > { %4720 = vmatpush1.bf16.msra.mxu0 %v6506_v10  ;;  %4802 = vmatpush1.bf16.msra.mxu1 %v6509_v11  ;;  %v5471_v16 = vcombine.high %v7379_v14, %v7379_v14  ;;  %v5470_v0 = vcombine.low %v7379_v14, %v7379_v14 }
 0x5e0   : > { %4721 = vmatprep.subr.bf16.mxu0 %v6514_v12  ;;  %4803 = vmatprep.subr.bf16.mxu1 %v6519_v13 }
 0x5e1   : > { %4745 = vmatprep.mubr.bf16.mxu0 %v5471_v16  ;;  %4827 = vmatprep.mubr.bf16.mxu1 %v5471_v16 }
 0x5e3   : > { %4722 = vmatpush1.bf16.msra.mxu0 %v6512_v15  ;;  %4804 = vmatpush1.bf16.msra.mxu1 %v6517_v17 }
 0x5e4   : > { %4723 = vmatprep.subr.bf16.mxu0 %v6522_v18  ;;  %4805 = vmatprep.subr.bf16.mxu1 %v6525_v19 }
 0x5e7   : > { %4724 = vmatpush1.bf16.msra.mxu0 %v6520_v20  ;;  %4806 = vmatpush1.bf16.msra.mxu1 %v6523_v21 }
 0x5e8   : > { %4725 = vmatprep.subr.bf16.mxu0 %v6528_v23  ;;  %4807 = vmatprep.subr.bf16.mxu1 %v6531_v24 }
 0x5eb   : > { %4726 = vmatpush1.bf16.msra.mxu0 %v6526_v25  ;;  %4808 = vmatpush1.bf16.msra.mxu1 %v6529_v26 }
 0x5ec   : > { %4727 = vmatprep.subr.bf16.mxu0 %v6534_v27  ;;  %4809 = vmatprep.subr.bf16.mxu1 %v6537_v28 }
 0x5ef   : > { %4728 = vmatpush1.bf16.msra.mxu0 %v6532_v29  ;;  %4810 = vmatpush1.bf16.msra.mxu1 %v6535_v30 }
 0x5f0   : > { %4729 = vmatprep.subr.bf16.mxu0 %v6540_v31  ;;  %4811 = vmatprep.subr.bf16.mxu1 %v6543_v32 }
 0x5f3   : > { %4730 = vmatpush1.bf16.msra.mxu0 %v6538_v33  ;;  %4812 = vmatpush1.bf16.msra.mxu1 %v6541_v34 }
 0x5f4   : > { %4731 = vmatprep.subr.bf16.mxu0 %v6546_v35  ;;  %4813 = vmatprep.subr.bf16.mxu1 %v6549_v36 }
 0x5f7   : > { %4732 = vmatpush1.bf16.msra.mxu0 %v6544_v37  ;;  %4814 = vmatpush1.bf16.msra.mxu1 %v6547_v38 }
 0x5f8   : > { %4733 = vmatprep.subr.bf16.mxu0 %v6552_v39  ;;  %4815 = vmatprep.subr.bf16.mxu1 %v6555_v40 }
 0x5fb   : > { %4734 = vmatpush1.bf16.msra.mxu0 %v6550_v41  ;;  %4816 = vmatpush1.bf16.msra.mxu1 %v6553_v42 }
 0x5fc   : > { %4735 = vmatprep.subr.bf16.mxu0 %v6558_v43  ;;  %4817 = vmatprep.subr.bf16.mxu1 %v6561_v46 }
 0x5ff   : > { %4736 = vmatpush1.bf16.msra.mxu0 %v6556_v47  ;;  %4818 = vmatpush1.bf16.msra.mxu1 %v6559_v48 }
 0x600   : > { %4737 = vmatprep.subr.bf16.mxu0 %v6564_v49  ;;  %4819 = vmatprep.subr.bf16.mxu1 %v6567_v50 }
 0x603   : > { %4738 = vmatpush1.bf16.msra.mxu0 %v6562_v51  ;;  %4820 = vmatpush1.bf16.msra.mxu1 %v6565_v52 }
 0x604   : > { %4739 = vmatprep.subr.bf16.mxu0 %v6570_v53  ;;  %4821 = vmatprep.subr.bf16.mxu1 %v6573_v54 }
 0x607   : > { %4740 = vmatpush1.bf16.msra.mxu0 %v6568_v55  ;;  %4822 = vmatpush1.bf16.msra.mxu1 %v6571_v56 }
 0x608   : > { %4741 = vmatprep.subr.bf16.mxu0 %v6576_v57  ;;  %4823 = vmatprep.subr.bf16.mxu1 %v6579_v58 }
 0x60b   : > { %4742 = vmatpush1.bf16.msra.mxu0 %v6574_v59  ;;  %4824 = vmatpush1.bf16.msra.mxu1 %v6577_v60 }
 0x60c   : > { %4743 = vmatprep.subr.bf16.mxu0 %v6582_v61  ;;  %4825 = vmatprep.subr.bf16.mxu1 %v6585_v62 }
 0x60f   : > { %4744 = vmatpush1.bf16.msra.mxu0 %v6580_v45  ;;  %4826 = vmatpush1.bf16.msra.mxu1 %v6583_v63 }
 0x612   : > { %4746 = vmatmul.mubr.bf16.vlgmr.msra.gmra.mrb[28].mxu0 %v5470_v0  ;;  %4828 = vmatmul.mubr.bf16.vlgmr.msra.gmra.mrb[28].mxu1 %v5470_v0 }
 0x6e5   : > { %v4747_v22 = vpop.f32.mrb[28].mxu0  ;;  %v4829_v1 = vpop.f32.mrb[28].mxu1 }
 0x6e6   : > { %v4836_v2 = vmul.f32 %v4747_v22, %v7289_v44  ;;  %v4838_v3 = vmul.f32 %v4829_v1, %v7289_v44  ;;  %v4749_v4 = vpop.f32.mrb[29].mxu0  ;;  %v4831_v5 = vpop.f32.mrb[29].mxu1 }
 0x6e7   : > { %v4837_v6 = vmul.f32 %v4749_v4, %v7289_v44  ;;  %v4839_v7 = vmul.f32 %v4831_v5, %v7289_v44  ;;  %v4751_v8 = vpop.f32.mrb[30].mxu0  ;;  %v4833_v9 = vpop.f32.mrb[30].mxu1 }
 0x6e8   : > { %4840 = vst [vmem:[%s545_s5] sm:$0xff] %v4836_v2  ;;  %4842 = vst [vmem:[%s545_s5 + $0x10] sm:$0xff] %v4838_v3  ;;  %v4752_v10 = vpop.f32.mrb[31].mxu0  ;;  %v4834_v11 = vpop.f32.mrb[31].mxu1 }
 0x6e9   : > { %4841 = vst [vmem:[%s545_s5 + $0x8] sm:$0xff] %v4837_v6  ;;  %4843 = vst [vmem:[%s545_s5 + $0x18] sm:$0xff] %v4839_v7 }
 0x6ea   : > { %6817 = shalt.err (!%p6814_p10)
}
 0x6eb   : > { %s6818_s17 = scalar_lea.hbm %s7394_s27, 512  ;;  %s6822_s8 = scalar_lea.hbm %s7514_s3, 1024 }
 0x6ec   : > { %p6819_p3 = scmp.ne.s32.totalorder %s7394_s27, %s6818_s17  ;;  %p6823_p0 = scmp.lt.u32.totalorder %s7394_s27, %s7514_s3 }
 0x6ed   : > { %p6824_p7 = scmp.lt.u32.totalorder %s6822_s8, %s6818_s17  ;;  %p6826_p13 = scmp.lt.u32.totalorder %s6818_s17, %s7394_s27 }
 0x6ee   : > { %p6820_p8 = pnand %p6819_p3, %p7515_p11 }
 0x6ef   : > { %p6825_p9 = por %p6824_p7, %p6823_p0 }
 0x6f0   : > { %p6821_p12 = pneg %p6820_p8 }
 0x6f1   : > { %p6827_p1 = por %p6826_p13, %p6825_p9 }
 0x6f3   : > { %p6828_p6 = pnand %p6827_p1, %p6821_p12 }
 0x6f5   : > { %6831 = shalt.err (!%p6828_p6)
}
 0x6f6   : > { %5733 = dma.vmem_to_hbm [thread:$0]  (%p7515_p11), %s7396_s29, 512, %s7394_s27, %s4845_s12  }
 0x6f7 PF: > { %s7516_s16 = sld [smem:[#allocation24_spill]]  ;;  %s7517_s28 = sld [smem:[#allocation29_spill]] }
 0x6f8   : > { %s7518_s10 = sld [smem:[#allocation25_spill]] }
 0x6fd   : > { %s4871_s24 = sand.u32 1, %s7516_s16   ;;  %p7519_p5 = scmp.ne.s32.totalorder %s7517_s28, 0 }
 0x6fe   : > { %p7520_p2 = scmp.ge.s32.totalorder %s7518_s10, 2  ;;  %s4872_s13 = scalar_lea.sflag [#allocation8], %s4871_s24 }
 0x700   : > { %p5759_p4 = pnand %p7520_p2, %p7519_p5 }
 0x702   : > { %6865 = dma.done.wait (!%p5759_p4), %s4872_s13, 512  }
 0x703   : > { %6867 = vsyncadd (!%p5759_p4), %s4872_s13, 4294966784  ;;  %s7521_s16 = sld [smem:[#allocation26_spill]]  ;;  %s7522_s30 = sld [smem:[#allocation27_spill]] }
 0x704   : > { %s7523_s13 = smov %s6874_s14  ;;  %s7524_s14 = smov %s6878_s15 }
 0x709   : > { %p28_p10 = scmp.ge.s32.totalorder %s7521_s16, 4   ;;  %s7525_s15 = smov %s7522_s30 }
 0x70b   :  { %30 = sbr.rel (!%p28_p10) target bundleno = 16 (0x10), region = 154 }
 0x712   :  { %4877 = vsyncpa [#allocation7], 1 }
 0x713   :  { %4879 = vsyncpa [#allocation7 + $0x1], 1 }
 0x714   :  { %4880 = vsyncpa [#allocation10], 1 }
 0x715   :  { %4882 = vsyncpa [#allocation10 + $0x1], 1 }
 0x716   :  { %4883 = vsyncpa [#allocation13], 1 }
 0x717   :  { %4884 = vsyncpa [#allocation16], 1 }
 0x718   :  { %4885 = vsyncpa [#allocation8], 1 }
 0x719   :  { %4887 = vsyncpa [#allocation8 + $0x1], 1 }

// kernel: tpu_custom_call.1
= control target key start
LH: loop header
LB: loop body
LE: loop exit
PB: predicated region body
PF: predicated region fallthrough
CT: control target
= control target key end

     0   :  { %s7438_s0 = inlined_call_operand.hbm [shape: f32[2,8,512], index: 0, kind: input, shape index: {}]   ;;  %s7439_s1 = inlined_call_operand.hbm [shape: f32[2,8,512], index: 1, kind: input, shape index: {}]   ;;  %s7440_s2 = inlined_call_operand.hbm [shape: f32[2,8,512], index: 2, kind: input, shape index: {}]   ;;  %s7441_s3 = inlined_call_operand.vmem [shape: f32[2,8,1], index: 3, kind: input, shape index: {}]   ;;  %s7442_s4 = inlined_call_operand.vmem [shape: f32[2,8,1], index: 4, kind: input, shape index: {}]   ;;  %s7443_s5 = inlined_call_operand.vmem [shape: s8[2,8,8], index: 5, kind: input, shape index: {}]   ;;  %s7444_s6 = inlined_call_operand.hbm [shape: bf16[512,512], index: 6, kind: input, shape index: {}]   ;;  %s7445_s7 = inlined_call_operand.hbm [shape: bf16[512,512], index: 7, kind: input, shape index: {}]   ;;  %s7446_s8 = inlined_call_operand.hbm [shape: bf16[512,512], index: 8, kind: input, shape index: {}]   ;;  %s7447_s9 = inlined_call_operand.hbm [shape: bf16[512,512], index: 9, kind: input, shape index: {}]   ;;  %s7448_s10 = inlined_call_operand.hbm [shape: f32[2,8,512], index: 10, kind: output, shape index: {}]  }
   0x1   :  { %7474 = sst [smem:[#allocation30_spill]] %s7439_s1 }
   0x2   :  { %7475 = sst [smem:[#allocation31_spill]] %s7441_s3 }
   0x3   :  { %7476 = sst [smem:[#allocation32_spill]] %s7443_s5 }
   0x4   :  { %7477 = sst [smem:[#allocation33_spill]] %s7444_s6 }
   0x5   :  { %7478 = sst [smem:[#allocation34_spill]] %s7446_s8 }
   0x6   :  { %7479 = sst [smem:[#allocation35_spill]] %s7448_s10 }
   0x7   :  { %15 = vsyncpa [#allocation7], 0 }
   0x8   :  { %17 = vsyncpa [#allocation7 + $0x1], 0 }
   0x9   :  { %18 = vsyncpa [#allocation10], 0 }
   0xa   :  { %20 = vsyncpa [#allocation10 + $0x1], 0 }
   0xb   :  { %21 = vsyncpa [#allocation13], 0 }
   0xc   :  { %22 = vsyncpa [#allocation16], 0 }
   0xd   :  { %23 = vsyncpa [#allocation8], 0 }
   0xe   :  { %25 = vsyncpa [#allocation8 + $0x1], 0  ;;  %s6952_s13 = smov 0   ;;  %s6954_s14 = smov 0  }
   0xf   :  { %s6956_s15 = smov 0   ;;  %s6958_s16 = smov 0  }
  0x10 LB: > { %7480 = sst [smem:[#allocation24_spill]] %s6870_s13  ;;  %s6884_s17 = smov [#allocation12]   ;;  %s6882_s16 = sphi %s6958_s16, %s7521_s16   ;;  %s6878_s15 = sphi %s6956_s15, %s7525_s15   ;;  %s6874_s14 = sphi %s6954_s14, %s7524_s14   ;;  %s6870_s13 = sphi %s6952_s13, %s7523_s13  }
  0x11   : > { %7481 = sst [smem:[#allocation25_spill]] %s6882_s16  ;;  %s314_s18 = sshll.u32 %s6884_s17, 4  ;;  %s6978_s18 = int_to_ptr.vmem [resolvable:$true] %s314_s18 }
  0x12   : > { %s6973_s19 = sadd.s32 4294967295, %s6882_s16   ;;  %p5047_p0 = scmp.ge.s32.totalorder %s6882_s16, 1 }
  0x13   : > { %p7461_p1 = scmp.eq.s32.totalorder %s6973_s19, 0  ;;  %p302_p2 = scmp.lt.s32.totalorder %s6882_s16, 3 }
  0x14   : > { %s6885_s21 = smov [#allocation15]   ;;  %s7484_s6 = sld [smem:[#allocation33_spill]] }
  0x15   : > { %p6980_p3 = pnand %p5047_p0, %p302_p2  ;;  %s340_s22 = sshll.u32 %s6885_s21, 4  ;;  %s6993_s22 = int_to_ptr.vmem [resolvable:$true] %s340_s22 }
  0x17   : > { %s7482_s20 = scalar_select %p6980_p3, 1, 0 }
  0x18   : > { %p5735_p5 = pneg %p6980_p3 }
  0x1a   : > { %p6989_p6 = pnand %p5735_p5, %p7461_p1  ;;  %s6602_s26 = scalar_lea.hbm %s7484_s6, 16384 }
  0x1b   : > { %p6603_p7 = scmp.ne.s32.totalorder %s7484_s6, %s6602_s26  ;;  %p6609_p11 = scmp.lt.u32.totalorder %s6602_s26, %s7484_s6 }
  0x1c   : > { %s7483_s23 = scalar_select %p6989_p6, 1, 0 }
  0x1d   : > { %p7003_p8 = pneg %p6989_p6 }
  0x1f   : > { %s7485_s29 = scalar_select %p7003_p8, 1, 0 }
  0x20   : > { %p6605_p9 = pnand %p7003_p8, %p6603_p7 }
  0x22   : > { %p6606_p10 = pneg %p6605_p9 }
  0x24   : > { %p6611_p12 = pnand %p6609_p11, %p6606_p10 }
  0x26   : > { %6614 = shalt.err (!%p6611_p12)
}
  0x27   : > { %s6615_s12 = scalar_lea.vmem %s6978_s18, 16384  ;;  %p6623_p5 = scmp.lt.s32.totalorder %s6978_s18, %s6978_s18 }
  0x28   : > { %p6616_p13 = scmp.ne.s32.totalorder %s6978_s18, %s6615_s12  ;;  %p6624_p4 = scmp.lt.s32.totalorder %s6615_s12, %s6615_s12 }
  0x2a   : > { %p6618_p0 = pnand %p6616_p13, %p7003_p8  ;;  %p6625_p7 = por %p6624_p4, %p6623_p5 }
  0x2c   : > { %p6619_p2 = pneg %p6618_p0 }
  0x2e   : > { %p6626_p9 = pnand %p6625_p7, %p6619_p2 }
  0x30   : > { %6629 = shalt.err (!%p6626_p9)
}
  0x31   : > { %s7451_s17 = smov 256   ;;  %s7453_s21 = smov 16  }
  0x32   : > { %5738 = dma.hbm_to_vmem [thread:$0]  (!%p6989_p6), %s7484_s6, 16384, %s6978_s18, [#allocation13], %s7451_s17, %s7451_s17, %s7453_s21  }
  0x33   : > { %s7486_s8 = sld [smem:[#allocation34_spill]] }
  0x39   : > { %s6630_s28 = scalar_lea.hbm %s7486_s8, 16384 }
  0x3a   : > { %p6631_p4 = scmp.ne.s32.totalorder %s7486_s8, %s6630_s28  ;;  %p6637_p12 = scmp.lt.u32.totalorder %s6630_s28, %s7486_s8 }
  0x3c   : > { %p6633_p10 = pnand %p6631_p4, %p7003_p8 }
  0x3e   : > { %p6634_p11 = pneg %p6633_p10 }
  0x40   : > { %p6639_p13 = pnand %p6637_p12, %p6634_p11 }
  0x42   : > { %6642 = shalt.err (!%p6639_p13)
}
  0x43   : > { %s6643_s18 = scalar_lea.vmem %s6993_s22, 16384  ;;  %p6651_p7 = scmp.lt.s32.totalorder %s6993_s22, %s6993_s22 }
  0x44   : > { %p6644_p0 = scmp.ne.s32.totalorder %s6993_s22, %s6643_s18  ;;  %p6652_p9 = scmp.lt.s32.totalorder %s6643_s18, %s6643_s18 }
  0x46   : > { %p6646_p2 = pnand %p6644_p0, %p7003_p8  ;;  %p6653_p4 = por %p6652_p9, %p6651_p7 }
  0x48   : > { %p6647_p5 = pneg %p6646_p2 }
  0x4a   : > { %p6654_p10 = pnand %p6653_p4, %p6647_p5 }
  0x4c   : > { %6657 = shalt.err (!%p6654_p10)
}
  0x4d   : > { %5744 = dma.hbm_to_vmem [thread:$0]  (!%p6989_p6), %s7486_s8, 16384, %s6993_s22, [#allocation16], %s7451_s17, %s7451_s17, %s7453_s21  }
  0x4e   : > { %s5046_s25 = sadd.s32 4294967294, %s6882_s16   ;;  %s7055_s26 = sadd.s32 1, %s6882_s16  }
  0x4f   : > { %7487 = sst [smem:[#allocation26_spill]] %s7055_s26  ;;  %s35_s27 = ssub.s32 %s6882_s16, %s7055_s26 }
  0x50   : > { %s38_s28 = sadd.s32 1, %s6878_s15  ;;  %p36_p11 = scmp.eq.s32.totalorder %s35_s27, 0 }
  0x51   : > { %p45_p12 = scmp.ne.s32.totalorder %s6878_s15, %s6874_s14  ;;  %p46_p13 = scmp.eq.s32.totalorder %s6882_s16, 0 }
  0x52   : > { %p51_p0 = scmp.ne.s32.totalorder %s6874_s14, %s6870_s13  ;;  %p289_p7 = scmp.eq.s32.totalorder %s6973_s19, 1 }
  0x53   : > { %s7066_s30 = scalar_select %p36_p11, %s6878_s15, %s38_s28  }
  0x54   : > { %p47_p2 = por %p46_p13, %p45_p12  ;;  %p7070_p5 = por %p7461_p1, %p51_p0 }
  0x55   : > { %7488 = sst [smem:[#allocation27_spill]] %s7066_s30  ;;  %p295_p9 = scmp.eq.s32.totalorder %s5046_s25, 1 }
  0x56   : > { %s7489_s11 = scalar_select %p7070_p5, 1, 0 }
  0x57   : > { %p5766_p4 = scmp.lt.s32.totalorder %s6882_s16, 2  ;;  %s7455_s22 = sand.u32 1, %s6878_s15  }
  0x58   : > { %p7077_p10 = por %p289_p7, %p45_p12  ;;  %p7081_p3 = por %p295_p9, %p51_p0 }
  0x59   : > { %s7087_s10 = sshll.u32 %s7455_s22, 5  ;;  %s7090_s24 = sshll.u32 %s6882_s16, 9 }
  0x5a   : > { %s7490_s12 = scalar_select %p7077_p10, 1, 0 }
  0x5b   : > { %s7492_s18 = scalar_select %p7081_p3, 1, 0 }
  0x5c   : > { %7491 = sst [smem:[#allocation28_spill]] %s7490_s12  ;;  %p7092_p11 = pnand %p5766_p4, %p47_p2 }
  0x5d   : > { %7493 = sst [smem:[#allocation29_spill]] %s7492_s18  ;;  %s386_s25 = sand.u32 1, %s6882_s16  }
  0x5e   : > { %s7494_s27 = scalar_select %p7092_p11, 1, 0 }
  0x5f   : > { %s7495_s1 = sld [smem:[#allocation30_spill]]  ;;  %s390_s22 = scalar_lea.vmem [#allocation9], %s7087_s10 }
  0x60   : > { %s398_s6 = sshll.u32 %s390_s22, 4  ;;  %s6888_s8 = smov [#allocation14]   ;;  %s7104_s6 = int_to_ptr.vmem [resolvable:$true] %s398_s6 }
  0x61   : > { %s7106_s30 = sshll.u32 %s6888_s8, 4  ;;  %s7108_s26 = scalar_lea.sflag [#allocation10], %s386_s25  ;;  %s328_s30 = int_to_ptr.vmem [resolvable:$true] %s7106_s30 }
  0x62   : > { %p7114_p13 = pneg %p7092_p11 }
  0x64   : > { %s7496_s17 = scalar_select %p7114_p13, 1, 0 }
  0x65   : > { %s7101_s21 = scalar_lea.hbm %s7495_s1, %s7090_s24  ;;  %s6663_s16 = scalar_lea.hbm %s7495_s1, 1024 }
  0x66   : > { %s6658_s18 = scalar_lea.hbm %s7101_s21, 512  ;;  %p6664_p7 = scmp.lt.u32.totalorder %s7101_s21, %s7495_s1 }
  0x67   : > { %p6659_p12 = scmp.ne.s32.totalorder %s7101_s21, %s6658_s18  ;;  %p6665_p9 = scmp.lt.u32.totalorder %s6663_s16, %s6658_s18 }
  0x68   : > { %p6667_p1 = scmp.lt.u32.totalorder %s6658_s18, %s7101_s21 }
  0x69   : > { %p6661_p0 = pnand %p7114_p13, %p6659_p12  ;;  %p6666_p4 = por %p6665_p9, %p6664_p7 }
  0x6b   : > { %p6662_p2 = pneg %p6661_p0  ;;  %p6668_p3 = por %p6667_p1, %p6666_p4 }
  0x6d   : > { %p6669_p10 = pnand %p6668_p3, %p6662_p2 }
  0x6f   : > { %6672 = shalt.err (!%p6669_p10)
}
  0x70   : > { %s6673_s25 = scalar_lea.vmem %s7104_s6, 512  ;;  %s6889_s28 = smov [#allocation9]  }
  0x71   : > { %p6674_p12 = scmp.ne.s32.totalorder %s7104_s6, %s6673_s25  ;;  %s6678_s22 = sshll.u32 %s6889_s28, 4  ;;  %s6679_s22 = int_to_ptr.vmem [resolvable:$false] %s6678_s22 }
  0x72   : > { %s6680_s13 = scalar_lea.vmem %s6679_s22, 1024  ;;  %p6681_p6 = scmp.lt.s32.totalorder %s7104_s6, %s6679_s22 }
  0x73   : > { %p6676_p0 = pnand %p6674_p12, %p7114_p13  ;;  %p6682_p8 = scmp.lt.s32.totalorder %s6680_s13, %s6673_s25 }
  0x75   : > { %p6677_p5 = pneg %p6676_p0  ;;  %p6683_p7 = por %p6682_p8, %p6681_p6 }
  0x77   : > { %p6684_p9 = pnand %p6683_p7, %p6677_p5 }
  0x79   : > { %6687 = shalt.err (!%p6684_p9)
}
  0x7a   : > { %5754 = dma.hbm_to_vmem [thread:$0]  (!%p7092_p11), %s7101_s21, 512, %s7104_s6, %s7108_s26  }
  0x7b   : > { %s6688_s8 = scalar_lea.hbm %s7445_s7, 16384  ;;  %p7497_p3 = scmp.ne.s32.totalorder %s7485_s29, 0 }
  0x7c   : > { %p6689_p1 = scmp.ne.s32.totalorder %s7445_s7, %s6688_s8  ;;  %p6695_p5 = scmp.lt.u32.totalorder %s6688_s8, %s7445_s7 }
  0x7e   : > { %p6691_p6 = pnand %p6689_p1, %p7497_p3 }
  0x80   : > { %p6692_p8 = pneg %p6691_p6 }
  0x82   : > { %p6697_p10 = pnand %p6695_p5, %p6692_p8 }
  0x84   : > { %6700 = shalt.err (!%p6697_p10)
}
  0x85   : > { %s6701_s13 = scalar_lea.vmem %s328_s30, 16384  ;;  %p6709_p0 = scmp.lt.s32.totalorder %s328_s30, %s328_s30 }
  0x86   : > { %p6702_p2 = scmp.ne.s32.totalorder %s328_s30, %s6701_s13  ;;  %p6710_p7 = scmp.lt.s32.totalorder %s6701_s13, %s6701_s13 }
  0x88   : > { %p6704_p4 = pnand %p6702_p2, %p7497_p3  ;;  %p6711_p9 = por %p6710_p7, %p6709_p0 }
  0x8a   : > { %p6705_p12 = pneg %p6704_p4 }
  0x8c   : > { %p6712_p11 = pnand %p6711_p9, %p6705_p12 }
  0x8e   : > { %6715 = shalt.err (!%p6712_p11)
}
  0x8f   : > { %p7498_p1 = scmp.ne.s32.totalorder %s7483_s23, 0  ;;  %s7499_s1 = smov 16  }
  0x90   : > { %s7500_s6 = smov 256   ;;  %s6890_s18 = smov [#allocation17]  }
  0x91   : > { %5741 = dma.hbm_to_vmem [thread:$0]  (!%p7498_p1), %s7445_s7, 16384, %s328_s30, [#allocation13], %s7500_s6, %s7500_s6, %s7499_s1  }
  0x92   : > { %s353_s8 = sshll.u32 %s6890_s18, 4  ;;  %s6716_s22 = scalar_lea.hbm %s7447_s9, 16384  ;;  %s354_s8 = int_to_ptr.vmem [resolvable:$true] %s353_s8 }
  0x93   : > { %p6717_p11 = scmp.ne.s32.totalorder %s7447_s9, %s6716_s22  ;;  %p6723_p5 = scmp.lt.u32.totalorder %s6716_s22, %s7447_s9 }
  0x95   : > { %p6719_p6 = pnand %p6717_p11, %p7497_p3 }
  0x97   : > { %p6720_p8 = pneg %p6719_p6 }
  0x99   : > { %p6725_p10 = pnand %p6723_p5, %p6720_p8 }
  0x9b   : > { %6728 = shalt.err (!%p6725_p10)
}
  0x9c   : > { %s6729_s30 = scalar_lea.vmem %s354_s8, 16384  ;;  %p6737_p0 = scmp.lt.s32.totalorder %s354_s8, %s354_s8 }
  0x9d   : > { %p6730_p2 = scmp.ne.s32.totalorder %s354_s8, %s6729_s30  ;;  %p6738_p7 = scmp.lt.s32.totalorder %s6729_s30, %s6729_s30 }
  0x9f   : > { %p6732_p4 = pnand %p6730_p2, %p7497_p3  ;;  %p6739_p9 = por %p6738_p7, %p6737_p0 }
  0xa1   : > { %p6733_p12 = pneg %p6732_p4 }
  0xa3   : > { %p6740_p13 = pnand %p6739_p9, %p6733_p12 }
  0xa5   : > { %6743 = shalt.err (!%p6740_p13)
}
  0xa6   : > { %5747 = dma.hbm_to_vmem [thread:$0]  (!%p7498_p1), %s7447_s9, 16384, %s354_s8, [#allocation16], %s7500_s6, %s7500_s6, %s7499_s1  }
  0xa7   : > { %s7185_s21 = scalar_lea.hbm %s7438_s0, %s7090_s24  ;;  %s371_s23 = scalar_lea.vmem [#allocation6], %s7087_s10 }
  0xa8   : > { %s379_s16 = sshll.u32 %s371_s23, 4  ;;  %s7501_s18 = sand.u32 1, %s6878_s15   ;;  %s380_s16 = int_to_ptr.vmem [resolvable:$true] %s379_s16 }
  0xa9   : > { %s368_s28 = scalar_lea.sflag [#allocation7], %s7501_s18  ;;  %s6744_s25 = scalar_lea.hbm %s7185_s21, 512 }
  0xaa   : > { %p6745_p13 = scmp.ne.s32.totalorder %s7185_s21, %s6744_s25  ;;  %p7502_p3 = scmp.ne.s32.totalorder %s7496_s17, 0 }
  0xab   : > { %s6749_s8 = scalar_lea.hbm %s7438_s0, 1024  ;;  %p6750_p1 = scmp.lt.u32.totalorder %s7185_s21, %s7438_s0 }
  0xac   : > { %p6747_p11 = pnand %p6745_p13, %p7502_p3  ;;  %p6751_p8 = scmp.lt.u32.totalorder %s6749_s8, %s6744_s25 }
  0xad   : > { %p6753_p10 = scmp.lt.u32.totalorder %s6744_s25, %s7185_s21 }
  0xae   : > { %p6748_p6 = pneg %p6747_p11  ;;  %p6752_p5 = por %p6751_p8, %p6750_p1 }
  0xb0   : > { %p6754_p2 = por %p6753_p10, %p6752_p5 }
  0xb2   : > { %p6755_p4 = pnand %p6754_p2, %p6748_p6 }
  0xb4   : > { %6758 = shalt.err (!%p6755_p4)
}
  0xb5   : > { %s6759_s30 = scalar_lea.vmem %s380_s16, 512  ;;  %s6891_s3 = smov [#allocation6]  }
  0xb6   : > { %p6760_p12 = scmp.ne.s32.totalorder %s380_s16, %s6759_s30  ;;  %s6764_s5 = sshll.u32 %s6891_s3, 4  ;;  %s6765_s5 = int_to_ptr.vmem [resolvable:$false] %s6764_s5 }
  0xb7   : > { %s6766_s29 = scalar_lea.vmem %s6765_s5, 1024  ;;  %p6767_p9 = scmp.lt.s32.totalorder %s380_s16, %s6765_s5 }
  0xb8   : > { %p6762_p0 = pnand %p6760_p12, %p7502_p3  ;;  %p6768_p13 = scmp.lt.s32.totalorder %s6766_s29, %s6759_s30 }
  0xba   : > { %p6763_p7 = pneg %p6762_p0  ;;  %p6769_p11 = por %p6768_p13, %p6767_p9 }
  0xbc   : > { %p6770_p1 = pnand %p6769_p11, %p6763_p7 }
  0xbe   : > { %6773 = shalt.err (!%p6770_p1)
}
  0xbf   : > { %p7503_p8 = scmp.ne.s32.totalorder %s7494_s27, 0  ;;  %s7211_s18 = scalar_lea.hbm %s7440_s2, %s7090_s24 }
  0xc0   : > { %s409_s25 = scalar_lea.vmem [#allocation11], %s7087_s10  ;;  %s6774_s6 = scalar_lea.hbm %s7211_s18, 512 }
  0xc1   : > { %5751 = dma.hbm_to_vmem [thread:$0]  (!%p7503_p8), %s7185_s21, 512, %s380_s16, %s368_s28  }
  0xc2   : > { %s417_s1 = sshll.u32 %s409_s25, 4  ;;  %p6775_p6 = scmp.ne.s32.totalorder %s7211_s18, %s6774_s6  ;;  %s418_s1 = int_to_ptr.vmem [resolvable:$true] %s417_s1 }
  0xc3   : > { %s6779_s21 = scalar_lea.hbm %s7440_s2, 1024  ;;  %p6780_p2 = scmp.lt.u32.totalorder %s7211_s18, %s7440_s2 }
  0xc4   : > { %p6777_p5 = pnand %p6775_p6, %p7502_p3  ;;  %p6781_p4 = scmp.lt.u32.totalorder %s6779_s21, %s6774_s6 }
  0xc5   : > { %p6783_p0 = scmp.lt.u32.totalorder %s6774_s6, %s7211_s18 }
  0xc6   : > { %p6778_p10 = pneg %p6777_p5  ;;  %p6782_p12 = por %p6781_p4, %p6780_p2 }
  0xc8   : > { %p6784_p7 = por %p6783_p0, %p6782_p12 }
  0xca   : > { %p6785_p9 = pnand %p6784_p7, %p6778_p10 }
  0xcc   : > { %6788 = shalt.err (!%p6785_p9)
}
  0xcd   : > { %s6789_s10 = scalar_lea.vmem %s418_s1, 512  ;;  %s6892_s24 = smov [#allocation11]  }
  0xce   : > { %p6790_p13 = scmp.ne.s32.totalorder %s418_s1, %s6789_s10  ;;  %s6794_s13 = sshll.u32 %s6892_s24, 4  ;;  %s6795_s13 = int_to_ptr.vmem [resolvable:$false] %s6794_s13 }
  0xcf   : > { %s6796_s30 = scalar_lea.vmem %s6795_s13, 1024  ;;  %p6797_p6 = scmp.lt.s32.totalorder %s418_s1, %s6795_s13 }
  0xd0   : > { %p6792_p11 = pnand %p6790_p13, %p7502_p3  ;;  %p6798_p5 = scmp.lt.s32.totalorder %s6796_s30, %s6789_s10 }
  0xd2   : > { %p6793_p1 = pneg %p6792_p11  ;;  %p6799_p8 = por %p6798_p5, %p6797_p6 }
  0xd4   : > { %p6800_p2 = pnand %p6799_p8, %p6793_p1 }
  0xd6   : > { %6803 = shalt.err (!%p6800_p2)
}
  0xd7   : > { %p7504_p4 = scmp.ne.s32.totalorder %s7494_s27, 0  ;;  %p7505_p10 = scmp.ne.s32.totalorder %s7482_s20, 0 }
  0xd8   : > { %s7235_s17 = sand.u32 (!%p7505_p10), 1, %s6874_s14   ;;  %p7506_p3 = scmp.ne.s32.totalorder (!%p7505_p10), %s7489_s11, 0 }
  0xd9   : > { %5757 = dma.hbm_to_vmem [thread:$0]  (!%p7504_p4), %s7211_s18, 512, %s418_s1, %s7108_s26  }
  0xda   : > { %447 = sbr.rel (%p7505_p10) target bundleno = 1783 (0x6f7), region = 60  ;;  %s7238_s3 = sshll.u32 (!%p7505_p10), %s7235_s17, 5 }
  0xdb   : > { %s450_s5 = scalar_lea.sflag (!%p7505_p10), [#allocation7], %s7235_s17  ;;  %s7242_s29 = scalar_lea.vmem (!%p7505_p10), [#allocation6], %s7238_s3 }
  0xe1   : > { %6849 = dma.done.wait (%p7506_p3), %s450_s5, 512  }
  0xe2   : > { %6851 = vsyncadd (%p7506_p3), %s450_s5, 4294966784  ;;  %s458_s20 = sand.u32 1, %s6973_s19   ;;  %s7250_s27 = scalar_lea.vmem [#allocation9], %s7238_s3 }
  0xe3   : > { %s459_s26 = scalar_lea.sflag [#allocation10], %s458_s20 }
  0xe4   : > { %6853 = dma.done.wait (%p7506_p3), %s459_s26, 1024  }
  0xe5   : > { %6855 = vsyncadd (%p7506_p3), %s459_s26, 4294966272  ;;  %s7257_s12 = scalar_lea.vmem [#allocation11], %s7238_s3  ;;  %p7507_p8 = scmp.eq.s32.totalorder %s6973_s19, 0 }
  0xe7   : > { %6857 = dma.done.wait (%p7507_p8), [#allocation13], 32768   ;;  %p7508_p12 = pmov %p7507_p8 }
  0xe8   : > { %p7509_p0 = pmov %p7507_p8 }
  0xe9   : > { %6859 = vsyncadd (%p7508_p12), [#allocation13], 4294934528 }
  0xea   : > { %6861 = dma.done.wait (%p7509_p0), [#allocation16], 32768   ;;  %p7510_p7 = pmov %p7509_p0 }
  0xeb   : > { %v5814_v0 = vld [vmem:[#allocation12 + $0x4] ss:$16 sps:$4 sm:$0xff]   ;;  %v5816_v1 = vld [vmem:[#allocation12 + $0xc] ss:$16 sps:$4 sm:$0xff]   ;;  %v5818_v2 = vld [vmem:[#allocation12] ss:$16 sps:$4 sm:$0xff]  }
  0xec   : > { %6863 = vsyncadd (%p7510_p7), [#allocation16], 4294934528  ;;  %1337 = vmatprep.subr.bf16.mxu0 %v5814_v0  ;;  %v5819_v3 = vld [vmem:[#allocation12 + $0x8] ss:$16 sps:$4 sm:$0xff]   ;;  %1419 = vmatprep.subr.bf16.mxu1 %v5816_v1  ;;  %v5820_v4 = vld [vmem:[#allocation12 + $0x24] ss:$16 sps:$4 sm:$0xff]  }
  0xed   : > { %1338 = vmatpush1.bf16.msra.mxu0 %v5818_v2  ;;  %1420 = vmatpush1.bf16.msra.mxu1 %v5819_v3  ;;  %v5822_v5 = vld [vmem:[#allocation12 + $0x2c] ss:$16 sps:$4 sm:$0xff]   ;;  %v5824_v6 = vld [vmem:[#allocation12 + $0x20] ss:$16 sps:$4 sm:$0xff]   ;;  %v5825_v7 = vld [vmem:[#allocation12 + $0x28] ss:$16 sps:$4 sm:$0xff]  }
  0xee   : > { %1339 = vmatprep.subr.bf16.mxu0 %v5820_v4  ;;  %1421 = vmatprep.subr.bf16.mxu1 %v5822_v5  ;;  %v5826_v8 = vld [vmem:[#allocation12 + $0x44] ss:$16 sps:$4 sm:$0xff]   ;;  %v5828_v9 = vld [vmem:[#allocation12 + $0x4c] ss:$16 sps:$4 sm:$0xff]   ;;  %v5830_v10 = vld [vmem:[#allocation12 + $0x40] ss:$16 sps:$4 sm:$0xff]  }
  0xef   : > { %v5831_v11 = vld [vmem:[#allocation12 + $0x48] ss:$16 sps:$4 sm:$0xff]   ;;  %v5832_v12 = vld [vmem:[#allocation12 + $0x64] ss:$16 sps:$4 sm:$0xff]   ;;  %v5834_v13 = vld [vmem:[#allocation12 + $0x6c] ss:$16 sps:$4 sm:$0xff]  }
  0xf0   : > { %v5836_v14 = vld [vmem:[#allocation12 + $0x60] ss:$16 sps:$4 sm:$0xff]   ;;  %v5837_v15 = vld [vmem:[#allocation12 + $0x68] ss:$16 sps:$4 sm:$0xff]   ;;  %v5838_v16 = vld [vmem:[#allocation12 + $0x84] ss:$16 sps:$4 sm:$0xff]  }
  0xf1   : > { %1340 = vmatpush1.bf16.msra.mxu0 %v5824_v6  ;;  %1422 = vmatpush1.bf16.msra.mxu1 %v5825_v7  ;;  %v5840_v17 = vld [vmem:[#allocation12 + $0x8c] ss:$16 sps:$4 sm:$0xff]   ;;  %v5842_v18 = vld [vmem:[#allocation12 + $0x80] ss:$16 sps:$4 sm:$0xff]   ;;  %v5843_v19 = vld [vmem:[#allocation12 + $0x88] ss:$16 sps:$4 sm:$0xff]  }
  0xf2   : > { %1341 = vmatprep.subr.bf16.mxu0 %v5826_v8  ;;  %1423 = vmatprep.subr.bf16.mxu1 %v5828_v9  ;;  %v5844_v20 = vld [vmem:[#allocation12 + $0xa4] ss:$16 sps:$4 sm:$0xff]   ;;  %v5846_v21 = vld [vmem:[#allocation12 + $0xac] ss:$16 sps:$4 sm:$0xff]   ;;  %v5848_v22 = vld [vmem:[#allocation12 + $0xa0] ss:$16 sps:$4 sm:$0xff]  }
  0xf3   : > { %v5849_v23 = vld [vmem:[#allocation12 + $0xa8] ss:$16 sps:$4 sm:$0xff]   ;;  %v5850_v24 = vld [vmem:[#allocation12 + $0xc4] ss:$16 sps:$4 sm:$0xff]   ;;  %v5852_v25 = vld [vmem:[#allocation12 + $0xcc] ss:$16 sps:$4 sm:$0xff]  }
  0xf4   : > { %v5854_v26 = vld [vmem:[#allocation12 + $0xc0] ss:$16 sps:$4 sm:$0xff]   ;;  %v5855_v27 = vld [vmem:[#allocation12 + $0xc8] ss:$16 sps:$4 sm:$0xff]   ;;  %v5856_v28 = vld [vmem:[#allocation12 + $0xe4] ss:$16 sps:$4 sm:$0xff]  }
  0xf5   : > { %1342 = vmatpush1.bf16.msra.mxu0 %v5830_v10  ;;  %1424 = vmatpush1.bf16.msra.mxu1 %v5831_v11  ;;  %v5858_v29 = vld [vmem:[#allocation12 + $0xec] ss:$16 sps:$4 sm:$0xff]   ;;  %v5860_v30 = vld [vmem:[#allocation12 + $0xe0] ss:$16 sps:$4 sm:$0xff]   ;;  %v5861_v31 = vld [vmem:[#allocation12 + $0xe8] ss:$16 sps:$4 sm:$0xff]  }
  0xf6   : > { %1343 = vmatprep.subr.bf16.mxu0 %v5832_v12  ;;  %1425 = vmatprep.subr.bf16.mxu1 %v5834_v13  ;;  %v5862_v32 = vld [vmem:[#allocation12 + $0x104] ss:$16 sps:$4 sm:$0xff]   ;;  %v5864_v33 = vld [vmem:[#allocation12 + $0x10c] ss:$16 sps:$4 sm:$0xff]   ;;  %v5866_v34 = vld [vmem:[#allocation12 + $0x100] ss:$16 sps:$4 sm:$0xff]  }
  0xf7   : > { %v5867_v35 = vld [vmem:[#allocation12 + $0x108] ss:$16 sps:$4 sm:$0xff]   ;;  %v5868_v36 = vld [vmem:[#allocation12 + $0x124] ss:$16 sps:$4 sm:$0xff]   ;;  %v5870_v37 = vld [vmem:[#allocation12 + $0x12c] ss:$16 sps:$4 sm:$0xff]  }
  0xf8   : > { %v5872_v38 = vld [vmem:[#allocation12 + $0x120] ss:$16 sps:$4 sm:$0xff]   ;;  %v5873_v39 = vld [vmem:[#allocation12 + $0x128] ss:$16 sps:$4 sm:$0xff]   ;;  %v5874_v40 = vld [vmem:[#allocation12 + $0x144] ss:$16 sps:$4 sm:$0xff]  }
  0xf9   : > { %1344 = vmatpush1.bf16.msra.mxu0 %v5836_v14  ;;  %1426 = vmatpush1.bf16.msra.mxu1 %v5837_v15  ;;  %v5876_v41 = vld [vmem:[#allocation12 + $0x14c] ss:$16 sps:$4 sm:$0xff]   ;;  %v5878_v42 = vld [vmem:[#allocation12 + $0x140] ss:$16 sps:$4 sm:$0xff]   ;;  %v5879_v43 = vld [vmem:[#allocation12 + $0x148] ss:$16 sps:$4 sm:$0xff]  }
  0xfa   : > { %1345 = vmatprep.subr.bf16.mxu0 %v5838_v16  ;;  %1427 = vmatprep.subr.bf16.mxu1 %v5840_v17  ;;  %v5880_v44 = vld [vmem:[#allocation12 + $0x164] ss:$16 sps:$4 sm:$0xff]   ;;  %v5882_v45 = vld [vmem:[#allocation12 + $0x16c] ss:$16 sps:$4 sm:$0xff]   ;;  %v5884_v47 = vld [vmem:[#allocation12 + $0x160] ss:$16 sps:$4 sm:$0xff]  }
  0xfb   : > { %v562_v46 = vld [vmem:[%s7242_s29 + $0x8] sm:$0xff]  ;;  %v5886_v50 = vld [vmem:[#allocation12 + $0x184] ss:$16 sps:$4 sm:$0xff]   ;;  %v5890_v52 = vld [vmem:[#allocation12 + $0x180] ss:$16 sps:$4 sm:$0xff]   ;;  %p546_p9 = scmp.lt.s32.totalorder %s6973_s19, 1 }
  0xfc   : > { %v566_v48 = vpack.c.bf16 %v562_v46, %v562_v46  ;;  %v5885_v49 = vld [vmem:[#allocation12 + $0x168] ss:$16 sps:$4 sm:$0xff]   ;;  %v5888_v51 = vld [vmem:[#allocation12 + $0x18c] ss:$16 sps:$4 sm:$0xff]   ;;  %v5892_v54 = vld [vmem:[#allocation12 + $0x1a4] ss:$16 sps:$4 sm:$0xff]  }
  0xfd   : > { %1346 = vmatpush1.bf16.msra.mxu0 %v5842_v18  ;;  %1428 = vmatpush1.bf16.msra.mxu1 %v5843_v19  ;;  %v5891_v53 = vld [vmem:[#allocation12 + $0x188] ss:$16 sps:$4 sm:$0xff]   ;;  %v5894_v55 = vld [vmem:[#allocation12 + $0x1ac] ss:$16 sps:$4 sm:$0xff]   ;;  %v5896_v56 = vld [vmem:[#allocation12 + $0x1a0] ss:$16 sps:$4 sm:$0xff]  }
  0xfe   : > { %1347 = vmatprep.subr.bf16.mxu0 %v5844_v20  ;;  %1429 = vmatprep.subr.bf16.mxu1 %v5846_v21  ;;  %v5897_v57 = vld [vmem:[#allocation12 + $0x1a8] ss:$16 sps:$4 sm:$0xff]   ;;  %v5898_v58 = vld [vmem:[#allocation12 + $0x1c4] ss:$16 sps:$4 sm:$0xff]   ;;  %v5900_v59 = vld [vmem:[#allocation12 + $0x1cc] ss:$16 sps:$4 sm:$0xff]  }
  0xff   : > { %1369 = vmatprep.mubr.bf16.mxu0 %v566_v48  ;;  %1451 = vmatprep.mubr.bf16.mxu1 %v566_v48  ;;  %v5902_v60 = vld [vmem:[#allocation12 + $0x1c0] ss:$16 sps:$4 sm:$0xff]   ;;  %v5903_v61 = vld [vmem:[#allocation12 + $0x1c8] ss:$16 sps:$4 sm:$0xff]   ;;  %v5904_v62 = vld [vmem:[#allocation12 + $0x1e4] ss:$16 sps:$4 sm:$0xff]  }
 0x100   : > { %v5906_v63 = vld [vmem:[#allocation12 + $0x1ec] ss:$16 sps:$4 sm:$0xff]   ;;  %v5908_v0 = vld [vmem:[#allocation12 + $0x1e0] ss:$16 sps:$4 sm:$0xff]   ;;  %v5909_v1 = vld [vmem:[#allocation12 + $0x1e8] ss:$16 sps:$4 sm:$0xff]  }
 0x101   : > { %1348 = vmatpush1.bf16.msra.mxu0 %v5848_v22  ;;  %1430 = vmatpush1.bf16.msra.mxu1 %v5849_v23  ;;  %v561_v2 = vld [vmem:[%s7242_s29] sm:$0xff]  ;;  %v5915_v4 = vld [vmem:[#allocation12 + $0x20c] ss:$16 sps:$4 sm:$0xff]   ;;  %v5913_v7 = vld [vmem:[#allocation12 + $0x208] ss:$16 sps:$4 sm:$0xff]   ;;  %s7274_s11 = scalar_select %p546_p9, %s6973_s19, 1 }
 0x102   : > { %1349 = vmatprep.subr.bf16.mxu0 %v5850_v24  ;;  %1431 = vmatprep.subr.bf16.mxu1 %v5852_v25  ;;  %v5912_v3 = vld [vmem:[#allocation12 + $0x204] ss:$16 sps:$4 sm:$0xff]   ;;  %v565_v5 = vpack.c.bf16 %v561_v2, %v561_v2  ;;  %v5910_v6 = vld [vmem:[#allocation12 + $0x200] ss:$16 sps:$4 sm:$0xff]   ;;  %v5921_v9 = vld [vmem:[#allocation12 + $0x22c] ss:$16 sps:$4 sm:$0xff]  }
 0x103   : > { %v5918_v8 = vld [vmem:[#allocation12 + $0x224] ss:$16 sps:$4 sm:$0xff]   ;;  %v5916_v10 = vld [vmem:[#allocation12 + $0x220] ss:$16 sps:$4 sm:$0xff]   ;;  %v5919_v11 = vld [vmem:[#allocation12 + $0x228] ss:$16 sps:$4 sm:$0xff]  }
 0x104   : > { %v5924_v12 = vld [vmem:[#allocation12 + $0x244] ss:$16 sps:$4 sm:$0xff]   ;;  %v5927_v13 = vld [vmem:[#allocation12 + $0x24c] ss:$16 sps:$4 sm:$0xff]   ;;  %v5922_v14 = vld [vmem:[#allocation12 + $0x240] ss:$16 sps:$4 sm:$0xff]  }
 0x105   : > { %1350 = vmatpush1.bf16.msra.mxu0 %v5854_v26  ;;  %1432 = vmatpush1.bf16.msra.mxu1 %v5855_v27  ;;  %v5925_v15 = vld [vmem:[#allocation12 + $0x248] ss:$16 sps:$4 sm:$0xff]   ;;  %v5930_v16 = vld [vmem:[#allocation12 + $0x264] ss:$16 sps:$4 sm:$0xff]   ;;  %v5933_v17 = vld [vmem:[#allocation12 + $0x26c] ss:$16 sps:$4 sm:$0xff]  }
 0x106   : > { %1351 = vmatprep.subr.bf16.mxu0 %v5856_v28  ;;  %1433 = vmatprep.subr.bf16.mxu1 %v5858_v29  ;;  %v5928_v18 = vld [vmem:[#allocation12 + $0x260] ss:$16 sps:$4 sm:$0xff]   ;;  %v5931_v19 = vld [vmem:[#allocation12 + $0x268] ss:$16 sps:$4 sm:$0xff]   ;;  %v5936_v20 = vld [vmem:[#allocation12 + $0x284] ss:$16 sps:$4 sm:$0xff]  }
 0x107   : > { %v5939_v21 = vld [vmem:[#allocation12 + $0x28c] ss:$16 sps:$4 sm:$0xff]   ;;  %v5934_v22 = vld [vmem:[#allocation12 + $0x280] ss:$16 sps:$4 sm:$0xff]   ;;  %v5937_v23 = vld [vmem:[#allocation12 + $0x288] ss:$16 sps:$4 sm:$0xff]  }
 0x108   : > { %v5942_v24 = vld [vmem:[#allocation12 + $0x2a4] ss:$16 sps:$4 sm:$0xff]   ;;  %v5945_v25 = vld [vmem:[#allocation12 + $0x2ac] ss:$16 sps:$4 sm:$0xff]   ;;  %v6893_v26 = vmov 0   ;;  %s5071_s23 = sshll.u32 %s7274_s11, 3 }
 0x109   : > { %1352 = vmatpush1.bf16.msra.mxu0 %v5860_v30  ;;  %1434 = vmatpush1.bf16.msra.mxu1 %v5861_v31  ;;  %v5940_v27 = vld [vmem:[#allocation12 + $0x2a0] ss:$16 sps:$4 sm:$0xff]   ;;  %v5943_v28 = vld [vmem:[#allocation12 + $0x2a8] ss:$16 sps:$4 sm:$0xff]   ;;  %v5948_v29 = vld [vmem:[#allocation12 + $0x2c4] ss:$16 sps:$4 sm:$0xff]   ;;  %s553_s1 = scalar_lea.vmem %s7442_s4, %s5071_s23 }
 0x10a   : > { %1353 = vmatprep.subr.bf16.mxu0 %v5862_v32  ;;  %1435 = vmatprep.subr.bf16.mxu1 %v5864_v33  ;;  %v5951_v30 = vld [vmem:[#allocation12 + $0x2cc] ss:$16 sps:$4 sm:$0xff]   ;;  %v5946_v32 = vld [vmem:[#allocation12 + $0x2c0] ss:$16 sps:$4 sm:$0xff]   ;;  %v5949_v33 = vld [vmem:[#allocation12 + $0x2c8] ss:$16 sps:$4 sm:$0xff]  }
 0x10b   : > { %5813 = vset.pattern.permute.xlu0 %v6893_v26  ;;  %v564_v31 = vld [vmem:[%s7242_s29 + $0x18] sm:$0xff]  ;;  %s7511_s22 = sld [smem:[#allocation31_spill]]  ;;  %vm6895_vm0 = vmmov 0   ;;  %vm3523_vm1 = vcmask 1043456   ;;  %s5073_s16 = sshll.u32 %s7274_s11, 1  ;;  %vm3505_vm3 = vcmask 64512  }
 0x10c   : > { %v5967_v46 = vld [vmem:[#allocation12 + $0x328] ss:$16 sps:$4 sm:$0xff]   ;;  %v5975_v48 = vld [vmem:[#allocation12 + $0x34c] ss:$16 sps:$4 sm:$0xff]   ;;  %s7512_s24 = sld [smem:[#allocation32_spill]]  ;;  %s5614_s30 = sshll.u32 %s6973_s19, 9 }
 0x10d   : > { %1354 = vmatpush1.bf16.msra.mxu0 %v5866_v34  ;;  %1436 = vmatpush1.bf16.msra.mxu1 %v5867_v35  ;;  %v568_v34 = vpack.c.bf16 %v564_v31, %v564_v31  ;;  %v5954_v35 = vld [vmem:[#allocation12 + $0x2e4] ss:$16 sps:$4 sm:$0xff]   ;;  %v5997_v2 = vld [vmem:[#allocation12 + $0x3c8] ss:$16 sps:$4 sm:$0xff]   ;;  %s545_s5 = scalar_lea.vmem [#allocation18], %s7238_s3  ;;  %s7513_s20 = sld [smem:[#allocation28_spill]] }
 0x10e   : > { %1355 = vmatprep.subr.bf16.mxu0 %v5868_v36  ;;  %1437 = vmatprep.subr.bf16.mxu1 %v5870_v37  ;;  %v5957_v36 = vld [vmem:[#allocation12 + $0x2ec] ss:$16 sps:$4 sm:$0xff]   ;;  %v5952_v37 = vld [vmem:[#allocation12 + $0x2e0] ss:$16 sps:$4 sm:$0xff]   ;;  %v6027_v26 = vld [vmem:[#allocation14 + $0x68] ss:$16 sps:$4 sm:$0xff]  }
 0x10f   : > { %v560_v31 = vld [vmem:[%s553_s1] sm:$0xff]  ;;  %s7514_s3 = sld [smem:[#allocation35_spill]] }
 0x110   : > { %2471 = vperm.xlu0 %5813, %v560_v31   ;;  %v6125_v31 = vld [vmem:[#allocation14 + $0x26c] ss:$16 sps:$4 sm:$0xff]  }
 0x111   : > { %1356 = vmatpush1.bf16.msra.mxu0 %v5872_v38  ;;  %1438 = vmatpush1.bf16.msra.mxu1 %v5873_v39  ;;  %v5955_v38 = vld [vmem:[#allocation12 + $0x2e8] ss:$16 sps:$4 sm:$0xff]   ;;  %v5960_v39 = vld [vmem:[#allocation12 + $0x304] ss:$16 sps:$4 sm:$0xff]   ;;  %s549_s21 = scalar_lea.vmem %s7511_s22, %s5071_s23  ;;  %s6896_s23 = smov [#allocation18]  }
 0x112   : > { %1357 = vmatprep.subr.bf16.mxu0 %v5874_v40  ;;  %1439 = vmatprep.subr.bf16.mxu1 %v5876_v41  ;;  %v5963_v40 = vld [vmem:[#allocation12 + $0x30c] ss:$16 sps:$4 sm:$0xff]   ;;  %v5958_v41 = vld [vmem:[#allocation12 + $0x300] ss:$16 sps:$4 sm:$0xff]   ;;  %s557_s13 = scalar_lea.vmem %s7512_s24, %s5073_s16  ;;  %s6808_s18 = sshll.u32 %s6896_s23, 4  ;;  %s6809_s18 = int_to_ptr.vmem [resolvable:$false] %s6808_s18 }
 0x113   : > { %p7515_p11 = scmp.ne.s32.totalorder %s7513_s20, 0  ;;  %s6810_s25 = scalar_lea.vmem %s6809_s18, 1024 }
 0x115   : > { %1358 = vmatpush1.bf16.msra.mxu0 %v5878_v42  ;;  %1440 = vmatpush1.bf16.msra.mxu1 %v5879_v43  ;;  %v5961_v42 = vld [vmem:[#allocation12 + $0x308] ss:$16 sps:$4 sm:$0xff]   ;;  %v5966_v43 = vld [vmem:[#allocation12 + $0x324] ss:$16 sps:$4 sm:$0xff]  }
 0x116   : > { %1359 = vmatprep.subr.bf16.mxu0 %v5880_v44  ;;  %1441 = vmatprep.subr.bf16.mxu1 %v5882_v45  ;;  %v5969_v44 = vld [vmem:[#allocation12 + $0x32c] ss:$16 sps:$4 sm:$0xff]   ;;  %v5964_v45 = vld [vmem:[#allocation12 + $0x320] ss:$16 sps:$4 sm:$0xff]  }
 0x119   : > { %1360 = vmatpush1.bf16.msra.mxu0 %v5884_v47  ;;  %1442 = vmatpush1.bf16.msra.mxu1 %v5885_v49  ;;  %v5972_v47 = vld [vmem:[#allocation12 + $0x344] ss:$16 sps:$4 sm:$0xff]   ;;  %v5970_v49 = vld [vmem:[#allocation12 + $0x340] ss:$16 sps:$4 sm:$0xff]  }
 0x11a   : > { %1361 = vmatprep.subr.bf16.mxu0 %v5886_v50  ;;  %1443 = vmatprep.subr.bf16.mxu1 %v5888_v51  ;;  %v5973_v50 = vld [vmem:[#allocation12 + $0x348] ss:$16 sps:$4 sm:$0xff]   ;;  %v5978_v51 = vld [vmem:[#allocation12 + $0x364] ss:$16 sps:$4 sm:$0xff]  }
 0x11d   : > { %1362 = vmatpush1.bf16.msra.mxu0 %v5890_v52  ;;  %1444 = vmatpush1.bf16.msra.mxu1 %v5891_v53  ;;  %v5981_v52 = vld [vmem:[#allocation12 + $0x36c] ss:$16 sps:$4 sm:$0xff]   ;;  %v5976_v53 = vld [vmem:[#allocation12 + $0x360] ss:$16 sps:$4 sm:$0xff]  }
 0x11e   : > { %1363 = vmatprep.subr.bf16.mxu0 %v5892_v54  ;;  %1445 = vmatprep.subr.bf16.mxu1 %v5894_v55  ;;  %v5979_v54 = vld [vmem:[#allocation12 + $0x368] ss:$16 sps:$4 sm:$0xff]   ;;  %v5984_v55 = vld [vmem:[#allocation12 + $0x384] ss:$16 sps:$4 sm:$0xff]  }
 0x121   : > { %1364 = vmatpush1.bf16.msra.mxu0 %v5896_v56  ;;  %1446 = vmatpush1.bf16.msra.mxu1 %v5897_v57  ;;  %v5987_v56 = vld [vmem:[#allocation12 + $0x38c] ss:$16 sps:$4 sm:$0xff]   ;;  %v5982_v57 = vld [vmem:[#allocation12 + $0x380] ss:$16 sps:$4 sm:$0xff]  }
 0x122   : > { %1365 = vmatprep.subr.bf16.mxu0 %v5898_v58  ;;  %1447 = vmatprep.subr.bf16.mxu1 %v5900_v59  ;;  %v5985_v58 = vld [vmem:[#allocation12 + $0x388] ss:$16 sps:$4 sm:$0xff]   ;;  %v5990_v59 = vld [vmem:[#allocation12 + $0x3a4] ss:$16 sps:$4 sm:$0xff]  }
 0x125   : > { %1366 = vmatpush1.bf16.msra.mxu0 %v5902_v60  ;;  %1448 = vmatpush1.bf16.msra.mxu1 %v5903_v61  ;;  %v5993_v60 = vld [vmem:[#allocation12 + $0x3ac] ss:$16 sps:$4 sm:$0xff]   ;;  %v5988_v61 = vld [vmem:[#allocation12 + $0x3a0] ss:$16 sps:$4 sm:$0xff]  }
 0x126   : > { %1367 = vmatprep.subr.bf16.mxu0 %v5904_v62  ;;  %1449 = vmatprep.subr.bf16.mxu1 %v5906_v63  ;;  %v5991_v62 = vld [vmem:[#allocation12 + $0x3a8] ss:$16 sps:$4 sm:$0xff]   ;;  %v5996_v63 = vld [vmem:[#allocation12 + $0x3c4] ss:$16 sps:$4 sm:$0xff]  }
 0x129   : > { %1368 = vmatpush1.bf16.msra.mxu0 %v5908_v0  ;;  %1450 = vmatpush1.bf16.msra.mxu1 %v5909_v1  ;;  %v5999_v0 = vld [vmem:[#allocation12 + $0x3cc] ss:$16 sps:$4 sm:$0xff]   ;;  %v5994_v1 = vld [vmem:[#allocation12 + $0x3c0] ss:$16 sps:$4 sm:$0xff]  }
 0x12a   : > { %1378 = vmatprep.subr.bf16.mxu0 %v5912_v3  ;;  %1460 = vmatprep.subr.bf16.mxu1 %v5915_v4  ;;  %v6002_v3 = vld [vmem:[#allocation12 + $0x3e4] ss:$16 sps:$4 sm:$0xff]   ;;  %v6005_v4 = vld [vmem:[#allocation12 + $0x3ec] ss:$16 sps:$4 sm:$0xff]  }
 0x12c   : > { %1370 = vmatmul.mubr.bf16.vlgmr.msra.gmra.mrb[0].mxu0 %v565_v5  ;;  %1452 = vmatmul.mubr.bf16.vlgmr.msra.gmra.mrb[0].mxu1 %v565_v5  ;;  %v6000_v5 = vld [vmem:[#allocation12 + $0x3e0] ss:$16 sps:$4 sm:$0xff]  }
 0x12d   : > { %1379 = vmatpush1.bf16.msra.mxu0 %v5910_v6  ;;  %1461 = vmatpush1.bf16.msra.mxu1 %v5913_v7  ;;  %v6003_v6 = vld [vmem:[#allocation12 + $0x3e8] ss:$16 sps:$4 sm:$0xff]   ;;  %v563_v7 = vld [vmem:[%s7242_s29 + $0x10] sm:$0xff]  ;;  %s4859_s29 = sshll.u32 %s545_s5, 4  ;;  %s7396_s29 = int_to_ptr.vmem [resolvable:$true] %s4859_s29 }
 0x12e   : > { %1380 = vmatprep.subr.bf16.mxu0 %v5918_v8  ;;  %1462 = vmatprep.subr.bf16.mxu1 %v5921_v9  ;;  %v6008_v8 = vld [vmem:[#allocation14 + $0x4] ss:$16 sps:$4 sm:$0xff]   ;;  %v6011_v9 = vld [vmem:[#allocation14 + $0xc] ss:$16 sps:$4 sm:$0xff]   ;;  %s6804_s11 = scalar_lea.vmem %s7396_s29, 512  ;;  %p6811_p5 = scmp.lt.s32.totalorder %s7396_s29, %s6809_s18 }
 0x12f   : > { %1410 = vmatprep.mubr.bf16.mxu0 %v568_v34  ;;  %1492 = vmatprep.mubr.bf16.mxu1 %v568_v34  ;;  %v559_v34 = vld [vmem:[%s549_s21] sm:$0xff]  ;;  %p6805_p13 = scmp.ne.s32.totalorder %s7396_s29, %s6804_s11  ;;  %p6812_p2 = scmp.lt.s32.totalorder %s6810_s25, %s6804_s11 }
 0x131   : > { %1381 = vmatpush1.bf16.msra.mxu0 %v5916_v10  ;;  %1463 = vmatpush1.bf16.msra.mxu1 %v5919_v11  ;;  %v567_v10 = vpack.c.bf16 %v563_v7, %v563_v7  ;;  %v6006_v11 = vld [vmem:[#allocation14] ss:$16 sps:$4 sm:$0xff]   ;;  %v6095_v7 = vld [vmem:[#allocation14 + $0x1cc] ss:$16 sps:$4 sm:$0xff]   ;;  %p6806_p1 = pnand %p6805_p13, %p7515_p11  ;;  %p6813_p4 = por %p6812_p2, %p6811_p5 }
 0x132   : > { %1382 = vmatprep.subr.bf16.mxu0 %v5924_v12  ;;  %1464 = vmatprep.subr.bf16.mxu1 %v5927_v13  ;;  %v6009_v12 = vld [vmem:[#allocation14 + $0x8] ss:$16 sps:$4 sm:$0xff]   ;;  %v6014_v13 = vld [vmem:[#allocation14 + $0x24] ss:$16 sps:$4 sm:$0xff]  }
 0x133   : > { %p6807_p6 = pneg %p6806_p1 }
 0x135   : > { %1383 = vmatpush1.bf16.msra.mxu0 %v5922_v14  ;;  %1465 = vmatpush1.bf16.msra.mxu1 %v5925_v15  ;;  %v6017_v14 = vld [vmem:[#allocation14 + $0x2c] ss:$16 sps:$4 sm:$0xff]   ;;  %p6814_p10 = pnand %p6813_p4, %p6807_p6 }
 0x136   : > { %1384 = vmatprep.subr.bf16.mxu0 %v5930_v16  ;;  %1466 = vmatprep.subr.bf16.mxu1 %v5933_v17  ;;  %v1530_v15 = vld [vmem:[%s7250_s27 + $0x8] sm:$0xff]  ;;  %v6012_v17 = vld [vmem:[#allocation14 + $0x20] ss:$16 sps:$4 sm:$0xff]  }
 0x137   : > { %v1534_v16 = vpack.c.bf16 %v1530_v15, %v1530_v15  ;;  %v1529_v15 = vld [vmem:[%s7250_s27] sm:$0xff] }
 0x139   : > { %1385 = vmatpush1.bf16.msra.mxu0 %v5928_v18  ;;  %1467 = vmatpush1.bf16.msra.mxu1 %v5931_v19  ;;  %v6015_v18 = vld [vmem:[#allocation14 + $0x28] ss:$16 sps:$4 sm:$0xff]   ;;  %v6020_v19 = vld [vmem:[#allocation14 + $0x44] ss:$16 sps:$4 sm:$0xff]  }
 0x13a   : > { %1386 = vmatprep.subr.bf16.mxu0 %v5936_v20  ;;  %1468 = vmatprep.subr.bf16.mxu1 %v5939_v21  ;;  %v6023_v20 = vld [vmem:[#allocation14 + $0x4c] ss:$16 sps:$4 sm:$0xff]   ;;  %v6018_v21 = vld [vmem:[#allocation14 + $0x40] ss:$16 sps:$4 sm:$0xff]  }
 0x13d   : > { %1387 = vmatpush1.bf16.msra.mxu0 %v5934_v22  ;;  %1469 = vmatpush1.bf16.msra.mxu1 %v5937_v23  ;;  %v6021_v22 = vld [vmem:[#allocation14 + $0x48] ss:$16 sps:$4 sm:$0xff]   ;;  %v6026_v23 = vld [vmem:[#allocation14 + $0x64] ss:$16 sps:$4 sm:$0xff]  }
 0x13e   : > { %1388 = vmatprep.subr.bf16.mxu0 %v5942_v24  ;;  %1470 = vmatprep.subr.bf16.mxu1 %v5945_v25  ;;  %v6029_v24 = vld [vmem:[#allocation14 + $0x6c] ss:$16 sps:$4 sm:$0xff]   ;;  %v6024_v25 = vld [vmem:[#allocation14 + $0x60] ss:$16 sps:$4 sm:$0xff]  }
 0x141   : > { %1389 = vmatpush1.bf16.msra.mxu0 %v5940_v27  ;;  %1471 = vmatpush1.bf16.msra.mxu1 %v5943_v28  ;;  %v6032_v27 = vld [vmem:[#allocation14 + $0x84] ss:$16 sps:$4 sm:$0xff]   ;;  %v6035_v28 = vld [vmem:[#allocation14 + $0x8c] ss:$16 sps:$4 sm:$0xff]  }
 0x142   : > { %1390 = vmatprep.subr.bf16.mxu0 %v5948_v29  ;;  %1472 = vmatprep.subr.bf16.mxu1 %v5951_v30  ;;  %v6030_v29 = vld [vmem:[#allocation14 + $0x80] ss:$16 sps:$4 sm:$0xff]   ;;  %v6033_v30 = vld [vmem:[#allocation14 + $0x88] ss:$16 sps:$4 sm:$0xff]  }
 0x145   : > { %1391 = vmatpush1.bf16.msra.mxu0 %v5946_v32  ;;  %1473 = vmatpush1.bf16.msra.mxu1 %v5949_v33  ;;  %v6038_v32 = vld [vmem:[#allocation14 + $0xa4] ss:$16 sps:$4 sm:$0xff]   ;;  %v6041_v33 = vld [vmem:[#allocation14 + $0xac] ss:$16 sps:$4 sm:$0xff]  }
 0x146   : > { %1392 = vmatprep.subr.bf16.mxu0 %v5954_v35  ;;  %1474 = vmatprep.subr.bf16.mxu1 %v5957_v36  ;;  %v6036_v35 = vld [vmem:[#allocation14 + $0xa0] ss:$16 sps:$4 sm:$0xff]   ;;  %v1501_v36 = vmul.f32 0.088388346, %v559_v34  ;;  %v6128_v34 = vld [vmem:[#allocation14 + $0x284] ss:$16 sps:$4 sm:$0xff]  }
 0x148   : > { %1504 = vperm.xlu0 %5813, %v1501_v36   ;;  %v6126_v36 = vld [vmem:[#allocation14 + $0x280] ss:$16 sps:$4 sm:$0xff]  }
 0x149   : > { %1393 = vmatpush1.bf16.msra.mxu0 %v5952_v37  ;;  %1475 = vmatpush1.bf16.msra.mxu1 %v5955_v38  ;;  %v6039_v37 = vld [vmem:[#allocation14 + $0xa8] ss:$16 sps:$4 sm:$0xff]   ;;  %v6044_v38 = vld [vmem:[#allocation14 + $0xc4] ss:$16 sps:$4 sm:$0xff]  }
 0x14a   : > { %1394 = vmatprep.subr.bf16.mxu0 %v5960_v39  ;;  %1476 = vmatprep.subr.bf16.mxu1 %v5963_v40  ;;  %v6047_v39 = vld [vmem:[#allocation14 + $0xcc] ss:$16 sps:$4 sm:$0xff]   ;;  %v6042_v40 = vld [vmem:[#allocation14 + $0xc0] ss:$16 sps:$4 sm:$0xff]  }
 0x14d   : > { %1395 = vmatpush1.bf16.msra.mxu0 %v5958_v41  ;;  %1477 = vmatpush1.bf16.msra.mxu1 %v5961_v42  ;;  %v6045_v41 = vld [vmem:[#allocation14 + $0xc8] ss:$16 sps:$4 sm:$0xff]   ;;  %v6050_v42 = vld [vmem:[#allocation14 + $0xe4] ss:$16 sps:$4 sm:$0xff]  }
 0x14e   : > { %1396 = vmatprep.subr.bf16.mxu0 %v5966_v43  ;;  %1478 = vmatprep.subr.bf16.mxu1 %v5969_v44  ;;  %v6053_v43 = vld [vmem:[#allocation14 + $0xec] ss:$16 sps:$4 sm:$0xff]   ;;  %v6048_v44 = vld [vmem:[#allocation14 + $0xe0] ss:$16 sps:$4 sm:$0xff]  }
 0x151   : > { %1397 = vmatpush1.bf16.msra.mxu0 %v5964_v45  ;;  %1479 = vmatpush1.bf16.msra.mxu1 %v5967_v46  ;;  %v6051_v45 = vld [vmem:[#allocation14 + $0xe8] ss:$16 sps:$4 sm:$0xff]   ;;  %v6056_v46 = vld [vmem:[#allocation14 + $0x104] ss:$16 sps:$4 sm:$0xff]  }
 0x152   : > { %1398 = vmatprep.subr.bf16.mxu0 %v5972_v47  ;;  %1480 = vmatprep.subr.bf16.mxu1 %v5975_v48  ;;  %v6059_v47 = vld [vmem:[#allocation14 + $0x10c] ss:$16 sps:$4 sm:$0xff]   ;;  %v6054_v48 = vld [vmem:[#allocation14 + $0x100] ss:$16 sps:$4 sm:$0xff]  }
 0x155   : > { %1399 = vmatpush1.bf16.msra.mxu0 %v5970_v49  ;;  %1481 = vmatpush1.bf16.msra.mxu1 %v5973_v50  ;;  %v6057_v49 = vld [vmem:[#allocation14 + $0x108] ss:$16 sps:$4 sm:$0xff]   ;;  %v6062_v50 = vld [vmem:[#allocation14 + $0x124] ss:$16 sps:$4 sm:$0xff]  }
 0x156   : > { %1400 = vmatprep.subr.bf16.mxu0 %v5978_v51  ;;  %1482 = vmatprep.subr.bf16.mxu1 %v5981_v52  ;;  %v6065_v51 = vld [vmem:[#allocation14 + $0x12c] ss:$16 sps:$4 sm:$0xff]   ;;  %v6060_v52 = vld [vmem:[#allocation14 + $0x120] ss:$16 sps:$4 sm:$0xff]  }
 0x159   : > { %1401 = vmatpush1.bf16.msra.mxu0 %v5976_v53  ;;  %1483 = vmatpush1.bf16.msra.mxu1 %v5979_v54  ;;  %v6063_v53 = vld [vmem:[#allocation14 + $0x128] ss:$16 sps:$4 sm:$0xff]   ;;  %v6068_v54 = vld [vmem:[#allocation14 + $0x144] ss:$16 sps:$4 sm:$0xff]  }
 0x15a   : > { %1402 = vmatprep.subr.bf16.mxu0 %v5984_v55  ;;  %1484 = vmatprep.subr.bf16.mxu1 %v5987_v56  ;;  %v6071_v55 = vld [vmem:[#allocation14 + $0x14c] ss:$16 sps:$4 sm:$0xff]   ;;  %v6066_v56 = vld [vmem:[#allocation14 + $0x140] ss:$16 sps:$4 sm:$0xff]  }
 0x15d   : > { %1403 = vmatpush1.bf16.msra.mxu0 %v5982_v57  ;;  %1485 = vmatpush1.bf16.msra.mxu1 %v5985_v58  ;;  %v6069_v57 = vld [vmem:[#allocation14 + $0x148] ss:$16 sps:$4 sm:$0xff]   ;;  %v6074_v58 = vld [vmem:[#allocation14 + $0x164] ss:$16 sps:$4 sm:$0xff]  }
 0x15e   : > { %1404 = vmatprep.subr.bf16.mxu0 %v5990_v59  ;;  %1486 = vmatprep.subr.bf16.mxu1 %v5993_v60  ;;  %v6077_v59 = vld [vmem:[#allocation14 + $0x16c] ss:$16 sps:$4 sm:$0xff]   ;;  %v6072_v60 = vld [vmem:[#allocation14 + $0x160] ss:$16 sps:$4 sm:$0xff]  }
 0x161   : > { %1405 = vmatpush1.bf16.msra.mxu0 %v5988_v61  ;;  %1487 = vmatpush1.bf16.msra.mxu1 %v5991_v62  ;;  %v6075_v61 = vld [vmem:[#allocation14 + $0x168] ss:$16 sps:$4 sm:$0xff]   ;;  %v6080_v62 = vld [vmem:[#allocation14 + $0x184] ss:$16 sps:$4 sm:$0xff]  }
 0x162   : > { %1406 = vmatprep.subr.bf16.mxu0 %v5996_v63  ;;  %1488 = vmatprep.subr.bf16.mxu1 %v5999_v0  ;;  %v6083_v63 = vld [vmem:[#allocation14 + $0x18c] ss:$16 sps:$4 sm:$0xff]   ;;  %v6078_v0 = vld [vmem:[#allocation14 + $0x180] ss:$16 sps:$4 sm:$0xff]  }
 0x165   : > { %1407 = vmatpush1.bf16.msra.mxu0 %v5994_v1  ;;  %1489 = vmatpush1.bf16.msra.mxu1 %v5997_v2  ;;  %v6081_v1 = vld [vmem:[#allocation14 + $0x188] ss:$16 sps:$4 sm:$0xff]   ;;  %v6086_v2 = vld [vmem:[#allocation14 + $0x1a4] ss:$16 sps:$4 sm:$0xff]  }
 0x166   : > { %1408 = vmatprep.subr.bf16.mxu0 %v6002_v3  ;;  %1490 = vmatprep.subr.bf16.mxu1 %v6005_v4  ;;  %v6089_v3 = vld [vmem:[#allocation14 + $0x1ac] ss:$16 sps:$4 sm:$0xff]   ;;  %v6084_v4 = vld [vmem:[#allocation14 + $0x1a0] ss:$16 sps:$4 sm:$0xff]  }
 0x169   : > { %1409 = vmatpush1.bf16.msra.mxu0 %v6000_v5  ;;  %1491 = vmatpush1.bf16.msra.mxu1 %v6003_v6  ;;  %v6087_v5 = vld [vmem:[#allocation14 + $0x1a8] ss:$16 sps:$4 sm:$0xff]   ;;  %v6092_v6 = vld [vmem:[#allocation14 + $0x1c4] ss:$16 sps:$4 sm:$0xff]  }
 0x16a   : > { %2305 = vmatprep.subr.bf16.mxu0 %v6008_v8  ;;  %2387 = vmatprep.subr.bf16.mxu1 %v6011_v9  ;;  %v6090_v8 = vld [vmem:[#allocation14 + $0x1c0] ss:$16 sps:$4 sm:$0xff]   ;;  %v6093_v9 = vld [vmem:[#allocation14 + $0x1c8] ss:$16 sps:$4 sm:$0xff]  }
 0x16c   : > { %1411 = vmatmul.mubr.bf16.vlgmr.msra.gmra.mrb[0].mxu0 %v567_v10  ;;  %1493 = vmatmul.mubr.bf16.vlgmr.msra.gmra.mrb[0].mxu1 %v567_v10  ;;  %v6098_v10 = vld [vmem:[#allocation14 + $0x1e4] ss:$16 sps:$4 sm:$0xff]  }
 0x16d   : > { %2306 = vmatpush1.bf16.msra.mxu0 %v6006_v11  ;;  %2388 = vmatpush1.bf16.msra.mxu1 %v6009_v12  ;;  %v6101_v11 = vld [vmem:[#allocation14 + $0x1ec] ss:$16 sps:$4 sm:$0xff]   ;;  %v6096_v12 = vld [vmem:[#allocation14 + $0x1e0] ss:$16 sps:$4 sm:$0xff]  }
 0x16e   : > { %2307 = vmatprep.subr.bf16.mxu0 %v6014_v13  ;;  %2389 = vmatprep.subr.bf16.mxu1 %v6017_v14  ;;  %v6099_v13 = vld [vmem:[#allocation14 + $0x1e8] ss:$16 sps:$4 sm:$0xff]   ;;  %v6104_v14 = vld [vmem:[#allocation14 + $0x204] ss:$16 sps:$4 sm:$0xff]  }
 0x16f   : > { %2337 = vmatprep.mubr.bf16.mxu0 %v1534_v16  ;;  %2419 = vmatprep.mubr.bf16.mxu1 %v1534_v16  ;;  %v6107_v16 = vld [vmem:[#allocation14 + $0x20c] ss:$16 sps:$4 sm:$0xff]  }
 0x171   : > { %2308 = vmatpush1.bf16.msra.mxu0 %v6012_v17  ;;  %2390 = vmatpush1.bf16.msra.mxu1 %v6015_v18  ;;  %v6102_v17 = vld [vmem:[#allocation14 + $0x200] ss:$16 sps:$4 sm:$0xff]   ;;  %v1533_v18 = vpack.c.bf16 %v1529_v15, %v1529_v15  ;;  %v6197_v15 = vld [vmem:[#allocation14 + $0x3ec] ss:$16 sps:$4 sm:$0xff]  }
 0x172   : > { %2309 = vmatprep.subr.bf16.mxu0 %v6020_v19  ;;  %2391 = vmatprep.subr.bf16.mxu1 %v6023_v20  ;;  %v1532_v19 = vld [vmem:[%s7250_s27 + $0x18] sm:$0xff] }
 0x173   : > { %v6105_v20 = vld [vmem:[#allocation14 + $0x208] ss:$16 sps:$4 sm:$0xff]  }
 0x175   : > { %2310 = vmatpush1.bf16.msra.mxu0 %v6018_v21  ;;  %2392 = vmatpush1.bf16.msra.mxu1 %v6021_v22  ;;  %v6110_v21 = vld [vmem:[#allocation14 + $0x224] ss:$16 sps:$4 sm:$0xff]   ;;  %v6113_v22 = vld [vmem:[#allocation14 + $0x22c] ss:$16 sps:$4 sm:$0xff]  }
 0x176   : > { %2311 = vmatprep.subr.bf16.mxu0 %v6026_v23  ;;  %2393 = vmatprep.subr.bf16.mxu1 %v6029_v24  ;;  %v1536_v23 = vpack.c.bf16 %v1532_v19, %v1532_v19  ;;  %v6108_v24 = vld [vmem:[#allocation14 + $0x220] ss:$16 sps:$4 sm:$0xff]   ;;  %v6200_v19 = vld [vmem:[#allocation15 + $0x4] ss:$16 sps:$4 sm:$0xff]  }
 0x179   : > { %2312 = vmatpush1.bf16.msra.mxu0 %v6024_v25  ;;  %2394 = vmatpush1.bf16.msra.mxu1 %v6027_v26  ;;  %v6111_v25 = vld [vmem:[#allocation14 + $0x228] ss:$16 sps:$4 sm:$0xff]   ;;  %v6116_v26 = vld [vmem:[#allocation14 + $0x244] ss:$16 sps:$4 sm:$0xff]  }
 0x17a   : > { %2313 = vmatprep.subr.bf16.mxu0 %v6032_v27  ;;  %2395 = vmatprep.subr.bf16.mxu1 %v6035_v28  ;;  %v6119_v27 = vld [vmem:[#allocation14 + $0x24c] ss:$16 sps:$4 sm:$0xff]   ;;  %v6114_v28 = vld [vmem:[#allocation14 + $0x240] ss:$16 sps:$4 sm:$0xff]  }
 0x17d   : > { %2314 = vmatpush1.bf16.msra.mxu0 %v6030_v29  ;;  %2396 = vmatpush1.bf16.msra.mxu1 %v6033_v30  ;;  %v6117_v29 = vld [vmem:[#allocation14 + $0x248] ss:$16 sps:$4 sm:$0xff]   ;;  %v6122_v30 = vld [vmem:[#allocation14 + $0x264] ss:$16 sps:$4 sm:$0xff]  }
 0x17e   : > { %2315 = vmatprep.subr.bf16.mxu0 %v6038_v32  ;;  %2397 = vmatprep.subr.bf16.mxu1 %v6041_v33  ;;  %v6120_v32 = vld [vmem:[#allocation14 + $0x260] ss:$16 sps:$4 sm:$0xff]   ;;  %v6123_v33 = vld [vmem:[#allocation14 + $0x268] ss:$16 sps:$4 sm:$0xff]  }
 0x181   : > { %2316 = vmatpush1.bf16.msra.mxu0 %v6036_v35  ;;  %2398 = vmatpush1.bf16.msra.mxu1 %v6039_v37  ;;  %v6131_v35 = vld [vmem:[#allocation14 + $0x28c] ss:$16 sps:$4 sm:$0xff]   ;;  %v6129_v37 = vld [vmem:[#allocation14 + $0x288] ss:$16 sps:$4 sm:$0xff]  }
 0x182   : > { %2317 = vmatprep.subr.bf16.mxu0 %v6044_v38  ;;  %2399 = vmatprep.subr.bf16.mxu1 %v6047_v39  ;;  %v6134_v38 = vld [vmem:[#allocation14 + $0x2a4] ss:$16 sps:$4 sm:$0xff]   ;;  %v6137_v39 = vld [vmem:[#allocation14 + $0x2ac] ss:$16 sps:$4 sm:$0xff]  }
 0x185   : > { %2318 = vmatpush1.bf16.msra.mxu0 %v6042_v40  ;;  %2400 = vmatpush1.bf16.msra.mxu1 %v6045_v41  ;;  %v6132_v40 = vld [vmem:[#allocation14 + $0x2a0] ss:$16 sps:$4 sm:$0xff]   ;;  %v6135_v41 = vld [vmem:[#allocation14 + $0x2a8] ss:$16 sps:$4 sm:$0xff]  }
 0x186   : > { %2319 = vmatprep.subr.bf16.mxu0 %v6050_v42  ;;  %2401 = vmatprep.subr.bf16.mxu1 %v6053_v43  ;;  %v6140_v42 = vld [vmem:[#allocation14 + $0x2c4] ss:$16 sps:$4 sm:$0xff]   ;;  %v6143_v43 = vld [vmem:[#allocation14 + $0x2cc] ss:$16 sps:$4 sm:$0xff]  }
 0x189   : > { %2320 = vmatpush1.bf16.msra.mxu0 %v6048_v44  ;;  %2402 = vmatpush1.bf16.msra.mxu1 %v6051_v45  ;;  %v6138_v44 = vld [vmem:[#allocation14 + $0x2c0] ss:$16 sps:$4 sm:$0xff]   ;;  %v6141_v45 = vld [vmem:[#allocation14 + $0x2c8] ss:$16 sps:$4 sm:$0xff]  }
 0x18a   : > { %2321 = vmatprep.subr.bf16.mxu0 %v6056_v46  ;;  %2403 = vmatprep.subr.bf16.mxu1 %v6059_v47  ;;  %v6146_v46 = vld [vmem:[#allocation14 + $0x2e4] ss:$16 sps:$4 sm:$0xff]   ;;  %v6149_v47 = vld [vmem:[#allocation14 + $0x2ec] ss:$16 sps:$4 sm:$0xff]  }
 0x18d   : > { %2322 = vmatpush1.bf16.msra.mxu0 %v6054_v48  ;;  %2404 = vmatpush1.bf16.msra.mxu1 %v6057_v49  ;;  %v6144_v48 = vld [vmem:[#allocation14 + $0x2e0] ss:$16 sps:$4 sm:$0xff]   ;;  %v6147_v49 = vld [vmem:[#allocation14 + $0x2e8] ss:$16 sps:$4 sm:$0xff]  }
 0x18e   : > { %2323 = vmatprep.subr.bf16.mxu0 %v6062_v50  ;;  %2405 = vmatprep.subr.bf16.mxu1 %v6065_v51  ;;  %v6152_v50 = vld [vmem:[#allocation14 + $0x304] ss:$16 sps:$4 sm:$0xff]   ;;  %v6155_v51 = vld [vmem:[#allocation14 + $0x30c] ss:$16 sps:$4 sm:$0xff]  }
 0x191   : > { %2324 = vmatpush1.bf16.msra.mxu0 %v6060_v52  ;;  %2406 = vmatpush1.bf16.msra.mxu1 %v6063_v53  ;;  %v6150_v52 = vld [vmem:[#allocation14 + $0x300] ss:$16 sps:$4 sm:$0xff]   ;;  %v6153_v53 = vld [vmem:[#allocation14 + $0x308] ss:$16 sps:$4 sm:$0xff]  }
 0x192   : > { %2325 = vmatprep.subr.bf16.mxu0 %v6068_v54  ;;  %2407 = vmatprep.subr.bf16.mxu1 %v6071_v55  ;;  %v6158_v54 = vld [vmem:[#allocation14 + $0x324] ss:$16 sps:$4 sm:$0xff]   ;;  %v6161_v55 = vld [vmem:[#allocation14 + $0x32c] ss:$16 sps:$4 sm:$0xff]  }
 0x195   : > { %2326 = vmatpush1.bf16.msra.mxu0 %v6066_v56  ;;  %2408 = vmatpush1.bf16.msra.mxu1 %v6069_v57  ;;  %v6156_v56 = vld [vmem:[#allocation14 + $0x320] ss:$16 sps:$4 sm:$0xff]   ;;  %v6159_v57 = vld [vmem:[#allocation14 + $0x328] ss:$16 sps:$4 sm:$0xff]  }
 0x196   : > { %2327 = vmatprep.subr.bf16.mxu0 %v6074_v58  ;;  %2409 = vmatprep.subr.bf16.mxu1 %v6077_v59  ;;  %v6164_v58 = vld [vmem:[#allocation14 + $0x344] ss:$16 sps:$4 sm:$0xff]   ;;  %v6167_v59 = vld [vmem:[#allocation14 + $0x34c] ss:$16 sps:$4 sm:$0xff]  }
 0x199   : > { %2328 = vmatpush1.bf16.msra.mxu0 %v6072_v60  ;;  %2410 = vmatpush1.bf16.msra.mxu1 %v6075_v61  ;;  %v6162_v60 = vld [vmem:[#allocation14 + $0x340] ss:$16 sps:$4 sm:$0xff]   ;;  %v6165_v61 = vld [vmem:[#allocation14 + $0x348] ss:$16 sps:$4 sm:$0xff]  }
 0x19a   : > { %2329 = vmatprep.subr.bf16.mxu0 %v6080_v62  ;;  %2411 = vmatprep.subr.bf16.mxu1 %v6083_v63  ;;  %v6170_v62 = vld [vmem:[#allocation14 + $0x364] ss:$16 sps:$4 sm:$0xff]   ;;  %v6173_v63 = vld [vmem:[#allocation14 + $0x36c] ss:$16 sps:$4 sm:$0xff]  }
 0x19d   : > { %2330 = vmatpush1.bf16.msra.mxu0 %v6078_v0  ;;  %2412 = vmatpush1.bf16.msra.mxu1 %v6081_v1  ;;  %v6168_v0 = vld [vmem:[#allocation14 + $0x360] ss:$16 sps:$4 sm:$0xff]   ;;  %v6171_v1 = vld [vmem:[#allocation14 + $0x368] ss:$16 sps:$4 sm:$0xff]  }
 0x19e   : > { %2331 = vmatprep.subr.bf16.mxu0 %v6086_v2  ;;  %2413 = vmatprep.subr.bf16.mxu1 %v6089_v3  ;;  %v6176_v2 = vld [vmem:[#allocation14 + $0x384] ss:$16 sps:$4 sm:$0xff]   ;;  %v6179_v3 = vld [vmem:[#allocation14 + $0x38c] ss:$16 sps:$4 sm:$0xff]  }
 0x1a1   : > { %2332 = vmatpush1.bf16.msra.mxu0 %v6084_v4  ;;  %2414 = vmatpush1.bf16.msra.mxu1 %v6087_v5  ;;  %v6174_v4 = vld [vmem:[#allocation14 + $0x380] ss:$16 sps:$4 sm:$0xff]   ;;  %v6177_v5 = vld [vmem:[#allocation14 + $0x388] ss:$16 sps:$4 sm:$0xff]  }
 0x1a2   : > { %2333 = vmatprep.subr.bf16.mxu0 %v6092_v6  ;;  %2415 = vmatprep.subr.bf16.mxu1 %v6095_v7  ;;  %v6182_v6 = vld [vmem:[#allocation14 + $0x3a4] ss:$16 sps:$4 sm:$0xff]   ;;  %v6185_v7 = vld [vmem:[#allocation14 + $0x3ac] ss:$16 sps:$4 sm:$0xff]  }
 0x1a5   : > { %2334 = vmatpush1.bf16.msra.mxu0 %v6090_v8  ;;  %2416 = vmatpush1.bf16.msra.mxu1 %v6093_v9  ;;  %v6180_v8 = vld [vmem:[#allocation14 + $0x3a0] ss:$16 sps:$4 sm:$0xff]   ;;  %v6183_v9 = vld [vmem:[#allocation14 + $0x3a8] ss:$16 sps:$4 sm:$0xff]  }
 0x1a6   : > { %2335 = vmatprep.subr.bf16.mxu0 %v6098_v10  ;;  %2417 = vmatprep.subr.bf16.mxu1 %v6101_v11  ;;  %v6188_v10 = vld [vmem:[#allocation14 + $0x3c4] ss:$16 sps:$4 sm:$0xff]   ;;  %v6191_v11 = vld [vmem:[#allocation14 + $0x3cc] ss:$16 sps:$4 sm:$0xff]  }
 0x1a9   : > { %2336 = vmatpush1.bf16.msra.mxu0 %v6096_v12  ;;  %2418 = vmatpush1.bf16.msra.mxu1 %v6099_v13  ;;  %v6186_v12 = vld [vmem:[#allocation14 + $0x3c0] ss:$16 sps:$4 sm:$0xff]   ;;  %v6189_v13 = vld [vmem:[#allocation14 + $0x3c8] ss:$16 sps:$4 sm:$0xff]  }
 0x1aa   : > { %2346 = vmatprep.subr.bf16.mxu0 %v6104_v14  ;;  %2428 = vmatprep.subr.bf16.mxu1 %v6107_v16  ;;  %v6194_v14 = vld [vmem:[#allocation14 + $0x3e4] ss:$16 sps:$4 sm:$0xff]   ;;  %v6192_v16 = vld [vmem:[#allocation14 + $0x3e0] ss:$16 sps:$4 sm:$0xff]  }
 0x1ac   : > { %2338 = vmatmul.mubr.bf16.vlgmr.msra.gmra.mrb[4].mxu0 %v1533_v18  ;;  %2420 = vmatmul.mubr.bf16.vlgmr.msra.gmra.mrb[4].mxu1 %v1533_v18  ;;  %v1531_v18 = vld [vmem:[%s7250_s27 + $0x10] sm:$0xff]  ;;  %s7394_s27 = scalar_lea.hbm %s7514_s3, %s5614_s30 }
 0x1ad   : > { %2347 = vmatpush1.bf16.msra.mxu0 %v6102_v17  ;;  %2429 = vmatpush1.bf16.msra.mxu1 %v6105_v20  ;;  %v6195_v17 = vld [vmem:[#allocation14 + $0x3e8] ss:$16 sps:$4 sm:$0xff]   ;;  %v6203_v20 = vld [vmem:[#allocation15 + $0xc] ss:$16 sps:$4 sm:$0xff]  }
 0x1ae   : > { %2348 = vmatprep.subr.bf16.mxu0 %v6110_v21  ;;  %2430 = vmatprep.subr.bf16.mxu1 %v6113_v22  ;;  %v6198_v21 = vld [vmem:[#allocation15] ss:$16 sps:$4 sm:$0xff]   ;;  %v1535_v22 = vpack.c.bf16 %v1531_v18, %v1531_v18  ;;  %v6290_v18 = vld [vmem:[#allocation15 + $0x1e4] ss:$16 sps:$4 sm:$0xff]  }
 0x1af   : > { %2378 = vmatprep.mubr.bf16.mxu0 %v1536_v23  ;;  %2460 = vmatprep.mubr.bf16.mxu1 %v1536_v23  ;;  %v2497_v23 = vld [vmem:[%s7257_s12 + $0x8] sm:$0xff] }
 0x1b1   : > { %2349 = vmatpush1.bf16.msra.mxu0 %v6108_v24  ;;  %2431 = vmatpush1.bf16.msra.mxu1 %v6111_v25  ;;  %v6201_v24 = vld [vmem:[#allocation15 + $0x8] ss:$16 sps:$4 sm:$0xff]   ;;  %v6206_v25 = vld [vmem:[#allocation15 + $0x24] ss:$16 sps:$4 sm:$0xff]  }
 0x1b2   : > { %2350 = vmatprep.subr.bf16.mxu0 %v6116_v26  ;;  %2432 = vmatprep.subr.bf16.mxu1 %v6119_v27  ;;  %v6209_v26 = vld [vmem:[#allocation15 + $0x2c] ss:$16 sps:$4 sm:$0xff]   ;;  %v2501_v27 = vpack.c.bf16 %v2497_v23, %v2497_v23  ;;  %v6296_v23 = vld [vmem:[#allocation15 + $0x204] ss:$16 sps:$4 sm:$0xff]  }
 0x1b5   : > { %2351 = vmatpush1.bf16.msra.mxu0 %v6114_v28  ;;  %2433 = vmatpush1.bf16.msra.mxu1 %v6117_v29  ;;  %v6204_v28 = vld [vmem:[#allocation15 + $0x20] ss:$16 sps:$4 sm:$0xff]   ;;  %v6207_v29 = vld [vmem:[#allocation15 + $0x28] ss:$16 sps:$4 sm:$0xff]  }
 0x1b6   : > { %2352 = vmatprep.subr.bf16.mxu0 %v6122_v30  ;;  %2434 = vmatprep.subr.bf16.mxu1 %v6125_v31  ;;  %v6212_v30 = vld [vmem:[#allocation15 + $0x44] ss:$16 sps:$4 sm:$0xff]   ;;  %v6215_v31 = vld [vmem:[#allocation15 + $0x4c] ss:$16 sps:$4 sm:$0xff]  }
 0x1b9   : > { %2353 = vmatpush1.bf16.msra.mxu0 %v6120_v32  ;;  %2435 = vmatpush1.bf16.msra.mxu1 %v6123_v33  ;;  %v6210_v32 = vld [vmem:[#allocation15 + $0x40] ss:$16 sps:$4 sm:$0xff]   ;;  %v6213_v33 = vld [vmem:[#allocation15 + $0x48] ss:$16 sps:$4 sm:$0xff]  }
 0x1ba   : > { %2354 = vmatprep.subr.bf16.mxu0 %v6128_v34  ;;  %2436 = vmatprep.subr.bf16.mxu1 %v6131_v35  ;;  %v6218_v34 = vld [vmem:[#allocation15 + $0x64] ss:$16 sps:$4 sm:$0xff]   ;;  %v6221_v35 = vld [vmem:[#allocation15 + $0x6c] ss:$16 sps:$4 sm:$0xff]  }
 0x1bd   : > { %2355 = vmatpush1.bf16.msra.mxu0 %v6126_v36  ;;  %2437 = vmatpush1.bf16.msra.mxu1 %v6129_v37  ;;  %v6216_v36 = vld [vmem:[#allocation15 + $0x60] ss:$16 sps:$4 sm:$0xff]   ;;  %v6219_v37 = vld [vmem:[#allocation15 + $0x68] ss:$16 sps:$4 sm:$0xff]  }
 0x1be   : > { %2356 = vmatprep.subr.bf16.mxu0 %v6134_v38  ;;  %2438 = vmatprep.subr.bf16.mxu1 %v6137_v39  ;;  %v6224_v38 = vld [vmem:[#allocation15 + $0x84] ss:$16 sps:$4 sm:$0xff]   ;;  %v6227_v39 = vld [vmem:[#allocation15 + $0x8c] ss:$16 sps:$4 sm:$0xff]  }
 0x1c1   : > { %2357 = vmatpush1.bf16.msra.mxu0 %v6132_v40  ;;  %2439 = vmatpush1.bf16.msra.mxu1 %v6135_v41  ;;  %v6222_v40 = vld [vmem:[#allocation15 + $0x80] ss:$16 sps:$4 sm:$0xff]   ;;  %v6225_v41 = vld [vmem:[#allocation15 + $0x88] ss:$16 sps:$4 sm:$0xff]  }
 0x1c2   : > { %2358 = vmatprep.subr.bf16.mxu0 %v6140_v42  ;;  %2440 = vmatprep.subr.bf16.mxu1 %v6143_v43  ;;  %v6230_v42 = vld [vmem:[#allocation15 + $0xa4] ss:$16 sps:$4 sm:$0xff]   ;;  %v6233_v43 = vld [vmem:[#allocation15 + $0xac] ss:$16 sps:$4 sm:$0xff]  }
 0x1c5   : > { %2359 = vmatpush1.bf16.msra.mxu0 %v6138_v44  ;;  %2441 = vmatpush1.bf16.msra.mxu1 %v6141_v45  ;;  %v6228_v44 = vld [vmem:[#allocation15 + $0xa0] ss:$16 sps:$4 sm:$0xff]   ;;  %v6231_v45 = vld [vmem:[#allocation15 + $0xa8] ss:$16 sps:$4 sm:$0xff]  }
 0x1c6   : > { %2360 = vmatprep.subr.bf16.mxu0 %v6146_v46  ;;  %2442 = vmatprep.subr.bf16.mxu1 %v6149_v47  ;;  %v6236_v46 = vld [vmem:[#allocation15 + $0xc4] ss:$16 sps:$4 sm:$0xff]   ;;  %v6239_v47 = vld [vmem:[#allocation15 + $0xcc] ss:$16 sps:$4 sm:$0xff]  }
 0x1c9   : > { %2361 = vmatpush1.bf16.msra.mxu0 %v6144_v48  ;;  %2443 = vmatpush1.bf16.msra.mxu1 %v6147_v49  ;;  %v6234_v48 = vld [vmem:[#allocation15 + $0xc0] ss:$16 sps:$4 sm:$0xff]   ;;  %v6237_v49 = vld [vmem:[#allocation15 + $0xc8] ss:$16 sps:$4 sm:$0xff]  }
 0x1ca   : > { %2362 = vmatprep.subr.bf16.mxu0 %v6152_v50  ;;  %2444 = vmatprep.subr.bf16.mxu1 %v6155_v51  ;;  %v6242_v50 = vld [vmem:[#allocation15 + $0xe4] ss:$16 sps:$4 sm:$0xff]   ;;  %v6245_v51 = vld [vmem:[#allocation15 + $0xec] ss:$16 sps:$4 sm:$0xff]  }
 0x1cd   : > { %2363 = vmatpush1.bf16.msra.mxu0 %v6150_v52  ;;  %2445 = vmatpush1.bf16.msra.mxu1 %v6153_v53  ;;  %v6240_v52 = vld [vmem:[#allocation15 + $0xe0] ss:$16 sps:$4 sm:$0xff]   ;;  %v6243_v53 = vld [vmem:[#allocation15 + $0xe8] ss:$16 sps:$4 sm:$0xff]  }
 0x1ce   : > { %2364 = vmatprep.subr.bf16.mxu0 %v6158_v54  ;;  %2446 = vmatprep.subr.bf16.mxu1 %v6161_v55  ;;  %v6248_v54 = vld [vmem:[#allocation15 + $0x104] ss:$16 sps:$4 sm:$0xff]   ;;  %v6251_v55 = vld [vmem:[#allocation15 + $0x10c] ss:$16 sps:$4 sm:$0xff]  }
 0x1d1   : > { %2365 = vmatpush1.bf16.msra.mxu0 %v6156_v56  ;;  %2447 = vmatpush1.bf16.msra.mxu1 %v6159_v57  ;;  %v6246_v56 = vld [vmem:[#allocation15 + $0x100] ss:$16 sps:$4 sm:$0xff]   ;;  %v6249_v57 = vld [vmem:[#allocation15 + $0x108] ss:$16 sps:$4 sm:$0xff]  }
 0x1d2   : > { %2366 = vmatprep.subr.bf16.mxu0 %v6164_v58  ;;  %2448 = vmatprep.subr.bf16.mxu1 %v6167_v59  ;;  %v6254_v58 = vld [vmem:[#allocation15 + $0x124] ss:$16 sps:$4 sm:$0xff]   ;;  %v6257_v59 = vld [vmem:[#allocation15 + $0x12c] ss:$16 sps:$4 sm:$0xff]  }
 0x1d5   : > { %2367 = vmatpush1.bf16.msra.mxu0 %v6162_v60  ;;  %2449 = vmatpush1.bf16.msra.mxu1 %v6165_v61  ;;  %v6252_v60 = vld [vmem:[#allocation15 + $0x120] ss:$16 sps:$4 sm:$0xff]   ;;  %v6255_v61 = vld [vmem:[#allocation15 + $0x128] ss:$16 sps:$4 sm:$0xff]  }
 0x1d6   : > { %2368 = vmatprep.subr.bf16.mxu0 %v6170_v62  ;;  %2450 = vmatprep.subr.bf16.mxu1 %v6173_v63  ;;  %v6260_v62 = vld [vmem:[#allocation15 + $0x144] ss:$16 sps:$4 sm:$0xff]   ;;  %v6263_v63 = vld [vmem:[#allocation15 + $0x14c] ss:$16 sps:$4 sm:$0xff]  }
 0x1d9   : > { %2369 = vmatpush1.bf16.msra.mxu0 %v6168_v0  ;;  %2451 = vmatpush1.bf16.msra.mxu1 %v6171_v1  ;;  %v6258_v0 = vld [vmem:[#allocation15 + $0x140] ss:$16 sps:$4 sm:$0xff]   ;;  %v6261_v1 = vld [vmem:[#allocation15 + $0x148] ss:$16 sps:$4 sm:$0xff]  }
 0x1da   : > { %2370 = vmatprep.subr.bf16.mxu0 %v6176_v2  ;;  %2452 = vmatprep.subr.bf16.mxu1 %v6179_v3  ;;  %v6266_v2 = vld [vmem:[#allocation15 + $0x164] ss:$16 sps:$4 sm:$0xff]   ;;  %v6269_v3 = vld [vmem:[#allocation15 + $0x16c] ss:$16 sps:$4 sm:$0xff]  }
 0x1dd   : > { %2371 = vmatpush1.bf16.msra.mxu0 %v6174_v4  ;;  %2453 = vmatpush1.bf16.msra.mxu1 %v6177_v5  ;;  %v6264_v4 = vld [vmem:[#allocation15 + $0x160] ss:$16 sps:$4 sm:$0xff]   ;;  %v6267_v5 = vld [vmem:[#allocation15 + $0x168] ss:$16 sps:$4 sm:$0xff]  }
 0x1de   : > { %2372 = vmatprep.subr.bf16.mxu0 %v6182_v6  ;;  %2454 = vmatprep.subr.bf16.mxu1 %v6185_v7  ;;  %v6272_v6 = vld [vmem:[#allocation15 + $0x184] ss:$16 sps:$4 sm:$0xff]   ;;  %v6275_v7 = vld [vmem:[#allocation15 + $0x18c] ss:$16 sps:$4 sm:$0xff]  }
 0x1e1   : > { %2373 = vmatpush1.bf16.msra.mxu0 %v6180_v8  ;;  %2455 = vmatpush1.bf16.msra.mxu1 %v6183_v9  ;;  %v6270_v8 = vld [vmem:[#allocation15 + $0x180] ss:$16 sps:$4 sm:$0xff]   ;;  %v6273_v9 = vld [vmem:[#allocation15 + $0x188] ss:$16 sps:$4 sm:$0xff]  }
 0x1e2   : > { %2374 = vmatprep.subr.bf16.mxu0 %v6188_v10  ;;  %2456 = vmatprep.subr.bf16.mxu1 %v6191_v11  ;;  %v6278_v10 = vld [vmem:[#allocation15 + $0x1a4] ss:$16 sps:$4 sm:$0xff]   ;;  %v6281_v11 = vld [vmem:[#allocation15 + $0x1ac] ss:$16 sps:$4 sm:$0xff]  }
 0x1e5   : > { %2375 = vmatpush1.bf16.msra.mxu0 %v6186_v12  ;;  %2457 = vmatpush1.bf16.msra.mxu1 %v6189_v13  ;;  %v6276_v12 = vld [vmem:[#allocation15 + $0x1a0] ss:$16 sps:$4 sm:$0xff]   ;;  %v6279_v13 = vld [vmem:[#allocation15 + $0x1a8] ss:$16 sps:$4 sm:$0xff]  }
 0x1e6   : > { %2376 = vmatprep.subr.bf16.mxu0 %v6194_v14  ;;  %2458 = vmatprep.subr.bf16.mxu1 %v6197_v15  ;;  %v6284_v14 = vld [vmem:[#allocation15 + $0x1c4] ss:$16 sps:$4 sm:$0xff]   ;;  %v6287_v15 = vld [vmem:[#allocation15 + $0x1cc] ss:$16 sps:$4 sm:$0xff]  }
 0x1e9   : > { %2377 = vmatpush1.bf16.msra.mxu0 %v6192_v16  ;;  %2459 = vmatpush1.bf16.msra.mxu1 %v6195_v17  ;;  %v6282_v16 = vld [vmem:[#allocation15 + $0x1c0] ss:$16 sps:$4 sm:$0xff]   ;;  %v6285_v17 = vld [vmem:[#allocation15 + $0x1c8] ss:$16 sps:$4 sm:$0xff]  }
 0x1ea   : > { %3272 = vmatprep.subr.bf16.mxu0 %v6200_v19  ;;  %3354 = vmatprep.subr.bf16.mxu1 %v6203_v20  ;;  %v6293_v19 = vld [vmem:[#allocation15 + $0x1ec] ss:$16 sps:$4 sm:$0xff]   ;;  %v6288_v20 = vld [vmem:[#allocation15 + $0x1e0] ss:$16 sps:$4 sm:$0xff]  }
 0x1ec   : > { %2379 = vmatmul.mubr.bf16.vlgmr.msra.gmra.mrb[4].mxu0 %v1535_v22  ;;  %2461 = vmatmul.mubr.bf16.vlgmr.msra.gmra.mrb[4].mxu1 %v1535_v22  ;;  %v2496_v22 = vld [vmem:[%s7257_s12] sm:$0xff] }
 0x1ed   : > { %3273 = vmatpush1.bf16.msra.mxu0 %v6198_v21  ;;  %3355 = vmatpush1.bf16.msra.mxu1 %v6201_v24  ;;  %v6291_v21 = vld [vmem:[#allocation15 + $0x1e8] ss:$16 sps:$4 sm:$0xff]   ;;  %v6299_v24 = vld [vmem:[#allocation15 + $0x20c] ss:$16 sps:$4 sm:$0xff]  }
 0x1ee   : > { %3274 = vmatprep.subr.bf16.mxu0 %v6206_v25  ;;  %3356 = vmatprep.subr.bf16.mxu1 %v6209_v26  ;;  %v2500_v25 = vpack.c.bf16 %v2496_v22, %v2496_v22  ;;  %v2499_v26 = vld [vmem:[%s7257_s12 + $0x18] sm:$0xff]  ;;  %v6362_v22 = vld [vmem:[#allocation15 + $0x364] ss:$16 sps:$4 sm:$0xff]  }
 0x1ef   : > { %3304 = vmatprep.mubr.bf16.mxu0 %v2501_v27  ;;  %3386 = vmatprep.mubr.bf16.mxu1 %v2501_v27  ;;  %v6294_v27 = vld [vmem:[#allocation15 + $0x200] ss:$16 sps:$4 sm:$0xff]  }
 0x1f1   : > { %3275 = vmatpush1.bf16.msra.mxu0 %v6204_v28  ;;  %3357 = vmatpush1.bf16.msra.mxu1 %v6207_v29  ;;  %v6297_v28 = vld [vmem:[#allocation15 + $0x208] ss:$16 sps:$4 sm:$0xff]   ;;  %v6302_v29 = vld [vmem:[#allocation15 + $0x224] ss:$16 sps:$4 sm:$0xff]  }
 0x1f2   : > { %3276 = vmatprep.subr.bf16.mxu0 %v6212_v30  ;;  %3358 = vmatprep.subr.bf16.mxu1 %v6215_v31  ;;  %v6305_v30 = vld [vmem:[#allocation15 + $0x22c] ss:$16 sps:$4 sm:$0xff]   ;;  %v2503_v31 = vpack.c.bf16 %v2499_v26, %v2499_v26  ;;  %v6368_v26 = vld [vmem:[#allocation15 + $0x384] ss:$16 sps:$4 sm:$0xff]  }
 0x1f5   : > { %3277 = vmatpush1.bf16.msra.mxu0 %v6210_v32  ;;  %3359 = vmatpush1.bf16.msra.mxu1 %v6213_v33  ;;  %v6300_v32 = vld [vmem:[#allocation15 + $0x220] ss:$16 sps:$4 sm:$0xff]   ;;  %v6303_v33 = vld [vmem:[#allocation15 + $0x228] ss:$16 sps:$4 sm:$0xff]  }
 0x1f6   : > { %3278 = vmatprep.subr.bf16.mxu0 %v6218_v34  ;;  %3360 = vmatprep.subr.bf16.mxu1 %v6221_v35  ;;  %v6308_v34 = vld [vmem:[#allocation15 + $0x244] ss:$16 sps:$4 sm:$0xff]   ;;  %v6311_v35 = vld [vmem:[#allocation15 + $0x24c] ss:$16 sps:$4 sm:$0xff]  }
 0x1f9   : > { %3279 = vmatpush1.bf16.msra.mxu0 %v6216_v36  ;;  %3361 = vmatpush1.bf16.msra.mxu1 %v6219_v37  ;;  %v6306_v36 = vld [vmem:[#allocation15 + $0x240] ss:$16 sps:$4 sm:$0xff]   ;;  %v6309_v37 = vld [vmem:[#allocation15 + $0x248] ss:$16 sps:$4 sm:$0xff]  }
 0x1fa   : > { %3280 = vmatprep.subr.bf16.mxu0 %v6224_v38  ;;  %3362 = vmatprep.subr.bf16.mxu1 %v6227_v39  ;;  %v6314_v38 = vld [vmem:[#allocation15 + $0x264] ss:$16 sps:$4 sm:$0xff]   ;;  %v6317_v39 = vld [vmem:[#allocation15 + $0x26c] ss:$16 sps:$4 sm:$0xff]  }
 0x1fd   : > { %3281 = vmatpush1.bf16.msra.mxu0 %v6222_v40  ;;  %3363 = vmatpush1.bf16.msra.mxu1 %v6225_v41  ;;  %v6312_v40 = vld [vmem:[#allocation15 + $0x260] ss:$16 sps:$4 sm:$0xff]   ;;  %v6315_v41 = vld [vmem:[#allocation15 + $0x268] ss:$16 sps:$4 sm:$0xff]  }
 0x1fe   : > { %3282 = vmatprep.subr.bf16.mxu0 %v6230_v42  ;;  %3364 = vmatprep.subr.bf16.mxu1 %v6233_v43  ;;  %v6320_v42 = vld [vmem:[#allocation15 + $0x284] ss:$16 sps:$4 sm:$0xff]   ;;  %v6323_v43 = vld [vmem:[#allocation15 + $0x28c] ss:$16 sps:$4 sm:$0xff]  }
 0x201   : > { %3283 = vmatpush1.bf16.msra.mxu0 %v6228_v44  ;;  %3365 = vmatpush1.bf16.msra.mxu1 %v6231_v45  ;;  %v7289_v44 = vpop.permute.xlu0 %2471  ;;  %v6318_v45 = vld [vmem:[#allocation15 + $0x280] ss:$16 sps:$4 sm:$0xff]  }
 0x202   : > { %3284 = vmatprep.subr.bf16.mxu0 %v6236_v46  ;;  %3366 = vmatprep.subr.bf16.mxu1 %v6239_v47  ;;  %v6321_v46 = vld [vmem:[#allocation15 + $0x288] ss:$16 sps:$4 sm:$0xff]   ;;  %v6326_v47 = vld [vmem:[#allocation15 + $0x2a4] ss:$16 sps:$4 sm:$0xff]  }
 0x205   : > { %3285 = vmatpush1.bf16.msra.mxu0 %v6234_v48  ;;  %3367 = vmatpush1.bf16.msra.mxu1 %v6237_v49  ;;  %v6329_v48 = vld [vmem:[#allocation15 + $0x2ac] ss:$16 sps:$4 sm:$0xff]   ;;  %v1505_v49 = vpop.permute.xlu0 %1504 }
 0x206   : > { %3286 = vmatprep.subr.bf16.mxu0 %v6242_v50  ;;  %3368 = vmatprep.subr.bf16.mxu1 %v6245_v51  ;;  %v6324_v50 = vld [vmem:[#allocation15 + $0x2a0] ss:$16 sps:$4 sm:$0xff]   ;;  %v6327_v51 = vld [vmem:[#allocation15 + $0x2a8] ss:$16 sps:$4 sm:$0xff]  }
 0x209   : > { %3287 = vmatpush1.bf16.msra.mxu0 %v6240_v52  ;;  %3369 = vmatpush1.bf16.msra.mxu1 %v6243_v53  ;;  %v6332_v52 = vld [vmem:[#allocation15 + $0x2c4] ss:$16 sps:$4 sm:$0xff]   ;;  %v6335_v53 = vld [vmem:[#allocation15 + $0x2cc] ss:$16 sps:$4 sm:$0xff]  }
 0x20a   : > { %3288 = vmatprep.subr.bf16.mxu0 %v6248_v54  ;;  %3370 = vmatprep.subr.bf16.mxu1 %v6251_v55 }
 0x20d   : > { %3289 = vmatpush1.bf16.msra.mxu0 %v6246_v56  ;;  %3371 = vmatpush1.bf16.msra.mxu1 %v6249_v57 }
 0x20e   : > { %3290 = vmatprep.subr.bf16.mxu0 %v6254_v58  ;;  %3372 = vmatprep.subr.bf16.mxu1 %v6257_v59 }
 0x211   : > { %3291 = vmatpush1.bf16.msra.mxu0 %v6252_v60  ;;  %3373 = vmatpush1.bf16.msra.mxu1 %v6255_v61 }
 0x212   : > { %3292 = vmatprep.subr.bf16.mxu0 %v6260_v62  ;;  %3374 = vmatprep.subr.bf16.mxu1 %v6263_v63 }
 0x215   : > { %3293 = vmatpush1.bf16.msra.mxu0 %v6258_v0  ;;  %3375 = vmatpush1.bf16.msra.mxu1 %v6261_v1  ;;  %v6330_v0 = vld [vmem:[#allocation15 + $0x2c0] ss:$16 sps:$4 sm:$0xff]   ;;  %v6333_v1 = vld [vmem:[#allocation15 + $0x2c8] ss:$16 sps:$4 sm:$0xff]  }
 0x216   : > { %3294 = vmatprep.subr.bf16.mxu0 %v6266_v2  ;;  %3376 = vmatprep.subr.bf16.mxu1 %v6269_v3 }
 0x219   : > { %3295 = vmatpush1.bf16.msra.mxu0 %v6264_v4  ;;  %3377 = vmatpush1.bf16.msra.mxu1 %v6267_v5  ;;  %v6338_v4 = vld [vmem:[#allocation15 + $0x2e4] ss:$16 sps:$4 sm:$0xff]   ;;  %v6341_v5 = vld [vmem:[#allocation15 + $0x2ec] ss:$16 sps:$4 sm:$0xff]  }
 0x21a   : > { %3296 = vmatprep.subr.bf16.mxu0 %v6272_v6  ;;  %3378 = vmatprep.subr.bf16.mxu1 %v6275_v7 }
 0x21d   : > { %3297 = vmatpush1.bf16.msra.mxu0 %v6270_v8  ;;  %3379 = vmatpush1.bf16.msra.mxu1 %v6273_v9  ;;  %v6336_v8 = vld [vmem:[#allocation15 + $0x2e0] ss:$16 sps:$4 sm:$0xff]   ;;  %v6339_v9 = vld [vmem:[#allocation15 + $0x2e8] ss:$16 sps:$4 sm:$0xff]  }
 0x21e   : > { %3298 = vmatprep.subr.bf16.mxu0 %v6278_v10  ;;  %3380 = vmatprep.subr.bf16.mxu1 %v6281_v11  ;;  %v6344_v10 = vld [vmem:[#allocation15 + $0x304] ss:$16 sps:$4 sm:$0xff]   ;;  %v6347_v11 = vld [vmem:[#allocation15 + $0x30c] ss:$16 sps:$4 sm:$0xff]  }
 0x221   : > { %3299 = vmatpush1.bf16.msra.mxu0 %v6276_v12  ;;  %3381 = vmatpush1.bf16.msra.mxu1 %v6279_v13  ;;  %v6342_v12 = vld [vmem:[#allocation15 + $0x300] ss:$16 sps:$4 sm:$0xff]   ;;  %v6345_v13 = vld [vmem:[#allocation15 + $0x308] ss:$16 sps:$4 sm:$0xff]  }
 0x222   : > { %3300 = vmatprep.subr.bf16.mxu0 %v6284_v14  ;;  %3382 = vmatprep.subr.bf16.mxu1 %v6287_v15  ;;  %v6350_v14 = vld [vmem:[#allocation15 + $0x324] ss:$16 sps:$4 sm:$0xff]   ;;  %v6353_v15 = vld [vmem:[#allocation15 + $0x32c] ss:$16 sps:$4 sm:$0xff]  }
 0x225   : > { %3301 = vmatpush1.bf16.msra.mxu0 %v6282_v16  ;;  %3383 = vmatpush1.bf16.msra.mxu1 %v6285_v17  ;;  %v6348_v16 = vld [vmem:[#allocation15 + $0x320] ss:$16 sps:$4 sm:$0xff]   ;;  %v6351_v17 = vld [vmem:[#allocation15 + $0x328] ss:$16 sps:$4 sm:$0xff]  }
 0x226   : > { %3302 = vmatprep.subr.bf16.mxu0 %v6290_v18  ;;  %3384 = vmatprep.subr.bf16.mxu1 %v6293_v19  ;;  %v6356_v18 = vld [vmem:[#allocation15 + $0x344] ss:$16 sps:$4 sm:$0xff]   ;;  %v6359_v19 = vld [vmem:[#allocation15 + $0x34c] ss:$16 sps:$4 sm:$0xff]  }
 0x229   : > { %3303 = vmatpush1.bf16.msra.mxu0 %v6288_v20  ;;  %3385 = vmatpush1.bf16.msra.mxu1 %v6291_v21  ;;  %v6354_v20 = vld [vmem:[#allocation15 + $0x340] ss:$16 sps:$4 sm:$0xff]   ;;  %v6357_v21 = vld [vmem:[#allocation15 + $0x348] ss:$16 sps:$4 sm:$0xff]  }
 0x22a   : > { %3313 = vmatprep.subr.bf16.mxu0 %v6296_v23  ;;  %3395 = vmatprep.subr.bf16.mxu1 %v6299_v24  ;;  %v6365_v23 = vld [vmem:[#allocation15 + $0x36c] ss:$16 sps:$4 sm:$0xff]   ;;  %v6360_v24 = vld [vmem:[#allocation15 + $0x360] ss:$16 sps:$4 sm:$0xff]  }
 0x22c   : > { %3305 = vmatmul.mubr.bf16.vlgmr.msra.gmra.mrb[8].mxu0 %v2500_v25  ;;  %3387 = vmatmul.mubr.bf16.vlgmr.msra.gmra.mrb[8].mxu1 %v2500_v25  ;;  %v6363_v25 = vld [vmem:[#allocation15 + $0x368] ss:$16 sps:$4 sm:$0xff]  }
 0x22d   : > { %3314 = vmatpush1.bf16.msra.mxu0 %v6294_v27  ;;  %3396 = vmatpush1.bf16.msra.mxu1 %v6297_v28  ;;  %v6371_v27 = vld [vmem:[#allocation15 + $0x38c] ss:$16 sps:$4 sm:$0xff]   ;;  %v6366_v28 = vld [vmem:[#allocation15 + $0x380] ss:$16 sps:$4 sm:$0xff]  }
 0x22e   : > { %3315 = vmatprep.subr.bf16.mxu0 %v6302_v29  ;;  %3397 = vmatprep.subr.bf16.mxu1 %v6305_v30  ;;  %v6369_v29 = vld [vmem:[#allocation15 + $0x388] ss:$16 sps:$4 sm:$0xff]   ;;  %v6374_v30 = vld [vmem:[#allocation15 + $0x3a4] ss:$16 sps:$4 sm:$0xff]  }
 0x22f   : > { %3345 = vmatprep.mubr.bf16.mxu0 %v2503_v31  ;;  %3427 = vmatprep.mubr.bf16.mxu1 %v2503_v31  ;;  %v6377_v31 = vld [vmem:[#allocation15 + $0x3ac] ss:$16 sps:$4 sm:$0xff]  }
 0x231   : > { %3316 = vmatpush1.bf16.msra.mxu0 %v6300_v32  ;;  %3398 = vmatpush1.bf16.msra.mxu1 %v6303_v33  ;;  %v6372_v32 = vld [vmem:[#allocation15 + $0x3a0] ss:$16 sps:$4 sm:$0xff]   ;;  %v6375_v33 = vld [vmem:[#allocation15 + $0x3a8] ss:$16 sps:$4 sm:$0xff]  }
 0x232   : > { %3317 = vmatprep.subr.bf16.mxu0 %v6308_v34  ;;  %3399 = vmatprep.subr.bf16.mxu1 %v6311_v35  ;;  %v6380_v34 = vld [vmem:[#allocation15 + $0x3c4] ss:$16 sps:$4 sm:$0xff]   ;;  %v6383_v35 = vld [vmem:[#allocation15 + $0x3cc] ss:$16 sps:$4 sm:$0xff]  }
 0x235   : > { %3318 = vmatpush1.bf16.msra.mxu0 %v6306_v36  ;;  %3400 = vmatpush1.bf16.msra.mxu1 %v6309_v37  ;;  %v6378_v36 = vld [vmem:[#allocation15 + $0x3c0] ss:$16 sps:$4 sm:$0xff]   ;;  %v6381_v37 = vld [vmem:[#allocation15 + $0x3c8] ss:$16 sps:$4 sm:$0xff]  }
 0x236   : > { %3319 = vmatprep.subr.bf16.mxu0 %v6314_v38  ;;  %3401 = vmatprep.subr.bf16.mxu1 %v6317_v39  ;;  %v6386_v38 = vld [vmem:[#allocation15 + $0x3e4] ss:$16 sps:$4 sm:$0xff]   ;;  %v6389_v39 = vld [vmem:[#allocation15 + $0x3ec] ss:$16 sps:$4 sm:$0xff]  }
 0x239   : > { %3320 = vmatpush1.bf16.msra.mxu0 %v6312_v40  ;;  %3402 = vmatpush1.bf16.msra.mxu1 %v6315_v41  ;;  %v6384_v40 = vld [vmem:[#allocation15 + $0x3e0] ss:$16 sps:$4 sm:$0xff]   ;;  %v6387_v41 = vld [vmem:[#allocation15 + $0x3e8] ss:$16 sps:$4 sm:$0xff]  }
 0x23a   : > { %3321 = vmatprep.subr.bf16.mxu0 %v6320_v42  ;;  %3403 = vmatprep.subr.bf16.mxu1 %v6323_v43  ;;  %v2498_v42 = vld [vmem:[%s7257_s12 + $0x10] sm:$0xff]  ;;  %s4845_s12 = scalar_lea.sflag [#allocation8], %s7235_s17 }
 0x23b   : > { %v2502_v43 = vpack.c.bf16 %v2498_v42, %v2498_v42 }
 0x23d   : > { %3322 = vmatpush1.bf16.msra.mxu0 %v6318_v45  ;;  %3404 = vmatpush1.bf16.msra.mxu1 %v6321_v46  ;;  %v6894_v45 = vmov 0.0  }
 0x23e   : > { %3323 = vmatprep.subr.bf16.mxu0 %v6326_v47  ;;  %3405 = vmatprep.subr.bf16.mxu1 %v6329_v48 }
 0x23f   : > { %v1412_v54 = vpop.f32.mrb[0].mxu0  ;;  %v1494_v55 = vpop.f32.mrb[0].mxu1 }
 0x240   : > { %v1414_v56 = vpop.f32.mrb[1].mxu0  ;;  %v1507_v57 = vmul.f32 %v1505_v49, %v1412_v54  ;;  %v1496_v58 = vpop.f32.mrb[1].mxu1  ;;  %v1509_v59 = vmul.f32 %v1505_v49, %v1494_v55 }
 0x241   : > { %v1508_v60 = vmul.f32 %v1505_v49, %v1414_v56  ;;  %v1510_v61 = vmul.f32 %v1505_v49, %v1496_v58  ;;  %v1416_v62 = vpop.f32.mrb[2].mxu0  ;;  %v1498_v63 = vpop.f32.mrb[2].mxu1  ;;  %3324 = vmatpush1.bf16.msra.mxu0 %v6324_v50  ;;  %3406 = vmatpush1.bf16.msra.mxu1 %v6327_v51 }
 0x242   : > { %v1417_v2 = vpop.f32.mrb[3].mxu0  ;;  %v1499_v3 = vpop.f32.mrb[3].mxu1  ;;  %3325 = vmatprep.subr.bf16.mxu0 %v6332_v52  ;;  %3407 = vmatprep.subr.bf16.mxu1 %v6335_v53 }
 0x243   : > { %v5608_v6 = vpack.c.bf16 %v1508_v60, %v1507_v57  ;;  %v5609_v7 = vpack.c.bf16 %v1510_v61, %v1509_v59 }
 0x245   : > { %1527 = vst [vmem:[#allocation2] sm:$0xff] %v5608_v6  ;;  %1528 = vst [vmem:[#allocation2 + $0x8] sm:$0xff] %v5609_v7  ;;  %3326 = vmatpush1.bf16.msra.mxu0 %v6330_v0  ;;  %3408 = vmatpush1.bf16.msra.mxu1 %v6333_v1 }
 0x246   : > { %3327 = vmatprep.subr.bf16.mxu0 %v6338_v4  ;;  %3409 = vmatprep.subr.bf16.mxu1 %v6341_v5 }
 0x249   : > { %3328 = vmatpush1.bf16.msra.mxu0 %v6336_v8  ;;  %3410 = vmatpush1.bf16.msra.mxu1 %v6339_v9 }
 0x24a   : > { %3329 = vmatprep.subr.bf16.mxu0 %v6344_v10  ;;  %3411 = vmatprep.subr.bf16.mxu1 %v6347_v11 }
 0x24c   : > { %v3461_v61 = vld [vmem:[#allocation2] sm:$0xf]  ;;  %v3570_v63 = vld [vmem:[#allocation2 + $0x4] sm:$0xf]  ;;  %v3676_v1 = vld [vmem:[#allocation2 + $0x8] sm:$0xf] }
 0x24d   : > { %3330 = vmatpush1.bf16.msra.mxu0 %v6342_v12  ;;  %3412 = vmatpush1.bf16.msra.mxu1 %v6345_v13  ;;  %v3782_v3 = vld [vmem:[#allocation2 + $0xc] sm:$0xf] }
 0x24e   : > { %3331 = vmatprep.subr.bf16.mxu0 %v6350_v14  ;;  %3413 = vmatprep.subr.bf16.mxu1 %v6353_v15 }
 0x251   : > { %3332 = vmatpush1.bf16.msra.mxu0 %v6348_v16  ;;  %3414 = vmatpush1.bf16.msra.mxu1 %v6351_v17 }
 0x252   : > { %3333 = vmatprep.subr.bf16.mxu0 %v6356_v18  ;;  %3415 = vmatprep.subr.bf16.mxu1 %v6359_v19 }
 0x255   : > { %3334 = vmatpush1.bf16.msra.mxu0 %v6354_v20  ;;  %3416 = vmatpush1.bf16.msra.mxu1 %v6357_v21  ;;  %v3458_v20 = vld [vmem:[%s557_s13] sm:$0x3] }
 0x256   : > { %3335 = vmatprep.subr.bf16.mxu0 %v6362_v22  ;;  %3417 = vmatprep.subr.bf16.mxu1 %v6365_v23  ;;  %v3459_v21 = vunpack.c.0.s8 %v3458_v20  ;;  %v6432_v20 = vld [vmem:[#allocation17 + $0xe0] ss:$16 sps:$4 sm:$0xff]  }
 0x258   : > { %v7321_v22 = vcvt.s32.f32 %v3459_v21  ;;  %v6440_v21 = vld [vmem:[#allocation17 + $0x104] ss:$16 sps:$4 sm:$0xff]  }
 0x259   : > { %3336 = vmatpush1.bf16.msra.mxu0 %v6360_v24  ;;  %3418 = vmatpush1.bf16.msra.mxu1 %v6363_v25 }
 0x25a   : > { %3337 = vmatprep.subr.bf16.mxu0 %v6368_v26  ;;  %3419 = vmatprep.subr.bf16.mxu1 %v6371_v27  ;;  %vm3503_vm2 = vcmp.ne.f32.partialorder %v7321_v22, 1.0 }
 0x25d   : > { %3338 = vmatpush1.bf16.msra.mxu0 %v6366_v28  ;;  %3420 = vmatpush1.bf16.msra.mxu1 %v6369_v29 }
 0x25e   : > { %3339 = vmatprep.subr.bf16.mxu0 %v6374_v30  ;;  %3421 = vmatprep.subr.bf16.mxu1 %v6377_v31 }
 0x261   : > { %3340 = vmatpush1.bf16.msra.mxu0 %v6372_v32  ;;  %3422 = vmatpush1.bf16.msra.mxu1 %v6375_v33 }
 0x262   : > { %3341 = vmatprep.subr.bf16.mxu0 %v6380_v34  ;;  %3423 = vmatprep.subr.bf16.mxu1 %v6383_v35 }
 0x265   : > { %3342 = vmatpush1.bf16.msra.mxu0 %v6378_v36  ;;  %3424 = vmatpush1.bf16.msra.mxu1 %v6381_v37 }
 0x266   : > { %3343 = vmatprep.subr.bf16.mxu0 %v6386_v38  ;;  %3425 = vmatprep.subr.bf16.mxu1 %v6389_v39 }
 0x269   : > { %3344 = vmatpush1.bf16.msra.mxu0 %v6384_v40  ;;  %3426 = vmatpush1.bf16.msra.mxu1 %v6387_v41 }
 0x26a   : > { %5631 = vmatprep.subr.bf16.mxu0 %v6894_v45  ;;  %5637 = vmatprep.subr.bf16.mxu1 %v6894_v45 }
 0x26c   : > { %3346 = vmatmul.mubr.bf16.vlgmr.msra.gmra.mrb[8].mxu0 %v2502_v43  ;;  %3428 = vmatmul.mubr.bf16.vlgmr.msra.gmra.mrb[8].mxu1 %v2502_v43 }
 0x26d   : > { %5633 = vmatprep.mubr.msk.bf16.mxu0 %vm6895_vm0, %v6894_v45  ;;  %5639 = vmatprep.mubr.msk.bf16.mxu1 %vm6895_vm0, %v6894_v45 }
 0x2bf   : > { %v2380_v46 = vpop.f32.mrb[4].mxu0  ;;  %v2462_v47 = vpop.f32.mrb[4].mxu1 }
 0x2c0   : > { %v2474_v48 = vmul.f32 %v7289_v44, %v2380_v46  ;;  %v2476_v49 = vmul.f32 %v7289_v44, %v2462_v47  ;;  %v2382_v50 = vpop.f32.mrb[5].mxu0  ;;  %v2464_v51 = vpop.f32.mrb[5].mxu1 }
 0x2c1   : > { %v2475_v52 = vmul.f32 %v7289_v44, %v2382_v50  ;;  %v2477_v53 = vmul.f32 %v7289_v44, %v2464_v51  ;;  %v2384_v54 = vpop.f32.mrb[6].mxu0  ;;  %v2466_v55 = vpop.f32.mrb[6].mxu1 }
 0x2c2   : > { %v2385_v56 = vpop.f32.mrb[7].mxu0  ;;  %v2467_v57 = vpop.f32.mrb[7].mxu1 }
 0x2c3   : > { %v5610_v58 = vpack.c.bf16 %v2475_v52, %v2474_v48  ;;  %v5611_v59 = vpack.c.bf16 %v2477_v53, %v2476_v49 }
 0x2c5   : > { %2494 = vst [vmem:[#allocation3] sm:$0xff] %v5610_v58  ;;  %2495 = vst [vmem:[#allocation3 + $0x8] sm:$0xff] %v5611_v59 }
 0x2cc   : > { %v3462_v60 = vld [vmem:[#allocation3] sm:$0xf]  ;;  %v3571_v62 = vld [vmem:[#allocation3 + $0x4] sm:$0xf]  ;;  %v3677_v0 = vld [vmem:[#allocation3 + $0x8] sm:$0xf] }
 0x2cd   : > { %5632 = vmatpush3.bf16.xpose.msra.mxu0 %v3462_v60  ;;  %v3783_v2 = vld [vmem:[#allocation3 + $0xc] sm:$0xf] }
 0x2ce   : > { %5643 = vmatprep.subr.bf16.mxu0 %v6894_v45 }
 0x2d4   : > { %5634 = vmatmul.mubr.bf16.vlgmr.msra.gmra.mrb[12].mxu0 %v3461_v61 }
 0x2d5   : > { %5644 = vmatpush3.bf16.xpose.msra.mxu0 %v3571_v62  ;;  %5645 = vmatprep.mubr.msk.bf16.mxu0 %vm6895_vm0, %v6894_v45 }
 0x2d6   : > { %5655 = vmatprep.subr.bf16.mxu0 %v6894_v45 }
 0x2dc   : > { %5646 = vmatmul.mubr.bf16.vlgmr.msra.gmra.mrb[16].mxu0 %v3570_v63 }
 0x2dd   : > { %5656 = vmatpush3.bf16.xpose.msra.mxu0 %v3677_v0  ;;  %5657 = vmatprep.mubr.msk.bf16.mxu0 %vm6895_vm0, %v6894_v45 }
 0x2de   : > { %5667 = vmatprep.subr.bf16.mxu0 %v6894_v45 }
 0x2e4   : > { %5658 = vmatmul.mubr.bf16.vlgmr.msra.gmra.mrb[20].mxu0 %v3676_v1 }
 0x2e5   : > { %5668 = vmatpush3.bf16.xpose.msra.mxu0 %v3783_v2  ;;  %5669 = vmatprep.mubr.msk.bf16.mxu0 %vm6895_vm0, %v6894_v45 }
 0x2ec   : > { %5670 = vmatmul.mubr.bf16.vlgmr.msra.gmra.mrb[24].mxu0 %v3782_v3 }
 0x33f   : > { %v3347_v4 = vpop.f32.mrb[8].mxu0  ;;  %v3429_v5 = vpop.f32.mrb[8].mxu1 }
 0x340   : > { %v3436_v6 = vmul.f32 %v3347_v4, %v7289_v44  ;;  %v3438_v7 = vmul.f32 %v3429_v5, %v7289_v44  ;;  %v3349_v8 = vpop.f32.mrb[9].mxu0  ;;  %v3431_v9 = vpop.f32.mrb[9].mxu1  ;;  %v6390_v5 = vld [vmem:[#allocation17] ss:$16 sps:$4 sm:$0xff]  }
 0x341   : > { %v3437_v10 = vmul.f32 %v3349_v8, %v7289_v44  ;;  %v3439_v11 = vmul.f32 %v3431_v9, %v7289_v44  ;;  %v3351_v12 = vpop.f32.mrb[10].mxu0  ;;  %v3433_v13 = vpop.f32.mrb[10].mxu1  ;;  %v6396_v8 = vld [vmem:[#allocation17 + $0x20] ss:$16 sps:$4 sm:$0xff]   ;;  %v6404_v9 = vld [vmem:[#allocation17 + $0x44] ss:$16 sps:$4 sm:$0xff]  }
 0x342   : > { %v3352_v14 = vpop.f32.mrb[11].mxu0  ;;  %v3434_v15 = vpop.f32.mrb[11].mxu1  ;;  %v6408_v12 = vld [vmem:[#allocation17 + $0x60] ss:$16 sps:$4 sm:$0xff]   ;;  %v6416_v13 = vld [vmem:[#allocation17 + $0x84] ss:$16 sps:$4 sm:$0xff]  }
 0x343   : > { %v5612_v16 = vpack.c.bf16 %v3437_v10, %v3436_v6  ;;  %v5613_v17 = vpack.c.bf16 %v3439_v11, %v3438_v7  ;;  %v6392_v6 = vld [vmem:[#allocation17 + $0x4] ss:$16 sps:$4 sm:$0xff]   ;;  %v6402_v10 = vld [vmem:[#allocation17 + $0x40] ss:$16 sps:$4 sm:$0xff]  }
 0x344   : > { %v6398_v7 = vld [vmem:[#allocation17 + $0x24] ss:$16 sps:$4 sm:$0xff]   ;;  %4672 = vmatprep.subr.bf16.mxu0 %v6392_v6  ;;  %v6414_v14 = vld [vmem:[#allocation17 + $0x80] ss:$16 sps:$4 sm:$0xff]   ;;  %v6443_v6 = vld [vmem:[#allocation17 + $0x10c] ss:$16 sps:$4 sm:$0xff]  }
 0x345   : > { %3456 = vst [vmem:[#allocation4] sm:$0xff] %v5612_v16  ;;  %3457 = vst [vmem:[#allocation4 + $0x8] sm:$0xff] %v5613_v17  ;;  %4673 = vmatpush1.bf16.msra.mxu0 %v6390_v5  ;;  %v6410_v11 = vld [vmem:[#allocation17 + $0x64] ss:$16 sps:$4 sm:$0xff]   ;;  %v6420_v16 = vld [vmem:[#allocation17 + $0xa0] ss:$16 sps:$4 sm:$0xff]  }
 0x346   : > { %4674 = vmatprep.subr.bf16.mxu0 %v6398_v7  ;;  %v6422_v15 = vld [vmem:[#allocation17 + $0xa4] ss:$16 sps:$4 sm:$0xff]   ;;  %v6435_v5 = vld [vmem:[#allocation17 + $0xe8] ss:$16 sps:$4 sm:$0xff]  }
 0x347   : > { %v6428_v17 = vld [vmem:[#allocation17 + $0xc4] ss:$16 sps:$4 sm:$0xff]   ;;  %v6441_v7 = vld [vmem:[#allocation17 + $0x108] ss:$16 sps:$4 sm:$0xff]  }
 0x349   : > { %4675 = vmatpush1.bf16.msra.mxu0 %v6396_v8  ;;  %v6449_v8 = vld [vmem:[#allocation17 + $0x12c] ss:$16 sps:$4 sm:$0xff]  }
 0x34a   : > { %4676 = vmatprep.subr.bf16.mxu0 %v6404_v9  ;;  %v6447_v9 = vld [vmem:[#allocation17 + $0x128] ss:$16 sps:$4 sm:$0xff]  }
 0x34c   : > { %v3519_v18 = vld [vmem:[#allocation4] sm:$0xf] }
 0x34d   : > { %v3525_v19 = vsel %vm3523_vm1, %v3519_v18, 0  ;;  %4677 = vmatpush1.bf16.msra.mxu0 %v6402_v10  ;;  %v6426_v18 = vld [vmem:[#allocation17 + $0xc0] ss:$16 sps:$4 sm:$0xff]   ;;  %v6455_v10 = vld [vmem:[#allocation17 + $0x14c] ss:$16 sps:$4 sm:$0xff]  }
 0x34e   : > { %5638 = vmatpush3.bf16.msra.mxu1 %v3525_v19  ;;  %4678 = vmatprep.subr.bf16.mxu0 %v6410_v11  ;;  %v6434_v19 = vld [vmem:[#allocation17 + $0xe4] ss:$16 sps:$4 sm:$0xff]   ;;  %v6453_v11 = vld [vmem:[#allocation17 + $0x148] ss:$16 sps:$4 sm:$0xff]  }
 0x34f   : > { %5649 = vmatprep.subr.bf16.mxu1 %v6894_v45 }
 0x351   : > { %4679 = vmatpush1.bf16.msra.mxu0 %v6408_v12  ;;  %v6458_v12 = vld [vmem:[#allocation17 + $0x164] ss:$16 sps:$4 sm:$0xff]  }
 0x352   : > { %4680 = vmatprep.subr.bf16.mxu0 %v6416_v13  ;;  %v6461_v13 = vld [vmem:[#allocation17 + $0x16c] ss:$16 sps:$4 sm:$0xff]  }
 0x355   : > { %4681 = vmatpush1.bf16.msra.mxu0 %v6414_v14  ;;  %v6456_v14 = vld [vmem:[#allocation17 + $0x160] ss:$16 sps:$4 sm:$0xff]  }
 0x356   : > { %4682 = vmatprep.subr.bf16.mxu0 %v6422_v15  ;;  %v6459_v15 = vld [vmem:[#allocation17 + $0x168] ss:$16 sps:$4 sm:$0xff]  }
 0x359   : > { %4683 = vmatpush1.bf16.msra.mxu0 %v6420_v16  ;;  %v6462_v16 = vld [vmem:[#allocation17 + $0x180] ss:$16 sps:$4 sm:$0xff]  }
 0x35a   : > { %4684 = vmatprep.subr.bf16.mxu0 %v6428_v17  ;;  %v6464_v17 = vld [vmem:[#allocation17 + $0x184] ss:$16 sps:$4 sm:$0xff]  }
 0x35d   : > { %4685 = vmatpush1.bf16.msra.mxu0 %v6426_v18  ;;  %v6465_v18 = vld [vmem:[#allocation17 + $0x188] ss:$16 sps:$4 sm:$0xff]  }
 0x35e   : > { %4686 = vmatprep.subr.bf16.mxu0 %v6434_v19  ;;  %v6467_v19 = vld [vmem:[#allocation17 + $0x18c] ss:$16 sps:$4 sm:$0xff]  }
 0x361   : > { %4687 = vmatpush1.bf16.msra.mxu0 %v6432_v20  ;;  %v6470_v20 = vld [vmem:[#allocation17 + $0x1a4] ss:$16 sps:$4 sm:$0xff]  }
 0x362   : > { %4688 = vmatprep.subr.bf16.mxu0 %v6440_v21  ;;  %v6473_v21 = vld [vmem:[#allocation17 + $0x1ac] ss:$16 sps:$4 sm:$0xff]  }
 0x3a7   : > { %v3497_v23 = vpop.f32.mrb[12].mxu0 }
 0x3a8   : > { %v3504_v24 = vsel %vm3503_vm2, -1e+30, %v3497_v23  ;;  %v5635_v25 = vpop.f32.mrb[13].mxu0  ;;  %v6438_v23 = vld [vmem:[#allocation17 + $0x100] ss:$16 sps:$4 sm:$0xff]  }
 0x3a9   : > { %v3500_v26 = vpop.f32.mrb[14].mxu0  ;;  %v3506_v27 = vsel %vm3505_vm3, %v3504_v24, -inf  ;;  %4689 = vmatpush1.bf16.msra.mxu0 %v6438_v23  ;;  %v6444_v25 = vld [vmem:[#allocation17 + $0x120] ss:$16 sps:$4 sm:$0xff]  }
 0x3aa   : > { %3507 = vmax.xlane.f32.xlu1 %v3506_v27  ;;  %v5636_v28 = vpop.f32.mrb[15].mxu0  ;;  %v6452_v26 = vld [vmem:[#allocation17 + $0x144] ss:$16 sps:$4 sm:$0xff]   ;;  %v6450_v27 = vld [vmem:[#allocation17 + $0x140] ss:$16 sps:$4 sm:$0xff]  }
 0x3ab   : > { %v6468_v23 = vld [vmem:[#allocation17 + $0x1a0] ss:$16 sps:$4 sm:$0xff]  }
 0x3af   : > { %v3606_v29 = vpop.f32.mrb[16].mxu0 }
 0x3b0   : > { %v3612_v30 = vsel %vm3503_vm2, -1e+30, %v3606_v29  ;;  %v5647_v31 = vpop.f32.mrb[17].mxu0 }
 0x3b1   : > { %v3609_v32 = vpop.f32.mrb[18].mxu0  ;;  %v3613_v33 = vsel %vm3505_vm3, %v3612_v30, -inf }
 0x3b2   : > { %3614 = vmax.xlane.f32.xlu1 %v3613_v33  ;;  %v5648_v34 = vpop.f32.mrb[19].mxu0  ;;  %v3626_v33 = vld [vmem:[#allocation4 + $0x4] sm:$0xf] }
 0x3b7   : > { %v3712_v35 = vpop.f32.mrb[20].mxu0 }
 0x3b8   : > { %v3718_v36 = vsel %vm3503_vm2, -1e+30, %v3712_v35  ;;  %v5659_v37 = vpop.f32.mrb[21].mxu0 }
 0x3b9   : > { %v3715_v38 = vpop.f32.mrb[22].mxu0  ;;  %v3719_v39 = vsel %vm3505_vm3, %v3718_v36, -inf }
 0x3ba   : > { %3720 = vmax.xlane.f32.xlu0 %v3719_v39  ;;  %v5660_v40 = vpop.f32.mrb[23].mxu0 }
 0x3bb   : > { %v3732_v40 = vld [vmem:[#allocation4 + $0x8] sm:$0xf] }
 0x3bf   : > { %v3818_v41 = vpop.f32.mrb[24].mxu0 }
 0x3c0   : > { %v3824_v42 = vsel %vm3503_vm2, -1e+30, %v3818_v41  ;;  %v5671_v43 = vpop.f32.mrb[25].mxu0 }
 0x3c1   : > { %v3821_v46 = vpop.f32.mrb[26].mxu0  ;;  %v3825_v47 = vsel %vm3505_vm3, %v3824_v42, -inf  ;;  %v3737_v43 = vsel %vm3523_vm1, %v3732_v40, 0 }
 0x3c2   : > { %3826 = vmax.xlane.f32.xlu1 %v3825_v47  ;;  %v5672_v48 = vpop.f32.mrb[27].mxu0 }
 0x437   : > { %v3508_v49 = vpop.xlane.xlu1 %3507 }
 0x438   : > { %v3509_v50 = vsub.f32 %v3504_v24, %v3508_v49  ;;  %v6446_v24 = vld [vmem:[#allocation17 + $0x124] ss:$16 sps:$4 sm:$0xff]   ;;  %v3838_v49 = vld [vmem:[#allocation4 + $0xc] sm:$0xf] }
 0x439   : > { %4690 = vmatprep.subr.bf16.mxu0 %v6446_v24  ;;  %v6471_v24 = vld [vmem:[#allocation17 + $0x1a8] ss:$16 sps:$4 sm:$0xff]  }
 0x43a   : > { %v3510_v51 = vmul.f32 1.442695, %v3509_v50  ;;  %4691 = vmatpush1.bf16.msra.mxu0 %v6444_v25  ;;  %v6474_v25 = vld [vmem:[#allocation17 + $0x1c0] ss:$16 sps:$4 sm:$0xff]  }
 0x43b   : > { %4692 = vmatprep.subr.bf16.mxu0 %v6452_v26  ;;  %v6476_v26 = vld [vmem:[#allocation17 + $0x1c4] ss:$16 sps:$4 sm:$0xff]  }
 0x43c   : > { %6586 = vpow2.f32 %v3510_v51  ;;  %v6395_v51 = vld [vmem:[#allocation17 + $0xc] ss:$16 sps:$4 sm:$0xff]  }
 0x43e   : > { %4693 = vmatpush1.bf16.msra.mxu0 %v6450_v27  ;;  %v6477_v27 = vld [vmem:[#allocation17 + $0x1c8] ss:$16 sps:$4 sm:$0xff]  }
 0x43f   : > { %v3615_v52 = vpop.xlane.xlu1 %3614  ;;  %4694 = vmatprep.subr.bf16.mxu0 %v6458_v12  ;;  %v6514_v12 = vld [vmem:[#allocation17 + $0x284] ss:$16 sps:$4 sm:$0xff]  }
 0x440   : > { %v3616_v53 = vsub.f32 %v3612_v30, %v3615_v52  ;;  %v3843_v52 = vsel %vm3523_vm1, %v3838_v49, 0 }
 0x442   : > { %v3617_v54 = vmul.f32 1.442695, %v3616_v53  ;;  %4695 = vmatpush1.bf16.msra.mxu0 %v6456_v14 }
 0x443   : > { %4696 = vmatprep.subr.bf16.mxu0 %v6464_v17  ;;  %v6517_v17 = vld [vmem:[#allocation17 + $0x288] ss:$16 sps:$4 sm:$0xff]  }
 0x444   : > { %6588 = vpow2.f32 %v3617_v54 }
 0x446   : > { %v7336_v55 = vpop.eup %6586  ;;  %4697 = vmatpush1.bf16.msra.mxu0 %v6462_v16 }
 0x447   : > { %v3721_v56 = vpop.xlane.xlu0 %3720  ;;  %v3512_v57 = vsel %vm3505_vm3, %v7336_v55, 0.0  ;;  %4698 = vmatprep.subr.bf16.mxu0 %v6470_v20  ;;  %v6520_v20 = vld [vmem:[#allocation17 + $0x2a0] ss:$16 sps:$4 sm:$0xff]  }
 0x448   : > { %v3722_v58 = vsub.f32 %v3718_v36, %v3721_v56  ;;  %3513 = vadd.xlane.f32.xlu1 %v3512_v57  ;;  %v3631_v36 = vsel %vm3523_vm1, %v3626_v33, 0  ;;  %v6393_v56 = vld [vmem:[#allocation17 + $0x8] ss:$16 sps:$4 sm:$0xff]   ;;  %v6490_v33 = vld [vmem:[#allocation17 + $0x204] ss:$16 sps:$4 sm:$0xff]  }
 0x44a   : > { %v3723_v59 = vmul.f32 1.442695, %v3722_v58  ;;  %v6401_v58 = vld [vmem:[#allocation17 + $0x2c] ss:$16 sps:$4 sm:$0xff]   ;;  %4699 = vmatpush1.bf16.msra.mxu0 %v6468_v23  ;;  %v6528_v23 = vld [vmem:[#allocation17 + $0x2c4] ss:$16 sps:$4 sm:$0xff]  }
 0x44b   : > { %4700 = vmatprep.subr.bf16.mxu0 %v6476_v26  ;;  %v6529_v26 = vld [vmem:[#allocation17 + $0x2c8] ss:$16 sps:$4 sm:$0xff]  }
 0x44c   : > { %6590 = vpow2.f32 %v3723_v59  ;;  %v6399_v59 = vld [vmem:[#allocation17 + $0x28] ss:$16 sps:$4 sm:$0xff]  }
 0x44e   : > { %v7340_v60 = vpop.eup %6588  ;;  %4701 = vmatpush1.bf16.msra.mxu0 %v6474_v25  ;;  %v6526_v25 = vld [vmem:[#allocation17 + $0x2c0] ss:$16 sps:$4 sm:$0xff]  }
 0x44f   : > { %v3827_v61 = vpop.xlane.xlu1 %3826  ;;  %v3619_v62 = vsel %vm3505_vm3, %v7340_v60, 0.0 }
 0x450   : > { %v3828_v63 = vsub.f32 %v3824_v42, %v3827_v61  ;;  %3620 = vadd.xlane.f32.xlu1 %v3619_v62  ;;  %v6405_v61 = vld [vmem:[#allocation17 + $0x48] ss:$16 sps:$4 sm:$0xff]   ;;  %v6413_v62 = vld [vmem:[#allocation17 + $0x6c] ss:$16 sps:$4 sm:$0xff]  }
 0x452   : > { %v3829_v0 = vmul.f32 1.442695, %v3828_v63  ;;  %v6419_v63 = vld [vmem:[#allocation17 + $0x8c] ss:$16 sps:$4 sm:$0xff]  }
 0x454   : > { %6592 = vpow2.f32 %v3829_v0  ;;  %v6417_v0 = vld [vmem:[#allocation17 + $0x88] ss:$16 sps:$4 sm:$0xff]  }
 0x456   : > { %v7344_v1 = vpop.eup %6590 }
 0x457   : > { %v3725_v2 = vsel %vm3505_vm3, %v7344_v1, 0.0 }
 0x458   : > { %3726 = vadd.xlane.f32.xlu1 %v3725_v2  ;;  %v6431_v2 = vld [vmem:[#allocation17 + $0xcc] ss:$16 sps:$4 sm:$0xff]  }
 0x45e   : > { %v7348_v3 = vpop.eup %6592 }
 0x45f   : > { %v3831_v4 = vsel %vm3505_vm3, %v7348_v3, 0.0 }
 0x460   : > { %3832 = vadd.xlane.f32.xlu1 %v3831_v4  ;;  %v6437_v4 = vld [vmem:[#allocation17 + $0xec] ss:$16 sps:$4 sm:$0xff]  }
 0x4d5   : > { %v3514_v28 = vpop.xlane.xlu1 %3513 }
 0x4d6   : > { %6594 = vrcp.f32 %v3514_v28  ;;  %v6479_v28 = vld [vmem:[#allocation17 + $0x1cc] ss:$16 sps:$4 sm:$0xff]  }
 0x4dd   : > { %v3621_v29 = vpop.xlane.xlu1 %3620 }
 0x4de   : > { %6596 = vrcp.f32 %v3621_v29  ;;  %v6482_v29 = vld [vmem:[#allocation17 + $0x1e4] ss:$16 sps:$4 sm:$0xff]  }
 0x4df   : > { %4702 = vmatprep.subr.bf16.mxu0 %v6482_v29  ;;  %v6532_v29 = vld [vmem:[#allocation17 + $0x2e0] ss:$16 sps:$4 sm:$0xff]  }
 0x4e0   : > { %v6595_v30 = vpop.eup %6594 }
 0x4e1   : > { %v3516_v31 = vmul.f32 %v6595_v30, %v7336_v55  ;;  %v6485_v30 = vld [vmem:[#allocation17 + $0x1ec] ss:$16 sps:$4 sm:$0xff]  }
 0x4e3   : > { %v3517_v32 = vmul.f32 %v3516_v31, %v7321_v22  ;;  %v6480_v31 = vld [vmem:[#allocation17 + $0x1e0] ss:$16 sps:$4 sm:$0xff]  }
 0x4e4   : > { %4703 = vmatpush1.bf16.msra.mxu0 %v6480_v31  ;;  %v6540_v31 = vld [vmem:[#allocation17 + $0x304] ss:$16 sps:$4 sm:$0xff]  }
 0x4e5   : > { %v3727_v34 = vpop.xlane.xlu1 %3726  ;;  %v3518_v35 = vpack.c.bf16 %v3517_v32, %v3517_v32  ;;  %v6483_v32 = vld [vmem:[#allocation17 + $0x1e8] ss:$16 sps:$4 sm:$0xff]   ;;  %4713 = vmatprep.subr.bf16.mxu0 %v6490_v33  ;;  %v6538_v33 = vld [vmem:[#allocation17 + $0x300] ss:$16 sps:$4 sm:$0xff]  }
 0x4e6   : > { %6598 = vrcp.f32 %v3727_v34  ;;  %v6493_v34 = vld [vmem:[#allocation17 + $0x20c] ss:$16 sps:$4 sm:$0xff]  }
 0x4e7   : > { %5640 = vmatmul.mubr.msk.bf16.vlgmr.msra.gmra.mrb[12].mxu1 %vm3505_vm3, %v3518_v35 }
 0x4e8   : > { %v6597_v37 = vpop.eup %6596  ;;  %5650 = vmatpush3.bf16.msra.mxu1 %v3631_v36  ;;  %5651 = vmatprep.mubr.msk.bf16.mxu1 %vm6895_vm0, %v6894_v45 }
 0x4e9   : > { %v3623_v38 = vmul.f32 %v6597_v37, %v7340_v60  ;;  %5661 = vmatprep.subr.bf16.mxu1 %v6894_v45  ;;  %v6407_v60 = vld [vmem:[#allocation17 + $0x4c] ss:$16 sps:$4 sm:$0xff]  }
 0x4eb   : > { %v3624_v39 = vmul.f32 %v3623_v38, %v7321_v22 }
 0x4ed   : > { %v3833_v41 = vpop.xlane.xlu1 %3832  ;;  %v3625_v42 = vpack.c.bf16 %v3624_v39, %v3624_v39 }
 0x4ee   : > { %6600 = vrcp.f32 %v3833_v41 }
 0x4ef   : > { %5652 = vmatmul.mubr.msk.bf16.vlgmr.msra.gmra.mrb[16].mxu1 %vm3505_vm3, %v3625_v42 }
 0x4f0   : > { %v6599_v46 = vpop.eup %6598  ;;  %5662 = vmatpush3.bf16.msra.mxu1 %v3737_v43  ;;  %5663 = vmatprep.mubr.msk.bf16.mxu1 %vm6895_vm0, %v6894_v45 }
 0x4f1   : > { %v3729_v47 = vmul.f32 %v6599_v46, %v7344_v1  ;;  %5673 = vmatprep.subr.bf16.mxu1 %v6894_v45  ;;  %v6423_v1 = vld [vmem:[#allocation17 + $0xa8] ss:$16 sps:$4 sm:$0xff]  }
 0x4f3   : > { %v3730_v48 = vmul.f32 %v3729_v47, %v7321_v22 }
 0x4f5   : > { %v3731_v50 = vpack.c.bf16 %v3730_v48, %v3730_v48 }
 0x4f7   : > { %5664 = vmatmul.mubr.msk.bf16.vlgmr.msra.gmra.mrb[20].mxu1 %vm3505_vm3, %v3731_v50 }
 0x4f8   : > { %v6601_v53 = vpop.eup %6600  ;;  %5674 = vmatpush3.bf16.msra.mxu1 %v3843_v52  ;;  %5675 = vmatprep.mubr.msk.bf16.mxu1 %vm6895_vm0, %v6894_v45  ;;  %v6411_v45 = vld [vmem:[#allocation17 + $0x68] ss:$16 sps:$4 sm:$0xff]  }
 0x4f9   : > { %v3835_v54 = vmul.f32 %v6601_v53, %v7348_v3  ;;  %4754 = vmatprep.subr.bf16.mxu1 %v6395_v51  ;;  %v6429_v3 = vld [vmem:[#allocation17 + $0xc8] ss:$16 sps:$4 sm:$0xff]  }
 0x4fb   : > { %v3836_v55 = vmul.f32 %v3835_v54, %v7321_v22  ;;  %v6425_v22 = vld [vmem:[#allocation17 + $0xac] ss:$16 sps:$4 sm:$0xff]  }
 0x4fd   : > { %v3837_v57 = vpack.c.bf16 %v3836_v55, %v3836_v55 }
 0x4ff   : > { %5676 = vmatmul.mubr.msk.bf16.vlgmr.msra.gmra.mrb[24].mxu1 %vm3505_vm3, %v3837_v57 }
 0x500   : > { %4755 = vmatpush1.bf16.msra.mxu1 %v6393_v56 }
 0x501   : > { %4756 = vmatprep.subr.bf16.mxu1 %v6401_v58  ;;  %v6488_v58 = vld [vmem:[#allocation17 + $0x200] ss:$16 sps:$4 sm:$0xff]  }
 0x504   : > { %4757 = vmatpush1.bf16.msra.mxu1 %v6399_v59  ;;  %v6491_v59 = vld [vmem:[#allocation17 + $0x208] ss:$16 sps:$4 sm:$0xff]  }
 0x505   : > { %4758 = vmatprep.subr.bf16.mxu1 %v6407_v60  ;;  %v6496_v60 = vld [vmem:[#allocation17 + $0x224] ss:$16 sps:$4 sm:$0xff]  }
 0x508   : > { %4759 = vmatpush1.bf16.msra.mxu1 %v6405_v61  ;;  %v6499_v61 = vld [vmem:[#allocation17 + $0x22c] ss:$16 sps:$4 sm:$0xff]  }
 0x509   : > { %4760 = vmatprep.subr.bf16.mxu1 %v6413_v62 }
 0x50c   : > { %4761 = vmatpush1.bf16.msra.mxu1 %v6411_v45 }
 0x50d   : > { %4762 = vmatprep.subr.bf16.mxu1 %v6419_v63 }
 0x510   : > { %4763 = vmatpush1.bf16.msra.mxu1 %v6417_v0  ;;  %v6494_v0 = vld [vmem:[#allocation17 + $0x220] ss:$16 sps:$4 sm:$0xff]  }
 0x511   : > { %4764 = vmatprep.subr.bf16.mxu1 %v6425_v22  ;;  %v6497_v22 = vld [vmem:[#allocation17 + $0x228] ss:$16 sps:$4 sm:$0xff]  }
 0x514   : > { %4765 = vmatpush1.bf16.msra.mxu1 %v6423_v1 }
 0x515   : > { %4766 = vmatprep.subr.bf16.mxu1 %v6431_v2  ;;  %v6502_v2 = vld [vmem:[#allocation17 + $0x244] ss:$16 sps:$4 sm:$0xff]  }
 0x518   : > { %4767 = vmatpush1.bf16.msra.mxu1 %v6429_v3  ;;  %v6505_v3 = vld [vmem:[#allocation17 + $0x24c] ss:$16 sps:$4 sm:$0xff]  }
 0x519   : > { %4768 = vmatprep.subr.bf16.mxu1 %v6437_v4 }
 0x51c   : > { %4769 = vmatpush1.bf16.msra.mxu1 %v6435_v5 }
 0x51d   : > { %4770 = vmatprep.subr.bf16.mxu1 %v6443_v6  ;;  %v6500_v6 = vld [vmem:[#allocation17 + $0x240] ss:$16 sps:$4 sm:$0xff]  }
 0x520   : > { %4771 = vmatpush1.bf16.msra.mxu1 %v6441_v7  ;;  %v6503_v7 = vld [vmem:[#allocation17 + $0x248] ss:$16 sps:$4 sm:$0xff]  }
 0x521   : > { %4772 = vmatprep.subr.bf16.mxu1 %v6449_v8  ;;  %v6508_v8 = vld [vmem:[#allocation17 + $0x264] ss:$16 sps:$4 sm:$0xff]  }
 0x524   : > { %4773 = vmatpush1.bf16.msra.mxu1 %v6447_v9  ;;  %v6511_v9 = vld [vmem:[#allocation17 + $0x26c] ss:$16 sps:$4 sm:$0xff]  }
 0x525   : > { %4774 = vmatprep.subr.bf16.mxu1 %v6455_v10  ;;  %v6506_v10 = vld [vmem:[#allocation17 + $0x260] ss:$16 sps:$4 sm:$0xff]  }
 0x528   : > { %4775 = vmatpush1.bf16.msra.mxu1 %v6453_v11  ;;  %v6509_v11 = vld [vmem:[#allocation17 + $0x268] ss:$16 sps:$4 sm:$0xff]  }
 0x529   : > { %4776 = vmatprep.subr.bf16.mxu1 %v6461_v13  ;;  %v6519_v13 = vld [vmem:[#allocation17 + $0x28c] ss:$16 sps:$4 sm:$0xff]  }
 0x52c   : > { %4777 = vmatpush1.bf16.msra.mxu1 %v6459_v15  ;;  %v6512_v15 = vld [vmem:[#allocation17 + $0x280] ss:$16 sps:$4 sm:$0xff]  }
 0x52d   : > { %4778 = vmatprep.subr.bf16.mxu1 %v6467_v19  ;;  %v6525_v19 = vld [vmem:[#allocation17 + $0x2ac] ss:$16 sps:$4 sm:$0xff]  }
 0x530   : > { %4779 = vmatpush1.bf16.msra.mxu1 %v6465_v18  ;;  %v6522_v18 = vld [vmem:[#allocation17 + $0x2a4] ss:$16 sps:$4 sm:$0xff]  }
 0x531   : > { %4780 = vmatprep.subr.bf16.mxu1 %v6473_v21  ;;  %v6523_v21 = vld [vmem:[#allocation17 + $0x2a8] ss:$16 sps:$4 sm:$0xff]  }
 0x534   : > { %4781 = vmatpush1.bf16.msra.mxu1 %v6471_v24  ;;  %v6531_v24 = vld [vmem:[#allocation17 + $0x2cc] ss:$16 sps:$4 sm:$0xff]  }
 0x535   : > { %4782 = vmatprep.subr.bf16.mxu1 %v6479_v28  ;;  %v6537_v28 = vld [vmem:[#allocation17 + $0x2ec] ss:$16 sps:$4 sm:$0xff]  }
 0x538   : > { %4783 = vmatpush1.bf16.msra.mxu1 %v6477_v27  ;;  %v6534_v27 = vld [vmem:[#allocation17 + $0x2e4] ss:$16 sps:$4 sm:$0xff]  }
 0x539   : > { %4784 = vmatprep.subr.bf16.mxu1 %v6485_v30  ;;  %v6535_v30 = vld [vmem:[#allocation17 + $0x2e8] ss:$16 sps:$4 sm:$0xff]  }
 0x53c   : > { %4785 = vmatpush1.bf16.msra.mxu1 %v6483_v32  ;;  %v6543_v32 = vld [vmem:[#allocation17 + $0x30c] ss:$16 sps:$4 sm:$0xff]  }
 0x53d   : > { %4795 = vmatprep.subr.bf16.mxu1 %v6493_v34  ;;  %v6541_v34 = vld [vmem:[#allocation17 + $0x308] ss:$16 sps:$4 sm:$0xff]  }
 0x5ba   : > { %v3561_v35 = vpop.f32.mrb[12].mxu1 }
 0x5bb   : > { %v3567_v36 = vmul.f32 %v3561_v35, %v7289_v44  ;;  %v5641_v37 = vpop.f32.mrb[13].mxu1  ;;  %v6546_v35 = vld [vmem:[#allocation17 + $0x324] ss:$16 sps:$4 sm:$0xff]  }
 0x5bc   : > { %v3564_v38 = vpop.f32.mrb[14].mxu1  ;;  %v6544_v37 = vld [vmem:[#allocation17 + $0x320] ss:$16 sps:$4 sm:$0xff]  }
 0x5bd   : > { %v3568_v39 = vpack.c.bf16 %v3567_v36, %v3567_v36  ;;  %v5642_v40 = vpop.f32.mrb[15].mxu1  ;;  %v6549_v36 = vld [vmem:[#allocation17 + $0x32c] ss:$16 sps:$4 sm:$0xff]   ;;  %v6547_v38 = vld [vmem:[#allocation17 + $0x328] ss:$16 sps:$4 sm:$0xff]  }
 0x5be   : > { %v6555_v40 = vld [vmem:[#allocation17 + $0x34c] ss:$16 sps:$4 sm:$0xff]  }
 0x5bf   : > { %3569 = vst [vmem:[#allocation5] sm:$0xf] %v3568_v39  ;;  %v6552_v39 = vld [vmem:[#allocation17 + $0x344] ss:$16 sps:$4 sm:$0xff]  }
 0x5c2   : > { %v3667_v41 = vpop.f32.mrb[16].mxu1 }
 0x5c3   : > { %v3673_v42 = vmul.f32 %v3667_v41, %v7289_v44  ;;  %v5653_v43 = vpop.f32.mrb[17].mxu1  ;;  %v6550_v41 = vld [vmem:[#allocation17 + $0x340] ss:$16 sps:$4 sm:$0xff]  }
 0x5c4   : > { %v3670_v46 = vpop.f32.mrb[18].mxu1  ;;  %v6558_v43 = vld [vmem:[#allocation17 + $0x364] ss:$16 sps:$4 sm:$0xff]  }
 0x5c5   : > { %v3674_v47 = vpack.c.bf16 %v3673_v42, %v3673_v42  ;;  %v5654_v48 = vpop.f32.mrb[19].mxu1  ;;  %v6553_v42 = vld [vmem:[#allocation17 + $0x348] ss:$16 sps:$4 sm:$0xff]   ;;  %v6561_v46 = vld [vmem:[#allocation17 + $0x36c] ss:$16 sps:$4 sm:$0xff]  }
 0x5c6   : > { %v6559_v48 = vld [vmem:[#allocation17 + $0x368] ss:$16 sps:$4 sm:$0xff]  }
 0x5c7   : > { %3675 = vst [vmem:[#allocation5 + $0x4] sm:$0xf] %v3674_v47  ;;  %v6556_v47 = vld [vmem:[#allocation17 + $0x360] ss:$16 sps:$4 sm:$0xff]  }
 0x5ca   : > { %v3773_v49 = vpop.f32.mrb[20].mxu1 }
 0x5cb   : > { %v3779_v50 = vmul.f32 %v3773_v49, %v7289_v44  ;;  %v5665_v51 = vpop.f32.mrb[21].mxu1  ;;  %v6564_v49 = vld [vmem:[#allocation17 + $0x384] ss:$16 sps:$4 sm:$0xff]  }
 0x5cc   : > { %v3776_v52 = vpop.f32.mrb[22].mxu1  ;;  %v6562_v51 = vld [vmem:[#allocation17 + $0x380] ss:$16 sps:$4 sm:$0xff]  }
 0x5cd   : > { %v3780_v53 = vpack.c.bf16 %v3779_v50, %v3779_v50  ;;  %v5666_v54 = vpop.f32.mrb[23].mxu1  ;;  %v6567_v50 = vld [vmem:[#allocation17 + $0x38c] ss:$16 sps:$4 sm:$0xff]   ;;  %v6565_v52 = vld [vmem:[#allocation17 + $0x388] ss:$16 sps:$4 sm:$0xff]  }
 0x5ce   : > { %v3888_v55 = vld [vmem:[#allocation5] sm:$0xff]  ;;  %v6573_v54 = vld [vmem:[#allocation17 + $0x3ac] ss:$16 sps:$4 sm:$0xff]  }
 0x5cf   : > { %3781 = vst [vmem:[#allocation5 + $0x8] sm:$0xf] %v3780_v53  ;;  %v5468_v56 = vcombine.low %v3888_v55, %v3888_v55  ;;  %v5469_v57 = vcombine.high %v3888_v55, %v3888_v55  ;;  %v6570_v53 = vld [vmem:[#allocation17 + $0x3a4] ss:$16 sps:$4 sm:$0xff]   ;;  %v6568_v55 = vld [vmem:[#allocation17 + $0x3a0] ss:$16 sps:$4 sm:$0xff]  }
 0x5d1   : > { %4704 = vmatprep.mubr.bf16.mxu0 %v5469_v57  ;;  %4786 = vmatprep.mubr.bf16.mxu1 %v5469_v57  ;;  %v6576_v57 = vld [vmem:[#allocation17 + $0x3c4] ss:$16 sps:$4 sm:$0xff]  }
 0x5d2   : > { %v3879_v62 = vpop.f32.mrb[24].mxu1  ;;  %4705 = vmatmul.mubr.bf16.vlgmr.msra.gmra.mrb[28].mxu0 %v5468_v56  ;;  %4787 = vmatmul.mubr.bf16.vlgmr.msra.gmra.mrb[28].mxu1 %v5468_v56  ;;  %v6571_v56 = vld [vmem:[#allocation17 + $0x3a8] ss:$16 sps:$4 sm:$0xff]  }
 0x5d3   : > { %v3885_v45 = vmul.f32 %v3879_v62, %v7289_v44  ;;  %4714 = vmatpush1.bf16.msra.mxu0 %v6488_v58  ;;  %4796 = vmatpush1.bf16.msra.mxu1 %v6491_v59  ;;  %v5677_v63 = vpop.f32.mrb[25].mxu1  ;;  %v6579_v58 = vld [vmem:[#allocation17 + $0x3cc] ss:$16 sps:$4 sm:$0xff]   ;;  %v6574_v59 = vld [vmem:[#allocation17 + $0x3c0] ss:$16 sps:$4 sm:$0xff]  }
 0x5d4   : > { %v3882_v1 = vpop.f32.mrb[26].mxu1  ;;  %4715 = vmatprep.subr.bf16.mxu0 %v6496_v60  ;;  %4797 = vmatprep.subr.bf16.mxu1 %v6499_v61  ;;  %v6577_v60 = vld [vmem:[#allocation17 + $0x3c8] ss:$16 sps:$4 sm:$0xff]   ;;  %v6582_v61 = vld [vmem:[#allocation17 + $0x3e4] ss:$16 sps:$4 sm:$0xff]  }
 0x5d5   : > { %v3886_v4 = vpack.c.bf16 %v3885_v45, %v3885_v45  ;;  %v5678_v5 = vpop.f32.mrb[27].mxu1  ;;  %v6585_v62 = vld [vmem:[#allocation17 + $0x3ec] ss:$16 sps:$4 sm:$0xff]   ;;  %v6580_v45 = vld [vmem:[#allocation17 + $0x3e0] ss:$16 sps:$4 sm:$0xff]  }
 0x5d6   : > { %v6583_v63 = vld [vmem:[#allocation17 + $0x3e8] ss:$16 sps:$4 sm:$0xff]  }
 0x5d7   : > { %3887 = vst [vmem:[#allocation5 + $0xc] sm:$0xf] %v3886_v4  ;;  %4716 = vmatpush1.bf16.msra.mxu0 %v6494_v0  ;;  %4798 = vmatpush1.bf16.msra.mxu1 %v6497_v22 }
 0x5d8   : > { %4717 = vmatprep.subr.bf16.mxu0 %v6502_v2  ;;  %4799 = vmatprep.subr.bf16.mxu1 %v6505_v3 }
 0x5db   : > { %4718 = vmatpush1.bf16.msra.mxu0 %v6500_v6  ;;  %4800 = vmatpush1.bf16.msra.mxu1 %v6503_v7 }
 0x5dc   : > { %4719 = vmatprep.subr.bf16.mxu0 %v6508_v8  ;;  %4801 = vmatprep.subr.bf16.mxu1 %v6511_v9 }
 0x5de   : > { %v7379_v14 = vld [vmem:[#allocation5 + $0x8] sm:$0xff] }
 0x5df   : > { %4720 = vmatpush1.bf16.msra.mxu0 %v6506_v10  ;;  %4802 = vmatpush1.bf16.msra.mxu1 %v6509_v11  ;;  %v5471_v16 = vcombine.high %v7379_v14, %v7379_v14  ;;  %v5470_v0 = vcombine.low %v7379_v14, %v7379_v14 }
 0x5e0   : > { %4721 = vmatprep.subr.bf16.mxu0 %v6514_v12  ;;  %4803 = vmatprep.subr.bf16.mxu1 %v6519_v13 }
 0x5e1   : > { %4745 = vmatprep.mubr.bf16.mxu0 %v5471_v16  ;;  %4827 = vmatprep.mubr.bf16.mxu1 %v5471_v16 }
 0x5e3   : > { %4722 = vmatpush1.bf16.msra.mxu0 %v6512_v15  ;;  %4804 = vmatpush1.bf16.msra.mxu1 %v6517_v17 }
 0x5e4   : > { %4723 = vmatprep.subr.bf16.mxu0 %v6522_v18  ;;  %4805 = vmatprep.subr.bf16.mxu1 %v6525_v19 }
 0x5e7   : > { %4724 = vmatpush1.bf16.msra.mxu0 %v6520_v20  ;;  %4806 = vmatpush1.bf16.msra.mxu1 %v6523_v21 }
 0x5e8   : > { %4725 = vmatprep.subr.bf16.mxu0 %v6528_v23  ;;  %4807 = vmatprep.subr.bf16.mxu1 %v6531_v24 }
 0x5eb   : > { %4726 = vmatpush1.bf16.msra.mxu0 %v6526_v25  ;;  %4808 = vmatpush1.bf16.msra.mxu1 %v6529_v26 }
 0x5ec   : > { %4727 = vmatprep.subr.bf16.mxu0 %v6534_v27  ;;  %4809 = vmatprep.subr.bf16.mxu1 %v6537_v28 }
 0x5ef   : > { %4728 = vmatpush1.bf16.msra.mxu0 %v6532_v29  ;;  %4810 = vmatpush1.bf16.msra.mxu1 %v6535_v30 }
 0x5f0   : > { %4729 = vmatprep.subr.bf16.mxu0 %v6540_v31  ;;  %4811 = vmatprep.subr.bf16.mxu1 %v6543_v32 }
 0x5f3   : > { %4730 = vmatpush1.bf16.msra.mxu0 %v6538_v33  ;;  %4812 = vmatpush1.bf16.msra.mxu1 %v6541_v34 }
 0x5f4   : > { %4731 = vmatprep.subr.bf16.mxu0 %v6546_v35  ;;  %4813 = vmatprep.subr.bf16.mxu1 %v6549_v36 }
 0x5f7   : > { %4732 = vmatpush1.bf16.msra.mxu0 %v6544_v37  ;;  %4814 = vmatpush1.bf16.msra.mxu1 %v6547_v38 }
 0x5f8   : > { %4733 = vmatprep.subr.bf16.mxu0 %v6552_v39  ;;  %4815 = vmatprep.subr.bf16.mxu1 %v6555_v40 }
 0x5fb   : > { %4734 = vmatpush1.bf16.msra.mxu0 %v6550_v41  ;;  %4816 = vmatpush1.bf16.msra.mxu1 %v6553_v42 }
 0x5fc   : > { %4735 = vmatprep.subr.bf16.mxu0 %v6558_v43  ;;  %4817 = vmatprep.subr.bf16.mxu1 %v6561_v46 }
 0x5ff   : > { %4736 = vmatpush1.bf16.msra.mxu0 %v6556_v47  ;;  %4818 = vmatpush1.bf16.msra.mxu1 %v6559_v48 }
 0x600   : > { %4737 = vmatprep.subr.bf16.mxu0 %v6564_v49  ;;  %4819 = vmatprep.subr.bf16.mxu1 %v6567_v50 }
 0x603   : > { %4738 = vmatpush1.bf16.msra.mxu0 %v6562_v51  ;;  %4820 = vmatpush1.bf16.msra.mxu1 %v6565_v52 }
 0x604   : > { %4739 = vmatprep.subr.bf16.mxu0 %v6570_v53  ;;  %4821 = vmatprep.subr.bf16.mxu1 %v6573_v54 }
 0x607   : > { %4740 = vmatpush1.bf16.msra.mxu0 %v6568_v55  ;;  %4822 = vmatpush1.bf16.msra.mxu1 %v6571_v56 }
 0x608   : > { %4741 = vmatprep.subr.bf16.mxu0 %v6576_v57  ;;  %4823 = vmatprep.subr.bf16.mxu1 %v6579_v58 }
 0x60b   : > { %4742 = vmatpush1.bf16.msra.mxu0 %v6574_v59  ;;  %4824 = vmatpush1.bf16.msra.mxu1 %v6577_v60 }
 0x60c   : > { %4743 = vmatprep.subr.bf16.mxu0 %v6582_v61  ;;  %4825 = vmatprep.subr.bf16.mxu1 %v6585_v62 }
 0x60f   : > { %4744 = vmatpush1.bf16.msra.mxu0 %v6580_v45  ;;  %4826 = vmatpush1.bf16.msra.mxu1 %v6583_v63 }
 0x612   : > { %4746 = vmatmul.mubr.bf16.vlgmr.msra.gmra.mrb[28].mxu0 %v5470_v0  ;;  %4828 = vmatmul.mubr.bf16.vlgmr.msra.gmra.mrb[28].mxu1 %v5470_v0 }
 0x6e5   : > { %v4747_v22 = vpop.f32.mrb[28].mxu0  ;;  %v4829_v1 = vpop.f32.mrb[28].mxu1 }
 0x6e6   : > { %v4836_v2 = vmul.f32 %v4747_v22, %v7289_v44  ;;  %v4838_v3 = vmul.f32 %v4829_v1, %v7289_v44  ;;  %v4749_v4 = vpop.f32.mrb[29].mxu0  ;;  %v4831_v5 = vpop.f32.mrb[29].mxu1 }
 0x6e7   : > { %v4837_v6 = vmul.f32 %v4749_v4, %v7289_v44  ;;  %v4839_v7 = vmul.f32 %v4831_v5, %v7289_v44  ;;  %v4751_v8 = vpop.f32.mrb[30].mxu0  ;;  %v4833_v9 = vpop.f32.mrb[30].mxu1 }
 0x6e8   : > { %4840 = vst [vmem:[%s545_s5] sm:$0xff] %v4836_v2  ;;  %4842 = vst [vmem:[%s545_s5 + $0x10] sm:$0xff] %v4838_v3  ;;  %v4752_v10 = vpop.f32.mrb[31].mxu0  ;;  %v4834_v11 = vpop.f32.mrb[31].mxu1 }
 0x6e9   : > { %4841 = vst [vmem:[%s545_s5 + $0x8] sm:$0xff] %v4837_v6  ;;  %4843 = vst [vmem:[%s545_s5 + $0x18] sm:$0xff] %v4839_v7 }
 0x6ea   : > { %6817 = shalt.err (!%p6814_p10)
}
 0x6eb   : > { %s6818_s17 = scalar_lea.hbm %s7394_s27, 512  ;;  %s6822_s8 = scalar_lea.hbm %s7514_s3, 1024 }
 0x6ec   : > { %p6819_p3 = scmp.ne.s32.totalorder %s7394_s27, %s6818_s17  ;;  %p6823_p0 = scmp.lt.u32.totalorder %s7394_s27, %s7514_s3 }
 0x6ed   : > { %p6824_p7 = scmp.lt.u32.totalorder %s6822_s8, %s6818_s17  ;;  %p6826_p13 = scmp.lt.u32.totalorder %s6818_s17, %s7394_s27 }
 0x6ee   : > { %p6820_p8 = pnand %p6819_p3, %p7515_p11 }
 0x6ef   : > { %p6825_p9 = por %p6824_p7, %p6823_p0 }
 0x6f0   : > { %p6821_p12 = pneg %p6820_p8 }
 0x6f1   : > { %p6827_p1 = por %p6826_p13, %p6825_p9 }
 0x6f3   : > { %p6828_p6 = pnand %p6827_p1, %p6821_p12 }
 0x6f5   : > { %6831 = shalt.err (!%p6828_p6)
}
 0x6f6   : > { %5733 = dma.vmem_to_hbm [thread:$0]  (%p7515_p11), %s7396_s29, 512, %s7394_s27, %s4845_s12  }
 0x6f7 PF: > { %s7516_s16 = sld [smem:[#allocation24_spill]]  ;;  %s7517_s28 = sld [smem:[#allocation29_spill]] }
 0x6f8   : > { %s7518_s10 = sld [smem:[#allocation25_spill]] }
 0x6fd   : > { %s4871_s24 = sand.u32 1, %s7516_s16   ;;  %p7519_p5 = scmp.ne.s32.totalorder %s7517_s28, 0 }
 0x6fe   : > { %p7520_p2 = scmp.ge.s32.totalorder %s7518_s10, 2  ;;  %s4872_s13 = scalar_lea.sflag [#allocation8], %s4871_s24 }
 0x700   : > { %p5759_p4 = pnand %p7520_p2, %p7519_p5 }
 0x702   : > { %6865 = dma.done.wait (!%p5759_p4), %s4872_s13, 512  }
 0x703   : > { %6867 = vsyncadd (!%p5759_p4), %s4872_s13, 4294966784  ;;  %s7521_s16 = sld [smem:[#allocation26_spill]]  ;;  %s7522_s30 = sld [smem:[#allocation27_spill]] }
 0x704   : > { %s7523_s13 = smov %s6874_s14  ;;  %s7524_s14 = smov %s6878_s15 }
 0x709   : > { %p28_p10 = scmp.ge.s32.totalorder %s7521_s16, 4   ;;  %s7525_s15 = smov %s7522_s30 }
 0x70b   :  { %30 = sbr.rel (!%p28_p10) target bundleno = 16 (0x10), region = 154 }
 0x712   :  { %4877 = vsyncpa [#allocation7], 1 }
 0x713   :  { %4879 = vsyncpa [#allocation7 + $0x1], 1 }
 0x714   :  { %4880 = vsyncpa [#allocation10], 1 }
 0x715   :  { %4882 = vsyncpa [#allocation10 + $0x1], 1 }
 0x716   :  { %4883 = vsyncpa [#allocation13], 1 }
 0x717   :  { %4884 = vsyncpa [#allocation16], 1 }
 0x718   :  { %4885 = vsyncpa [#allocation8], 1 }
 0x719   :  { %4887 = vsyncpa [#allocation8 + $0x1], 1 }

</bundles_post_ra>
